<compile_context>
chip_gen: v7x
topology: tpu7x:2x2x1
jax: 0.10.0
libtpu: 0.0.40
codegen_flags: <defaults>
</compile_context>

<pallas_src>
import functools

import jax
import jax.numpy as jnp
from jax import lax
from jax.experimental import pallas as pl
from jax.experimental.pallas import tpu as pltpu


def _full_spec(shape):
    # Whole-array block, single grid step.
    return pl.BlockSpec(shape, lambda i: (0,) * len(shape))


# --------------------------------------------------------------------------
# Fused kernel
# --------------------------------------------------------------------------

def _fused_kernel(p1_ref, w1_ref, b1_ref,
                  w2_ref, b2_ref,
                  w3_ref, b3_ref,
                  wp_ref, bp_ref,
                  wk1_ref, wk2_ref,
                  wc_ref, bc_ref,
                  o_ref, *,
                  batch, ih, iw, num_knots, max_iter, tol, alpha):
    f32 = jnp.float32

    def mm(a, b):  # f32 MXU matmul (keep f32: interpret-safe + exact DEQ check)
        return jnp.dot(a, b, preferred_element_type=f32)

    # ---- conv1 (3x3, stride 1, pad 1); im2col done wrapper-side on raw input.
    # (B*ih*iw, 27) @ (27, 32) -> (B*ih*iw, 32), position-major / lane=channels.
    h1 = jnp.maximum(mm(p1_ref[...], w1_ref[...]) + b1_ref[...], 0.0)

    # ---- 3x3 stride-2 pad-1 conv via in-kernel even/odd tap extraction.
    # For tap (di, dj): input coord = (2*yo + di - 1, 2*xo + dj - 1).
    def conv3x3_s2(h_in, w_ref, b_ref, hdim, wdim):
        cin, cout = w_ref.shape[1], w_ref.shape[2]
        ho, wo = hdim // 2, wdim // 2
        x = h_in.reshape(batch, ho, 2, wdim, cin)
        row_even = x[:, :, 0, :, :]                    # yi = 2*yo      (di=1)
        row_odd = x[:, :, 1, :, :]                     # yi = 2*yo + 1  (di=2)
        row_oddm = jnp.concatenate(                    # yi = 2*yo - 1  (di=0)
            [jnp.zeros_like(row_odd[:, :1]), row_odd[:, :ho - 1]], axis=1)
        rows = (row_oddm, row_even, row_odd)
        acc = jnp.zeros((batch * ho * wo, cout), f32)
        for di in range(3):                            # static unroll, 9 taps
            r = rows[di].reshape(batch, ho, wo, 2, cin)
            col_even = r[:, :, :, 0, :]                # xi = 2*xo      (dj=1)
            col_odd = r[:, :, :, 1, :]                 # xi = 2*xo + 1  (dj=2)
            col_oddm = jnp.concatenate(                # xi = 2*xo - 1  (dj=0)
                [jnp.zeros_like(col_odd[:, :, :1]), col_odd[:, :, :wo - 1]],
                axis=2)
            cols = (col_oddm, col_even, col_odd)
            for dj in range(3):
                tap = cols[dj].reshape(batch * ho * wo, cin)
                acc = acc + mm(tap, w_ref[di * 3 + dj])   # MXU-accumulated
        return jnp.maximum(acc + b_ref[...], 0.0)

    h2 = conv3x3_s2(h1, w2_ref, b2_ref, ih, iw)              # (B*(ih/2*iw/2), 64)
    h3 = conv3x3_s2(h2, w3_ref, b3_ref, ih // 2, iw // 2)    # (B*(ih/4*iw/4),128)

    # ---- global average pool + cnn_proj (batch-major from here on) ----
    pos3 = (ih // 4) * (iw // 4)
    feat = jnp.mean(h3.reshape(batch, pos3, h3.shape[1]), axis=1)   # (B, 128)
    feat_proj = mm(feat, wp_ref[...]) + bp_ref[...]                 # (B, H)

    # ---- DEQ fixed point:  F(x,z) = z + feat_proj + KAN(z + feat_proj)
    #      z_{k+1} = z + alpha * (F(x,z) - z) = z + alpha*(feat_proj + kan_out)
    knots = [(-1.0 + 2.0 * k / (num_knots - 1)) for k in range(num_knots)]
    inv_h = (num_knots - 1) / 2.0
    wk1 = wk1_ref[...]                                  # ((K+1)*H, H)
    wk2 = wk2_ref[...]

    def kan_basis(c):                                   # c: (B, H) f32
        sig = 1.0 / (1.0 + jnp.exp(-c))                 # exact sigmoid
        parts = [c * sig]                               # SiLU base path
        for k in range(num_knots):                      # uniform RBF spline
            t = (c - knots[k]) * inv_h
            parts.append(jnp.exp(-t * t))
        return jnp.concatenate(parts, axis=1)           # (B, (K+1)*H)

    def kan_block(c):
        hk = mm(kan_basis(c), wk1)                      # KAN layer 1
        # TODO(synk): dropout(p=0.2) inside the KAN block is inference identity.
        return mm(kan_basis(hk), wk2)                   # KAN layer 2

    def deq_step(z):
        return z + alpha * (feat_proj + kan_block(z + feat_proj))

    def mean_norm(z_new, z_old):                        # mean_b ||dz_b||_2
        d = z_new - z_old
        per = jnp.sqrt(jnp.sum(d * d, axis=1, keepdims=True))   # (B, 1)
        return jnp.mean(per)

    def cond(state):
        _, diff, it = state
        return jnp.logical_and(it < max_iter, diff >= tol)

    def body(state):
        # Two updates per body; where-selects keep results identical to the
        # reference's per-iteration check while halving scalar-branch stalls.
        z, _, it = state
        z1 = deq_step(z)
        d1 = mean_norm(z1, z)
        done1 = jnp.logical_or(d1 < tol, it + 1 >= max_iter)
        z2 = deq_step(z1)
        d2 = mean_norm(z2, z1)
        z_out = jnp.where(done1, z1, z2)
        d_out = jnp.where(done1, d1, d2)
        it_out = jnp.where(done1, it + 1, it + 2)
        return z_out, d_out, it_out

    z0 = jnp.zeros_like(feat_proj)
    z_fin, _, _ = lax.while_loop(
        cond, body, (z0, jnp.float32(1e30), jnp.int32(0)))

    # ---- classifier ----
    o_ref[...] = mm(z_fin, wc_ref[...]) + bc_ref[...]   # (B, NC)


# --------------------------------------------------------------------------
# Wrapper
# --------------------------------------------------------------------------

def _im2col_s1p1(x):
    # x: (B, H, W, C) NHWC -> (B*H*W, 9*C) for the 3x3 stride-1 pad-1 conv1.
    B, H, W, C = x.shape
    xp = jnp.pad(x, ((0, 0), (1, 1), (1, 1), (0, 0)))
    cols = []
    for di in range(3):
        for dj in range(3):
            cols.append(xp[:, di:di + H, dj:dj + W, :])
    patches = jnp.stack(cols, axis=3)                   # (B, H, W, 9, C)
    return patches.reshape(B * H * W, 9 * C)


def equilibrium_kan_forward(x_nchw, params, *, num_knots, max_iter, tol, alpha):
    B, _, IH, IW = x_nchw.shape
    nc = params["wc"].shape[1]
    f32 = jnp.float32

    x = jnp.transpose(x_nchw, (0, 2, 3, 1)).astype(f32)          # NHWC
    p1 = _im2col_s1p1(x)                                          # (B*IH*IW, 27)

    # Stack KAN base + per-knot spline weights so each KAN layer is one
    # ((num_knots+1)*H)-deep matmul against the (B, (K+1)*H) basis.
    wk1 = jnp.concatenate([params["wb1"]] +
                          [params["ws1"][k] for k in range(num_knots)],
                          axis=0).astype(f32)                     # ((K+1)*H, H)
    wk2 = jnp.concatenate([params["wb2"]] +
                          [params["ws2"][k] for k in range(num_knots)],
                          axis=0).astype(f32)

    operands = (
        p1,
        params["w1"].astype(f32), params["b1"].reshape(1, -1).astype(f32),
        params["w2"].astype(f32), params["b2"].reshape(1, -1).astype(f32),
        params["w3"].astype(f32), params["b3"].reshape(1, -1).astype(f32),
        params["wp"].astype(f32), params["bp"].reshape(1, -1).astype(f32),
        wk1, wk2,
        params["wc"].astype(f32), params["bc"].reshape(1, -1).astype(f32),
    )

    kernel = functools.partial(_fused_kernel, batch=B, ih=IH, iw=IW,
                               num_knots=num_knots, max_iter=max_iter,
                               tol=tol, alpha=alpha)
    out = pl.pallas_call(
        kernel,
        grid=(1,),
        out_shape=jax.ShapeDtypeStruct((B, nc), f32),
        in_specs=[_full_spec(op.shape) for op in operands],
        out_specs=_full_spec((B, nc)),
        compiler_params=pltpu.CompilerParams(
            dimension_semantics=("arbitrary",)),
    )(*operands)

    # .squeeze(-1) semantics: drop last dim only when num_classes == 1
    return out[:, 0] if nc == 1 else out


# --------------------------------------------------------------------------
# Deterministic parameter init (same reconstruction as before)
# --------------------------------------------------------------------------

def init_params(key, hidden_dim=32, num_knots=10, num_classes=1):
    ks = jax.random.split(key, 14)

    def nrm(k, shape, std):
        return (std * jax.random.normal(k, shape)).astype(jnp.float32)

    p = {}
    # Backbone: 3 conv3x3 layers (3->32 s1, 32->64 s2, 64->128 s2) + GAP.
    p["w1"] = nrm(ks[0], (3 * 3 * 3, 32), 0.05)        # (9*IC, OC)
    p["b1"] = nrm(ks[1], (32,), 0.05)
    p["w2"] = nrm(ks[2], (9, 32, 64), 0.05)            # (kh*kw, IC, OC)
    p["b2"] = nrm(ks[3], (64,), 0.05)
    p["w3"] = nrm(ks[4], (9, 64, 128), 0.05)
    p["b3"] = nrm(ks[5], (128,), 0.05)
    # cnn_proj: Linear(128 -> hidden_dim)
    p["wp"] = nrm(ks[6], (128, hidden_dim), 0.05)
    p["bp"] = nrm(ks[7], (hidden_dim,), 0.05)
    # KAN block: two KAN layers (base weight + per-knot spline weights)
    p["wb1"] = nrm(ks[8], (hidden_dim, hidden_dim), 0.02)
    p["ws1"] = nrm(ks[9], (num_knots, hidden_dim, hidden_dim), 0.02)
    p["wb2"] = nrm(ks[10], (hidden_dim, hidden_dim), 0.02)
    p["ws2"] = nrm(ks[11], (num_knots, hidden_dim, hidden_dim), 0.02)
    # classifier: Linear(hidden_dim -> num_classes)
    p["wc"] = nrm(ks[12], (hidden_dim, num_classes), 0.05)
    p["bc"] = nrm(ks[13], (num_classes,), 0.05)
    return p


if __name__ == "__main__":
    HIDDEN = 32
    NUM_KNOTS = 10
    MAX_ITER = 25
    TOL = 1e-3
    ALPHA = 1.0

    key = jax.random.PRNGKey(0)
    kx, kp = jax.random.split(key)
    x = jax.random.normal(kx, (2, 3, 16, 16), dtype=jnp.float32)  # NCHW input
    params = init_params(kp, hidden_dim=HIDDEN, num_knots=NUM_KNOTS,
                         num_classes=1)

    fwd = jax.jit(functools.partial(equilibrium_kan_forward,
                                    num_knots=NUM_KNOTS, max_iter=MAX_ITER,
                                    tol=TOL, alpha=ALPHA))
    logits = fwd(x, params)
    jax.block_until_ready(logits)
    assert logits.shape == (2,), logits.shape
    assert bool(jnp.all(jnp.isfinite(logits)))
    print("KERNEL_OK")
</pallas_src>

<mosaic_0001>
module attributes {stable_mosaic.version = 11 : i64} {
  func.func @_fused_kernel(%arg0: i32, %arg1: memref<512x27xf32, #tpu.memory_space<vmem>>, %arg2: memref<27x32xf32, #tpu.memory_space<vmem>>, %arg3: memref<1x32xf32, #tpu.memory_space<vmem>>, %arg4: memref<9x32x64xf32, #tpu.memory_space<vmem>>, %arg5: memref<1x64xf32, #tpu.memory_space<vmem>>, %arg6: memref<9x64x128xf32, #tpu.memory_space<vmem>>, %arg7: memref<1x128xf32, #tpu.memory_space<vmem>>, %arg8: memref<128x32xf32, #tpu.memory_space<vmem>>, %arg9: memref<1x32xf32, #tpu.memory_space<vmem>>, %arg10: memref<352x32xf32, #tpu.memory_space<vmem>>, %arg11: memref<352x32xf32, #tpu.memory_space<vmem>>, %arg12: memref<32x1xf32, #tpu.memory_space<vmem>>, %arg13: memref<1x1xf32, #tpu.memory_space<vmem>>, %arg14: memref<2x1xf32, #tpu.memory_space<vmem>>) attributes {dimension_semantics = [#tpu.dimension_semantics<arbitrary>], iteration_bounds = array<i64: 1>, scalar_prefetch = 0 : i64, scratch_operands = 0 : i64, tpu.core_type = #tpu.core_type<tc>, window_params = [{pipeline_mode = #tpu.pipeline_mode<synchronous>, transform_indices = @transform_0, window_bounds = array<i64: 512, 27>}, {pipeline_mode = #tpu.pipeline_mode<synchronous>, transform_indices = @transform_1, window_bounds = array<i64: 27, 32>}, {pipeline_mode = #tpu.pipeline_mode<synchronous>, transform_indices = @transform_2, window_bounds = array<i64: 1, 32>}, {pipeline_mode = #tpu.pipeline_mode<synchronous>, transform_indices = @transform_3, window_bounds = array<i64: 9, 32, 64>}, {pipeline_mode = #tpu.pipeline_mode<synchronous>, transform_indices = @transform_4, window_bounds = array<i64: 1, 64>}, {pipeline_mode = #tpu.pipeline_mode<synchronous>, transform_indices = @transform_5, window_bounds = array<i64: 9, 64, 128>}, {pipeline_mode = #tpu.pipeline_mode<synchronous>, transform_indices = @transform_6, window_bounds = array<i64: 1, 128>}, {pipeline_mode = #tpu.pipeline_mode<synchronous>, transform_indices = @transform_7, window_bounds = array<i64: 128, 32>}, {pipeline_mode = #tpu.pipeline_mode<synchronous>, transform_indices = @transform_8, window_bounds = array<i64: 1, 32>}, {pipeline_mode = #tpu.pipeline_mode<synchronous>, transform_indices = @transform_9, window_bounds = array<i64: 352, 32>}, {pipeline_mode = #tpu.pipeline_mode<synchronous>, transform_indices = @transform_10, window_bounds = array<i64: 352, 32>}, {pipeline_mode = #tpu.pipeline_mode<synchronous>, transform_indices = @transform_11, window_bounds = array<i64: 32, 1>}, {pipeline_mode = #tpu.pipeline_mode<synchronous>, transform_indices = @transform_12, window_bounds = array<i64: 1, 1>}, {pipeline_mode = #tpu.pipeline_mode<synchronous>, transform_indices = @transform_13, window_bounds = array<i64: 2, 1>}]} {
    %c0 = arith.constant 0 : index
    %c0_0 = arith.constant 0 : index
    %0 = vector.load %arg1[%c0, %c0_0] : memref<512x27xf32, #tpu.memory_space<vmem>>, vector<512x27xf32>
    %c0_1 = arith.constant 0 : index
    %c0_2 = arith.constant 0 : index
    %1 = vector.load %arg2[%c0_1, %c0_2] : memref<27x32xf32, #tpu.memory_space<vmem>>, vector<27x32xf32>
    %cst = arith.constant dense<0.000000e+00> : vector<512x32xf32>
    %2 = tpu.matmul %0, %1, %cst {dimension_numbers = #tpu.dot_dimension_numbers<[1], [0], [0], [1], [0, 0, 1, 1], [], []>} : vector<512x27xf32>, vector<27x32xf32>, vector<512x32xf32> -> vector<512x32xf32>
    %c0_3 = arith.constant 0 : index
    %c0_4 = arith.constant 0 : index
    %3 = vector.load %arg3[%c0_3, %c0_4] : memref<1x32xf32, #tpu.memory_space<vmem>>, vector<1x32xf32>
    %4 = vector.broadcast %3 : vector<1x32xf32> to vector<512x32xf32>
    %5 = arith.addf %2, %4 : vector<512x32xf32>
    %cst_5 = arith.constant 0.000000e+00 : f32
    %6 = vector.broadcast %cst_5 : f32 to vector<512x32xf32>
    %7 = arith.maximumf %5, %6 : vector<512x32xf32>
    %8 = vector.shape_cast %7 : vector<512x32xf32> to vector<2x8x2x16x32xf32>
    %9 = vector.extract_strided_slice %8 {offsets = [0, 0, 0, 0, 0], sizes = [2, 8, 1, 16, 32], strides = [1, 1, 1, 1, 1]} : vector<2x8x2x16x32xf32> to vector<2x8x1x16x32xf32>
    %10 = vector.shape_cast %9 : vector<2x8x1x16x32xf32> to vector<2x8x16x32xf32>
    %11 = vector.extract_strided_slice %8 {offsets = [0, 0, 1, 0, 0], sizes = [2, 8, 1, 16, 32], strides = [1, 1, 1, 1, 1]} : vector<2x8x2x16x32xf32> to vector<2x8x1x16x32xf32>
    %12 = vector.shape_cast %11 : vector<2x8x1x16x32xf32> to vector<2x8x16x32xf32>
    %cst_6 = arith.constant 0.000000e+00 : f32
    %13 = vector.broadcast %cst_6 : f32 to vector<2x1x16x32xf32>
    %14 = vector.extract_strided_slice %12 {offsets = [0, 0, 0, 0], sizes = [2, 7, 16, 32], strides = [1, 1, 1, 1]} : vector<2x8x16x32xf32> to vector<2x7x16x32xf32>
    %15 = tpu.concatenate %13, %14 in 1 : vector<2x1x16x32xf32>, vector<2x7x16x32xf32> -> vector<2x8x16x32xf32>
    %cst_7 = arith.constant 0.000000e+00 : f32
    %16 = vector.broadcast %cst_7 : f32 to vector<128x64xf32>
    %17 = vector.shape_cast %15 : vector<2x8x16x32xf32> to vector<2x8x8x2x32xf32>
    %18 = vector.extract_strided_slice %17 {offsets = [0, 0, 0, 0, 0], sizes = [2, 8, 8, 1, 32], strides = [1, 1, 1, 1, 1]} : vector<2x8x8x2x32xf32> to vector<2x8x8x1x32xf32>
    %19 = vector.shape_cast %18 : vector<2x8x8x1x32xf32> to vector<2x8x8x32xf32>
    %20 = vector.extract_strided_slice %17 {offsets = [0, 0, 0, 1, 0], sizes = [2, 8, 8, 1, 32], strides = [1, 1, 1, 1, 1]} : vector<2x8x8x2x32xf32> to vector<2x8x8x1x32xf32>
    %21 = vector.shape_cast %20 : vector<2x8x8x1x32xf32> to vector<2x8x8x32xf32>
    %cst_8 = arith.constant 0.000000e+00 : f32
    %22 = vector.broadcast %cst_8 : f32 to vector<2x8x1x32xf32>
    %23 = vector.extract_strided_slice %21 {offsets = [0, 0, 0, 0], sizes = [2, 8, 7, 32], strides = [1, 1, 1, 1]} : vector<2x8x8x32xf32> to vector<2x8x7x32xf32>
    %24 = tpu.concatenate %22, %23 in 2 : vector<2x8x1x32xf32>, vector<2x8x7x32xf32> -> vector<2x8x8x32xf32>
    %25 = vector.shape_cast %24 : vector<2x8x8x32xf32> to vector<128x32xf32>
    %c0_9 = arith.constant 0 : index
    %c0_10 = arith.constant 0 : index
    %c0_11 = arith.constant 0 : index
    %26 = vector.load %arg4[%c0_9, %c0_10, %c0_11] : memref<9x32x64xf32, #tpu.memory_space<vmem>>, vector<1x32x64xf32>
    %27 = vector.shape_cast %26 : vector<1x32x64xf32> to vector<32x64xf32>
    %cst_12 = arith.constant dense<0.000000e+00> : vector<128x64xf32>
    %28 = tpu.matmul %25, %27, %cst_12 {dimension_numbers = #tpu.dot_dimension_numbers<[1], [0], [0], [1], [0, 0, 1, 1], [], []>} : vector<128x32xf32>, vector<32x64xf32>, vector<128x64xf32> -> vector<128x64xf32>
    %29 = arith.addf %16, %28 : vector<128x64xf32>
    %30 = vector.shape_cast %19 : vector<2x8x8x32xf32> to vector<128x32xf32>
    %c1 = arith.constant 1 : index
    %c0_13 = arith.constant 0 : index
    %c0_14 = arith.constant 0 : index
    %31 = vector.load %arg4[%c1, %c0_13, %c0_14] : memref<9x32x64xf32, #tpu.memory_space<vmem>>, vector<1x32x64xf32>
    %32 = vector.shape_cast %31 : vector<1x32x64xf32> to vector<32x64xf32>
    %cst_15 = arith.constant dense<0.000000e+00> : vector<128x64xf32>
    %33 = tpu.matmul %30, %32, %cst_15 {dimension_numbers = #tpu.dot_dimension_numbers<[1], [0], [0], [1], [0, 0, 1, 1], [], []>} : vector<128x32xf32>, vector<32x64xf32>, vector<128x64xf32> -> vector<128x64xf32>
    %34 = arith.addf %29, %33 : vector<128x64xf32>
    %35 = vector.shape_cast %21 : vector<2x8x8x32xf32> to vector<128x32xf32>
    %c2 = arith.constant 2 : index
    %c0_16 = arith.constant 0 : index
    %c0_17 = arith.constant 0 : index
    %36 = vector.load %arg4[%c2, %c0_16, %c0_17] : memref<9x32x64xf32, #tpu.memory_space<vmem>>, vector<1x32x64xf32>
    %37 = vector.shape_cast %36 : vector<1x32x64xf32> to vector<32x64xf32>
    %cst_18 = arith.constant dense<0.000000e+00> : vector<128x64xf32>
    %38 = tpu.matmul %35, %37, %cst_18 {dimension_numbers = #tpu.dot_dimension_numbers<[1], [0], [0], [1], [0, 0, 1, 1], [], []>} : vector<128x32xf32>, vector<32x64xf32>, vector<128x64xf32> -> vector<128x64xf32>
    %39 = arith.addf %34, %38 : vector<128x64xf32>
    %40 = vector.shape_cast %10 : vector<2x8x16x32xf32> to vector<2x8x8x2x32xf32>
    %41 = vector.extract_strided_slice %40 {offsets = [0, 0, 0, 0, 0], sizes = [2, 8, 8, 1, 32], strides = [1, 1, 1, 1, 1]} : vector<2x8x8x2x32xf32> to vector<2x8x8x1x32xf32>
    %42 = vector.shape_cast %41 : vector<2x8x8x1x32xf32> to vector<2x8x8x32xf32>
    %43 = vector.extract_strided_slice %40 {offsets = [0, 0, 0, 1, 0], sizes = [2, 8, 8, 1, 32], strides = [1, 1, 1, 1, 1]} : vector<2x8x8x2x32xf32> to vector<2x8x8x1x32xf32>
    %44 = vector.shape_cast %43 : vector<2x8x8x1x32xf32> to vector<2x8x8x32xf32>
    %cst_19 = arith.constant 0.000000e+00 : f32
    %45 = vector.broadcast %cst_19 : f32 to vector<2x8x1x32xf32>
    %46 = vector.extract_strided_slice %44 {offsets = [0, 0, 0, 0], sizes = [2, 8, 7, 32], strides = [1, 1, 1, 1]} : vector<2x8x8x32xf32> to vector<2x8x7x32xf32>
    %47 = tpu.concatenate %45, %46 in 2 : vector<2x8x1x32xf32>, vector<2x8x7x32xf32> -> vector<2x8x8x32xf32>
    %48 = vector.shape_cast %47 : vector<2x8x8x32xf32> to vector<128x32xf32>
    %c3 = arith.constant 3 : index
    %c0_20 = arith.constant 0 : index
    %c0_21 = arith.constant 0 : index
    %49 = vector.load %arg4[%c3, %c0_20, %c0_21] : memref<9x32x64xf32, #tpu.memory_space<vmem>>, vector<1x32x64xf32>
    %50 = vector.shape_cast %49 : vector<1x32x64xf32> to vector<32x64xf32>
    %cst_22 = arith.constant dense<0.000000e+00> : vector<128x64xf32>
    %51 = tpu.matmul %48, %50, %cst_22 {dimension_numbers = #tpu.dot_dimension_numbers<[1], [0], [0], [1], [0, 0, 1, 1], [], []>} : vector<128x32xf32>, vector<32x64xf32>, vector<128x64xf32> -> vector<128x64xf32>
    %52 = arith.addf %39, %51 : vector<128x64xf32>
    %53 = vector.shape_cast %42 : vector<2x8x8x32xf32> to vector<128x32xf32>
    %c4 = arith.constant 4 : index
    %c0_23 = arith.constant 0 : index
    %c0_24 = arith.constant 0 : index
    %54 = vector.load %arg4[%c4, %c0_23, %c0_24] : memref<9x32x64xf32, #tpu.memory_space<vmem>>, vector<1x32x64xf32>
    %55 = vector.shape_cast %54 : vector<1x32x64xf32> to vector<32x64xf32>
    %cst_25 = arith.constant dense<0.000000e+00> : vector<128x64xf32>
    %56 = tpu.matmul %53, %55, %cst_25 {dimension_numbers = #tpu.dot_dimension_numbers<[1], [0], [0], [1], [0, 0, 1, 1], [], []>} : vector<128x32xf32>, vector<32x64xf32>, vector<128x64xf32> -> vector<128x64xf32>
    %57 = arith.addf %52, %56 : vector<128x64xf32>
    %58 = vector.shape_cast %44 : vector<2x8x8x32xf32> to vector<128x32xf32>
    %c5 = arith.constant 5 : index
    %c0_26 = arith.constant 0 : index
    %c0_27 = arith.constant 0 : index
    %59 = vector.load %arg4[%c5, %c0_26, %c0_27] : memref<9x32x64xf32, #tpu.memory_space<vmem>>, vector<1x32x64xf32>
    %60 = vector.shape_cast %59 : vector<1x32x64xf32> to vector<32x64xf32>
    %cst_28 = arith.constant dense<0.000000e+00> : vector<128x64xf32>
    %61 = tpu.matmul %58, %60, %cst_28 {dimension_numbers = #tpu.dot_dimension_numbers<[1], [0], [0], [1], [0, 0, 1, 1], [], []>} : vector<128x32xf32>, vector<32x64xf32>, vector<128x64xf32> -> vector<128x64xf32>
    %62 = arith.addf %57, %61 : vector<128x64xf32>
    %63 = vector.shape_cast %12 : vector<2x8x16x32xf32> to vector<2x8x8x2x32xf32>
    %64 = vector.extract_strided_slice %63 {offsets = [0, 0, 0, 0, 0], sizes = [2, 8, 8, 1, 32], strides = [1, 1, 1, 1, 1]} : vector<2x8x8x2x32xf32> to vector<2x8x8x1x32xf32>
    %65 = vector.shape_cast %64 : vector<2x8x8x1x32xf32> to vector<2x8x8x32xf32>
    %66 = vector.extract_strided_slice %63 {offsets = [0, 0, 0, 1, 0], sizes = [2, 8, 8, 1, 32], strides = [1, 1, 1, 1, 1]} : vector<2x8x8x2x32xf32> to vector<2x8x8x1x32xf32>
    %67 = vector.shape_cast %66 : vector<2x8x8x1x32xf32> to vector<2x8x8x32xf32>
    %cst_29 = arith.constant 0.000000e+00 : f32
    %68 = vector.broadcast %cst_29 : f32 to vector<2x8x1x32xf32>
    %69 = vector.extract_strided_slice %67 {offsets = [0, 0, 0, 0], sizes = [2, 8, 7, 32], strides = [1, 1, 1, 1]} : vector<2x8x8x32xf32> to vector<2x8x7x32xf32>
    %70 = tpu.concatenate %68, %69 in 2 : vector<2x8x1x32xf32>, vector<2x8x7x32xf32> -> vector<2x8x8x32xf32>
    %71 = vector.shape_cast %70 : vector<2x8x8x32xf32> to vector<128x32xf32>
    %c6 = arith.constant 6 : index
    %c0_30 = arith.constant 0 : index
    %c0_31 = arith.constant 0 : index
    %72 = vector.load %arg4[%c6, %c0_30, %c0_31] : memref<9x32x64xf32, #tpu.memory_space<vmem>>, vector<1x32x64xf32>
    %73 = vector.shape_cast %72 : vector<1x32x64xf32> to vector<32x64xf32>
    %cst_32 = arith.constant dense<0.000000e+00> : vector<128x64xf32>
    %74 = tpu.matmul %71, %73, %cst_32 {dimension_numbers = #tpu.dot_dimension_numbers<[1], [0], [0], [1], [0, 0, 1, 1], [], []>} : vector<128x32xf32>, vector<32x64xf32>, vector<128x64xf32> -> vector<128x64xf32>
    %75 = arith.addf %62, %74 : vector<128x64xf32>
    %76 = vector.shape_cast %65 : vector<2x8x8x32xf32> to vector<128x32xf32>
    %c7 = arith.constant 7 : index
    %c0_33 = arith.constant 0 : index
    %c0_34 = arith.constant 0 : index
    %77 = vector.load %arg4[%c7, %c0_33, %c0_34] : memref<9x32x64xf32, #tpu.memory_space<vmem>>, vector<1x32x64xf32>
    %78 = vector.shape_cast %77 : vector<1x32x64xf32> to vector<32x64xf32>
    %cst_35 = arith.constant dense<0.000000e+00> : vector<128x64xf32>
    %79 = tpu.matmul %76, %78, %cst_35 {dimension_numbers = #tpu.dot_dimension_numbers<[1], [0], [0], [1], [0, 0, 1, 1], [], []>} : vector<128x32xf32>, vector<32x64xf32>, vector<128x64xf32> -> vector<128x64xf32>
    %80 = arith.addf %75, %79 : vector<128x64xf32>
    %81 = vector.shape_cast %67 : vector<2x8x8x32xf32> to vector<128x32xf32>
    %c8 = arith.constant 8 : index
    %c0_36 = arith.constant 0 : index
    %c0_37 = arith.constant 0 : index
    %82 = vector.load %arg4[%c8, %c0_36, %c0_37] : memref<9x32x64xf32, #tpu.memory_space<vmem>>, vector<1x32x64xf32>
    %83 = vector.shape_cast %82 : vector<1x32x64xf32> to vector<32x64xf32>
    %cst_38 = arith.constant dense<0.000000e+00> : vector<128x64xf32>
    %84 = tpu.matmul %81, %83, %cst_38 {dimension_numbers = #tpu.dot_dimension_numbers<[1], [0], [0], [1], [0, 0, 1, 1], [], []>} : vector<128x32xf32>, vector<32x64xf32>, vector<128x64xf32> -> vector<128x64xf32>
    %85 = arith.addf %80, %84 : vector<128x64xf32>
    %c0_39 = arith.constant 0 : index
    %c0_40 = arith.constant 0 : index
    %86 = vector.load %arg5[%c0_39, %c0_40] : memref<1x64xf32, #tpu.memory_space<vmem>>, vector<1x64xf32>
    %87 = vector.broadcast %86 : vector<1x64xf32> to vector<128x64xf32>
    %88 = arith.addf %85, %87 : vector<128x64xf32>
    %cst_41 = arith.constant 0.000000e+00 : f32
    %89 = vector.broadcast %cst_41 : f32 to vector<128x64xf32>
    %90 = arith.maximumf %88, %89 : vector<128x64xf32>
    %91 = vector.shape_cast %90 : vector<128x64xf32> to vector<2x4x2x8x64xf32>
    %92 = vector.extract_strided_slice %91 {offsets = [0, 0, 0, 0, 0], sizes = [2, 4, 1, 8, 64], strides = [1, 1, 1, 1, 1]} : vector<2x4x2x8x64xf32> to vector<2x4x1x8x64xf32>
    %93 = vector.shape_cast %92 : vector<2x4x1x8x64xf32> to vector<2x4x8x64xf32>
    %94 = vector.extract_strided_slice %91 {offsets = [0, 0, 1, 0, 0], sizes = [2, 4, 1, 8, 64], strides = [1, 1, 1, 1, 1]} : vector<2x4x2x8x64xf32> to vector<2x4x1x8x64xf32>
    %95 = vector.shape_cast %94 : vector<2x4x1x8x64xf32> to vector<2x4x8x64xf32>
    %cst_42 = arith.constant 0.000000e+00 : f32
    %96 = vector.broadcast %cst_42 : f32 to vector<2x1x8x64xf32>
    %97 = vector.extract_strided_slice %95 {offsets = [0, 0, 0, 0], sizes = [2, 3, 8, 64], strides = [1, 1, 1, 1]} : vector<2x4x8x64xf32> to vector<2x3x8x64xf32>
    %98 = tpu.concatenate %96, %97 in 1 : vector<2x1x8x64xf32>, vector<2x3x8x64xf32> -> vector<2x4x8x64xf32>
    %cst_43 = arith.constant 0.000000e+00 : f32
    %99 = vector.broadcast %cst_43 : f32 to vector<32x128xf32>
    %100 = vector.shape_cast %98 : vector<2x4x8x64xf32> to vector<2x4x4x2x64xf32>
    %101 = vector.extract_strided_slice %100 {offsets = [0, 0, 0, 0, 0], sizes = [2, 4, 4, 1, 64], strides = [1, 1, 1, 1, 1]} : vector<2x4x4x2x64xf32> to vector<2x4x4x1x64xf32>
    %102 = vector.shape_cast %101 : vector<2x4x4x1x64xf32> to vector<2x4x4x64xf32>
    %103 = vector.extract_strided_slice %100 {offsets = [0, 0, 0, 1, 0], sizes = [2, 4, 4, 1, 64], strides = [1, 1, 1, 1, 1]} : vector<2x4x4x2x64xf32> to vector<2x4x4x1x64xf32>
    %104 = vector.shape_cast %103 : vector<2x4x4x1x64xf32> to vector<2x4x4x64xf32>
    %cst_44 = arith.constant 0.000000e+00 : f32
    %105 = vector.broadcast %cst_44 : f32 to vector<2x4x1x64xf32>
    %106 = vector.extract_strided_slice %104 {offsets = [0, 0, 0, 0], sizes = [2, 4, 3, 64], strides = [1, 1, 1, 1]} : vector<2x4x4x64xf32> to vector<2x4x3x64xf32>
    %107 = tpu.concatenate %105, %106 in 2 : vector<2x4x1x64xf32>, vector<2x4x3x64xf32> -> vector<2x4x4x64xf32>
    %108 = vector.shape_cast %107 : vector<2x4x4x64xf32> to vector<32x64xf32>
    %c0_45 = arith.constant 0 : index
    %c0_46 = arith.constant 0 : index
    %c0_47 = arith.constant 0 : index
    %109 = vector.load %arg6[%c0_45, %c0_46, %c0_47] : memref<9x64x128xf32, #tpu.memory_space<vmem>>, vector<1x64x128xf32>
    %110 = vector.shape_cast %109 : vector<1x64x128xf32> to vector<64x128xf32>
    %cst_48 = arith.constant dense<0.000000e+00> : vector<32x128xf32>
    %111 = tpu.matmul %108, %110, %cst_48 {dimension_numbers = #tpu.dot_dimension_numbers<[1], [0], [0], [1], [0, 0, 1, 1], [], []>} : vector<32x64xf32>, vector<64x128xf32>, vector<32x128xf32> -> vector<32x128xf32>
    %112 = arith.addf %99, %111 : vector<32x128xf32>
    %113 = vector.shape_cast %102 : vector<2x4x4x64xf32> to vector<32x64xf32>
    %c1_49 = arith.constant 1 : index
    %c0_50 = arith.constant 0 : index
    %c0_51 = arith.constant 0 : index
    %114 = vector.load %arg6[%c1_49, %c0_50, %c0_51] : memref<9x64x128xf32, #tpu.memory_space<vmem>>, vector<1x64x128xf32>
    %115 = vector.shape_cast %114 : vector<1x64x128xf32> to vector<64x128xf32>
    %cst_52 = arith.constant dense<0.000000e+00> : vector<32x128xf32>
    %116 = tpu.matmul %113, %115, %cst_52 {dimension_numbers = #tpu.dot_dimension_numbers<[1], [0], [0], [1], [0, 0, 1, 1], [], []>} : vector<32x64xf32>, vector<64x128xf32>, vector<32x128xf32> -> vector<32x128xf32>
    %117 = arith.addf %112, %116 : vector<32x128xf32>
    %118 = vector.shape_cast %104 : vector<2x4x4x64xf32> to vector<32x64xf32>
    %c2_53 = arith.constant 2 : index
    %c0_54 = arith.constant 0 : index
    %c0_55 = arith.constant 0 : index
    %119 = vector.load %arg6[%c2_53, %c0_54, %c0_55] : memref<9x64x128xf32, #tpu.memory_space<vmem>>, vector<1x64x128xf32>
    %120 = vector.shape_cast %119 : vector<1x64x128xf32> to vector<64x128xf32>
    %cst_56 = arith.constant dense<0.000000e+00> : vector<32x128xf32>
    %121 = tpu.matmul %118, %120, %cst_56 {dimension_numbers = #tpu.dot_dimension_numbers<[1], [0], [0], [1], [0, 0, 1, 1], [], []>} : vector<32x64xf32>, vector<64x128xf32>, vector<32x128xf32> -> vector<32x128xf32>
    %122 = arith.addf %117, %121 : vector<32x128xf32>
    %123 = vector.shape_cast %93 : vector<2x4x8x64xf32> to vector<2x4x4x2x64xf32>
    %124 = vector.extract_strided_slice %123 {offsets = [0, 0, 0, 0, 0], sizes = [2, 4, 4, 1, 64], strides = [1, 1, 1, 1, 1]} : vector<2x4x4x2x64xf32> to vector<2x4x4x1x64xf32>
    %125 = vector.shape_cast %124 : vector<2x4x4x1x64xf32> to vector<2x4x4x64xf32>
    %126 = vector.extract_strided_slice %123 {offsets = [0, 0, 0, 1, 0], sizes = [2, 4, 4, 1, 64], strides = [1, 1, 1, 1, 1]} : vector<2x4x4x2x64xf32> to vector<2x4x4x1x64xf32>
    %127 = vector.shape_cast %126 : vector<2x4x4x1x64xf32> to vector<2x4x4x64xf32>
    %cst_57 = arith.constant 0.000000e+00 : f32
    %128 = vector.broadcast %cst_57 : f32 to vector<2x4x1x64xf32>
    %129 = vector.extract_strided_slice %127 {offsets = [0, 0, 0, 0], sizes = [2, 4, 3, 64], strides = [1, 1, 1, 1]} : vector<2x4x4x64xf32> to vector<2x4x3x64xf32>
    %130 = tpu.concatenate %128, %129 in 2 : vector<2x4x1x64xf32>, vector<2x4x3x64xf32> -> vector<2x4x4x64xf32>
    %131 = vector.shape_cast %130 : vector<2x4x4x64xf32> to vector<32x64xf32>
    %c3_58 = arith.constant 3 : index
    %c0_59 = arith.constant 0 : index
    %c0_60 = arith.constant 0 : index
    %132 = vector.load %arg6[%c3_58, %c0_59, %c0_60] : memref<9x64x128xf32, #tpu.memory_space<vmem>>, vector<1x64x128xf32>
    %133 = vector.shape_cast %132 : vector<1x64x128xf32> to vector<64x128xf32>
    %cst_61 = arith.constant dense<0.000000e+00> : vector<32x128xf32>
    %134 = tpu.matmul %131, %133, %cst_61 {dimension_numbers = #tpu.dot_dimension_numbers<[1], [0], [0], [1], [0, 0, 1, 1], [], []>} : vector<32x64xf32>, vector<64x128xf32>, vector<32x128xf32> -> vector<32x128xf32>
    %135 = arith.addf %122, %134 : vector<32x128xf32>
    %136 = vector.shape_cast %125 : vector<2x4x4x64xf32> to vector<32x64xf32>
    %c4_62 = arith.constant 4 : index
    %c0_63 = arith.constant 0 : index
    %c0_64 = arith.constant 0 : index
    %137 = vector.load %arg6[%c4_62, %c0_63, %c0_64] : memref<9x64x128xf32, #tpu.memory_space<vmem>>, vector<1x64x128xf32>
    %138 = vector.shape_cast %137 : vector<1x64x128xf32> to vector<64x128xf32>
    %cst_65 = arith.constant dense<0.000000e+00> : vector<32x128xf32>
    %139 = tpu.matmul %136, %138, %cst_65 {dimension_numbers = #tpu.dot_dimension_numbers<[1], [0], [0], [1], [0, 0, 1, 1], [], []>} : vector<32x64xf32>, vector<64x128xf32>, vector<32x128xf32> -> vector<32x128xf32>
    %140 = arith.addf %135, %139 : vector<32x128xf32>
    %141 = vector.shape_cast %127 : vector<2x4x4x64xf32> to vector<32x64xf32>
    %c5_66 = arith.constant 5 : index
    %c0_67 = arith.constant 0 : index
    %c0_68 = arith.constant 0 : index
    %142 = vector.load %arg6[%c5_66, %c0_67, %c0_68] : memref<9x64x128xf32, #tpu.memory_space<vmem>>, vector<1x64x128xf32>
    %143 = vector.shape_cast %142 : vector<1x64x128xf32> to vector<64x128xf32>
    %cst_69 = arith.constant dense<0.000000e+00> : vector<32x128xf32>
    %144 = tpu.matmul %141, %143, %cst_69 {dimension_numbers = #tpu.dot_dimension_numbers<[1], [0], [0], [1], [0, 0, 1, 1], [], []>} : vector<32x64xf32>, vector<64x128xf32>, vector<32x128xf32> -> vector<32x128xf32>
    %145 = arith.addf %140, %144 : vector<32x128xf32>
    %146 = vector.shape_cast %95 : vector<2x4x8x64xf32> to vector<2x4x4x2x64xf32>
    %147 = vector.extract_strided_slice %146 {offsets = [0, 0, 0, 0, 0], sizes = [2, 4, 4, 1, 64], strides = [1, 1, 1, 1, 1]} : vector<2x4x4x2x64xf32> to vector<2x4x4x1x64xf32>
    %148 = vector.shape_cast %147 : vector<2x4x4x1x64xf32> to vector<2x4x4x64xf32>
    %149 = vector.extract_strided_slice %146 {offsets = [0, 0, 0, 1, 0], sizes = [2, 4, 4, 1, 64], strides = [1, 1, 1, 1, 1]} : vector<2x4x4x2x64xf32> to vector<2x4x4x1x64xf32>
    %150 = vector.shape_cast %149 : vector<2x4x4x1x64xf32> to vector<2x4x4x64xf32>
    %cst_70 = arith.constant 0.000000e+00 : f32
    %151 = vector.broadcast %cst_70 : f32 to vector<2x4x1x64xf32>
    %152 = vector.extract_strided_slice %150 {offsets = [0, 0, 0, 0], sizes = [2, 4, 3, 64], strides = [1, 1, 1, 1]} : vector<2x4x4x64xf32> to vector<2x4x3x64xf32>
    %153 = tpu.concatenate %151, %152 in 2 : vector<2x4x1x64xf32>, vector<2x4x3x64xf32> -> vector<2x4x4x64xf32>
    %154 = vector.shape_cast %153 : vector<2x4x4x64xf32> to vector<32x64xf32>
    %c6_71 = arith.constant 6 : index
    %c0_72 = arith.constant 0 : index
    %c0_73 = arith.constant 0 : index
    %155 = vector.load %arg6[%c6_71, %c0_72, %c0_73] : memref<9x64x128xf32, #tpu.memory_space<vmem>>, vector<1x64x128xf32>
    %156 = vector.shape_cast %155 : vector<1x64x128xf32> to vector<64x128xf32>
    %cst_74 = arith.constant dense<0.000000e+00> : vector<32x128xf32>
    %157 = tpu.matmul %154, %156, %cst_74 {dimension_numbers = #tpu.dot_dimension_numbers<[1], [0], [0], [1], [0, 0, 1, 1], [], []>} : vector<32x64xf32>, vector<64x128xf32>, vector<32x128xf32> -> vector<32x128xf32>
    %158 = arith.addf %145, %157 : vector<32x128xf32>
    %159 = vector.shape_cast %148 : vector<2x4x4x64xf32> to vector<32x64xf32>
    %c7_75 = arith.constant 7 : index
    %c0_76 = arith.constant 0 : index
    %c0_77 = arith.constant 0 : index
    %160 = vector.load %arg6[%c7_75, %c0_76, %c0_77] : memref<9x64x128xf32, #tpu.memory_space<vmem>>, vector<1x64x128xf32>
    %161 = vector.shape_cast %160 : vector<1x64x128xf32> to vector<64x128xf32>
    %cst_78 = arith.constant dense<0.000000e+00> : vector<32x128xf32>
    %162 = tpu.matmul %159, %161, %cst_78 {dimension_numbers = #tpu.dot_dimension_numbers<[1], [0], [0], [1], [0, 0, 1, 1], [], []>} : vector<32x64xf32>, vector<64x128xf32>, vector<32x128xf32> -> vector<32x128xf32>
    %163 = arith.addf %158, %162 : vector<32x128xf32>
    %164 = vector.shape_cast %150 : vector<2x4x4x64xf32> to vector<32x64xf32>
    %c8_79 = arith.constant 8 : index
    %c0_80 = arith.constant 0 : index
    %c0_81 = arith.constant 0 : index
    %165 = vector.load %arg6[%c8_79, %c0_80, %c0_81] : memref<9x64x128xf32, #tpu.memory_space<vmem>>, vector<1x64x128xf32>
    %166 = vector.shape_cast %165 : vector<1x64x128xf32> to vector<64x128xf32>
    %cst_82 = arith.constant dense<0.000000e+00> : vector<32x128xf32>
    %167 = tpu.matmul %164, %166, %cst_82 {dimension_numbers = #tpu.dot_dimension_numbers<[1], [0], [0], [1], [0, 0, 1, 1], [], []>} : vector<32x64xf32>, vector<64x128xf32>, vector<32x128xf32> -> vector<32x128xf32>
    %168 = arith.addf %163, %167 : vector<32x128xf32>
    %c0_83 = arith.constant 0 : index
    %c0_84 = arith.constant 0 : index
    %169 = vector.load %arg7[%c0_83, %c0_84] : memref<1x128xf32, #tpu.memory_space<vmem>>, vector<1x128xf32>
    %170 = vector.broadcast %169 : vector<1x128xf32> to vector<32x128xf32>
    %171 = arith.addf %168, %170 : vector<32x128xf32>
    %cst_85 = arith.constant 0.000000e+00 : f32
    %172 = vector.broadcast %cst_85 : f32 to vector<32x128xf32>
    %173 = arith.maximumf %171, %172 : vector<32x128xf32>
    %174 = vector.shape_cast %173 : vector<32x128xf32> to vector<2x16x128xf32>
    %cst_86 = arith.constant dense<0.000000e+00> : vector<2x128xf32>
    %175 = vector.multi_reduction <add>, %174, %cst_86 [1] : vector<2x16x128xf32> to vector<2x128xf32>
    %cst_87 = arith.constant 1.600000e+01 : f32
    %176 = vector.broadcast %cst_87 : f32 to vector<2x128xf32>
    %177 = arith.divf %175, %176 : vector<2x128xf32>
    %c0_88 = arith.constant 0 : index
    %c0_89 = arith.constant 0 : index
    %178 = vector.load %arg8[%c0_88, %c0_89] : memref<128x32xf32, #tpu.memory_space<vmem>>, vector<128x32xf32>
    %cst_90 = arith.constant dense<0.000000e+00> : vector<2x32xf32>
    %179 = tpu.matmul %177, %178, %cst_90 {dimension_numbers = #tpu.dot_dimension_numbers<[1], [0], [0], [1], [0, 0, 1, 1], [], []>} : vector<2x128xf32>, vector<128x32xf32>, vector<2x32xf32> -> vector<2x32xf32>
    %c0_91 = arith.constant 0 : index
    %c0_92 = arith.constant 0 : index
    %180 = vector.load %arg9[%c0_91, %c0_92] : memref<1x32xf32, #tpu.memory_space<vmem>>, vector<1x32xf32>
    %181 = vector.broadcast %180 : vector<1x32xf32> to vector<2x32xf32>
    %182 = arith.addf %179, %181 : vector<2x32xf32>
    %c0_93 = arith.constant 0 : index
    %c0_94 = arith.constant 0 : index
    %183 = vector.load %arg10[%c0_93, %c0_94] : memref<352x32xf32, #tpu.memory_space<vmem>>, vector<352x32xf32>
    %c0_95 = arith.constant 0 : index
    %c0_96 = arith.constant 0 : index
    %184 = vector.load %arg11[%c0_95, %c0_96] : memref<352x32xf32, #tpu.memory_space<vmem>>, vector<352x32xf32>
    %cst_97 = arith.constant 0.000000e+00 : f32
    %185 = vector.broadcast %cst_97 : f32 to vector<2x32xf32>
    %cst_98 = arith.constant 1.000000e+30 : f32
    %c0_i32 = arith.constant 0 : i32
    %186:3 = scf.while (%arg15 = %185, %arg16 = %cst_98, %arg17 = %c0_i32) : (vector<2x32xf32>, f32, i32) -> (vector<2x32xf32>, f32, i32) {
      %c25_i32 = arith.constant 25 : i32
      %193 = arith.cmpi slt, %arg17, %c25_i32 : i32
      %cst_106 = arith.constant 1.000000e-03 : f32
      %194 = arith.cmpf oge, %arg16, %cst_106 : f32
      %195 = arith.andi %193, %194 : i1
      scf.condition(%195) %arg15, %arg16, %arg17 : vector<2x32xf32>, f32, i32
    } do {
    ^bb0(%arg15: vector<2x32xf32>, %arg16: f32, %arg17: i32):
      %193 = arith.addf %arg15, %182 : vector<2x32xf32>
      %cst_106 = arith.constant 0.000000e+00 : f32
      %194 = vector.broadcast %cst_106 : f32 to vector<2x32xf32>
      %195 = arith.subf %194, %193 : vector<2x32xf32>
      %196 = math.exp %195 : vector<2x32xf32>
      %cst_107 = arith.constant 1.000000e+00 : f32
      %197 = vector.broadcast %cst_107 : f32 to vector<2x32xf32>
      %198 = arith.addf %197, %196 : vector<2x32xf32>
      %cst_108 = arith.constant 1.000000e+00 : f32
      %199 = vector.broadcast %cst_108 : f32 to vector<2x32xf32>
      %200 = arith.divf %199, %198 : vector<2x32xf32>
      %201 = arith.mulf %193, %200 : vector<2x32xf32>
      %cst_109 = arith.constant -1.000000e+00 : f32
      %202 = vector.broadcast %cst_109 : f32 to vector<2x32xf32>
      %203 = arith.subf %193, %202 : vector<2x32xf32>
      %cst_110 = arith.constant 4.500000e+00 : f32
      %204 = vector.broadcast %cst_110 : f32 to vector<2x32xf32>
      %205 = arith.mulf %203, %204 : vector<2x32xf32>
      %cst_111 = arith.constant 0.000000e+00 : f32
      %206 = vector.broadcast %cst_111 : f32 to vector<2x32xf32>
      %207 = arith.subf %206, %205 : vector<2x32xf32>
      %208 = arith.mulf %207, %205 : vector<2x32xf32>
      %209 = math.exp %208 : vector<2x32xf32>
      %cst_112 = arith.constant -0.777777791 : f32
      %210 = vector.broadcast %cst_112 : f32 to vector<2x32xf32>
      %211 = arith.subf %193, %210 : vector<2x32xf32>
      %cst_113 = arith.constant 4.500000e+00 : f32
      %212 = vector.broadcast %cst_113 : f32 to vector<2x32xf32>
      %213 = arith.mulf %211, %212 : vector<2x32xf32>
      %cst_114 = arith.constant 0.000000e+00 : f32
      %214 = vector.broadcast %cst_114 : f32 to vector<2x32xf32>
      %215 = arith.subf %214, %213 : vector<2x32xf32>
      %216 = arith.mulf %215, %213 : vector<2x32xf32>
      %217 = math.exp %216 : vector<2x32xf32>
      %cst_115 = arith.constant -0.555555582 : f32
      %218 = vector.broadcast %cst_115 : f32 to vector<2x32xf32>
      %219 = arith.subf %193, %218 : vector<2x32xf32>
      %cst_116 = arith.constant 4.500000e+00 : f32
      %220 = vector.broadcast %cst_116 : f32 to vector<2x32xf32>
      %221 = arith.mulf %219, %220 : vector<2x32xf32>
      %cst_117 = arith.constant 0.000000e+00 : f32
      %222 = vector.broadcast %cst_117 : f32 to vector<2x32xf32>
      %223 = arith.subf %222, %221 : vector<2x32xf32>
      %224 = arith.mulf %223, %221 : vector<2x32xf32>
      %225 = math.exp %224 : vector<2x32xf32>
      %cst_118 = arith.constant -0.333333343 : f32
      %226 = vector.broadcast %cst_118 : f32 to vector<2x32xf32>
      %227 = arith.subf %193, %226 : vector<2x32xf32>
      %cst_119 = arith.constant 4.500000e+00 : f32
      %228 = vector.broadcast %cst_119 : f32 to vector<2x32xf32>
      %229 = arith.mulf %227, %228 : vector<2x32xf32>
      %cst_120 = arith.constant 0.000000e+00 : f32
      %230 = vector.broadcast %cst_120 : f32 to vector<2x32xf32>
      %231 = arith.subf %230, %229 : vector<2x32xf32>
      %232 = arith.mulf %231, %229 : vector<2x32xf32>
      %233 = math.exp %232 : vector<2x32xf32>
      %cst_121 = arith.constant -0.111111112 : f32
      %234 = vector.broadcast %cst_121 : f32 to vector<2x32xf32>
      %235 = arith.subf %193, %234 : vector<2x32xf32>
      %cst_122 = arith.constant 4.500000e+00 : f32
      %236 = vector.broadcast %cst_122 : f32 to vector<2x32xf32>
      %237 = arith.mulf %235, %236 : vector<2x32xf32>
      %cst_123 = arith.constant 0.000000e+00 : f32
      %238 = vector.broadcast %cst_123 : f32 to vector<2x32xf32>
      %239 = arith.subf %238, %237 : vector<2x32xf32>
      %240 = arith.mulf %239, %237 : vector<2x32xf32>
      %241 = math.exp %240 : vector<2x32xf32>
      %cst_124 = arith.constant 0.111111112 : f32
      %242 = vector.broadcast %cst_124 : f32 to vector<2x32xf32>
      %243 = arith.subf %193, %242 : vector<2x32xf32>
      %cst_125 = arith.constant 4.500000e+00 : f32
      %244 = vector.broadcast %cst_125 : f32 to vector<2x32xf32>
      %245 = arith.mulf %243, %244 : vector<2x32xf32>
      %cst_126 = arith.constant 0.000000e+00 : f32
      %246 = vector.broadcast %cst_126 : f32 to vector<2x32xf32>
      %247 = arith.subf %246, %245 : vector<2x32xf32>
      %248 = arith.mulf %247, %245 : vector<2x32xf32>
      %249 = math.exp %248 : vector<2x32xf32>
      %cst_127 = arith.constant 0.333333343 : f32
      %250 = vector.broadcast %cst_127 : f32 to vector<2x32xf32>
      %251 = arith.subf %193, %250 : vector<2x32xf32>
      %cst_128 = arith.constant 4.500000e+00 : f32
      %252 = vector.broadcast %cst_128 : f32 to vector<2x32xf32>
      %253 = arith.mulf %251, %252 : vector<2x32xf32>
      %cst_129 = arith.constant 0.000000e+00 : f32
      %254 = vector.broadcast %cst_129 : f32 to vector<2x32xf32>
      %255 = arith.subf %254, %253 : vector<2x32xf32>
      %256 = arith.mulf %255, %253 : vector<2x32xf32>
      %257 = math.exp %256 : vector<2x32xf32>
      %cst_130 = arith.constant 0.555555582 : f32
      %258 = vector.broadcast %cst_130 : f32 to vector<2x32xf32>
      %259 = arith.subf %193, %258 : vector<2x32xf32>
      %cst_131 = arith.constant 4.500000e+00 : f32
      %260 = vector.broadcast %cst_131 : f32 to vector<2x32xf32>
      %261 = arith.mulf %259, %260 : vector<2x32xf32>
      %cst_132 = arith.constant 0.000000e+00 : f32
      %262 = vector.broadcast %cst_132 : f32 to vector<2x32xf32>
      %263 = arith.subf %262, %261 : vector<2x32xf32>
      %264 = arith.mulf %263, %261 : vector<2x32xf32>
      %265 = math.exp %264 : vector<2x32xf32>
      %cst_133 = arith.constant 0.777777791 : f32
      %266 = vector.broadcast %cst_133 : f32 to vector<2x32xf32>
      %267 = arith.subf %193, %266 : vector<2x32xf32>
      %cst_134 = arith.constant 4.500000e+00 : f32
      %268 = vector.broadcast %cst_134 : f32 to vector<2x32xf32>
      %269 = arith.mulf %267, %268 : vector<2x32xf32>
      %cst_135 = arith.constant 0.000000e+00 : f32
      %270 = vector.broadcast %cst_135 : f32 to vector<2x32xf32>
      %271 = arith.subf %270, %269 : vector<2x32xf32>
      %272 = arith.mulf %271, %269 : vector<2x32xf32>
      %273 = math.exp %272 : vector<2x32xf32>
      %cst_136 = arith.constant 1.000000e+00 : f32
      %274 = vector.broadcast %cst_136 : f32 to vector<2x32xf32>
      %275 = arith.subf %193, %274 : vector<2x32xf32>
      %cst_137 = arith.constant 4.500000e+00 : f32
      %276 = vector.broadcast %cst_137 : f32 to vector<2x32xf32>
      %277 = arith.mulf %275, %276 : vector<2x32xf32>
      %cst_138 = arith.constant 0.000000e+00 : f32
      %278 = vector.broadcast %cst_138 : f32 to vector<2x32xf32>
      %279 = arith.subf %278, %277 : vector<2x32xf32>
      %280 = arith.mulf %279, %277 : vector<2x32xf32>
      %281 = math.exp %280 : vector<2x32xf32>
      %282 = tpu.concatenate %201, %209, %217, %225, %233, %241, %249, %257, %265, %273, %281 in 1 : vector<2x32xf32>, vector<2x32xf32>, vector<2x32xf32>, vector<2x32xf32>, vector<2x32xf32>, vector<2x32xf32>, vector<2x32xf32>, vector<2x32xf32>, vector<2x32xf32>, vector<2x32xf32>, vector<2x32xf32> -> vector<2x352xf32>
      %cst_139 = arith.constant dense<0.000000e+00> : vector<2x32xf32>
      %283 = tpu.matmul %282, %183, %cst_139 {dimension_numbers = #tpu.dot_dimension_numbers<[1], [0], [0], [1], [0, 0, 1, 1], [], []>} : vector<2x352xf32>, vector<352x32xf32>, vector<2x32xf32> -> vector<2x32xf32>
      %cst_140 = arith.constant 0.000000e+00 : f32
      %284 = vector.broadcast %cst_140 : f32 to vector<2x32xf32>
      %285 = arith.subf %284, %283 : vector<2x32xf32>
      %286 = math.exp %285 : vector<2x32xf32>
      %cst_141 = arith.constant 1.000000e+00 : f32
      %287 = vector.broadcast %cst_141 : f32 to vector<2x32xf32>
      %288 = arith.addf %287, %286 : vector<2x32xf32>
      %cst_142 = arith.constant 1.000000e+00 : f32
      %289 = vector.broadcast %cst_142 : f32 to vector<2x32xf32>
      %290 = arith.divf %289, %288 : vector<2x32xf32>
      %291 = arith.mulf %283, %290 : vector<2x32xf32>
      %cst_143 = arith.constant -1.000000e+00 : f32
      %292 = vector.broadcast %cst_143 : f32 to vector<2x32xf32>
      %293 = arith.subf %283, %292 : vector<2x32xf32>
      %cst_144 = arith.constant 4.500000e+00 : f32
      %294 = vector.broadcast %cst_144 : f32 to vector<2x32xf32>
      %295 = arith.mulf %293, %294 : vector<2x32xf32>
      %cst_145 = arith.constant 0.000000e+00 : f32
      %296 = vector.broadcast %cst_145 : f32 to vector<2x32xf32>
      %297 = arith.subf %296, %295 : vector<2x32xf32>
      %298 = arith.mulf %297, %295 : vector<2x32xf32>
      %299 = math.exp %298 : vector<2x32xf32>
      %cst_146 = arith.constant -0.777777791 : f32
      %300 = vector.broadcast %cst_146 : f32 to vector<2x32xf32>
      %301 = arith.subf %283, %300 : vector<2x32xf32>
      %cst_147 = arith.constant 4.500000e+00 : f32
      %302 = vector.broadcast %cst_147 : f32 to vector<2x32xf32>
      %303 = arith.mulf %301, %302 : vector<2x32xf32>
      %cst_148 = arith.constant 0.000000e+00 : f32
      %304 = vector.broadcast %cst_148 : f32 to vector<2x32xf32>
      %305 = arith.subf %304, %303 : vector<2x32xf32>
      %306 = arith.mulf %305, %303 : vector<2x32xf32>
      %307 = math.exp %306 : vector<2x32xf32>
      %cst_149 = arith.constant -0.555555582 : f32
      %308 = vector.broadcast %cst_149 : f32 to vector<2x32xf32>
      %309 = arith.subf %283, %308 : vector<2x32xf32>
      %cst_150 = arith.constant 4.500000e+00 : f32
      %310 = vector.broadcast %cst_150 : f32 to vector<2x32xf32>
      %311 = arith.mulf %309, %310 : vector<2x32xf32>
      %cst_151 = arith.constant 0.000000e+00 : f32
      %312 = vector.broadcast %cst_151 : f32 to vector<2x32xf32>
      %313 = arith.subf %312, %311 : vector<2x32xf32>
      %314 = arith.mulf %313, %311 : vector<2x32xf32>
      %315 = math.exp %314 : vector<2x32xf32>
      %cst_152 = arith.constant -0.333333343 : f32
      %316 = vector.broadcast %cst_152 : f32 to vector<2x32xf32>
      %317 = arith.subf %283, %316 : vector<2x32xf32>
      %cst_153 = arith.constant 4.500000e+00 : f32
      %318 = vector.broadcast %cst_153 : f32 to vector<2x32xf32>
      %319 = arith.mulf %317, %318 : vector<2x32xf32>
      %cst_154 = arith.constant 0.000000e+00 : f32
      %320 = vector.broadcast %cst_154 : f32 to vector<2x32xf32>
      %321 = arith.subf %320, %319 : vector<2x32xf32>
      %322 = arith.mulf %321, %319 : vector<2x32xf32>
      %323 = math.exp %322 : vector<2x32xf32>
      %cst_155 = arith.constant -0.111111112 : f32
      %324 = vector.broadcast %cst_155 : f32 to vector<2x32xf32>
      %325 = arith.subf %283, %324 : vector<2x32xf32>
      %cst_156 = arith.constant 4.500000e+00 : f32
      %326 = vector.broadcast %cst_156 : f32 to vector<2x32xf32>
      %327 = arith.mulf %325, %326 : vector<2x32xf32>
      %cst_157 = arith.constant 0.000000e+00 : f32
      %328 = vector.broadcast %cst_157 : f32 to vector<2x32xf32>
      %329 = arith.subf %328, %327 : vector<2x32xf32>
      %330 = arith.mulf %329, %327 : vector<2x32xf32>
      %331 = math.exp %330 : vector<2x32xf32>
      %cst_158 = arith.constant 0.111111112 : f32
      %332 = vector.broadcast %cst_158 : f32 to vector<2x32xf32>
      %333 = arith.subf %283, %332 : vector<2x32xf32>
      %cst_159 = arith.constant 4.500000e+00 : f32
      %334 = vector.broadcast %cst_159 : f32 to vector<2x32xf32>
      %335 = arith.mulf %333, %334 : vector<2x32xf32>
      %cst_160 = arith.constant 0.000000e+00 : f32
      %336 = vector.broadcast %cst_160 : f32 to vector<2x32xf32>
      %337 = arith.subf %336, %335 : vector<2x32xf32>
      %338 = arith.mulf %337, %335 : vector<2x32xf32>
      %339 = math.exp %338 : vector<2x32xf32>
      %cst_161 = arith.constant 0.333333343 : f32
      %340 = vector.broadcast %cst_161 : f32 to vector<2x32xf32>
      %341 = arith.subf %283, %340 : vector<2x32xf32>
      %cst_162 = arith.constant 4.500000e+00 : f32
      %342 = vector.broadcast %cst_162 : f32 to vector<2x32xf32>
      %343 = arith.mulf %341, %342 : vector<2x32xf32>
      %cst_163 = arith.constant 0.000000e+00 : f32
      %344 = vector.broadcast %cst_163 : f32 to vector<2x32xf32>
      %345 = arith.subf %344, %343 : vector<2x32xf32>
      %346 = arith.mulf %345, %343 : vector<2x32xf32>
      %347 = math.exp %346 : vector<2x32xf32>
      %cst_164 = arith.constant 0.555555582 : f32
      %348 = vector.broadcast %cst_164 : f32 to vector<2x32xf32>
      %349 = arith.subf %283, %348 : vector<2x32xf32>
      %cst_165 = arith.constant 4.500000e+00 : f32
      %350 = vector.broadcast %cst_165 : f32 to vector<2x32xf32>
      %351 = arith.mulf %349, %350 : vector<2x32xf32>
      %cst_166 = arith.constant 0.000000e+00 : f32
      %352 = vector.broadcast %cst_166 : f32 to vector<2x32xf32>
      %353 = arith.subf %352, %351 : vector<2x32xf32>
      %354 = arith.mulf %353, %351 : vector<2x32xf32>
      %355 = math.exp %354 : vector<2x32xf32>
      %cst_167 = arith.constant 0.777777791 : f32
      %356 = vector.broadcast %cst_167 : f32 to vector<2x32xf32>
      %357 = arith.subf %283, %356 : vector<2x32xf32>
      %cst_168 = arith.constant 4.500000e+00 : f32
      %358 = vector.broadcast %cst_168 : f32 to vector<2x32xf32>
      %359 = arith.mulf %357, %358 : vector<2x32xf32>
      %cst_169 = arith.constant 0.000000e+00 : f32
      %360 = vector.broadcast %cst_169 : f32 to vector<2x32xf32>
      %361 = arith.subf %360, %359 : vector<2x32xf32>
      %362 = arith.mulf %361, %359 : vector<2x32xf32>
      %363 = math.exp %362 : vector<2x32xf32>
      %cst_170 = arith.constant 1.000000e+00 : f32
      %364 = vector.broadcast %cst_170 : f32 to vector<2x32xf32>
      %365 = arith.subf %283, %364 : vector<2x32xf32>
      %cst_171 = arith.constant 4.500000e+00 : f32
      %366 = vector.broadcast %cst_171 : f32 to vector<2x32xf32>
      %367 = arith.mulf %365, %366 : vector<2x32xf32>
      %cst_172 = arith.constant 0.000000e+00 : f32
      %368 = vector.broadcast %cst_172 : f32 to vector<2x32xf32>
      %369 = arith.subf %368, %367 : vector<2x32xf32>
      %370 = arith.mulf %369, %367 : vector<2x32xf32>
      %371 = math.exp %370 : vector<2x32xf32>
      %372 = tpu.concatenate %291, %299, %307, %315, %323, %331, %339, %347, %355, %363, %371 in 1 : vector<2x32xf32>, vector<2x32xf32>, vector<2x32xf32>, vector<2x32xf32>, vector<2x32xf32>, vector<2x32xf32>, vector<2x32xf32>, vector<2x32xf32>, vector<2x32xf32>, vector<2x32xf32>, vector<2x32xf32> -> vector<2x352xf32>
      %cst_173 = arith.constant dense<0.000000e+00> : vector<2x32xf32>
      %373 = tpu.matmul %372, %184, %cst_173 {dimension_numbers = #tpu.dot_dimension_numbers<[1], [0], [0], [1], [0, 0, 1, 1], [], []>} : vector<2x352xf32>, vector<352x32xf32>, vector<2x32xf32> -> vector<2x32xf32>
      %374 = arith.addf %182, %373 : vector<2x32xf32>
      %cst_174 = arith.constant 1.000000e+00 : f32
      %375 = vector.broadcast %cst_174 : f32 to vector<2x32xf32>
      %376 = arith.mulf %375, %374 : vector<2x32xf32>
      %377 = arith.addf %arg15, %376 : vector<2x32xf32>
      %378 = arith.subf %377, %arg15 : vector<2x32xf32>
      %379 = arith.mulf %378, %378 : vector<2x32xf32>
      %cst_175 = arith.constant dense<0.000000e+00> : vector<2xf32>
      %380 = vector.multi_reduction <add>, %379, %cst_175 [1] : vector<2x32xf32> to vector<2xf32>
      %381 = vector.shape_cast %380 : vector<2xf32> to vector<2x1xf32>
      %382 = math.sqrt %381 : vector<2x1xf32>
      %383 = vector.shape_cast %382 : vector<2x1xf32> to vector<1x2x1xf32>
      %cst_176 = arith.constant dense<0.000000e+00> : vector<1xf32>
      %384 = vector.multi_reduction <add>, %383, %cst_176 [1, 2] : vector<1x2x1xf32> to vector<1xf32>
      %385 = vector.shape_cast %384 : vector<1xf32> to vector<1x1x1xf32>
      %386 = vector.extract %385[0, 0, 0] : f32 from vector<1x1x1xf32>
      %cst_177 = arith.constant 2.000000e+00 : f32
      %387 = arith.divf %386, %cst_177 : f32
      %cst_178 = arith.constant 1.000000e-03 : f32
      %388 = arith.cmpf olt, %387, %cst_178 : f32
      %c1_i32 = arith.constant 1 : i32
      %389 = arith.addi %arg17, %c1_i32 : i32
      %c25_i32 = arith.constant 25 : i32
      %390 = arith.cmpi sge, %389, %c25_i32 : i32
      %391 = arith.ori %388, %390 : i1
      %392 = arith.addf %377, %182 : vector<2x32xf32>
      %cst_179 = arith.constant 0.000000e+00 : f32
      %393 = vector.broadcast %cst_179 : f32 to vector<2x32xf32>
      %394 = arith.subf %393, %392 : vector<2x32xf32>
      %395 = math.exp %394 : vector<2x32xf32>
      %cst_180 = arith.constant 1.000000e+00 : f32
      %396 = vector.broadcast %cst_180 : f32 to vector<2x32xf32>
      %397 = arith.addf %396, %395 : vector<2x32xf32>
      %cst_181 = arith.constant 1.000000e+00 : f32
      %398 = vector.broadcast %cst_181 : f32 to vector<2x32xf32>
      %399 = arith.divf %398, %397 : vector<2x32xf32>
      %400 = arith.mulf %392, %399 : vector<2x32xf32>
      %cst_182 = arith.constant -1.000000e+00 : f32
      %401 = vector.broadcast %cst_182 : f32 to vector<2x32xf32>
      %402 = arith.subf %392, %401 : vector<2x32xf32>
      %cst_183 = arith.constant 4.500000e+00 : f32
      %403 = vector.broadcast %cst_183 : f32 to vector<2x32xf32>
      %404 = arith.mulf %402, %403 : vector<2x32xf32>
      %cst_184 = arith.constant 0.000000e+00 : f32
      %405 = vector.broadcast %cst_184 : f32 to vector<2x32xf32>
      %406 = arith.subf %405, %404 : vector<2x32xf32>
      %407 = arith.mulf %406, %404 : vector<2x32xf32>
      %408 = math.exp %407 : vector<2x32xf32>
      %cst_185 = arith.constant -0.777777791 : f32
      %409 = vector.broadcast %cst_185 : f32 to vector<2x32xf32>
      %410 = arith.subf %392, %409 : vector<2x32xf32>
      %cst_186 = arith.constant 4.500000e+00 : f32
      %411 = vector.broadcast %cst_186 : f32 to vector<2x32xf32>
      %412 = arith.mulf %410, %411 : vector<2x32xf32>
      %cst_187 = arith.constant 0.000000e+00 : f32
      %413 = vector.broadcast %cst_187 : f32 to vector<2x32xf32>
      %414 = arith.subf %413, %412 : vector<2x32xf32>
      %415 = arith.mulf %414, %412 : vector<2x32xf32>
      %416 = math.exp %415 : vector<2x32xf32>
      %cst_188 = arith.constant -0.555555582 : f32
      %417 = vector.broadcast %cst_188 : f32 to vector<2x32xf32>
      %418 = arith.subf %392, %417 : vector<2x32xf32>
      %cst_189 = arith.constant 4.500000e+00 : f32
      %419 = vector.broadcast %cst_189 : f32 to vector<2x32xf32>
      %420 = arith.mulf %418, %419 : vector<2x32xf32>
      %cst_190 = arith.constant 0.000000e+00 : f32
      %421 = vector.broadcast %cst_190 : f32 to vector<2x32xf32>
      %422 = arith.subf %421, %420 : vector<2x32xf32>
      %423 = arith.mulf %422, %420 : vector<2x32xf32>
      %424 = math.exp %423 : vector<2x32xf32>
      %cst_191 = arith.constant -0.333333343 : f32
      %425 = vector.broadcast %cst_191 : f32 to vector<2x32xf32>
      %426 = arith.subf %392, %425 : vector<2x32xf32>
      %cst_192 = arith.constant 4.500000e+00 : f32
      %427 = vector.broadcast %cst_192 : f32 to vector<2x32xf32>
      %428 = arith.mulf %426, %427 : vector<2x32xf32>
      %cst_193 = arith.constant 0.000000e+00 : f32
      %429 = vector.broadcast %cst_193 : f32 to vector<2x32xf32>
      %430 = arith.subf %429, %428 : vector<2x32xf32>
      %431 = arith.mulf %430, %428 : vector<2x32xf32>
      %432 = math.exp %431 : vector<2x32xf32>
      %cst_194 = arith.constant -0.111111112 : f32
      %433 = vector.broadcast %cst_194 : f32 to vector<2x32xf32>
      %434 = arith.subf %392, %433 : vector<2x32xf32>
      %cst_195 = arith.constant 4.500000e+00 : f32
      %435 = vector.broadcast %cst_195 : f32 to vector<2x32xf32>
      %436 = arith.mulf %434, %435 : vector<2x32xf32>
      %cst_196 = arith.constant 0.000000e+00 : f32
      %437 = vector.broadcast %cst_196 : f32 to vector<2x32xf32>
      %438 = arith.subf %437, %436 : vector<2x32xf32>
      %439 = arith.mulf %438, %436 : vector<2x32xf32>
      %440 = math.exp %439 : vector<2x32xf32>
      %cst_197 = arith.constant 0.111111112 : f32
      %441 = vector.broadcast %cst_197 : f32 to vector<2x32xf32>
      %442 = arith.subf %392, %441 : vector<2x32xf32>
      %cst_198 = arith.constant 4.500000e+00 : f32
      %443 = vector.broadcast %cst_198 : f32 to vector<2x32xf32>
      %444 = arith.mulf %442, %443 : vector<2x32xf32>
      %cst_199 = arith.constant 0.000000e+00 : f32
      %445 = vector.broadcast %cst_199 : f32 to vector<2x32xf32>
      %446 = arith.subf %445, %444 : vector<2x32xf32>
      %447 = arith.mulf %446, %444 : vector<2x32xf32>
      %448 = math.exp %447 : vector<2x32xf32>
      %cst_200 = arith.constant 0.333333343 : f32
      %449 = vector.broadcast %cst_200 : f32 to vector<2x32xf32>
      %450 = arith.subf %392, %449 : vector<2x32xf32>
      %cst_201 = arith.constant 4.500000e+00 : f32
      %451 = vector.broadcast %cst_201 : f32 to vector<2x32xf32>
      %452 = arith.mulf %450, %451 : vector<2x32xf32>
      %cst_202 = arith.constant 0.000000e+00 : f32
      %453 = vector.broadcast %cst_202 : f32 to vector<2x32xf32>
      %454 = arith.subf %453, %452 : vector<2x32xf32>
      %455 = arith.mulf %454, %452 : vector<2x32xf32>
      %456 = math.exp %455 : vector<2x32xf32>
      %cst_203 = arith.constant 0.555555582 : f32
      %457 = vector.broadcast %cst_203 : f32 to vector<2x32xf32>
      %458 = arith.subf %392, %457 : vector<2x32xf32>
      %cst_204 = arith.constant 4.500000e+00 : f32
      %459 = vector.broadcast %cst_204 : f32 to vector<2x32xf32>
      %460 = arith.mulf %458, %459 : vector<2x32xf32>
      %cst_205 = arith.constant 0.000000e+00 : f32
      %461 = vector.broadcast %cst_205 : f32 to vector<2x32xf32>
      %462 = arith.subf %461, %460 : vector<2x32xf32>
      %463 = arith.mulf %462, %460 : vector<2x32xf32>
      %464 = math.exp %463 : vector<2x32xf32>
      %cst_206 = arith.constant 0.777777791 : f32
      %465 = vector.broadcast %cst_206 : f32 to vector<2x32xf32>
      %466 = arith.subf %392, %465 : vector<2x32xf32>
      %cst_207 = arith.constant 4.500000e+00 : f32
      %467 = vector.broadcast %cst_207 : f32 to vector<2x32xf32>
      %468 = arith.mulf %466, %467 : vector<2x32xf32>
      %cst_208 = arith.constant 0.000000e+00 : f32
      %469 = vector.broadcast %cst_208 : f32 to vector<2x32xf32>
      %470 = arith.subf %469, %468 : vector<2x32xf32>
      %471 = arith.mulf %470, %468 : vector<2x32xf32>
      %472 = math.exp %471 : vector<2x32xf32>
      %cst_209 = arith.constant 1.000000e+00 : f32
      %473 = vector.broadcast %cst_209 : f32 to vector<2x32xf32>
      %474 = arith.subf %392, %473 : vector<2x32xf32>
      %cst_210 = arith.constant 4.500000e+00 : f32
      %475 = vector.broadcast %cst_210 : f32 to vector<2x32xf32>
      %476 = arith.mulf %474, %475 : vector<2x32xf32>
      %cst_211 = arith.constant 0.000000e+00 : f32
      %477 = vector.broadcast %cst_211 : f32 to vector<2x32xf32>
      %478 = arith.subf %477, %476 : vector<2x32xf32>
      %479 = arith.mulf %478, %476 : vector<2x32xf32>
      %480 = math.exp %479 : vector<2x32xf32>
      %481 = tpu.concatenate %400, %408, %416, %424, %432, %440, %448, %456, %464, %472, %480 in 1 : vector<2x32xf32>, vector<2x32xf32>, vector<2x32xf32>, vector<2x32xf32>, vector<2x32xf32>, vector<2x32xf32>, vector<2x32xf32>, vector<2x32xf32>, vector<2x32xf32>, vector<2x32xf32>, vector<2x32xf32> -> vector<2x352xf32>
      %cst_212 = arith.constant dense<0.000000e+00> : vector<2x32xf32>
      %482 = tpu.matmul %481, %183, %cst_212 {dimension_numbers = #tpu.dot_dimension_numbers<[1], [0], [0], [1], [0, 0, 1, 1], [], []>} : vector<2x352xf32>, vector<352x32xf32>, vector<2x32xf32> -> vector<2x32xf32>
      %cst_213 = arith.constant 0.000000e+00 : f32
      %483 = vector.broadcast %cst_213 : f32 to vector<2x32xf32>
      %484 = arith.subf %483, %482 : vector<2x32xf32>
      %485 = math.exp %484 : vector<2x32xf32>
      %cst_214 = arith.constant 1.000000e+00 : f32
      %486 = vector.broadcast %cst_214 : f32 to vector<2x32xf32>
      %487 = arith.addf %486, %485 : vector<2x32xf32>
      %cst_215 = arith.constant 1.000000e+00 : f32
      %488 = vector.broadcast %cst_215 : f32 to vector<2x32xf32>
      %489 = arith.divf %488, %487 : vector<2x32xf32>
      %490 = arith.mulf %482, %489 : vector<2x32xf32>
      %cst_216 = arith.constant -1.000000e+00 : f32
      %491 = vector.broadcast %cst_216 : f32 to vector<2x32xf32>
      %492 = arith.subf %482, %491 : vector<2x32xf32>
      %cst_217 = arith.constant 4.500000e+00 : f32
      %493 = vector.broadcast %cst_217 : f32 to vector<2x32xf32>
      %494 = arith.mulf %492, %493 : vector<2x32xf32>
      %cst_218 = arith.constant 0.000000e+00 : f32
      %495 = vector.broadcast %cst_218 : f32 to vector<2x32xf32>
      %496 = arith.subf %495, %494 : vector<2x32xf32>
      %497 = arith.mulf %496, %494 : vector<2x32xf32>
      %498 = math.exp %497 : vector<2x32xf32>
      %cst_219 = arith.constant -0.777777791 : f32
      %499 = vector.broadcast %cst_219 : f32 to vector<2x32xf32>
      %500 = arith.subf %482, %499 : vector<2x32xf32>
      %cst_220 = arith.constant 4.500000e+00 : f32
      %501 = vector.broadcast %cst_220 : f32 to vector<2x32xf32>
      %502 = arith.mulf %500, %501 : vector<2x32xf32>
      %cst_221 = arith.constant 0.000000e+00 : f32
      %503 = vector.broadcast %cst_221 : f32 to vector<2x32xf32>
      %504 = arith.subf %503, %502 : vector<2x32xf32>
      %505 = arith.mulf %504, %502 : vector<2x32xf32>
      %506 = math.exp %505 : vector<2x32xf32>
      %cst_222 = arith.constant -0.555555582 : f32
      %507 = vector.broadcast %cst_222 : f32 to vector<2x32xf32>
      %508 = arith.subf %482, %507 : vector<2x32xf32>
      %cst_223 = arith.constant 4.500000e+00 : f32
      %509 = vector.broadcast %cst_223 : f32 to vector<2x32xf32>
      %510 = arith.mulf %508, %509 : vector<2x32xf32>
      %cst_224 = arith.constant 0.000000e+00 : f32
      %511 = vector.broadcast %cst_224 : f32 to vector<2x32xf32>
      %512 = arith.subf %511, %510 : vector<2x32xf32>
      %513 = arith.mulf %512, %510 : vector<2x32xf32>
      %514 = math.exp %513 : vector<2x32xf32>
      %cst_225 = arith.constant -0.333333343 : f32
      %515 = vector.broadcast %cst_225 : f32 to vector<2x32xf32>
      %516 = arith.subf %482, %515 : vector<2x32xf32>
      %cst_226 = arith.constant 4.500000e+00 : f32
      %517 = vector.broadcast %cst_226 : f32 to vector<2x32xf32>
      %518 = arith.mulf %516, %517 : vector<2x32xf32>
      %cst_227 = arith.constant 0.000000e+00 : f32
      %519 = vector.broadcast %cst_227 : f32 to vector<2x32xf32>
      %520 = arith.subf %519, %518 : vector<2x32xf32>
      %521 = arith.mulf %520, %518 : vector<2x32xf32>
      %522 = math.exp %521 : vector<2x32xf32>
      %cst_228 = arith.constant -0.111111112 : f32
      %523 = vector.broadcast %cst_228 : f32 to vector<2x32xf32>
      %524 = arith.subf %482, %523 : vector<2x32xf32>
      %cst_229 = arith.constant 4.500000e+00 : f32
      %525 = vector.broadcast %cst_229 : f32 to vector<2x32xf32>
      %526 = arith.mulf %524, %525 : vector<2x32xf32>
      %cst_230 = arith.constant 0.000000e+00 : f32
      %527 = vector.broadcast %cst_230 : f32 to vector<2x32xf32>
      %528 = arith.subf %527, %526 : vector<2x32xf32>
      %529 = arith.mulf %528, %526 : vector<2x32xf32>
      %530 = math.exp %529 : vector<2x32xf32>
      %cst_231 = arith.constant 0.111111112 : f32
      %531 = vector.broadcast %cst_231 : f32 to vector<2x32xf32>
      %532 = arith.subf %482, %531 : vector<2x32xf32>
      %cst_232 = arith.constant 4.500000e+00 : f32
      %533 = vector.broadcast %cst_232 : f32 to vector<2x32xf32>
      %534 = arith.mulf %532, %533 : vector<2x32xf32>
      %cst_233 = arith.constant 0.000000e+00 : f32
      %535 = vector.broadcast %cst_233 : f32 to vector<2x32xf32>
      %536 = arith.subf %535, %534 : vector<2x32xf32>
      %537 = arith.mulf %536, %534 : vector<2x32xf32>
      %538 = math.exp %537 : vector<2x32xf32>
      %cst_234 = arith.constant 0.333333343 : f32
      %539 = vector.broadcast %cst_234 : f32 to vector<2x32xf32>
      %540 = arith.subf %482, %539 : vector<2x32xf32>
      %cst_235 = arith.constant 4.500000e+00 : f32
      %541 = vector.broadcast %cst_235 : f32 to vector<2x32xf32>
      %542 = arith.mulf %540, %541 : vector<2x32xf32>
      %cst_236 = arith.constant 0.000000e+00 : f32
      %543 = vector.broadcast %cst_236 : f32 to vector<2x32xf32>
      %544 = arith.subf %543, %542 : vector<2x32xf32>
      %545 = arith.mulf %544, %542 : vector<2x32xf32>
      %546 = math.exp %545 : vector<2x32xf32>
      %cst_237 = arith.constant 0.555555582 : f32
      %547 = vector.broadcast %cst_237 : f32 to vector<2x32xf32>
      %548 = arith.subf %482, %547 : vector<2x32xf32>
      %cst_238 = arith.constant 4.500000e+00 : f32
      %549 = vector.broadcast %cst_238 : f32 to vector<2x32xf32>
      %550 = arith.mulf %548, %549 : vector<2x32xf32>
      %cst_239 = arith.constant 0.000000e+00 : f32
      %551 = vector.broadcast %cst_239 : f32 to vector<2x32xf32>
      %552 = arith.subf %551, %550 : vector<2x32xf32>
      %553 = arith.mulf %552, %550 : vector<2x32xf32>
      %554 = math.exp %553 : vector<2x32xf32>
      %cst_240 = arith.constant 0.777777791 : f32
      %555 = vector.broadcast %cst_240 : f32 to vector<2x32xf32>
      %556 = arith.subf %482, %555 : vector<2x32xf32>
      %cst_241 = arith.constant 4.500000e+00 : f32
      %557 = vector.broadcast %cst_241 : f32 to vector<2x32xf32>
      %558 = arith.mulf %556, %557 : vector<2x32xf32>
      %cst_242 = arith.constant 0.000000e+00 : f32
      %559 = vector.broadcast %cst_242 : f32 to vector<2x32xf32>
      %560 = arith.subf %559, %558 : vector<2x32xf32>
      %561 = arith.mulf %560, %558 : vector<2x32xf32>
      %562 = math.exp %561 : vector<2x32xf32>
      %cst_243 = arith.constant 1.000000e+00 : f32
      %563 = vector.broadcast %cst_243 : f32 to vector<2x32xf32>
      %564 = arith.subf %482, %563 : vector<2x32xf32>
      %cst_244 = arith.constant 4.500000e+00 : f32
      %565 = vector.broadcast %cst_244 : f32 to vector<2x32xf32>
      %566 = arith.mulf %564, %565 : vector<2x32xf32>
      %cst_245 = arith.constant 0.000000e+00 : f32
      %567 = vector.broadcast %cst_245 : f32 to vector<2x32xf32>
      %568 = arith.subf %567, %566 : vector<2x32xf32>
      %569 = arith.mulf %568, %566 : vector<2x32xf32>
      %570 = math.exp %569 : vector<2x32xf32>
      %571 = tpu.concatenate %490, %498, %506, %514, %522, %530, %538, %546, %554, %562, %570 in 1 : vector<2x32xf32>, vector<2x32xf32>, vector<2x32xf32>, vector<2x32xf32>, vector<2x32xf32>, vector<2x32xf32>, vector<2x32xf32>, vector<2x32xf32>, vector<2x32xf32>, vector<2x32xf32>, vector<2x32xf32> -> vector<2x352xf32>
      %cst_246 = arith.constant dense<0.000000e+00> : vector<2x32xf32>
      %572 = tpu.matmul %571, %184, %cst_246 {dimension_numbers = #tpu.dot_dimension_numbers<[1], [0], [0], [1], [0, 0, 1, 1], [], []>} : vector<2x352xf32>, vector<352x32xf32>, vector<2x32xf32> -> vector<2x32xf32>
      %573 = arith.addf %182, %572 : vector<2x32xf32>
      %cst_247 = arith.constant 1.000000e+00 : f32
      %574 = vector.broadcast %cst_247 : f32 to vector<2x32xf32>
      %575 = arith.mulf %574, %573 : vector<2x32xf32>
      %576 = arith.addf %377, %575 : vector<2x32xf32>
      %577 = arith.subf %576, %377 : vector<2x32xf32>
      %578 = arith.mulf %577, %577 : vector<2x32xf32>
      %cst_248 = arith.constant dense<0.000000e+00> : vector<2xf32>
      %579 = vector.multi_reduction <add>, %578, %cst_248 [1] : vector<2x32xf32> to vector<2xf32>
      %580 = vector.shape_cast %579 : vector<2xf32> to vector<2x1xf32>
      %581 = math.sqrt %580 : vector<2x1xf32>
      %582 = vector.shape_cast %581 : vector<2x1xf32> to vector<1x2x1xf32>
      %cst_249 = arith.constant dense<0.000000e+00> : vector<1xf32>
      %583 = vector.multi_reduction <add>, %582, %cst_249 [1, 2] : vector<1x2x1xf32> to vector<1xf32>
      %584 = vector.shape_cast %583 : vector<1xf32> to vector<1x1x1xf32>
      %585 = vector.extract %584[0, 0, 0] : f32 from vector<1x1x1xf32>
      %cst_250 = arith.constant 2.000000e+00 : f32
      %586 = arith.divf %585, %cst_250 : f32
      %587 = arith.select %391, %377, %576 : vector<2x32xf32>
      %588 = arith.select %391, %387, %586 : f32
      %c1_i32_251 = arith.constant 1 : i32
      %589 = arith.addi %arg17, %c1_i32_251 : i32
      %c2_i32 = arith.constant 2 : i32
      %590 = arith.addi %arg17, %c2_i32 : i32
      %591 = arith.select %391, %589, %590 : i32
      scf.yield %587, %588, %591 : vector<2x32xf32>, f32, i32
    }
    %c0_99 = arith.constant 0 : index
    %c0_100 = arith.constant 0 : index
    %187 = vector.load %arg12[%c0_99, %c0_100] : memref<32x1xf32, #tpu.memory_space<vmem>>, vector<32x1xf32>
    %cst_101 = arith.constant dense<0.000000e+00> : vector<2x1xf32>
    %188 = tpu.matmul %186#0, %187, %cst_101 {dimension_numbers = #tpu.dot_dimension_numbers<[1], [0], [0], [1], [0, 0, 1, 1], [], []>} : vector<2x32xf32>, vector<32x1xf32>, vector<2x1xf32> -> vector<2x1xf32>
    %c0_102 = arith.constant 0 : index
    %c0_103 = arith.constant 0 : index
    %189 = vector.load %arg13[%c0_102, %c0_103] : memref<1x1xf32, #tpu.memory_space<vmem>>, vector<1x1xf32>
    %190 = vector.broadcast %189 : vector<1x1xf32> to vector<2x1xf32>
    %191 = arith.addf %188, %190 : vector<2x1xf32>
    %c0_104 = arith.constant 0 : index
    %c0_105 = arith.constant 0 : index
    %192 = vector.load %arg14[%c0_104, %c0_105] : memref<2x1xf32, #tpu.memory_space<vmem>>, vector<2x1xf32>
    tpu.vector_store %arg14[%c0_104, %c0_105], %191 {strides = array<i32>} : memref<2x1xf32, #tpu.memory_space<vmem>>, vector<2x1xf32>,
    return
  }
  func.func @transform_0(%arg0: i32) -> (i32, i32) {
    %c0_i32 = arith.constant 0 : i32
    %c0_i32_0 = arith.constant 0 : i32
    %c0_i32_1 = arith.constant 0 : i32
    return %c0_i32, %c0_i32_0 : i32, i32
  }
  func.func @transform_1(%arg0: i32) -> (i32, i32) {
    %c0_i32 = arith.constant 0 : i32
    %c0_i32_0 = arith.constant 0 : i32
    %c0_i32_1 = arith.constant 0 : i32
    return %c0_i32, %c0_i32_0 : i32, i32
  }
  func.func @transform_2(%arg0: i32) -> (i32, i32) {
    %c0_i32 = arith.constant 0 : i32
    %c0_i32_0 = arith.constant 0 : i32
    %c0_i32_1 = arith.constant 0 : i32
    return %c0_i32, %c0_i32_0 : i32, i32
  }
  func.func @transform_3(%arg0: i32) -> (i32, i32, i32) {
    %c0_i32 = arith.constant 0 : i32
    %c0_i32_0 = arith.constant 0 : i32
    %c0_i32_1 = arith.constant 0 : i32
    %c0_i32_2 = arith.constant 0 : i32
    return %c0_i32, %c0_i32_0, %c0_i32_1 : i32, i32, i32
  }
  func.func @transform_4(%arg0: i32) -> (i32, i32) {
    %c0_i32 = arith.constant 0 : i32
    %c0_i32_0 = arith.constant 0 : i32
    %c0_i32_1 = arith.constant 0 : i32
    return %c0_i32, %c0_i32_0 : i32, i32
  }
  func.func @transform_5(%arg0: i32) -> (i32, i32, i32) {
    %c0_i32 = arith.constant 0 : i32
    %c0_i32_0 = arith.constant 0 : i32
    %c0_i32_1 = arith.constant 0 : i32
    %c0_i32_2 = arith.constant 0 : i32
    return %c0_i32, %c0_i32_0, %c0_i32_1 : i32, i32, i32
  }
  func.func @transform_6(%arg0: i32) -> (i32, i32) {
    %c0_i32 = arith.constant 0 : i32
    %c0_i32_0 = arith.constant 0 : i32
    %c0_i32_1 = arith.constant 0 : i32
    return %c0_i32, %c0_i32_0 : i32, i32
  }
  func.func @transform_7(%arg0: i32) -> (i32, i32) {
    %c0_i32 = arith.constant 0 : i32
    %c0_i32_0 = arith.constant 0 : i32
    %c0_i32_1 = arith.constant 0 : i32
    return %c0_i32, %c0_i32_0 : i32, i32
  }
  func.func @transform_8(%arg0: i32) -> (i32, i32) {
    %c0_i32 = arith.constant 0 : i32
    %c0_i32_0 = arith.constant 0 : i32
    %c0_i32_1 = arith.constant 0 : i32
    return %c0_i32, %c0_i32_0 : i32, i32
  }
  func.func @transform_9(%arg0: i32) -> (i32, i32) {
    %c0_i32 = arith.constant 0 : i32
    %c0_i32_0 = arith.constant 0 : i32
    %c0_i32_1 = arith.constant 0 : i32
    return %c0_i32, %c0_i32_0 : i32, i32
  }
  func.func @transform_10(%arg0: i32) -> (i32, i32) {
    %c0_i32 = arith.constant 0 : i32
    %c0_i32_0 = arith.constant 0 : i32
    %c0_i32_1 = arith.constant 0 : i32
    return %c0_i32, %c0_i32_0 : i32, i32
  }
  func.func @transform_11(%arg0: i32) -> (i32, i32) {
    %c0_i32 = arith.constant 0 : i32
    %c0_i32_0 = arith.constant 0 : i32
    %c0_i32_1 = arith.constant 0 : i32
    return %c0_i32, %c0_i32_0 : i32, i32
  }
  func.func @transform_12(%arg0: i32) -> (i32, i32) {
    %c0_i32 = arith.constant 0 : i32
    %c0_i32_0 = arith.constant 0 : i32
    %c0_i32_1 = arith.constant 0 : i32
    return %c0_i32, %c0_i32_0 : i32, i32
  }
  func.func @transform_13(%arg0: i32) -> (i32, i32) {
    %c0_i32 = arith.constant 0 : i32
    %c0_i32_0 = arith.constant 0 : i32
    %c0_i32_1 = arith.constant 0 : i32
    return %c0_i32, %c0_i32_0 : i32, i32
  }
}

</mosaic_0001>

<bundles_post_ra>
// kernel: equilibrium_kan_forward.1
= control target key start
LH: loop header
LB: loop body
LE: loop exit
PB: predicated region body
PF: predicated region fallthrough
CT: control target
= control target key end

     0   :  { %vm314_vm0 = vcmask 1042432   ;;  %vm121_vm1 = vcmask 220160   ;;  %vm12409_vm2 = vmmov 1   ;;  %vm2297_vm4 = vcmask 1041409   ;;  %s18872_s20 = smov 0   ;;  %s19352_s1 = inlined_call_operand.vmem [shape: f32[27,32], index: 1, kind: input, shape index: {}]   ;;  %s19353_s11 = inlined_call_operand.vmem [shape: f32[32,1], index: 11, kind: input, shape index: {}]   ;;  %s19354_s12 = inlined_call_operand.<no memory space> [shape: f32[1,1], index: 12, kind: input, shape index: {}]   ;;  %s19355_s13 = inlined_call_operand.vmem [shape: f32[2,1], index: 13, kind: output, shape index: {}]   ;;  %s19356_s0 = inlined_call_operand.vmem [shape: f32[512,27], index: 0, kind: input, shape index: {}]   ;;  %s19357_s3 = inlined_call_operand.vmem [shape: f32[9,32,64], index: 3, kind: input, shape index: {}]   ;;  %s19358_s2 = inlined_call_operand.vmem [shape: f32[1,32], index: 2, kind: input, shape index: {}]   ;;  %s19359_s5 = inlined_call_operand.vmem [shape: f32[9,64,128], index: 5, kind: input, shape index: {}]   ;;  %s19360_s4 = inlined_call_operand.vmem [shape: f32[1,64], index: 4, kind: input, shape index: {}]   ;;  %s19361_s7 = inlined_call_operand.vmem [shape: f32[128,32], index: 7, kind: input, shape index: {}]   ;;  %s19362_s6 = inlined_call_operand.vmem [shape: f32[1,128], index: 6, kind: input, shape index: {}]   ;;  %s19363_s9 = inlined_call_operand.vmem [shape: f32[352,32], index: 9, kind: input, shape index: {}]   ;;  %s19364_s10 = inlined_call_operand.vmem [shape: f32[352,32], index: 10, kind: input, shape index: {}]   ;;  %s19365_s8 = inlined_call_operand.vmem [shape: f32[1,32], index: 8, kind: input, shape index: {}]  }
   0x1   :  { %v18_v0 = vstv %s19354_s12  ;;  %v110_v1 = vld [vmem:[%s19352_s1] sm:$0xff]  ;;  %v111_v2 = vld [vmem:[%s19352_s1 + $0x8] sm:$0xff]  ;;  %v112_v3 = vld [vmem:[%s19352_s1 + $0x10] sm:$0xff]  ;;  %vm1697_vm5 = vcmask 1042434   ;;  %vm1699_vm6 = vcmask 1043459   ;;  %vm1701_vm7 = vcmask 1044484  }
   0x2   :  { %19 = vst [vmem:[#allocation2] sm:$0x1] %v18_v0  ;;  %v11583_v4 = vpack.c.bf16 %v111_v2, %v110_v1  ;;  %v113_v5 = vld [vmem:[%s19352_s1 + $0x18] sm:$0x7]  ;;  %v46_v6 = vld [vmem:[%s19356_s0] sm:$0xff]  ;;  %vm11588_vm3 = vmpackc.low %vm314_vm0, %vm12409_vm2  ;;  %v800_v2 = vlaneseq  ;;  %vm1703_vm8 = vcmask 1045509  }
   0x3   :  { %v11587_v7 = vpack.c.bf16 %v113_v5, %v112_v3  ;;  %10847 = vmatprep.mubr.msk.f32.mxu0 %vm121_vm1, %v46_v6  ;;  %v47_v8 = vld [vmem:[%s19356_s0 + $0x8] sm:$0xff]  ;;  %v48_v9 = vld [vmem:[%s19356_s0 + $0x10] sm:$0xff]  ;;  %v49_v10 = vld [vmem:[%s19356_s0 + $0x18] sm:$0xff]  ;;  %v12410_v0 = vmov 1983009808   ;;  %vm1705_vm9 = vcmask 1046534  }
   0x4   :  { %11584 = vmatprep.subr.bf16.mxu0 %v11583_v4  ;;  %v50_v11 = vld [vmem:[%s19356_s0 + $0x20] sm:$0xff]  ;;  %v51_v12 = vld [vmem:[%s19356_s0 + $0x28] sm:$0xff]  ;;  %v52_v13 = vld [vmem:[%s19356_s0 + $0x30] sm:$0xff]  ;;  %v798_v1 = vunpack.c.l.s4 %v12410_v0  ;;  %v801_v6 = vshrl.u32 %v800_v2, 7  ;;  %vm1707_vm10 = vcmask 1047559   ;;  %vm2403_vm11 = vcmask 261120  }
   0x5   :  { %11586 = vmatpush3.bf16.msra.mxu0 %v11583_v4  ;;  %v53_v14 = vld [vmem:[%s19356_s0 + $0x38] sm:$0xff]  ;;  %v54_v15 = vld [vmem:[%s19356_s0 + $0x40] sm:$0xff]  ;;  %v55_v16 = vld [vmem:[%s19356_s0 + $0x48] sm:$0xff]  ;;  %vm1808_vm12 = vcmask 1040384   ;;  %vm6824_vm13 = vcmask 523264   ;;  %vm12413_vm14 = vmmov 0  }
   0x6   :  { %11589 = vmatprep.subr.msk.bf16.mxu0 %vm11588_vm3, %v11587_v7  ;;  %v56_v17 = vld [vmem:[%s19356_s0 + $0x50] sm:$0xff]  ;;  %v57_v18 = vld [vmem:[%s19356_s0 + $0x58] sm:$0xff]  ;;  %v58_v19 = vld [vmem:[%s19356_s0 + $0x60] sm:$0xff]  ;;  %v799_v5 = vunpack.c.0.s8 %v798_v1 }
   0x7   :  { %v59_v20 = vld [vmem:[%s19356_s0 + $0x68] sm:$0xff]  ;;  %v60_v21 = vld [vmem:[%s19356_s0 + $0x70] sm:$0xff]  ;;  %v61_v22 = vld [vmem:[%s19356_s0 + $0x78] sm:$0xff] }
   0x8   :  { %v62_v23 = vld [vmem:[%s19356_s0 + $0x80] sm:$0xff]  ;;  %v63_v24 = vld [vmem:[%s19356_s0 + $0x88] sm:$0xff]  ;;  %v64_v25 = vld [vmem:[%s19356_s0 + $0x90] sm:$0xff] }
   0x9   :  { %11592 = vmatpush3.bf16.msk.msra.mxu0 %vm11588_vm3, %v11587_v7  ;;  %v65_v26 = vld [vmem:[%s19356_s0 + $0x98] sm:$0xff]  ;;  %v66_v27 = vld [vmem:[%s19356_s0 + $0xa0] sm:$0xff]  ;;  %v67_v28 = vld [vmem:[%s19356_s0 + $0xa8] sm:$0xff] }
   0xa   :  { %v68_v29 = vld [vmem:[%s19356_s0 + $0xb0] sm:$0xff]  ;;  %v69_v30 = vld [vmem:[%s19356_s0 + $0xb8] sm:$0xff]  ;;  %v70_v31 = vld [vmem:[%s19356_s0 + $0xc0] sm:$0xff] }
   0xb   :  { %v71_v32 = vld [vmem:[%s19356_s0 + $0xc8] sm:$0xff]  ;;  %v72_v33 = vld [vmem:[%s19356_s0 + $0xd0] sm:$0xff]  ;;  %v73_v34 = vld [vmem:[%s19356_s0 + $0xd8] sm:$0xff] }
   0xc   :  { %10848 = vmatmul.mubr.msk.f32.vlgmr.msra.gmra.mrb[0].mxu0 %vm121_vm1, %v47_v8  ;;  %v74_v35 = vld [vmem:[%s19356_s0 + $0xe0] sm:$0xff]  ;;  %v75_v36 = vld [vmem:[%s19356_s0 + $0xe8] sm:$0xff]  ;;  %v76_v37 = vld [vmem:[%s19356_s0 + $0xf0] sm:$0xff] }
   0xd   :  { %10850 = vmatprep.mubr.msk.f32.mxu0 %vm121_vm1, %v48_v9  ;;  %v77_v38 = vld [vmem:[%s19356_s0 + $0xf8] sm:$0xff]  ;;  %v78_v39 = vld [vmem:[%s19356_s0 + $0x100] sm:$0xff]  ;;  %v79_v40 = vld [vmem:[%s19356_s0 + $0x108] sm:$0xff] }
   0xe   :  { %v80_v41 = vld [vmem:[%s19356_s0 + $0x110] sm:$0xff]  ;;  %v81_v42 = vld [vmem:[%s19356_s0 + $0x118] sm:$0xff]  ;;  %v82_v43 = vld [vmem:[%s19356_s0 + $0x120] sm:$0xff] }
   0xf   :  { %v83_v44 = vld [vmem:[%s19356_s0 + $0x128] sm:$0xff]  ;;  %v84_v45 = vld [vmem:[%s19356_s0 + $0x130] sm:$0xff]  ;;  %v85_v46 = vld [vmem:[%s19356_s0 + $0x138] sm:$0xff] }
  0x10   :  { %10851 = vmatmul.mubr.msk.f32.gmra.mrb[2].mxu0 %vm121_vm1, %v49_v10  ;;  %v86_v47 = vld [vmem:[%s19356_s0 + $0x140] sm:$0xff]  ;;  %v87_v48 = vld [vmem:[%s19356_s0 + $0x148] sm:$0xff]  ;;  %v88_v49 = vld [vmem:[%s19356_s0 + $0x150] sm:$0xff] }
  0x11   :  { %10853 = vmatprep.mubr.msk.f32.mxu0 %vm121_vm1, %v50_v11  ;;  %v89_v50 = vld [vmem:[%s19356_s0 + $0x158] sm:$0xff]  ;;  %v90_v51 = vld [vmem:[%s19356_s0 + $0x160] sm:$0xff]  ;;  %v91_v52 = vld [vmem:[%s19356_s0 + $0x168] sm:$0xff] }
  0x12   :  { %v92_v53 = vld [vmem:[%s19356_s0 + $0x170] sm:$0xff]  ;;  %v93_v54 = vld [vmem:[%s19356_s0 + $0x178] sm:$0xff]  ;;  %v94_v55 = vld [vmem:[%s19356_s0 + $0x180] sm:$0xff] }
  0x13   :  { %v95_v56 = vld [vmem:[%s19356_s0 + $0x188] sm:$0xff]  ;;  %v96_v57 = vld [vmem:[%s19356_s0 + $0x190] sm:$0xff]  ;;  %v97_v58 = vld [vmem:[%s19356_s0 + $0x198] sm:$0xff] }
  0x14   :  { %10854 = vmatmul.mubr.msk.f32.gmra.mrb[4].mxu0 %vm121_vm1, %v51_v12  ;;  %v98_v59 = vld [vmem:[%s19356_s0 + $0x1a0] sm:$0xff]  ;;  %v99_v60 = vld [vmem:[%s19356_s0 + $0x1a8] sm:$0xff]  ;;  %v100_v61 = vld [vmem:[%s19356_s0 + $0x1b0] sm:$0xff]  ;;  %v12754_v12 = vsub.s32 %v799_v5, %v801_v6 }
  0x15   :  { %10856 = vmatprep.mubr.msk.f32.mxu0 %vm121_vm1, %v52_v13  ;;  %v101_v62 = vld [vmem:[%s19356_s0 + $0x1b8] sm:$0xff]  ;;  %v102_v63 = vld [vmem:[%s19356_s0 + $0x1c0] sm:$0xff]  ;;  %v103_v3 = vld [vmem:[%s19356_s0 + $0x1c8] sm:$0xff] }
  0x16   :  { %v104_v4 = vld [vmem:[%s19356_s0 + $0x1d0] sm:$0xff]  ;;  %v105_v7 = vld [vmem:[%s19356_s0 + $0x1d8] sm:$0xff]  ;;  %v9944_v8 = vld [vmem:[%s19357_s3 + $0x20] sm:$0xff]  ;;  %19736 = vst [vmem:[#allocation3_spill] sm:$0xff] %v12754_v12 }
  0x17   :  { %v9945_v9 = vld [vmem:[%s19357_s3 + $0x28] sm:$0xff]  ;;  %v106_v10 = vld [vmem:[%s19356_s0 + $0x1e0] sm:$0xff] }
  0x18   :  { %10857 = vmatmul.mubr.msk.f32.gmra.mrb[6].mxu0 %vm121_vm1, %v53_v14  ;;  %v11593_v11 = vpack.c.bf16 %v9945_v9, %v9944_v8  ;;  %v107_v13 = vld [vmem:[%s19356_s0 + $0x1e8] sm:$0xff]  ;;  %v19366_v14 = vmov 0.0  }
  0x19   :  { %10859 = vmatprep.mubr.msk.f32.mxu0 %vm121_vm1, %v54_v15  ;;  %v796_v15 = vcombine.high %v19366_v14, %v19366_v14 }
  0x1a   :  { %11594 = vmatprep.subr.bf16.mxu1 %v11593_v11 }
  0x1b   :  { %11596 = vmatpush3.bf16.msra.mxu1 %v11593_v11 }
  0x1c   :  { %10860 = vmatmul.mubr.msk.f32.gmra.mrb[8].mxu0 %vm121_vm1, %v55_v16  ;;  %v12764_v16 = vrot.slane %v19366_v14, %v12754_v12 }
  0x1d   :  { %10862 = vmatprep.mubr.msk.f32.mxu0 %vm121_vm1, %v56_v17  ;;  %v12767_v17 = vsub.s32 0, %v801_v6 }
  0x1e   :  { %19737 = vst [vmem:[#allocation4_spill] sm:$0xff] %v12764_v16 }
  0x1f   :  { %19738 = vst [vmem:[#allocation5_spill] sm:$0xff] %v12767_v17 }
  0x20   :  { %10863 = vmatmul.mubr.msk.f32.gmra.mrb[10].mxu0 %vm121_vm1, %v57_v18  ;;  %v12770_v18 = vrot.slane %v796_v15, %v12754_v12 }
  0x21   :  { %10865 = vmatprep.mubr.msk.f32.mxu0 %vm121_vm1, %v58_v19  ;;  %v811_v19 = vcombine.high %v12764_v16, %v12764_v16 }
  0x22   :  { %19739 = vst [vmem:[#allocation6_spill] sm:$0xff] %v12770_v18 }
  0x24   :  { %10866 = vmatmul.mubr.msk.f32.gmra.mrb[12].mxu0 %vm121_vm1, %v59_v20  ;;  %v9946_v20 = vld [vmem:[%s19357_s3 + $0x30] sm:$0xff] }
  0x25   :  { %10868 = vmatprep.mubr.msk.f32.mxu0 %vm121_vm1, %v60_v21  ;;  %v9947_v21 = vld [vmem:[%s19357_s3 + $0x38] sm:$0xff] }
  0x28   :  { %10869 = vmatmul.mubr.msk.f32.gmra.mrb[14].mxu0 %vm121_vm1, %v61_v22  ;;  %v11597_v22 = vpack.c.bf16 %v9947_v21, %v9946_v20 }
  0x29   :  { %10871 = vmatprep.mubr.msk.f32.mxu0 %vm121_vm1, %v62_v23  ;;  %v812_v23 = vcombine.high %v12770_v18, %v12770_v18 }
  0x2a   :  { %11598 = vmatprep.subr.bf16.mxu1 %v11597_v22 }
  0x2b   :  { %11600 = vmatpush3.bf16.msra.mxu1 %v11597_v22 }
  0x2c   :  { %10872 = vmatmul.mubr.msk.f32.gmra.mrb[16].mxu0 %vm121_vm1, %v63_v24  ;;  %v1836_v24 = vrot.slane %v12764_v16, %v12767_v17 }
  0x2d   :  { %10874 = vmatprep.mubr.msk.f32.mxu0 %vm121_vm1, %v64_v25  ;;  %v1840_v25 = vrot.slane %v811_v19, %v12767_v17 }
  0x30   :  { %10875 = vmatmul.mubr.msk.f32.gmra.mrb[18].mxu0 %vm121_vm1, %v65_v26  ;;  %v1844_v26 = vrot.slane %v12770_v18, %v12767_v17 }
  0x31   :  { %10877 = vmatprep.mubr.msk.f32.mxu0 %vm121_vm1, %v66_v27  ;;  %v1848_v27 = vrot.slane %v812_v23, %v12767_v17 }
  0x34   :  { %10878 = vmatmul.mubr.msk.f32.gmra.mrb[20].mxu0 %vm121_vm1, %v67_v28  ;;  %v2298_v28 = vsel %vm2297_vm4, %v1840_v25, %v1836_v24 }
  0x35   :  { %10880 = vmatprep.mubr.msk.f32.mxu0 %vm121_vm1, %v68_v29  ;;  %v2299_v29 = vsel %vm1697_vm5, %v1844_v26, %v2298_v28 }
  0x38   :  { %10881 = vmatmul.mubr.msk.f32.gmra.mrb[22].mxu0 %vm121_vm1, %v69_v30  ;;  %v12791_v30 = vsel %vm1699_vm6, %v1848_v27, %v2299_v29 }
  0x39   :  { %10883 = vmatprep.mubr.msk.f32.mxu0 %vm121_vm1, %v70_v31  ;;  %19740 = vst [vmem:[#allocation7_spill] sm:$0xff] %v12791_v30  ;;  %v2301_v31 = vsel %vm1701_vm7, %v1836_v24, %v12791_v30 }
  0x3c   :  { %10884 = vmatmul.mubr.msk.f32.gmra.mrb[24].mxu0 %vm121_vm1, %v71_v32  ;;  %v2302_v32 = vsel %vm1703_vm8, %v1840_v25, %v2301_v31 }
  0x3d   :  { %10886 = vmatprep.mubr.msk.f32.mxu0 %vm121_vm1, %v72_v33  ;;  %v2303_v33 = vsel %vm1705_vm9, %v1844_v26, %v2302_v32 }
  0x40   :  { %10887 = vmatmul.mubr.msk.f32.gmra.mrb[26].mxu0 %vm121_vm1, %v73_v34  ;;  %v12798_v34 = vsel %vm1707_vm10, %v1848_v27, %v2303_v33 }
  0x41   :  { %10889 = vmatprep.mubr.msk.f32.mxu0 %vm121_vm1, %v74_v35  ;;  %10951 = vmatprep.mubr.msk.f32.mxu1 %vm2403_vm11, %v12798_v34  ;;  %v12805_v35 = vld [vmem:[%s19358_s2] ss:$0 sm:$0xff] }
  0x44   :  { %10890 = vmatmul.mubr.msk.f32.gmra.mrb[28].mxu0 %vm121_vm1, %v75_v36 }
  0x45   :  { %10892 = vmatprep.mubr.msk.f32.mxu0 %vm121_vm1, %v76_v37 }
  0x48   :  { %10893 = vmatmul.mubr.msk.f32.gmra.mrb[30].mxu0 %vm121_vm1, %v77_v38 }
  0x49   :  { %10895 = vmatprep.mubr.msk.f32.mxu0 %vm121_vm1, %v78_v39 }
  0x4c   :  { %10896 = vmatmul.mubr.msk.f32.gmra.mrb[32].mxu0 %vm121_vm1, %v79_v40 }
  0x4d   :  { %10898 = vmatprep.mubr.msk.f32.mxu0 %vm121_vm1, %v80_v41 }
  0x50   :  { %10899 = vmatmul.mubr.msk.f32.gmra.mrb[34].mxu0 %vm121_vm1, %v81_v42 }
  0x51   :  { %10901 = vmatprep.mubr.msk.f32.mxu0 %vm121_vm1, %v82_v43  ;;  %v12809_v43 = vsub.s32 1, %v801_v6 }
  0x54   :  { %10902 = vmatmul.mubr.msk.f32.gmra.mrb[36].mxu0 %vm121_vm1, %v83_v44 }
  0x55   :  { %10904 = vmatprep.mubr.msk.f32.mxu0 %vm121_vm1, %v84_v45 }
  0x58   :  { %10905 = vmatmul.mubr.msk.f32.gmra.mrb[38].mxu0 %vm121_vm1, %v85_v46 }
  0x59   :  { %10907 = vmatprep.mubr.msk.f32.mxu0 %vm121_vm1, %v86_v47 }
  0x5c   :  { %10908 = vmatmul.mubr.msk.f32.gmra.mrb[40].mxu0 %vm121_vm1, %v87_v48 }
  0x5d   :  { %10910 = vmatprep.mubr.msk.f32.mxu0 %vm121_vm1, %v88_v49 }
  0x60   :  { %10911 = vmatmul.mubr.msk.f32.gmra.mrb[42].mxu0 %vm121_vm1, %v89_v50 }
  0x61   :  { %10913 = vmatprep.mubr.msk.f32.mxu0 %vm121_vm1, %v90_v51 }
  0x64   :  { %10914 = vmatmul.mubr.msk.f32.gmra.mrb[44].mxu0 %vm121_vm1, %v91_v52  ;;  %v12821_v52 = vrot.slane %v811_v19, %v12809_v43 }
  0x65   :  { %10916 = vmatprep.mubr.msk.f32.mxu0 %vm121_vm1, %v92_v53 }
  0x66   :  { %19743 = vst [vmem:[#allocation10_spill] sm:$0xff] %v12821_v52 }
  0x68   :  { %10917 = vmatmul.mubr.msk.f32.gmra.mrb[46].mxu0 %vm121_vm1, %v93_v54 }
  0x69   :  { %10919 = vmatprep.mubr.msk.f32.mxu0 %vm121_vm1, %v94_v55 }
  0x6c   :  { %10920 = vmatmul.mubr.msk.f32.gmra.mrb[48].mxu0 %vm121_vm1, %v95_v56 }
  0x6d   :  { %10922 = vmatprep.mubr.msk.f32.mxu0 %vm121_vm1, %v96_v57  ;;  %v12829_v57 = vrot.slane %v812_v23, %v12809_v43 }
  0x6f   :  { %19745 = vst [vmem:[#allocation12_spill] sm:$0xff] %v12829_v57 }
  0x70   :  { %10923 = vmatmul.mubr.msk.f32.gmra.mrb[50].mxu0 %vm121_vm1, %v97_v58 }
  0x71   :  { %10925 = vmatprep.mubr.msk.f32.mxu0 %vm121_vm1, %v98_v59 }
  0x74   :  { %10926 = vmatmul.mubr.msk.f32.gmra.mrb[52].mxu0 %vm121_vm1, %v99_v60 }
  0x75   :  { %10928 = vmatprep.mubr.msk.f32.mxu0 %vm121_vm1, %v100_v61 }
  0x78   :  { %10929 = vmatmul.mubr.msk.f32.gmra.mrb[54].mxu0 %vm121_vm1, %v101_v62 }
  0x79   :  { %10931 = vmatprep.mubr.msk.f32.mxu0 %vm121_vm1, %v102_v63 }
  0x7c   :  { %10932 = vmatmul.mubr.msk.f32.gmra.mrb[56].mxu0 %vm121_vm1, %v103_v3 }
  0x7d   :  { %10934 = vmatprep.mubr.msk.f32.mxu0 %vm121_vm1, %v104_v4 }
  0x80   :  { %10935 = vmatmul.mubr.msk.f32.gmra.mrb[58].mxu0 %vm121_vm1, %v105_v7 }
  0x81   :  { %10937 = vmatprep.mubr.msk.f32.mxu0 %vm121_vm1, %v106_v10 }
  0x84   :  { %10938 = vmatmul.mubr.msk.f32.gmra.mrb[60].mxu0 %vm121_vm1, %v107_v13 }
  0xdf   :  { %v10849_v36 = vpop.f32.mrb[0].mxu0 }
  0xe0   :  { %v390_v37 = vadd.f32 %v10849_v36, %v12805_v35  ;;  %v384_v38 = vpop.f32.mrb[1].mxu0 }
  0xe1   :  { %v385_v39 = vadd.f32 %v12805_v35, %v384_v38 }
  0xe2   :  { %v704_v40 = vmax.f32 %v390_v37, 0.0 }
  0xe3   :  { %v703_v41 = vmax.f32 %v385_v39, 0.0  ;;  %v10852_v42 = vpop.f32.mrb[2].mxu0 }
  0xe4   :  { %v3175_v44 = vcombine.high %v704_v40, %v704_v40  ;;  %v12812_v45 = vrot.slane %v704_v40, %v12754_v12  ;;  %v394_v46 = vpop.f32.mrb[3].mxu0  ;;  %v400_v50 = vadd.f32 %v10852_v42, %v12805_v35 }
  0xe5   :  { %v3158_v47 = vcombine.high %v703_v41, %v703_v41  ;;  %v3165_v48 = vrot.slane %v703_v41, %v12754_v12  ;;  %v395_v51 = vadd.f32 %v12805_v35, %v394_v46 }
  0xe6   :  { %19741 = vst [vmem:[#allocation8_spill] sm:$0xff] %v12812_v45  ;;  %v12816_v49 = vrot.slane %v3175_v44, %v12754_v12  ;;  %v12825_v53 = vcombine.high %v12812_v45, %v12812_v45  ;;  %v12833_v58 = vrot.slane %v12812_v45, %v12809_v43  ;;  %v706_v4 = vmax.f32 %v400_v50, 0.0 }
  0xe7   :  { %v3172_v54 = vrot.slane %v3158_v47, %v12754_v12  ;;  %v3173_v55 = vcombine.high %v3165_v48, %v3165_v48  ;;  %v10855_v56 = vpop.f32.mrb[4].mxu0  ;;  %v3705_v60 = vrot.slane %v3165_v48, %v12809_v43  ;;  %v4500_v61 = vrot.slane %v3165_v48, %v12767_v17 }
  0xe8   :  { %19742 = vst [vmem:[#allocation9_spill] sm:$0xff] %v12816_v49  ;;  %19744 = vst [vmem:[#allocation11_spill] sm:$0xff] %v12825_v53  ;;  %v404_v62 = vpop.f32.mrb[5].mxu0  ;;  %v12848_v3 = vcombine.high %v12816_v49, %v12816_v49  ;;  %v705_v5 = vmax.f32 %v395_v51, 0.0  ;;  %v410_v6 = vadd.f32 %v10855_v56, %v12805_v35  ;;  %v12853_v7 = vrot.slane %v12825_v53, %v12809_v43 }
  0xe9   :  { %19746 = vst [vmem:[#allocation13_spill] sm:$0xff] %v12833_v58  ;;  %v12839_v63 = vcombine.high %v3172_v54, %v3172_v54  ;;  %v3709_v0 = vrot.slane %v3173_v55, %v12809_v43  ;;  %v12843_v1 = vrot.slane %v3172_v54, %v12809_v43  ;;  %v4504_v2 = vrot.slane %v3173_v55, %v12767_v17 }
  0xea   :  { %19749 = vst [vmem:[#allocation16_spill] sm:$0xff] %v12848_v3  ;;  %19750 = vst [vmem:[#allocation17_spill] sm:$0xff] %v12853_v7  ;;  %v4508_v10 = vrot.slane %v3172_v54, %v12767_v17  ;;  %v830_v19 = vcombine.high %v706_v4, %v706_v4  ;;  %v12863_v20 = vrot.slane %v706_v4, %v12754_v12  ;;  %v708_v29 = vmax.f32 %v410_v6, 0.0 }
  0xeb   :  { %19747 = vst [vmem:[#allocation14_spill] sm:$0xff] %v12839_v63  ;;  %19748 = vst [vmem:[#allocation15_spill] sm:$0xff] %v12843_v1  ;;  %v10858_v11 = vpop.f32.mrb[6].mxu0  ;;  %v5009_v13 = vsel %vm2297_vm4, %v4504_v2, %v4500_v61  ;;  %v5383_v15 = vsel %vm2297_vm4, %v3709_v0, %v3705_v60  ;;  %v12867_v22 = vrot.slane %v12839_v63, %v12809_v43 }
  0xec   :  { %v414_v21 = vpop.f32.mrb[7].mxu0  ;;  %v12871_v23 = vsel %vm1697_vm5, %v12843_v1, %v5383_v15  ;;  %v813_v24 = vcombine.high %v705_v5, %v705_v5  ;;  %v820_v25 = vrot.slane %v705_v5, %v12754_v12  ;;  %v12875_v26 = vsel %vm1697_vm5, %v3709_v0, %v3705_v60 }
  0xed   :  { %19751 = vst [vmem:[#allocation18_spill] sm:$0xff] %v12867_v22  ;;  %19752 = vst [vmem:[#allocation19_spill] sm:$0xff] %v12871_v23  ;;  %v12878_v27 = vrot.slane %v830_v19, %v12754_v12  ;;  %v12882_v28 = vcombine.high %v12863_v20, %v12863_v20  ;;  %v12887_v32 = vsel %vm1697_vm5, %v4508_v10, %v5009_v13 }
  0xee   :  { %19753 = vst [vmem:[#allocation20_spill] sm:$0xff] %v12875_v26  ;;  %19754 = vst [vmem:[#allocation21_spill] sm:$0xff] %v12887_v32  ;;  %v827_v33 = vrot.slane %v813_v24, %v12754_v12  ;;  %v828_v36 = vcombine.high %v820_v25, %v820_v25  ;;  %v12892_v38 = vrot.slane %v12863_v20, %v12809_v43 }
  0xef   :  { %v10861_v37 = vpop.f32.mrb[8].mxu0  ;;  %v1308_v40 = vrot.slane %v820_v25, %v12809_v43  ;;  %v1852_v41 = vrot.slane %v820_v25, %v12767_v17  ;;  %v12900_v44 = vcombine.high %v12878_v27, %v12878_v27  ;;  %v12908_v50 = vrot.slane %v12882_v28, %v12809_v43 }
  0xf0   :  { %19755 = vst [vmem:[#allocation22_spill] sm:$0xff] %v12892_v38  ;;  %v424_v42 = vpop.f32.mrb[9].mxu0  ;;  %v12902_v46 = vcombine.high %v827_v33, %v827_v33  ;;  %v1312_v47 = vrot.slane %v828_v36, %v12809_v43  ;;  %v1316_v48 = vrot.slane %v827_v33, %v12809_v43  ;;  %v12912_v51 = vrot.slane %v12878_v27, %v12809_v43 }
  0xf1   :  { %19756 = vst [vmem:[#allocation23_spill] sm:$0xff] %v12900_v44  ;;  %19757 = vst [vmem:[#allocation24_spill] sm:$0xff] %v12908_v50  ;;  %v1856_v54 = vrot.slane %v828_v36, %v12767_v17  ;;  %v3209_v55 = vcombine.high %v708_v29, %v708_v29  ;;  %v1860_v61 = vrot.slane %v827_v33, %v12767_v17 }
  0xf2   :  { %19758 = vst [vmem:[#allocation25_spill] sm:$0xff] %v12912_v51  ;;  %v1320_v56 = vrot.slane %v12902_v46, %v12809_v43  ;;  %v1709_v60 = vsel %vm1697_vm5, %v1312_v47, %v1308_v40  ;;  %v2837_v0 = vsel %vm2297_vm4, %v1312_v47, %v1308_v40  ;;  %v12924_v10 = vrot.slane %v708_v29, %v12754_v12 }
  0xf3   :  { %v10864_v2 = vpop.f32.mrb[10].mxu0  ;;  %v1710_v4 = vsel %vm1699_vm6, %v1316_v48, %v1709_v60  ;;  %v2305_v5 = vsel %vm2297_vm4, %v1856_v54, %v1852_v41  ;;  %v2838_v6 = vsel %vm1697_vm5, %v1316_v48, %v2837_v0  ;;  %v12937_v25 = vrot.slane %v3209_v55, %v12754_v12 }
  0xf4   :  { %19759 = vst [vmem:[#allocation26_spill] sm:$0xff] %v12924_v10  ;;  %v12926_v13 = vpop.f32.mrb[11].mxu0  ;;  %v12931_v19 = vsel %vm1701_vm7, %v1320_v56, %v1710_v4  ;;  %v12934_v24 = vsel %vm1699_vm6, %v1320_v56, %v2838_v6  ;;  %v12945_v36 = vcombine.high %v12924_v10, %v12924_v10  ;;  %v405_v40 = vadd.f32 %v12805_v35, %v404_v62 }
  0xf5   :  { %19760 = vst [vmem:[#allocation27_spill] sm:$0xff] %v12931_v19  ;;  %19761 = vst [vmem:[#allocation28_spill] sm:$0xff] %v12934_v24  ;;  %v12951_v47 = vsel %vm1697_vm5, %v1860_v61, %v2305_v5  ;;  %v12955_v48 = vcombine.high %v12937_v25, %v12937_v25  ;;  %v420_v54 = vadd.f32 %v10858_v11, %v12805_v35 }
  0xf6   :  { %19762 = vst [vmem:[#allocation29_spill] sm:$0xff] %v12937_v25  ;;  %19763 = vst [vmem:[#allocation30_spill] sm:$0xff] %v12945_v36  ;;  %v12962_v56 = vrot.slane %v12924_v10, %v12809_v43  ;;  %v707_v60 = vmax.f32 %v405_v40, 0.0  ;;  %v415_v0 = vadd.f32 %v12805_v35, %v414_v21  ;;  %v12971_v4 = vrot.slane %v12945_v36, %v12809_v43 }
  0xf7   :  { %19764 = vst [vmem:[#allocation31_spill] sm:$0xff] %v12955_v48  ;;  %v12958_v55 = vpop.f32.mrb[12].mxu0  ;;  %v12975_v11 = vrot.slane %v12937_v25, %v12809_v43  ;;  %v710_v6 = vmax.f32 %v420_v54, 0.0  ;;  %v430_v31 = vadd.f32 %v10861_v37, %v12805_v35  ;;  %v425_v21 = vadd.f32 %v12805_v35, %v424_v42 }
  0xf8   :  { %19765 = vst [vmem:[#allocation32_spill] sm:$0xff] %v12962_v56  ;;  %v12967_v61 = vpop.f32.mrb[13].mxu0  ;;  %19766 = vst [vmem:[#allocation33_spill] sm:$0xff] %v12971_v4  ;;  %v3192_v40 = vcombine.high %v707_v60, %v707_v60  ;;  %v3199_v9 = vrot.slane %v707_v60, %v12754_v12  ;;  %v709_v29 = vmax.f32 %v415_v0, 0.0  ;;  %v1880_v56 = vrot.slane %v12900_v44, %v12767_v17 }
  0xf9   :  { %19767 = vst [vmem:[#allocation34_spill] sm:$0xff] %v12975_v11  ;;  %v864_v8 = vcombine.high %v710_v6, %v710_v6  ;;  %v12987_v59 = vrot.slane %v710_v6, %v12754_v12  ;;  %v711_v63 = vmax.f32 %v425_v21, 0.0 }
  0xfa   :  { %v3206_v54 = vrot.slane %v3192_v40, %v12754_v12  ;;  %v3207_v14 = vcombine.high %v3199_v9, %v3199_v9  ;;  %v3733_v60 = vrot.slane %v3199_v9, %v12809_v43  ;;  %v4532_v62 = vrot.slane %v3199_v9, %v12767_v17 }
  0xfb   :  { %v12990_v5 = vpop.f32.mrb[14].mxu0  ;;  %v12999_v15 = vrot.slane %v864_v8, %v12754_v12  ;;  %v13003_v37 = vcombine.high %v12987_v59, %v12987_v59  ;;  %v13011_v41 = vrot.slane %v12987_v59, %v12809_v43  ;;  %v712_v9 = vmax.f32 %v430_v31, 0.0 }
  0xfc   :  { %v12994_v33 = vpop.f32.mrb[15].mxu0  ;;  %v3208_v6 = vcombine.high %v3206_v54, %v3206_v54  ;;  %v3737_v40 = vrot.slane %v3207_v14, %v12809_v43  ;;  %v3741_v0 = vrot.slane %v3206_v54, %v12809_v43  ;;  %v4536_v42 = vrot.slane %v3207_v14, %v12767_v17 }
  0xfd   :  { %19768 = vst [vmem:[#allocation35_spill] sm:$0xff] %v12999_v15  ;;  %v4540_v39 = vrot.slane %v3206_v54, %v12767_v17  ;;  %19769 = vst [vmem:[#allocation36_spill] sm:$0xff] %v13011_v41  ;;  %v440_v8 = vadd.f32 %v10864_v2, %v12805_v35  ;;  %v13028_v2 = vcombine.high %v12999_v15, %v12999_v15 }
  0xfe   :  { %v3745_v23 = vrot.slane %v3208_v6, %v12809_v43  ;;  %v4156_v48 = vsel %vm1697_vm5, %v3737_v40, %v3733_v60  ;;  %v5016_v25 = vsel %vm2297_vm4, %v4536_v42, %v4532_v62  ;;  %v4544_v10 = vrot.slane %v3208_v6, %v12767_v17 }
  0xff   :  { %v13014_v30 = vpop.f32.mrb[16].mxu0  ;;  %v4157_v54 = vsel %vm1699_vm6, %v3741_v0, %v4156_v48  ;;  %v5390_v31 = vsel %vm2297_vm4, %v3737_v40, %v3733_v60  ;;  %19770 = vst [vmem:[#allocation37_spill] sm:$0xff] %v13028_v2  ;;  %v5017_v53 = vsel %vm1697_vm5, %v4540_v39, %v5016_v25  ;;  %v13034_v62 = vrot.slane %v13003_v37, %v12809_v43 }
 0x100   :  { %v13021_v36 = vpop.f32.mrb[17].mxu0  ;;  %v5391_v45 = vsel %vm1697_vm5, %v3741_v0, %v5390_v31  ;;  %v847_v42 = vcombine.high %v709_v29, %v709_v29  ;;  %v854_v48 = vrot.slane %v709_v29, %v12754_v12  ;;  %v3243_v6 = vcombine.high %v712_v9, %v712_v9 }
 0x101   :  { %19771 = vst [vmem:[#allocation38_spill] sm:$0xff] %v13034_v62  ;;  %v13037_v14 = vsel %vm1699_vm6, %v3745_v23, %v5391_v45  ;;  %v13041_v60 = vrot.slane %v712_v9, %v12754_v12  ;;  %v13046_v39 = vsel %vm1701_vm7, %v3745_v23, %v4157_v54  ;;  %v13056_v29 = vsel %vm1699_vm6, %v4544_v10, %v5017_v53 }
 0x102   :  { %19772 = vst [vmem:[#allocation39_spill] sm:$0xff] %v13037_v14  ;;  %19774 = vst [vmem:[#allocation41_spill] sm:$0xff] %v13046_v39  ;;  %v861_v45 = vrot.slane %v847_v42, %v12754_v12  ;;  %v862_v9 = vcombine.high %v854_v48, %v854_v48  ;;  %v13059_v14 = vrot.slane %v3243_v6, %v12754_v12  ;;  %v714_v42 = vmax.f32 %v440_v8, 0.0 }
 0x103   :  { %19773 = vst [vmem:[#allocation40_spill] sm:$0xff] %v13041_v60  ;;  %v13043_v40 = vpop.f32.mrb[18].mxu0  ;;  %19775 = vst [vmem:[#allocation42_spill] sm:$0xff] %v13056_v29  ;;  %v13068_v0 = vcombine.high %v13041_v60, %v13041_v60  ;;  %v1336_v25 = vrot.slane %v854_v48, %v12809_v43  ;;  %v1884_v10 = vrot.slane %v854_v48, %v12767_v17 }
 0x104   :  { %v13053_v31 = vpop.f32.mrb[19].mxu0  ;;  %19776 = vst [vmem:[#allocation43_spill] sm:$0xff] %v13059_v14  ;;  %v13061_v23 = vcombine.high %v861_v45, %v861_v45  ;;  %v13064_v54 = vrot.slane %v861_v45, %v12809_v43  ;;  %v1340_v53 = vrot.slane %v862_v9, %v12809_v43  ;;  %v1888_v6 = vrot.slane %v862_v9, %v12767_v17 }
 0x105   :  { %19778 = vst [vmem:[#allocation45_spill] sm:$0xff] %v13068_v0  ;;  %v1892_v21 = vrot.slane %v861_v45, %v12767_v17  ;;  %v13079_v32 = vcombine.high %v13059_v14, %v13059_v14  ;;  %v13083_v3 = vrot.slane %v13041_v60, %v12809_v43  ;;  %v435_v8 = vadd.f32 %v12805_v35, %v12926_v13 }
 0x106   :  { %19777 = vst [vmem:[#allocation44_spill] sm:$0xff] %v13064_v54  ;;  %v13091_v48 = vrot.slane %v13061_v23, %v12809_v43  ;;  %v13094_v9 = vsel %vm1697_vm5, %v1340_v53, %v1336_v25  ;;  %v2312_v45 = vsel %vm2297_vm4, %v1888_v6, %v1884_v10  ;;  %v13106_v13 = vrot.slane %v13068_v0, %v12809_v43 }
 0x107   :  { %v13074_v29 = vpop.f32.mrb[20].mxu0  ;;  %19779 = vst [vmem:[#allocation46_spill] sm:$0xff] %v13079_v32  ;;  %19780 = vst [vmem:[#allocation47_spill] sm:$0xff] %v13083_v3  ;;  %v2844_v32 = vsel %vm2297_vm4, %v1340_v53, %v1336_v25  ;;  %v3226_v4 = vcombine.high %v711_v63, %v711_v63  ;;  %v3233_v49 = vrot.slane %v711_v63, %v12754_v12 }
 0x108   :  { %v13087_v11 = vpop.f32.mrb[21].mxu0  ;;  %19781 = vst [vmem:[#allocation48_spill] sm:$0xff] %v13091_v48  ;;  %19782 = vst [vmem:[#allocation49_spill] sm:$0xff] %v13094_v9  ;;  %v13102_v3 = vsel %vm1697_vm5, %v13064_v54, %v2844_v32  ;;  %v898_v10 = vcombine.high %v714_v42, %v714_v42  ;;  %v13112_v25 = vrot.slane %v714_v42, %v12754_v12  ;;  %v713_v42 = vmax.f32 %v435_v8, 0.0 }
 0x109   :  { %19783 = vst [vmem:[#allocation50_spill] sm:$0xff] %v13102_v3  ;;  %19784 = vst [vmem:[#allocation51_spill] sm:$0xff] %v13106_v13  ;;  %v13117_v6 = vsel %vm1697_vm5, %v1892_v21, %v2312_v45  ;;  %v3240_v13 = vrot.slane %v3226_v4, %v12754_v12  ;;  %v3241_v63 = vcombine.high %v3233_v49, %v3233_v49 }
 0x10a   :  { %v13127_v60 = vrot.slane %v898_v10, %v12754_v12  ;;  %v13138_v7 = vcombine.high %v13112_v25, %v13112_v25  ;;  %v19788_v4 = vrot.slane %v12902_v46, %v12767_v17  ;;  %v3761_v8 = vrot.slane %v3233_v49, %v12809_v43 }
 0x10b   :  { %v13114_v53 = vpop.f32.mrb[22].mxu0  ;;  %v13131_v21 = vcombine.high %v3240_v13, %v3240_v13  ;;  %v13134_v45 = vrot.slane %v3240_v13, %v12809_v43  ;;  %v3765_v32 = vrot.slane %v3241_v63, %v12809_v43  ;;  %v4568_v0 = vrot.slane %v3241_v63, %v12767_v17 }
 0x10c   :  { %v13124_v58 = vpop.f32.mrb[23].mxu0  ;;  %19785 = vst [vmem:[#allocation52_spill] sm:$0xff] %v13127_v60  ;;  %v2307_v10 = vsel %vm1699_vm6, %v19788_v4, %v12951_v47  ;;  %v450_v14 = vadd.f32 %v12958_v55, %v12805_v35  ;;  %v4564_v22 = vrot.slane %v3233_v49, %v12767_v17  ;;  %v4572_v1 = vrot.slane %v3240_v13, %v12767_v17 }
 0x10d   :  { %19786 = vst [vmem:[#allocation53_spill] sm:$0xff] %v13131_v21  ;;  %19787 = vst [vmem:[#allocation54_spill] sm:$0xff] %v13134_v45  ;;  %v13156_v46 = vcombine.high %v13127_v60, %v13127_v60  ;;  %v13160_v47 = vrot.slane %v13112_v25, %v12809_v43  ;;  %v13166_v63 = vrot.slane %v13131_v21, %v12809_v43 }
 0x10e   :  { %v5397_v49 = vsel %vm2297_vm4, %v3765_v32, %v3761_v8  ;;  %v13173_v13 = vrot.slane %v13138_v7, %v12809_v43  ;;  %v13176_v26 = vsel %vm1697_vm5, %v3765_v32, %v3761_v8  ;;  %v5023_v24 = vsel %vm2297_vm4, %v4568_v0, %v4564_v22 }
 0x10f   :  { %v13150_v39 = vpop.f32.mrb[24].mxu0  ;;  %19789 = vst [vmem:[#allocation55_spill] sm:$0xff] %v13156_v46  ;;  %19790 = vst [vmem:[#allocation56_spill] sm:$0xff] %v13160_v47  ;;  %v13180_v44 = vsel %vm1697_vm5, %v13134_v45, %v5397_v49  ;;  %v888_v55 = vrot.slane %v713_v42, %v12754_v12  ;;  %v19795_v21 = vrot.slane %v12863_v20, %v12767_v17  ;;  %v716_v47 = vmax.f32 %v450_v14, 0.0 }
 0x110   :  { %v13162_v4 = vpop.f32.mrb[25].mxu0  ;;  %19791 = vst [vmem:[#allocation57_spill] sm:$0xff] %v13166_v63  ;;  %19792 = vst [vmem:[#allocation58_spill] sm:$0xff] %v13173_v13  ;;  %v881_v63 = vcombine.high %v713_v42, %v713_v42  ;;  %v19796_v49 = vrot.slane %v12882_v28, %v12767_v17  ;;  %v445_v22 = vadd.f32 %v12805_v35, %v12967_v61 }
 0x111   :  { %19793 = vst [vmem:[#allocation59_spill] sm:$0xff] %v13176_v26  ;;  %19794 = vst [vmem:[#allocation60_spill] sm:$0xff] %v13180_v44  ;;  %v2308_v13 = vsel %vm1701_vm7, %v19795_v21, %v2307_v10  ;;  %v460_v0 = vadd.f32 %v12990_v5, %v12805_v35  ;;  %v896_v20 = vcombine.high %v888_v55, %v888_v55 }
 0x112   :  { %v895_v8 = vrot.slane %v881_v63, %v12754_v12  ;;  %v2309_v3 = vsel %vm1703_vm8, %v19796_v49, %v2308_v13  ;;  %v1364_v14 = vrot.slane %v888_v55, %v12809_v43  ;;  %v1916_v21 = vrot.slane %v888_v55, %v12767_v17 }
 0x113   :  { %v13190_v32 = vpop.f32.mrb[26].mxu0  ;;  %v19797_v10 = vrot.slane %v12878_v27, %v12767_v17  ;;  %v1368_v49 = vrot.slane %v896_v20, %v12809_v43  ;;  %v1920_v44 = vrot.slane %v896_v20, %v12767_v17  ;;  %v3277_v27 = vcombine.high %v716_v47, %v716_v47 }
 0x114   :  { %v13201_v42 = vpop.f32.mrb[27].mxu0  ;;  %v13209_v63 = vcombine.high %v895_v8, %v895_v8  ;;  %v13212_v13 = vrot.slane %v895_v8, %v12809_v43  ;;  %v1924_v61 = vrot.slane %v895_v8, %v12767_v17  ;;  %v715_v8 = vmax.f32 %v445_v22, 0.0 }
 0x115   :  { %v2310_v28 = vsel %vm1705_vm9, %v19797_v10, %v2309_v3  ;;  %v13223_v3 = vrot.slane %v716_v47, %v12754_v12  ;;  %v13228_v10 = vsel %vm1697_vm5, %v4572_v1, %v5023_v24  ;;  %v13235_v20 = vsel %vm1697_vm5, %v1368_v49, %v1364_v14 }
 0x116   :  { %19798 = vst [vmem:[#allocation61_spill] sm:$0xff] %v13212_v13  ;;  %v13216_v5 = vsel %vm1707_vm10, %v1880_v56, %v2310_v28  ;;  %19801 = vst [vmem:[#allocation64_spill] sm:$0xff] %v13228_v10  ;;  %v718_v28 = vmax.f32 %v460_v0, 0.0  ;;  %v2851_v47 = vsel %vm2297_vm4, %v1368_v49, %v1364_v14  ;;  %v13240_v26 = vrot.slane %v3277_v27, %v12754_v12 }
 0x117   :  { %19799 = vst [vmem:[#allocation62_spill] sm:$0xff] %v13216_v5  ;;  %10952 = vmatmul.mubr.msk.f32.vlgmr.msra.gmra.mrb[0].mxu1 %vm2403_vm11, %v13216_v5  ;;  %19800 = vst [vmem:[#allocation63_spill] sm:$0xff] %v13223_v3  ;;  %v13225_v55 = vpop.f32.mrb[28].mxu0  ;;  %v2319_v5 = vsel %vm2297_vm4, %v1920_v44, %v1916_v21  ;;  %v13246_v24 = vsel %vm1697_vm5, %v13212_v13, %v2851_v47  ;;  %v13250_v22 = vcombine.high %v13223_v3, %v13223_v3 }
 0x118   :  { %v13232_v45 = vpop.f32.mrb[29].mxu0  ;;  %19802 = vst [vmem:[#allocation65_spill] sm:$0xff] %v13235_v20  ;;  %19803 = vst [vmem:[#allocation66_spill] sm:$0xff] %v13240_v26  ;;  %v455_v0 = vadd.f32 %v12805_v35, %v12994_v33  ;;  %v13256_v44 = vrot.slane %v13209_v63, %v12809_v43  ;;  %v13261_v21 = vsel %vm1697_vm5, %v1924_v61, %v2319_v5 }
 0x119   :  { %19804 = vst [vmem:[#allocation67_spill] sm:$0xff] %v13246_v24  ;;  %19805 = vst [vmem:[#allocation68_spill] sm:$0xff] %v13250_v22  ;;  %v3260_v49 = vcombine.high %v715_v8, %v715_v8  ;;  %v13267_v47 = vcombine.high %v13240_v26, %v13240_v26  ;;  %v13271_v33 = vrot.slane %v13223_v3, %v12809_v43 }
 0x11a   :  { %19806 = vst [vmem:[#allocation69_spill] sm:$0xff] %v13256_v44  ;;  %v3267_v1 = vrot.slane %v715_v8, %v12754_v12  ;;  %v932_v56 = vcombine.high %v718_v28, %v718_v28  ;;  %v13282_v24 = vrot.slane %v718_v28, %v12754_v12 }
 0x11b   :  { %v13263_v27 = vpop.f32.mrb[30].mxu0  ;;  %19807 = vst [vmem:[#allocation70_spill] sm:$0xff] %v13267_v47  ;;  %19808 = vst [vmem:[#allocation71_spill] sm:$0xff] %v13271_v33  ;;  %v3274_v14 = vrot.slane %v3260_v49, %v12754_v12  ;;  %v13286_v47 = vrot.slane %v13250_v22, %v12809_v43  ;;  %v717_v49 = vmax.f32 %v455_v0, 0.0 }
 0x11c   :  { %v13274_v10 = vpop.f32.mrb[31].mxu0  ;;  %v3275_v33 = vcombine.high %v3267_v1, %v3267_v1  ;;  %v13291_v44 = vrot.slane %v932_v56, %v12754_v12  ;;  %v13300_v28 = vcombine.high %v13282_v24, %v13282_v24  ;;  %v1912_v56 = vrot.slane %v13028_v2, %v12767_v17 }
 0x11d   :  { %19809 = vst [vmem:[#allocation72_spill] sm:$0xff] %v13286_v47  ;;  %v13293_v61 = vcombine.high %v3274_v14, %v3274_v14  ;;  %v13296_v5 = vrot.slane %v3274_v14, %v12809_v43  ;;  %v3789_v47 = vrot.slane %v3267_v1, %v12809_v43  ;;  %v4596_v62 = vrot.slane %v3267_v1, %v12767_v17 }
 0x11e   :  { %19810 = vst [vmem:[#allocation73_spill] sm:$0xff] %v13291_v44  ;;  %v3793_v8 = vrot.slane %v3275_v33, %v12809_v43  ;;  %v4600_v22 = vrot.slane %v3275_v33, %v12767_v17  ;;  %v4604_v13 = vrot.slane %v3274_v14, %v12767_v17  ;;  %v13315_v0 = vcombine.high %v13291_v44, %v13291_v44 }
 0x11f   :  { %19811 = vst [vmem:[#allocation74_spill] sm:$0xff] %v13293_v61  ;;  %19812 = vst [vmem:[#allocation75_spill] sm:$0xff] %v13296_v5  ;;  %v13302_v3 = vpop.f32.mrb[32].mxu0  ;;  %v13319_v20 = vrot.slane %v13282_v24, %v12809_v43  ;;  %v13323_v33 = vrot.slane %v13293_v61, %v12809_v43  ;;  %v13330_v1 = vrot.slane %v13300_v28, %v12809_v43 }
 0x120   :  { %v13309_v26 = vpop.f32.mrb[33].mxu0  ;;  %19813 = vst [vmem:[#allocation76_spill] sm:$0xff] %v13315_v0  ;;  %v5404_v41 = vsel %vm2297_vm4, %v3793_v8, %v3789_v47  ;;  %v5030_v14 = vsel %vm2297_vm4, %v4600_v22, %v4596_v62  ;;  %v915_v54 = vcombine.high %v717_v49, %v717_v49  ;;  %v13342_v2 = vsel %vm1697_vm5, %v3793_v8, %v3789_v47 }
 0x121   :  { %19814 = vst [vmem:[#allocation77_spill] sm:$0xff] %v13319_v20  ;;  %19815 = vst [vmem:[#allocation78_spill] sm:$0xff] %v13323_v33  ;;  %v13335_v48 = vsel %vm1697_vm5, %v13296_v5, %v5404_v41  ;;  %v922_v61 = vrot.slane %v717_v49, %v12754_v12  ;;  %v470_v41 = vadd.f32 %v13014_v30, %v12805_v35 }
 0x122   :  { %19816 = vst [vmem:[#allocation79_spill] sm:$0xff] %v13330_v1  ;;  %19817 = vst [vmem:[#allocation80_spill] sm:$0xff] %v13335_v48  ;;  %v19819_v1 = vrot.slane %v13061_v23, %v12767_v17  ;;  %v929_v20 = vrot.slane %v915_v54, %v12754_v12  ;;  %v19820_v48 = vrot.slane %v12987_v59, %v12767_v17 }
 0x123   :  { %v13339_v33 = vpop.f32.mrb[34].mxu0  ;;  %19818 = vst [vmem:[#allocation81_spill] sm:$0xff] %v13342_v2  ;;  %v465_v8 = vadd.f32 %v12805_v35, %v13021_v36  ;;  %v480_v23 = vadd.f32 %v13043_v40, %v12805_v35  ;;  %v930_v49 = vcombine.high %v922_v61, %v922_v61  ;;  %v19822_v54 = vrot.slane %v13003_v37, %v12767_v17  ;;  %v109_v37 = vld [vmem:[%s19356_s0 + $0x1f8] sm:$0xff] }
 0x124   :  { %v2314_v62 = vsel %vm1699_vm6, %v19819_v1, %v13117_v6  ;;  %v13352_v22 = vpop.f32.mrb[35].mxu0  ;;  %v13364_v6 = vsel %vm1697_vm5, %v4604_v13, %v5030_v14  ;;  %v13375_v36 = vcombine.high %v929_v20, %v929_v20  ;;  %v1392_v40 = vrot.slane %v922_v61, %v12809_v43 }
 0x125   :  { %v2315_v47 = vsel %vm1701_vm7, %v19820_v48, %v2314_v62  ;;  %19821 = vst [vmem:[#allocation82_spill] sm:$0xff] %v13364_v6  ;;  %v108_v48 = vld [vmem:[%s19356_s0 + $0x1f0] sm:$0xff]  ;;  %v13379_v13 = vrot.slane %v929_v20, %v12809_v43  ;;  %v19824_v1 = vrot.slane %v12999_v15, %v12767_v17  ;;  %v720_v6 = vmax.f32 %v470_v41, 0.0 }
 0x126   :  { %v2316_v59 = vsel %vm1703_vm8, %v19822_v54, %v2315_v47  ;;  %10940 = vmatprep.mubr.msk.f32.mxu0 %vm121_vm1, %v108_v48  ;;  %v1396_v47 = vrot.slane %v930_v49, %v12809_v43  ;;  %v1952_v54 = vrot.slane %v930_v49, %v12767_v17  ;;  %v1948_v48 = vrot.slane %v922_v61, %v12767_v17 }
 0x127   :  { %19823 = vst [vmem:[#allocation83_spill] sm:$0xff] %v13379_v13  ;;  %v2317_v14 = vsel %vm1705_vm9, %v19824_v1, %v2316_v59  ;;  %v13385_v62 = vpop.f32.mrb[36].mxu0  ;;  %10941 = vmatmul.mubr.msk.f32.gmra.mrb[62].mxu0 %vm121_vm1, %v109_v37  ;;  %v719_v1 = vmax.f32 %v465_v8, 0.0  ;;  %v722_v2 = vmax.f32 %v480_v23, 0.0  ;;  %v13415_v61 = vrot.slane %v720_v6, %v12754_v12 }
 0x128   :  { %v13394_v30 = vsel %vm1707_vm10, %v1912_v56, %v2317_v14  ;;  %v13396_v5 = vpop.f32.mrb[37].mxu0  ;;  %v13405_v49 = vsel %vm1697_vm5, %v1396_v47, %v1392_v40  ;;  %v1956_v56 = vrot.slane %v929_v20, %v12767_v17  ;;  %v2858_v41 = vsel %vm2297_vm4, %v1396_v47, %v1392_v40 }
 0x129   :  { %19825 = vst [vmem:[#allocation84_spill] sm:$0xff] %v13394_v30  ;;  %10954 = vmatprep.mubr.msk.f32.mxu1 %vm2403_vm11, %v13394_v30  ;;  %19826 = vst [vmem:[#allocation85_spill] sm:$0xff] %v13405_v49  ;;  %v3311_v14 = vcombine.high %v720_v6, %v720_v6  ;;  %v2326_v37 = vsel %vm2297_vm4, %v1952_v54, %v1948_v48  ;;  %v13412_v59 = vsel %vm1697_vm5, %v13379_v13, %v2858_v41 }
 0x12a   :  { %19827 = vst [vmem:[#allocation86_spill] sm:$0xff] %v13412_v59  ;;  %19828 = vst [vmem:[#allocation87_spill] sm:$0xff] %v13415_v61  ;;  %v3294_v30 = vcombine.high %v719_v1, %v719_v1  ;;  %v13421_v23 = vrot.slane %v13375_v36, %v12809_v43  ;;  %v3301_v40 = vrot.slane %v719_v1, %v12754_v12 }
 0x12b   :  { %v13417_v8 = vpop.f32.mrb[38].mxu0  ;;  %v475_v47 = vadd.f32 %v12805_v35, %v13053_v31  ;;  %v13431_v6 = vrot.slane %v3311_v14, %v12754_v12  ;;  %v966_v41 = vcombine.high %v722_v2, %v722_v2  ;;  %v13435_v59 = vrot.slane %v722_v2, %v12754_v12 }
 0x12c   :  { %19829 = vst [vmem:[#allocation88_spill] sm:$0xff] %v13421_v23  ;;  %v13428_v54 = vpop.f32.mrb[39].mxu0  ;;  %v3308_v48 = vrot.slane %v3294_v30, %v12754_v12  ;;  %v13438_v23 = vsel %vm1697_vm5, %v1956_v56, %v2326_v37  ;;  %v13442_v1 = vcombine.high %v13415_v61, %v13415_v61  ;;  %v13446_v31 = vrot.slane %v13415_v61, %v12809_v43 }
 0x12d   :  { %19830 = vst [vmem:[#allocation89_spill] sm:$0xff] %v13431_v6  ;;  %v3309_v20 = vcombine.high %v3301_v40, %v3301_v40  ;;  %v3817_v2 = vrot.slane %v3301_v40, %v12809_v43  ;;  %v4628_v49 = vrot.slane %v3301_v40, %v12767_v17  ;;  %v13466_v14 = vcombine.high %v13431_v6, %v13431_v6 }
 0x12e   :  { %19831 = vst [vmem:[#allocation90_spill] sm:$0xff] %v13442_v1  ;;  %19832 = vst [vmem:[#allocation91_spill] sm:$0xff] %v13446_v31  ;;  %v13450_v30 = vcombine.high %v3308_v48, %v3308_v48  ;;  %v13454_v13 = vrot.slane %v3308_v48, %v12809_v43  ;;  %v4636_v31 = vrot.slane %v3308_v48, %v12767_v17 }
 0x12f   :  { %v13456_v56 = vpop.f32.mrb[40].mxu0  ;;  %v3821_v37 = vrot.slane %v3309_v20, %v12809_v43  ;;  %v4632_v9 = vrot.slane %v3309_v20, %v12767_v17  ;;  %19835 = vst [vmem:[#allocation94_spill] sm:$0xff] %v13466_v14  ;;  %v13471_v15 = vrot.slane %v966_v41, %v12754_v12  ;;  %v13475_v50 = vcombine.high %v13435_v59, %v13435_v59 }
 0x130   :  { %19833 = vst [vmem:[#allocation92_spill] sm:$0xff] %v13450_v30  ;;  %19834 = vst [vmem:[#allocation93_spill] sm:$0xff] %v13454_v13  ;;  %v13462_v51 = vpop.f32.mrb[41].mxu0  ;;  %v13479_v20 = vrot.slane %v13442_v1, %v12809_v43  ;;  %v13487_v61 = vrot.slane %v13450_v30, %v12809_v43  ;;  %v490_v6 = vadd.f32 %v13074_v29, %v12805_v35 }
 0x131   :  { %v5037_v48 = vsel %vm2297_vm4, %v4632_v9, %v4628_v49  ;;  %v5411_v14 = vsel %vm2297_vm4, %v3821_v37, %v3817_v2  ;;  %v13490_v41 = vsel %vm1697_vm5, %v3821_v37, %v3817_v2  ;;  %v13505_v49 = vcombine.high %v13471_v15, %v13471_v15 }
 0x132   :  { %19836 = vst [vmem:[#allocation95_spill] sm:$0xff] %v13479_v20  ;;  %19837 = vst [vmem:[#allocation96_spill] sm:$0xff] %v13487_v61  ;;  %v13496_v20 = vsel %vm1697_vm5, %v13454_v13, %v5411_v14  ;;  %v13501_v9 = vsel %vm1697_vm5, %v4636_v31, %v5037_v48  ;;  %v13509_v2 = vrot.slane %v13435_v59, %v12809_v43  ;;  %v721_v37 = vmax.f32 %v475_v47, 0.0 }
 0x133   :  { %19838 = vst [vmem:[#allocation97_spill] sm:$0xff] %v13490_v41  ;;  %19839 = vst [vmem:[#allocation98_spill] sm:$0xff] %v13496_v20  ;;  %v13498_v57 = vpop.f32.mrb[42].mxu0  ;;  %v13515_v14 = vrot.slane %v13475_v50, %v12809_v43  ;;  %v19844_v31 = vrot.slane %v13209_v63, %v12767_v17  ;;  %v485_v20 = vadd.f32 %v12805_v35, %v13087_v11  ;;  %v724_v11 = vmax.f32 %v490_v6, 0.0 }
 0x134   :  { %19840 = vst [vmem:[#allocation99_spill] sm:$0xff] %v13501_v9  ;;  %19841 = vst [vmem:[#allocation100_spill] sm:$0xff] %v13505_v49  ;;  %v13511_v40 = vpop.f32.mrb[43].mxu0  ;;  %v949_v1 = vcombine.high %v721_v37, %v721_v37  ;;  %v956_v30 = vrot.slane %v721_v37, %v12754_v12  ;;  %v19845_v9 = vrot.slane %v13112_v25, %v12767_v17 }
 0x135   :  { %19842 = vst [vmem:[#allocation101_spill] sm:$0xff] %v13509_v2  ;;  %19843 = vst [vmem:[#allocation102_spill] sm:$0xff] %v13515_v14  ;;  %v2321_v48 = vsel %vm1699_vm6, %v19844_v31, %v13261_v21  ;;  %v1944_v63 = vrot.slane %v13156_v46, %v12767_v17  ;;  %v19846_v29 = vrot.slane %v13138_v7, %v12767_v17  ;;  %v723_v31 = vmax.f32 %v485_v20, 0.0 }
 0x136   :  { %v2322_v61 = vsel %vm1701_vm7, %v19845_v9, %v2321_v48  ;;  %v963_v47 = vrot.slane %v949_v1, %v12754_v12  ;;  %v964_v37 = vcombine.high %v956_v30, %v956_v30  ;;  %v1420_v41 = vrot.slane %v956_v30, %v12809_v43 }
 0x137   :  { %v2323_v21 = vsel %vm1703_vm8, %v19846_v29, %v2322_v61  ;;  %v13539_v13 = vpop.f32.mrb[44].mxu0  ;;  %v500_v25 = vadd.f32 %v13114_v53, %v12805_v35  ;;  %v1980_v48 = vrot.slane %v956_v30, %v12767_v17  ;;  %v19847_v7 = vrot.slane %v13127_v60, %v12767_v17 }
 0x138   :  { %v13545_v9 = vpop.f32.mrb[45].mxu0  ;;  %v3345_v6 = vcombine.high %v724_v11, %v724_v11  ;;  %v13553_v20 = vrot.slane %v724_v11, %v12754_v12  ;;  %v13555_v1 = vcombine.high %v963_v47, %v963_v47  ;;  %v1424_v29 = vrot.slane %v964_v37, %v12809_v43 }
 0x139   :  { %v2324_v61 = vsel %vm1705_vm9, %v19847_v7, %v2323_v21  ;;  %v13559_v46 = vrot.slane %v963_v47, %v12809_v43  ;;  %v1984_v53 = vrot.slane %v964_v37, %v12767_v17  ;;  %v1988_v30 = vrot.slane %v963_v47, %v12767_v17 }
 0x13a   :  { %19848 = vst [vmem:[#allocation103_spill] sm:$0xff] %v13553_v20  ;;  %v13564_v14 = vsel %vm1707_vm10, %v1944_v63, %v2324_v61  ;;  %v13567_v21 = vrot.slane %v3345_v6, %v12754_v12  ;;  %v3328_v7 = vcombine.high %v723_v31, %v723_v31  ;;  %v13574_v60 = vsel %vm1697_vm5, %v1424_v29, %v1420_v41 }
 0x13b   :  { %19849 = vst [vmem:[#allocation104_spill] sm:$0xff] %v13559_v46  ;;  %19850 = vst [vmem:[#allocation105_spill] sm:$0xff] %v13564_v14  ;;  %v13569_v11 = vpop.f32.mrb[46].mxu0  ;;  %v2333_v38 = vsel %vm2297_vm4, %v1984_v53, %v1980_v48  ;;  %10955 = vmatmul.mubr.msk.f32.gmra.mrb[2].mxu1 %vm2403_vm11, %v13564_v14  ;;  %v13581_v47 = vcombine.high %v13553_v20, %v13553_v20  ;;  %v13589_v61 = vrot.slane %v13555_v1, %v12809_v43 }
 0x13c   :  { %19851 = vst [vmem:[#allocation106_spill] sm:$0xff] %v13567_v21  ;;  %19852 = vst [vmem:[#allocation107_spill] sm:$0xff] %v13574_v60  ;;  %v13583_v63 = vpop.f32.mrb[47].mxu0  ;;  %v2865_v6 = vsel %vm2297_vm4, %v1424_v29, %v1420_v41  ;;  %v495_v48 = vadd.f32 %v12805_v35, %v13124_v58  ;;  %v13597_v2 = vsel %vm1697_vm5, %v1988_v30, %v2333_v38  ;;  %v726_v53 = vmax.f32 %v500_v25, 0.0 }
 0x13d   :  { %19853 = vst [vmem:[#allocation108_spill] sm:$0xff] %v13581_v47  ;;  %19854 = vst [vmem:[#allocation109_spill] sm:$0xff] %v13589_v61  ;;  %v13601_v14 = vsel %vm1697_vm5, %v13559_v46, %v2865_v6  ;;  %v13605_v37 = vcombine.high %v13567_v21, %v13567_v21  ;;  %v13609_v41 = vrot.slane %v13553_v20, %v12809_v43 }
 0x13e   :  { %19855 = vst [vmem:[#allocation110_spill] sm:$0xff] %v13601_v14  ;;  %v3335_v58 = vrot.slane %v723_v31, %v12754_v12  ;;  %v3342_v29 = vrot.slane %v3328_v7, %v12754_v12  ;;  %v13617_v38 = vrot.slane %v13581_v47, %v12809_v43  ;;  %v725_v25 = vmax.f32 %v495_v48, 0.0 }
 0x13f   :  { %19856 = vst [vmem:[#allocation111_spill] sm:$0xff] %v13605_v37  ;;  %19857 = vst [vmem:[#allocation112_spill] sm:$0xff] %v13609_v41  ;;  %v13613_v61 = vpop.f32.mrb[48].mxu0  ;;  %v1976_v14 = vrot.slane %v13315_v0, %v12767_v17  ;;  %v1000_v30 = vcombine.high %v726_v53, %v726_v53  ;;  %v13636_v6 = vrot.slane %v726_v53, %v12754_v12 }
 0x140   :  { %19858 = vst [vmem:[#allocation113_spill] sm:$0xff] %v13617_v38  ;;  %v13625_v41 = vpop.f32.mrb[49].mxu0  ;;  %v3343_v31 = vcombine.high %v3335_v58, %v3335_v58  ;;  %v13627_v7 = vcombine.high %v3342_v29, %v3342_v29  ;;  %v3845_v38 = vrot.slane %v3335_v58, %v12809_v43  ;;  %v13633_v46 = vrot.slane %v3342_v29, %v12809_v43 }
 0x141   :  { %v4660_v47 = vrot.slane %v3335_v58, %v12767_v17  ;;  %v4668_v48 = vrot.slane %v3342_v29, %v12767_v17  ;;  %v13649_v60 = vrot.slane %v1000_v30, %v12754_v12  ;;  %v19862_v53 = vrot.slane %v13375_v36, %v12767_v17 }
 0x142   :  { %19859 = vst [vmem:[#allocation114_spill] sm:$0xff] %v13627_v7  ;;  %19860 = vst [vmem:[#allocation115_spill] sm:$0xff] %v13633_v46  ;;  %v3849_v37 = vrot.slane %v3343_v31, %v12809_v43  ;;  %v4664_v20 = vrot.slane %v3343_v31, %v12767_v17  ;;  %v13646_v0 = vrot.slane %v13627_v7, %v12809_v43 }
 0x143   :  { %v13642_v21 = vpop.f32.mrb[50].mxu0  ;;  %v2328_v19 = vsel %vm1699_vm6, %v19862_v53, %v13438_v23  ;;  %v510_v58 = vadd.f32 %v13150_v39, %v12805_v35  ;;  %v983_v30 = vcombine.high %v725_v25, %v725_v25  ;;  %v13674_v39 = vrot.slane %v13636_v6, %v12809_v43 }
 0x144   :  { %19861 = vst [vmem:[#allocation116_spill] sm:$0xff] %v13646_v0  ;;  %v13658_v31 = vpop.f32.mrb[51].mxu0  ;;  %v5044_v29 = vsel %vm2297_vm4, %v4664_v20, %v4660_v47  ;;  %v5418_v52 = vsel %vm2297_vm4, %v3849_v37, %v3845_v38  ;;  %v13664_v0 = vcombine.high %v13636_v6, %v13636_v6  ;;  %v13679_v20 = vsel %vm1697_vm5, %v3849_v37, %v3845_v38 }
 0x145   :  { %v13670_v36 = vsel %vm1697_vm5, %v13633_v46, %v5418_v52  ;;  %19864 = vst [vmem:[#allocation118_spill] sm:$0xff] %v13674_v39  ;;  %19865 = vst [vmem:[#allocation119_spill] sm:$0xff] %v13679_v20  ;;  %v13682_v47 = vsel %vm1697_vm5, %v4668_v48, %v5044_v29  ;;  %v990_v53 = vrot.slane %v725_v25, %v12754_v12  ;;  %v728_v37 = vmax.f32 %v510_v58, 0.0 }
 0x146   :  { %19863 = vst [vmem:[#allocation117_spill] sm:$0xff] %v13670_v36  ;;  %19866 = vst [vmem:[#allocation120_spill] sm:$0xff] %v13682_v47  ;;  %v997_v18 = vrot.slane %v983_v30, %v12754_v12  ;;  %v13690_v52 = vcombine.high %v13649_v60, %v13649_v60  ;;  %v19869_v36 = vrot.slane %v13282_v24, %v12767_v17 }
 0x147   :  { %v13686_v7 = vpop.f32.mrb[52].mxu0  ;;  %v505_v38 = vadd.f32 %v12805_v35, %v13162_v4  ;;  %v13702_v25 = vrot.slane %v13664_v0, %v12809_v43  ;;  %v998_v29 = vcombine.high %v990_v53, %v990_v53  ;;  %v520_v47 = vadd.f32 %v13190_v32, %v12805_v35 }
 0x148   :  { %19867 = vst [vmem:[#allocation121_spill] sm:$0xff] %v13686_v7  ;;  %19868 = vst [vmem:[#allocation122_spill] sm:$0xff] %v13690_v52  ;;  %v2329_v23 = vsel %vm1701_vm7, %v19869_v36, %v2328_v19  ;;  %v13698_v48 = vpop.f32.mrb[53].mxu0  ;;  %v13704_v30 = vcombine.high %v997_v18, %v997_v18  ;;  %v1448_v24 = vrot.slane %v990_v53, %v12809_v43 }
 0x149   :  { %19870 = vst [vmem:[#allocation123_spill] sm:$0xff] %v13698_v48  ;;  %19871 = vst [vmem:[#allocation124_spill] sm:$0xff] %v13702_v25  ;;  %v13710_v19 = vrot.slane %v997_v18, %v12809_v43  ;;  %v19873_v4 = vrot.slane %v13300_v28, %v12767_v17  ;;  %v3379_v36 = vcombine.high %v728_v37, %v728_v37 }
 0x14a   :  { %v1452_v46 = vrot.slane %v998_v29, %v12809_v43  ;;  %v2012_v20 = vrot.slane %v990_v53, %v12767_v17  ;;  %v2016_v25 = vrot.slane %v998_v29, %v12767_v17  ;;  %v2020_v39 = vrot.slane %v997_v18, %v12767_v17 }
 0x14b   :  { %19872 = vst [vmem:[#allocation125_spill] sm:$0xff] %v13710_v19  ;;  %v2330_v58 = vsel %vm1703_vm8, %v19873_v4, %v2329_v23  ;;  %v13720_v32 = vpop.f32.mrb[54].mxu0  ;;  %v19874_v16 = vrot.slane %v13291_v44, %v12767_v17  ;;  %v13727_v28 = vrot.slane %v728_v37, %v12754_v12  ;;  %v13730_v23 = vrot.slane %v3379_v36, %v12754_v12 }
 0x14c   :  { %v727_v4 = vmax.f32 %v505_v38, 0.0  ;;  %v13732_v7 = vpop.f32.mrb[55].mxu0  ;;  %v13735_v53 = vsel %vm1697_vm5, %v1452_v46, %v1448_v24  ;;  %v2340_v18 = vsel %vm2297_vm4, %v2016_v25, %v2012_v20  ;;  %v2872_v29 = vsel %vm2297_vm4, %v1452_v46, %v1448_v24 }
 0x14d   :  { %v2331_v48 = vsel %vm1705_vm9, %v19874_v16, %v2330_v58  ;;  %19875 = vst [vmem:[#allocation126_spill] sm:$0xff] %v13727_v28  ;;  %19876 = vst [vmem:[#allocation127_spill] sm:$0xff] %v13730_v23  ;;  %v13748_v38 = vrot.slane %v13704_v30, %v12809_v43  ;;  %v13752_v58 = vsel %vm1697_vm5, %v13710_v19, %v2872_v29  ;;  %v730_v29 = vmax.f32 %v520_v47, 0.0 }
 0x14e   :  { %19877 = vst [vmem:[#allocation128_spill] sm:$0xff] %v13735_v53  ;;  %v13740_v44 = vsel %vm1707_vm10, %v1976_v14, %v2331_v48  ;;  %19880 = vst [vmem:[#allocation131_spill] sm:$0xff] %v13752_v58  ;;  %v13759_v14 = vsel %vm1697_vm5, %v2020_v39, %v2340_v18  ;;  %v13763_v20 = vcombine.high %v13727_v28, %v13727_v28 }
 0x14f   :  { %19878 = vst [vmem:[#allocation129_spill] sm:$0xff] %v13740_v44  ;;  %19879 = vst [vmem:[#allocation130_spill] sm:$0xff] %v13748_v38  ;;  %10957 = vmatprep.mubr.msk.f32.mxu1 %vm2403_vm11, %v13740_v44  ;;  %v3362_v48 = vcombine.high %v727_v4, %v727_v4  ;;  %v13767_v25 = vcombine.high %v13730_v23, %v13730_v23  ;;  %v13771_v24 = vrot.slane %v13727_v28, %v12809_v43 }
 0x150   :  { %19881 = vst [vmem:[#allocation132_spill] sm:$0xff] %v13763_v20  ;;  %v3369_v36 = vrot.slane %v727_v4, %v12754_v12  ;;  %v515_v16 = vadd.f32 %v12805_v35, %v13201_v42  ;;  %v13790_v18 = vrot.slane %v730_v29, %v12754_v12 }
 0x151   :  { %19882 = vst [vmem:[#allocation133_spill] sm:$0xff] %v13767_v25  ;;  %19883 = vst [vmem:[#allocation134_spill] sm:$0xff] %v13771_v24  ;;  %v3376_v37 = vrot.slane %v3362_v48, %v12754_v12  ;;  %v1034_v24 = vcombine.high %v730_v29, %v730_v29  ;;  %v2008_v29 = vrot.slane %v13505_v49, %v12767_v17 }
 0x152   :  { %v3377_v46 = vcombine.high %v3369_v36, %v3369_v36  ;;  %v3873_v44 = vrot.slane %v3369_v36, %v12809_v43  ;;  %v4692_v25 = vrot.slane %v3369_v36, %v12767_v17  ;;  %v729_v39 = vmax.f32 %v515_v16, 0.0 }
 0x153   :  { %v13783_v58 = vcombine.high %v3376_v37, %v3376_v37  ;;  %v13786_v47 = vrot.slane %v3376_v37, %v12809_v43  ;;  %v4700_v4 = vrot.slane %v3376_v37, %v12767_v17  ;;  %v13795_v42 = vrot.slane %v1034_v24, %v12754_v12 }
 0x154   :  { %v3877_v48 = vrot.slane %v3377_v46, %v12809_v43  ;;  %v4696_v35 = vrot.slane %v3377_v46, %v12767_v17  ;;  %v13799_v36 = vrot.slane %v13763_v20, %v12809_v43  ;;  %v13805_v37 = vcombine.high %v13790_v18, %v13790_v18 }
 0x155   :  { %19884 = vst [vmem:[#allocation135_spill] sm:$0xff] %v13783_v58  ;;  %19885 = vst [vmem:[#allocation136_spill] sm:$0xff] %v13786_v47  ;;  %v13811_v46 = vrot.slane %v13783_v58, %v12809_v43 }
 0x156   :  { %19886 = vst [vmem:[#allocation137_spill] sm:$0xff] %v13799_v36  ;;  %v5051_v16 = vsel %vm2297_vm4, %v4696_v35, %v4692_v25  ;;  %v5425_v24 = vsel %vm2297_vm4, %v3877_v48, %v3873_v44  ;;  %v19888_v36 = vrot.slane %v13555_v1, %v12767_v17  ;;  %v13821_v20 = vsel %vm1697_vm5, %v3877_v48, %v3873_v44  ;;  %v13841_v48 = vpop.f32.mrb[56].mxu0 }
 0x157   :  { %19887 = vst [vmem:[#allocation138_spill] sm:$0xff] %v13811_v46  ;;  %19889 = vst [vmem:[#allocation139_spill] sm:$0xff] %v13821_v20  ;;  %v13827_v49 = vsel %vm1697_vm5, %v13786_v47, %v5425_v24  ;;  %v13831_v25 = vrot.slane %v13790_v18, %v12809_v43  ;;  %v13834_v35 = vsel %vm1697_vm5, %v4700_v4, %v5051_v16  ;;  %v13854_v4 = vld [vmem:[%s19358_s2] ss:$0 sm:$0xff] }
 0x158   :  { %v2335_v28 = vsel %vm1699_vm6, %v19888_v36, %v13597_v2  ;;  %19890 = vst [vmem:[#allocation140_spill] sm:$0xff] %v13827_v49  ;;  %19892 = vst [vmem:[#allocation142_spill] sm:$0xff] %v13834_v35  ;;  %v13838_v2 = vcombine.high %v13795_v42, %v13795_v42  ;;  %v1017_v44 = vcombine.high %v729_v39, %v729_v39 }
 0x159   :  { %19891 = vst [vmem:[#allocation141_spill] sm:$0xff] %v13831_v25  ;;  %v1024_v1 = vrot.slane %v729_v39, %v12754_v12  ;;  %v13845_v36 = vrot.slane %v13805_v37, %v12809_v43  ;;  %v19895_v24 = vrot.slane %v13435_v59, %v12767_v17  ;;  %v530_v16 = vadd.f32 %v13854_v4, %v13225_v55 }
 0x15a   :  { %19893 = vst [vmem:[#allocation143_spill] sm:$0xff] %v13838_v2  ;;  %v525_v39 = vadd.f32 %v13854_v4, %v13232_v45  ;;  %v1031_v49 = vrot.slane %v1017_v44, %v12754_v12  ;;  %v540_v59 = vadd.f32 %v13854_v4, %v13263_v27  ;;  %v19896_v46 = vrot.slane %v13475_v50, %v12767_v17 }
 0x15b   :  { %19894 = vst [vmem:[#allocation144_spill] sm:$0xff] %v13845_v36  ;;  %v2336_v23 = vsel %vm1701_vm7, %v19895_v24, %v2335_v28  ;;  %v1032_v58 = vcombine.high %v1024_v1, %v1024_v1  ;;  %v1476_v35 = vrot.slane %v1024_v1, %v12809_v43  ;;  %v13864_v28 = vpop.f32.mrb[57].mxu0  ;;  %v2044_v24 = vrot.slane %v1024_v1, %v12767_v17 }
 0x15c   :  { %v2337_v55 = vsel %vm1703_vm8, %v19896_v46, %v2336_v23  ;;  %v732_v47 = vmax.f32 %v530_v16, 0.0  ;;  %v731_v20 = vmax.f32 %v525_v39, 0.0  ;;  %v13871_v45 = vcombine.high %v1031_v49, %v1031_v49  ;;  %v13886_v46 = vpop.f32.mrb[58].mxu0 }
 0x15d   :  { %v1480_v44 = vrot.slane %v1032_v58, %v12809_v43  ;;  %v13875_v36 = vrot.slane %v1031_v49, %v12809_v43  ;;  %v2048_v27 = vrot.slane %v1032_v58, %v12767_v17  ;;  %v2052_v25 = vrot.slane %v1031_v49, %v12767_v17  ;;  %v13894_v19 = vpop.f32.mrb[59].mxu0 }
 0x15e   :  { %v19897_v1 = vrot.slane %v13471_v15, %v12767_v17  ;;  %v3413_v38 = vcombine.high %v732_v47, %v732_v47  ;;  %v13884_v23 = vrot.slane %v732_v47, %v12754_v12  ;;  %v734_v49 = vmax.f32 %v540_v59, 0.0 }
 0x15f   :  { %v13891_v39 = vsel %vm1697_vm5, %v1480_v44, %v1476_v35  ;;  %v2347_v58 = vsel %vm2297_vm4, %v2048_v27, %v2044_v24  ;;  %v13909_v24 = vrot.slane %v13871_v45, %v12809_v43  ;;  %v3403_v27 = vrot.slane %v731_v20, %v12754_v12 }
 0x160   :  { %v2338_v50 = vsel %vm1705_vm9, %v19897_v1, %v2337_v55  ;;  %19898 = vst [vmem:[#allocation145_spill] sm:$0xff] %v13884_v23  ;;  %v2879_v1 = vsel %vm2297_vm4, %v1480_v44, %v1476_v35  ;;  %v13903_v53 = vrot.slane %v3413_v38, %v12754_v12  ;;  %v13924_v35 = vsel %vm1697_vm5, %v2052_v25, %v2347_v58 }
 0x161   :  { %v13900_v47 = vsel %vm1707_vm10, %v2008_v29, %v2338_v50  ;;  %19901 = vst [vmem:[#allocation148_spill] sm:$0xff] %v13909_v24  ;;  %v13913_v59 = vsel %vm1697_vm5, %v13875_v36, %v2879_v1  ;;  %v13919_v29 = vcombine.high %v13884_v23, %v13884_v23  ;;  %v3396_v44 = vcombine.high %v731_v20, %v731_v20 }
 0x162   :  { %19899 = vst [vmem:[#allocation146_spill] sm:$0xff] %v13900_v47  ;;  %19900 = vst [vmem:[#allocation147_spill] sm:$0xff] %v13903_v53  ;;  %10958 = vmatmul.mubr.msk.f32.gmra.mrb[4].mxu1 %vm2403_vm11, %v13900_v47  ;;  %v13929_v50 = vrot.slane %v13884_v23, %v12809_v43  ;;  %v5709_v16 = vcombine.high %v734_v49, %v734_v49  ;;  %v13934_v55 = vrot.slane %v734_v49, %v12754_v12 }
 0x163   :  { %19902 = vst [vmem:[#allocation149_spill] sm:$0xff] %v13913_v59  ;;  %19903 = vst [vmem:[#allocation150_spill] sm:$0xff] %v13919_v29  ;;  %v13938_v38 = vcombine.high %v13903_v53, %v13903_v53  ;;  %v3410_v20 = vrot.slane %v3396_v44, %v12754_v12  ;;  %v3411_v58 = vcombine.high %v3403_v27, %v3403_v27 }
 0x164   :  { %19904 = vst [vmem:[#allocation151_spill] sm:$0xff] %v13929_v50  ;;  %19905 = vst [vmem:[#allocation152_spill] sm:$0xff] %v13934_v55  ;;  %v13945_v47 = vrot.slane %v13919_v29, %v12809_v43  ;;  %v13950_v49 = vrot.slane %v5709_v16, %v12754_v12  ;;  %v13954_v23 = vcombine.high %v13934_v55, %v13934_v55 }
 0x165   :  { %19906 = vst [vmem:[#allocation153_spill] sm:$0xff] %v13938_v38  ;;  %v13956_v38 = vcombine.high %v3410_v20, %v3410_v20  ;;  %v3905_v25 = vrot.slane %v3411_v58, %v12809_v43  ;;  %v13960_v44 = vrot.slane %v3410_v20, %v12809_v43  ;;  %v4728_v50 = vrot.slane %v3411_v58, %v12767_v17 }
 0x166   :  { %19907 = vst [vmem:[#allocation154_spill] sm:$0xff] %v13945_v47  ;;  %19908 = vst [vmem:[#allocation155_spill] sm:$0xff] %v13950_v49  ;;  %v3901_v47 = vrot.slane %v3403_v27, %v12809_v43  ;;  %v4724_v1 = vrot.slane %v3403_v27, %v12767_v17  ;;  %v13967_v16 = vrot.slane %v13934_v55, %v12809_v43 }
 0x167   :  { %19909 = vst [vmem:[#allocation156_spill] sm:$0xff] %v13954_v23  ;;  %19910 = vst [vmem:[#allocation157_spill] sm:$0xff] %v13956_v38  ;;  %v4732_v53 = vrot.slane %v3410_v20, %v12767_v17  ;;  %v13974_v59 = vcombine.high %v13950_v49, %v13950_v49  ;;  %v13978_v58 = vrot.slane %v13954_v23, %v12809_v43 }
 0x168   :  { %19911 = vst [vmem:[#allocation158_spill] sm:$0xff] %v13960_v44  ;;  %19912 = vst [vmem:[#allocation159_spill] sm:$0xff] %v13967_v16  ;;  %v13984_v24 = vrot.slane %v13956_v38, %v12809_v43  ;;  %v13987_v16 = vsel %vm1697_vm5, %v3905_v25, %v3901_v47  ;;  %v5432_v20 = vsel %vm2297_vm4, %v3905_v25, %v3901_v47 }
 0x169   :  { %19913 = vst [vmem:[#allocation160_spill] sm:$0xff] %v13974_v59  ;;  %19914 = vst [vmem:[#allocation161_spill] sm:$0xff] %v13978_v58  ;;  %v535_v29 = vadd.f32 %v13854_v4, %v13274_v10  ;;  %v5058_v59 = vsel %vm2297_vm4, %v4728_v50, %v4724_v1  ;;  %v13995_v55 = vsel %vm1697_vm5, %v13960_v44, %v5432_v20 }
 0x16a   :  { %19915 = vst [vmem:[#allocation162_spill] sm:$0xff] %v13984_v24  ;;  %19916 = vst [vmem:[#allocation163_spill] sm:$0xff] %v13987_v16  ;;  %v19918_v27 = vrot.slane %v13704_v30, %v12767_v17  ;;  %v550_v58 = vadd.f32 %v13854_v4, %v13302_v3  ;;  %v2040_v10 = vrot.slane %v13690_v52, %v12767_v17 }
 0x16b   :  { %19917 = vst [vmem:[#allocation164_spill] sm:$0xff] %v13995_v55  ;;  %v733_v25 = vmax.f32 %v535_v29, 0.0  ;;  %v19919_v50 = vrot.slane %v13636_v6, %v12767_v17  ;;  %v19920_v30 = vrot.slane %v13664_v0, %v12767_v17  ;;  %v545_v3 = vadd.f32 %v13854_v4, %v13309_v26 }
 0x16c   :  { %v2342_v23 = vsel %vm1699_vm6, %v19918_v27, %v13759_v14  ;;  %v736_v27 = vmax.f32 %v550_v58, 0.0  ;;  %v560_v29 = vadd.f32 %v13854_v4, %v13339_v33  ;;  %v14021_v20 = vsel %vm1697_vm5, %v4732_v53, %v5058_v59 }
 0x16d   :  { %v2343_v1 = vsel %vm1701_vm7, %v19919_v50, %v2342_v23  ;;  %19921 = vst [vmem:[#allocation165_spill] sm:$0xff] %v14021_v20  ;;  %v5692_v47 = vcombine.high %v733_v25, %v733_v25  ;;  %v14024_v6 = vrot.slane %v733_v25, %v12754_v12  ;;  %v19923_v23 = vrot.slane %v13649_v60, %v12767_v17 }
 0x16e   :  { %v2344_v14 = vsel %vm1703_vm8, %v19920_v30, %v2343_v1  ;;  %v3447_v50 = vcombine.high %v736_v27, %v736_v27  ;;  %v14036_v33 = vrot.slane %v736_v27, %v12754_v12  ;;  %v555_v25 = vadd.f32 %v13854_v4, %v13352_v22 }
 0x16f   :  { %19922 = vst [vmem:[#allocation166_spill] sm:$0xff] %v14024_v6  ;;  %v2345_v0 = vsel %vm1705_vm9, %v19923_v23, %v2344_v14  ;;  %v14039_v53 = vrot.slane %v5692_v47, %v12754_v12  ;;  %v14043_v59 = vcombine.high %v14024_v6, %v14024_v6  ;;  %v735_v30 = vmax.f32 %v545_v3, 0.0 }
 0x170   :  { %v14033_v26 = vsel %vm1707_vm10, %v2040_v10, %v2345_v0  ;;  %19925 = vst [vmem:[#allocation168_spill] sm:$0xff] %v14036_v33  ;;  %v14052_v1 = vrot.slane %v3447_v50, %v12754_v12  ;;  %v14056_v47 = vcombine.high %v14036_v33, %v14036_v33  ;;  %v738_v14 = vmax.f32 %v560_v29, 0.0 }
 0x171   :  { %19924 = vst [vmem:[#allocation167_spill] sm:$0xff] %v14033_v26  ;;  %19926 = vst [vmem:[#allocation169_spill] sm:$0xff] %v14039_v53  ;;  %10960 = vmatprep.mubr.msk.f32.mxu1 %vm2403_vm11, %v14033_v26  ;;  %v14060_v27 = vcombine.high %v14039_v53, %v14039_v53  ;;  %v14064_v23 = vrot.slane %v14024_v6, %v12809_v43  ;;  %v14068_v22 = vrot.slane %v14043_v59, %v12809_v43 }
 0x172   :  { %19927 = vst [vmem:[#allocation170_spill] sm:$0xff] %v14043_v59  ;;  %19928 = vst [vmem:[#allocation171_spill] sm:$0xff] %v14052_v1  ;;  %v14072_v0 = vrot.slane %v14039_v53, %v12809_v43  ;;  %v14080_v50 = vrot.slane %v14036_v33, %v12809_v43  ;;  %v14088_v26 = vcombine.high %v14052_v1, %v14052_v1 }
 0x173   :  { %19929 = vst [vmem:[#allocation172_spill] sm:$0xff] %v14056_v47  ;;  %19930 = vst [vmem:[#allocation173_spill] sm:$0xff] %v14060_v27  ;;  %v14092_v3 = vrot.slane %v14056_v47, %v12809_v43  ;;  %v14098_v49 = vrot.slane %v14060_v27, %v12809_v43  ;;  %v6265_v58 = vsel %vm2297_vm4, %v14068_v22, %v14064_v23  ;;  %v737_v27 = vmax.f32 %v555_v25, 0.0 }
 0x174   :  { %19931 = vst [vmem:[#allocation174_spill] sm:$0xff] %v14064_v23  ;;  %19932 = vst [vmem:[#allocation175_spill] sm:$0xff] %v14068_v22  ;;  %v3430_v53 = vcombine.high %v735_v30, %v735_v30  ;;  %v14107_v59 = vsel %vm1697_vm5, %v14072_v0, %v6265_v58  ;;  %v3437_v6 = vrot.slane %v735_v30, %v12754_v12 }
 0x175   :  { %19933 = vst [vmem:[#allocation176_spill] sm:$0xff] %v14072_v0  ;;  %19934 = vst [vmem:[#allocation177_spill] sm:$0xff] %v14080_v50  ;;  %v1068_v55 = vcombine.high %v738_v14, %v738_v14  ;;  %v14111_v29 = vrot.slane %v738_v14, %v12754_v12  ;;  %v19939_v22 = vrot.slane %v13871_v45, %v12767_v17 }
 0x176   :  { %19935 = vst [vmem:[#allocation178_spill] sm:$0xff] %v14088_v26  ;;  %19936 = vst [vmem:[#allocation179_spill] sm:$0xff] %v14092_v3  ;;  %v570_v23 = vadd.f32 %v13854_v4, %v13385_v62  ;;  %v3445_v58 = vcombine.high %v3437_v6, %v3437_v6  ;;  %v4756_v30 = vrot.slane %v3437_v6, %v12767_v17 }
 0x177   :  { %19937 = vst [vmem:[#allocation180_spill] sm:$0xff] %v14098_v49  ;;  %19938 = vst [vmem:[#allocation181_spill] sm:$0xff] %v14107_v59  ;;  %v3444_v49 = vrot.slane %v3430_v53, %v12754_v12  ;;  %v2349_v10 = vsel %vm1699_vm6, %v19939_v22, %v13924_v35  ;;  %v3929_v59 = vrot.slane %v3437_v6, %v12809_v43 }
 0x178   :  { %v14124_v14 = vrot.slane %v1068_v55, %v12754_v12  ;;  %v14134_v35 = vcombine.high %v14111_v29, %v14111_v29  ;;  %v3933_v62 = vrot.slane %v3445_v58, %v12809_v43  ;;  %v4760_v25 = vrot.slane %v3445_v58, %v12767_v17 }
 0x179   :  { %v14126_v0 = vcombine.high %v3444_v49, %v3444_v49  ;;  %v14129_v53 = vrot.slane %v3444_v49, %v12809_v43  ;;  %v4764_v45 = vrot.slane %v3444_v49, %v12767_v17  ;;  %v14144_v55 = vrot.slane %v14111_v29, %v12809_v43 }
 0x17a   :  { %v14140_v6 = vcombine.high %v14124_v14, %v14124_v14  ;;  %v14154_v47 = vrot.slane %v14134_v35, %v12809_v43  ;;  %v14159_v33 = vsel %vm1697_vm5, %v3933_v62, %v3929_v59  ;;  %v5065_v26 = vsel %vm2297_vm4, %v4760_v25, %v4756_v30 }
 0x17b   :  { %19940 = vst [vmem:[#allocation182_spill] sm:$0xff] %v14126_v0  ;;  %19941 = vst [vmem:[#allocation183_spill] sm:$0xff] %v14129_v53  ;;  %v14148_v22 = vrot.slane %v14126_v0, %v12809_v43  ;;  %v5439_v38 = vsel %vm2297_vm4, %v3933_v62, %v3929_v59  ;;  %v14166_v3 = vsel %vm1697_vm5, %v4764_v45, %v5065_v26  ;;  %v740_v62 = vmax.f32 %v570_v23, 0.0 }
 0x17c   :  { %19942 = vst [vmem:[#allocation184_spill] sm:$0xff] %v14140_v6  ;;  %19944 = vst [vmem:[#allocation186_spill] sm:$0xff] %v14159_v33  ;;  %v14170_v49 = vsel %vm1697_vm5, %v14129_v53, %v5439_v38  ;;  %v1051_v0 = vcombine.high %v737_v27, %v737_v27  ;;  %v1058_v50 = vrot.slane %v737_v27, %v12754_v12 }
 0x17d   :  { %19943 = vst [vmem:[#allocation185_spill] sm:$0xff] %v14148_v22  ;;  %19945 = vst [vmem:[#allocation187_spill] sm:$0xff] %v14166_v3  ;;  %v19947_v30 = vrot.slane %v13790_v18, %v12767_v17  ;;  %v565_v26 = vadd.f32 %v13854_v4, %v13396_v5  ;;  %v19948_v38 = vrot.slane %v13805_v37, %v12767_v17 }
 0x17e   :  { %19946 = vst [vmem:[#allocation188_spill] sm:$0xff] %v14170_v49  ;;  %v1065_v45 = vrot.slane %v1051_v0, %v12754_v12  ;;  %v580_v58 = vadd.f32 %v13854_v4, %v13417_v8  ;;  %v575_v27 = vadd.f32 %v13854_v4, %v13428_v54  ;;  %v1066_v18 = vcombine.high %v1058_v50, %v1058_v50 }
 0x17f   :  { %v2350_v59 = vsel %vm1701_vm7, %v19947_v30, %v2349_v10  ;;  %v1504_v10 = vrot.slane %v1058_v50, %v12809_v43  ;;  %v2076_v23 = vrot.slane %v1058_v50, %v12767_v17  ;;  %v19949_v5 = vrot.slane %v13795_v42, %v12767_v17 }
 0x180   :  { %v2351_v25 = vsel %vm1703_vm8, %v19948_v38, %v2350_v59  ;;  %v14196_v30 = vcombine.high %v1065_v45, %v1065_v45  ;;  %v14199_v37 = vrot.slane %v1065_v45, %v12809_v43  ;;  %v2084_v8 = vrot.slane %v1065_v45, %v12767_v17 }
 0x181   :  { %v2352_v0 = vsel %vm1705_vm9, %v19949_v5, %v2351_v25  ;;  %v19950_v54 = vrot.slane %v13838_v2, %v12767_v17  ;;  %v1508_v50 = vrot.slane %v1066_v18, %v12809_v43  ;;  %v2080_v38 = vrot.slane %v1066_v18, %v12767_v17 }
 0x182   :  { %v3481_v25 = vcombine.high %v740_v62, %v740_v62  ;;  %v14213_v5 = vrot.slane %v740_v62, %v12754_v12  ;;  %v14217_v45 = vrot.slane %v14196_v30, %v12809_v43  ;;  %v2088_v20 = vrot.slane %v14196_v30, %v12767_v17 }
 0x183   :  { %v14206_v59 = vsel %vm1707_vm10, %v19950_v54, %v2352_v0  ;;  %v739_v0 = vmax.f32 %v565_v26, 0.0  ;;  %v742_v54 = vmax.f32 %v580_v58, 0.0  ;;  %v14224_v18 = vsel %vm1697_vm5, %v1508_v50, %v1504_v10 }
 0x184   :  { %19951 = vst [vmem:[#allocation189_spill] sm:$0xff] %v14206_v59  ;;  %10961 = vmatmul.mubr.msk.f32.gmra.mrb[6].mxu1 %vm2403_vm11, %v14206_v59  ;;  %19952 = vst [vmem:[#allocation190_spill] sm:$0xff] %v14213_v5  ;;  %v2354_v59 = vsel %vm2297_vm4, %v2080_v38, %v2076_v23  ;;  %v2886_v62 = vsel %vm2297_vm4, %v1508_v50, %v1504_v10  ;;  %v14229_v49 = vrot.slane %v3481_v25, %v12754_v12 }
 0x185   :  { %10963 = vmatprep.mubr.msk.f32.mxu1 %vm2403_vm11, %v12798_v34  ;;  %v2355_v3 = vsel %vm1697_vm5, %v2084_v8, %v2354_v59  ;;  %v14234_v30 = vsel %vm1697_vm5, %v14199_v37, %v2886_v62  ;;  %v14238_v58 = vcombine.high %v14213_v5, %v14213_v5  ;;  %v14242_v34 = vrot.slane %v14213_v5, %v12809_v43 }
 0x186   :  { %19953 = vst [vmem:[#allocation191_spill] sm:$0xff] %v14229_v49  ;;  %19954 = vst [vmem:[#allocation192_spill] sm:$0xff] %v14234_v30  ;;  %v14246_v26 = vcombine.high %v14229_v49, %v14229_v49  ;;  %v3464_v8 = vcombine.high %v739_v0, %v739_v0  ;;  %v3471_v38 = vrot.slane %v739_v0, %v12754_v12  ;;  %v741_v10 = vmax.f32 %v575_v27, 0.0 }
 0x187   :  { %19955 = vst [vmem:[#allocation193_spill] sm:$0xff] %v14238_v58  ;;  %19956 = vst [vmem:[#allocation194_spill] sm:$0xff] %v14242_v34  ;;  %v14254_v59 = vrot.slane %v14238_v58, %v12809_v43  ;;  %v1102_v25 = vcombine.high %v742_v54, %v742_v54  ;;  %v590_v23 = vadd.f32 %v13854_v4, %v13456_v56 }
 0x188   :  { %19957 = vst [vmem:[#allocation195_spill] sm:$0xff] %v14246_v26  ;;  %v3478_v62 = vrot.slane %v3464_v8, %v12754_v12  ;;  %v14261_v26 = vrot.slane %v742_v54, %v12754_v12  ;;  %v3479_v5 = vcombine.high %v3471_v38, %v3471_v38  ;;  %v3957_v34 = vrot.slane %v3471_v38, %v12809_v43 }
 0x189   :  { %19958 = vst [vmem:[#allocation196_spill] sm:$0xff] %v14254_v59  ;;  %v4788_v59 = vrot.slane %v3471_v38, %v12767_v17  ;;  %v14268_v49 = vrot.slane %v1102_v25, %v12754_v12  ;;  %v744_v44 = vmax.f32 %v590_v23, 0.0 }
 0x18a   :  { %v14270_v50 = vcombine.high %v3478_v62, %v3478_v62  ;;  %v14273_v0 = vrot.slane %v3478_v62, %v12809_v43  ;;  %v4796_v54 = vrot.slane %v3478_v62, %v12767_v17  ;;  %v14278_v27 = vcombine.high %v14261_v26, %v14261_v26 }
 0x18b   :  { %v3961_v56 = vrot.slane %v3479_v5, %v12809_v43  ;;  %v4792_v8 = vrot.slane %v3479_v5, %v12767_v17  ;;  %v14284_v38 = vcombine.high %v14268_v49, %v14268_v49  ;;  %v14288_v25 = vrot.slane %v14261_v26, %v12809_v43 }
 0x18c   :  { %19959 = vst [vmem:[#allocation197_spill] sm:$0xff] %v14270_v50  ;;  %19960 = vst [vmem:[#allocation198_spill] sm:$0xff] %v14273_v0  ;;  %v14292_v58 = vrot.slane %v14270_v50, %v12809_v43  ;;  %v14298_v22 = vrot.slane %v14278_v27, %v12809_v43  ;;  %v1085_v50 = vcombine.high %v741_v10, %v741_v10 }
 0x18d   :  { %19961 = vst [vmem:[#allocation199_spill] sm:$0xff] %v14284_v38  ;;  %v14303_v53 = vsel %vm1697_vm5, %v3961_v56, %v3957_v34  ;;  %v5072_v33 = vsel %vm2297_vm4, %v4792_v8, %v4788_v59  ;;  %v5446_v1 = vsel %vm2297_vm4, %v3961_v56, %v3957_v34  ;;  %v585_v34 = vadd.f32 %v13854_v4, %v13462_v51 }
 0x18e   :  { %19962 = vst [vmem:[#allocation200_spill] sm:$0xff] %v14292_v58  ;;  %19963 = vst [vmem:[#allocation201_spill] sm:$0xff] %v14303_v53  ;;  %v14310_v24 = vsel %vm1697_vm5, %v4796_v54, %v5072_v33  ;;  %v14314_v62 = vsel %vm1697_vm5, %v14273_v0, %v5446_v1  ;;  %v1092_v53 = vrot.slane %v741_v10, %v12754_v12 }
 0x18f   :  { %19964 = vst [vmem:[#allocation202_spill] sm:$0xff] %v14310_v24  ;;  %19965 = vst [vmem:[#allocation203_spill] sm:$0xff] %v14314_v62  ;;  %v600_v59 = vadd.f32 %v13854_v4, %v13498_v57  ;;  %v1099_v33 = vrot.slane %v1085_v50, %v12754_v12  ;;  %v595_v54 = vadd.f32 %v13854_v4, %v13511_v40  ;;  %v743_v1 = vmax.f32 %v585_v34, 0.0 }
 0x190   :  { %v2356_v56 = vsel %vm1699_vm6, %v2088_v20, %v2355_v3  ;;  %v1100_v8 = vcombine.high %v1092_v53, %v1092_v53  ;;  %v1532_v10 = vrot.slane %v1092_v53, %v12809_v43  ;;  %v2108_v23 = vrot.slane %v1092_v53, %v12767_v17 }
 0x191   :  { %v3515_v5 = vcombine.high %v744_v44, %v744_v44  ;;  %v14331_v51 = vcombine.high %v1099_v33, %v1099_v33  ;;  %v14334_v57 = vrot.slane %v1099_v33, %v12809_v43  ;;  %v2116_v50 = vrot.slane %v1099_v33, %v12767_v17 }
 0x192   :  { %v14338_v40 = vrot.slane %v744_v44, %v12754_v12  ;;  %v1536_v58 = vrot.slane %v1100_v8, %v12809_v43  ;;  %v2112_v20 = vrot.slane %v1100_v8, %v12767_v17 }
 0x193   :  { %v14343_v3 = vrot.slane %v3515_v5, %v12754_v12  ;;  %v14347_v53 = vrot.slane %v14331_v51, %v12809_v43 }
 0x194   :  { %19966 = vst [vmem:[#allocation204_spill] sm:$0xff] %v14338_v40  ;;  %v14353_v33 = vcombine.high %v14338_v40, %v14338_v40  ;;  %v14357_v44 = vrot.slane %v14338_v40, %v12809_v43  ;;  %v14360_v8 = vsel %vm1697_vm5, %v1536_v58, %v1532_v10  ;;  %v2361_v5 = vsel %vm2297_vm4, %v2112_v20, %v2108_v23 }
 0x195   :  { %19967 = vst [vmem:[#allocation205_spill] sm:$0xff] %v14343_v3  ;;  %v2893_v34 = vsel %vm2297_vm4, %v1536_v58, %v1532_v10  ;;  %v14366_v24 = vcombine.high %v14343_v3, %v14343_v3  ;;  %v14369_v62 = vsel %vm1697_vm5, %v2116_v50, %v2361_v5  ;;  %v3498_v20 = vcombine.high %v743_v1, %v743_v1 }
 0x196   :  { %19968 = vst [vmem:[#allocation206_spill] sm:$0xff] %v14353_v33  ;;  %19969 = vst [vmem:[#allocation207_spill] sm:$0xff] %v14357_v44  ;;  %v14373_v0 = vsel %vm1697_vm5, %v14334_v57, %v2893_v34  ;;  %v14377_v44 = vrot.slane %v14353_v33, %v12809_v43  ;;  %v3505_v50 = vrot.slane %v743_v1, %v12754_v12  ;;  %v746_v5 = vmax.f32 %v600_v59, 0.0 }
 0x197   :  { %19970 = vst [vmem:[#allocation208_spill] sm:$0xff] %v14366_v24  ;;  %19971 = vst [vmem:[#allocation209_spill] sm:$0xff] %v14373_v0  ;;  %v745_v24 = vmax.f32 %v595_v54, 0.0  ;;  %v19973_v34 = vrot.slane %v14111_v29, %v12767_v17  ;;  %v3512_v23 = vrot.slane %v3498_v20, %v12754_v12 }
 0x198   :  { %19972 = vst [vmem:[#allocation210_spill] sm:$0xff] %v14377_v44  ;;  %v610_v44 = vadd.f32 %v13854_v4, %v13539_v13  ;;  %v3513_v40 = vcombine.high %v3505_v50, %v3505_v50  ;;  %v3985_v58 = vrot.slane %v3505_v50, %v12809_v43  ;;  %v4820_v10 = vrot.slane %v3505_v50, %v12767_v17 }
 0x199   :  { %v2357_v16 = vsel %vm1701_vm7, %v19973_v34, %v2356_v56  ;;  %v1136_v33 = vcombine.high %v746_v5, %v746_v5  ;;  %v14396_v1 = vrot.slane %v746_v5, %v12754_v12  ;;  %v1119_v59 = vcombine.high %v745_v24, %v745_v24 }
 0x19a   :  { %v1126_v54 = vrot.slane %v745_v24, %v12754_v12  ;;  %v14399_v29 = vcombine.high %v3512_v23, %v3512_v23  ;;  %v3989_v56 = vrot.slane %v3513_v40, %v12809_v43  ;;  %v14403_v13 = vrot.slane %v3512_v23, %v12809_v43 }
 0x19b   :  { %v4824_v20 = vrot.slane %v3513_v40, %v12767_v17  ;;  %v4828_v34 = vrot.slane %v3512_v23, %v12767_v17  ;;  %v14408_v50 = vrot.slane %v1136_v33, %v12754_v12  ;;  %v14412_v5 = vcombine.high %v14396_v1, %v14396_v1 }
 0x19c   :  { %19974 = vst [vmem:[#allocation211_spill] sm:$0xff] %v14399_v29  ;;  %19975 = vst [vmem:[#allocation212_spill] sm:$0xff] %v14403_v13  ;;  %v14416_v24 = vrot.slane %v14396_v1, %v12809_v43  ;;  %v14420_v3 = vrot.slane %v14399_v29, %v12809_v43  ;;  %v14423_v0 = vsel %vm1697_vm5, %v3989_v56, %v3985_v58  ;;  %v748_v29 = vmax.f32 %v610_v44, 0.0 }
 0x19d   :  { %19978 = vst [vmem:[#allocation215_spill] sm:$0xff] %v14423_v0  ;;  %v5079_v33 = vsel %vm2297_vm4, %v4824_v20, %v4820_v10  ;;  %v5453_v30 = vsel %vm2297_vm4, %v3989_v56, %v3985_v58  ;;  %v14434_v2 = vcombine.high %v14408_v50, %v14408_v50  ;;  %v1133_v56 = vrot.slane %v1119_v59, %v12754_v12 }
 0x19e   :  { %19976 = vst [vmem:[#allocation213_spill] sm:$0xff] %v14416_v24  ;;  %19977 = vst [vmem:[#allocation214_spill] sm:$0xff] %v14420_v3  ;;  %v14429_v23 = vsel %vm1697_vm5, %v4828_v34, %v5079_v33  ;;  %v14438_v3 = vrot.slane %v14412_v5, %v12809_v43  ;;  %v14442_v0 = vsel %vm1697_vm5, %v14403_v13, %v5453_v30 }
 0x19f   :  { %19979 = vst [vmem:[#allocation216_spill] sm:$0xff] %v14429_v23  ;;  %19980 = vst [vmem:[#allocation217_spill] sm:$0xff] %v14434_v2  ;;  %v1134_v34 = vcombine.high %v1126_v54, %v1126_v54  ;;  %v1560_v33 = vrot.slane %v1126_v54, %v12809_v43  ;;  %v2140_v40 = vrot.slane %v1126_v54, %v12767_v17 }
 0x1a0   :  { %19981 = vst [vmem:[#allocation218_spill] sm:$0xff] %v14438_v3  ;;  %19982 = vst [vmem:[#allocation219_spill] sm:$0xff] %v14442_v0  ;;  %v19983_v30 = vrot.slane %v14134_v35, %v12767_v17  ;;  %v605_v10 = vadd.f32 %v13854_v4, %v13545_v9  ;;  %v620_v20 = vadd.f32 %v13854_v4, %v13569_v11 }
 0x1a1   :  { %v14461_v58 = vcombine.high %v1133_v56, %v1133_v56  ;;  %v1564_v59 = vrot.slane %v1134_v34, %v12809_v43  ;;  %v14465_v23 = vrot.slane %v1133_v56, %v12809_v43  ;;  %v2144_v54 = vrot.slane %v1134_v34, %v12767_v17 }
 0x1a2   :  { %v2358_v0 = vsel %vm1703_vm8, %v19983_v30, %v2357_v16  ;;  %v2148_v35 = vrot.slane %v1133_v56, %v12767_v17  ;;  %v19984_v16 = vrot.slane %v14124_v14, %v12767_v17  ;;  %v3549_v9 = vcombine.high %v748_v29, %v748_v29 }
 0x1a3   :  { %v14474_v30 = vrot.slane %v748_v29, %v12754_v12  ;;  %v14478_v11 = vrot.slane %v14461_v58, %v12809_v43  ;;  %v14481_v13 = vsel %vm1697_vm5, %v1564_v59, %v1560_v33  ;;  %v2368_v56 = vsel %vm2297_vm4, %v2144_v54, %v2140_v40 }
 0x1a4   :  { %v2359_v44 = vsel %vm1705_vm9, %v19984_v16, %v2358_v0  ;;  %v14487_v52 = vsel %vm1697_vm5, %v2148_v35, %v2368_v56  ;;  %v2900_v0 = vsel %vm2297_vm4, %v1564_v59, %v1560_v33  ;;  %v19986_v29 = vrot.slane %v14140_v6, %v12767_v17 }
 0x1a5   :  { %19985 = vst [vmem:[#allocation220_spill] sm:$0xff] %v14474_v30  ;;  %v14497_v3 = vrot.slane %v3549_v9, %v12754_v12  ;;  %v14501_v24 = vsel %vm1697_vm5, %v14465_v23, %v2900_v0  ;;  %v14507_v40 = vcombine.high %v14474_v30, %v14474_v30  ;;  %v14511_v33 = vrot.slane %v14474_v30, %v12809_v43 }
 0x1a6   :  { %v14494_v16 = vsel %vm1707_vm10, %v19986_v29, %v2359_v44  ;;  %19989 = vst [vmem:[#allocation223_spill] sm:$0xff] %v14501_v24  ;;  %v747_v44 = vmax.f32 %v605_v10, 0.0  ;;  %v750_v9 = vmax.f32 %v620_v20, 0.0  ;;  %v615_v29 = vadd.f32 %v13854_v4, %v13583_v63 }
 0x1a7   :  { %19987 = vst [vmem:[#allocation221_spill] sm:$0xff] %v14494_v16  ;;  %19988 = vst [vmem:[#allocation222_spill] sm:$0xff] %v14497_v3  ;;  %10964 = vmatmul.mubr.msk.f32.gmra.mrb[8].mxu1 %vm2403_vm11, %v14494_v16  ;;  %v14517_v54 = vcombine.high %v14497_v3, %v14497_v3  ;;  %v14523_v56 = vrot.slane %v14507_v40, %v12809_v43  ;;  %v2136_v59 = vrot.slane %v14284_v38, %v12767_v17 }
 0x1a8   :  { %19990 = vst [vmem:[#allocation224_spill] sm:$0xff] %v14507_v40  ;;  %19991 = vst [vmem:[#allocation225_spill] sm:$0xff] %v14511_v33  ;;  %v3532_v34 = vcombine.high %v747_v44, %v747_v44  ;;  %v3539_v16 = vrot.slane %v747_v44, %v12754_v12  ;;  %v1170_v30 = vcombine.high %v750_v9, %v750_v9  ;;  %v749_v20 = vmax.f32 %v615_v29, 0.0 }
 0x1a9   :  { %19992 = vst [vmem:[#allocation226_spill] sm:$0xff] %v14517_v54  ;;  %19993 = vst [vmem:[#allocation227_spill] sm:$0xff] %v14523_v56  ;;  %v14533_v10 = vrot.slane %v750_v9, %v12754_v12  ;;  %v19994_v35 = vrot.slane %v14331_v51, %v12767_v17  ;;  %v630_v63 = vadd.f32 %v13854_v4, %v13613_v61 }
 0x1aa   :  { %v625_v40 = vadd.f32 %v13854_v4, %v13625_v41  ;;  %v3546_v54 = vrot.slane %v3532_v34, %v12754_v12  ;;  %v3547_v44 = vcombine.high %v3539_v16, %v3539_v16  ;;  %v4013_v56 = vrot.slane %v3539_v16, %v12809_v43 }
 0x1ab   :  { %v2363_v0 = vsel %vm1699_vm6, %v19994_v35, %v14369_v62  ;;  %v4852_v9 = vrot.slane %v3539_v16, %v12767_v17  ;;  %v14548_v29 = vrot.slane %v1170_v30, %v12754_v12  ;;  %v14552_v51 = vcombine.high %v14533_v10, %v14533_v10 }
 0x1ac   :  { %v14556_v61 = vrot.slane %v14533_v10, %v12809_v43  ;;  %v14560_v62 = vcombine.high %v3546_v54, %v3546_v54  ;;  %v4017_v34 = vrot.slane %v3547_v44, %v12809_v43  ;;  %v14564_v16 = vrot.slane %v3546_v54, %v12809_v43 }
 0x1ad   :  { %v4856_v30 = vrot.slane %v3547_v44, %v12767_v17  ;;  %v4860_v35 = vrot.slane %v3546_v54, %v12767_v17  ;;  %v14570_v33 = vcombine.high %v14548_v29, %v14548_v29  ;;  %v14574_v3 = vrot.slane %v14552_v51, %v12809_v43 }
 0x1ae   :  { %19995 = vst [vmem:[#allocation228_spill] sm:$0xff] %v14556_v61  ;;  %19996 = vst [vmem:[#allocation229_spill] sm:$0xff] %v14560_v62  ;;  %v14580_v24 = vrot.slane %v14560_v62, %v12809_v43  ;;  %v14583_v38 = vsel %vm1697_vm5, %v4017_v34, %v4013_v56  ;;  %v1153_v61 = vcombine.high %v749_v20, %v749_v20 }
 0x1af   :  { %19997 = vst [vmem:[#allocation230_spill] sm:$0xff] %v14564_v16  ;;  %19998 = vst [vmem:[#allocation231_spill] sm:$0xff] %v14570_v33  ;;  %v5086_v44 = vsel %vm2297_vm4, %v4856_v30, %v4852_v9  ;;  %v20004_v54 = vrot.slane %v14261_v26, %v12767_v17  ;;  %v752_v30 = vmax.f32 %v630_v63, 0.0  ;;  %v20006_v26 = vrot.slane %v14268_v49, %v12767_v17 }
 0x1b0   :  { %19999 = vst [vmem:[#allocation232_spill] sm:$0xff] %v14574_v3  ;;  %20000 = vst [vmem:[#allocation233_spill] sm:$0xff] %v14580_v24  ;;  %v14589_v6 = vsel %vm1697_vm5, %v4860_v35, %v5086_v44  ;;  %v5460_v3 = vsel %vm2297_vm4, %v4017_v34, %v4013_v56  ;;  %v1167_v35 = vrot.slane %v1153_v61, %v12754_v12  ;;  %v751_v44 = vmax.f32 %v625_v40, 0.0 }
 0x1b1   :  { %20001 = vst [vmem:[#allocation234_spill] sm:$0xff] %v14583_v38  ;;  %20002 = vst [vmem:[#allocation235_spill] sm:$0xff] %v14589_v6  ;;  %v14596_v24 = vsel %vm1697_vm5, %v14564_v16, %v5460_v3  ;;  %v1160_v38 = vrot.slane %v749_v20, %v12754_v12  ;;  %v2364_v9 = vsel %vm1701_vm7, %v20004_v54, %v2363_v0 }
 0x1b2   :  { %20003 = vst [vmem:[#allocation236_spill] sm:$0xff] %v14596_v24  ;;  %v20005_v56 = vrot.slane %v14278_v27, %v12767_v17  ;;  %v640_v3 = vadd.f32 %v13854_v4, %v13642_v21  ;;  %v14616_v63 = vcombine.high %v1167_v35, %v1167_v35  ;;  %v14619_v27 = vrot.slane %v1167_v35, %v12809_v43 }
 0x1b3   :  { %v1168_v41 = vcombine.high %v1160_v38, %v1160_v38  ;;  %v1588_v20 = vrot.slane %v1160_v38, %v12809_v43  ;;  %v2172_v24 = vrot.slane %v1160_v38, %v12767_v17  ;;  %v2180_v40 = vrot.slane %v1167_v35, %v12767_v17 }
 0x1b4   :  { %v2365_v34 = vsel %vm1703_vm8, %v20005_v56, %v2364_v9  ;;  %v3583_v38 = vcombine.high %v752_v30, %v752_v30  ;;  %v14630_v9 = vrot.slane %v752_v30, %v12754_v12  ;;  %v14634_v56 = vrot.slane %v14616_v63, %v12809_v43 }
 0x1b5   :  { %v2366_v0 = vsel %vm1705_vm9, %v20006_v26, %v2365_v34  ;;  %v1592_v21 = vrot.slane %v1168_v41, %v12809_v43  ;;  %v2176_v54 = vrot.slane %v1168_v41, %v12767_v17  ;;  %v3573_v34 = vrot.slane %v751_v44, %v12754_v12 }
 0x1b6   :  { %v14623_v61 = vsel %vm1707_vm10, %v2136_v59, %v2366_v0  ;;  %20008 = vst [vmem:[#allocation238_spill] sm:$0xff] %v14630_v9  ;;  %v3566_v59 = vcombine.high %v751_v44, %v751_v44  ;;  %v14645_v30 = vrot.slane %v3583_v38, %v12754_v12  ;;  %v14658_v44 = vcombine.high %v14630_v9, %v14630_v9 }
 0x1b7   :  { %20007 = vst [vmem:[#allocation237_spill] sm:$0xff] %v14623_v61  ;;  %10966 = vmatprep.mubr.msk.f32.mxu1 %vm2403_vm11, %v14623_v61  ;;  %v14640_v26 = vsel %vm1697_vm5, %v1592_v21, %v1588_v20  ;;  %v2375_v41 = vsel %vm2297_vm4, %v2176_v54, %v2172_v24  ;;  %v2907_v0 = vsel %vm2297_vm4, %v1592_v21, %v1588_v20  ;;  %v14647_v61 = vpop.f32.mrb[60].mxu0 }
 0x1b8   :  { %20009 = vst [vmem:[#allocation239_spill] sm:$0xff] %v14645_v30  ;;  %20010 = vst [vmem:[#allocation240_spill] sm:$0xff] %v14647_v61  ;;  %v14650_v62 = vsel %vm1697_vm5, %v2180_v40, %v2375_v41  ;;  %v14654_v35 = vsel %vm1697_vm5, %v14619_v27, %v2907_v0  ;;  %v14662_v24 = vrot.slane %v14630_v9, %v12809_v43  ;;  %v14664_v20 = vpop.f32.mrb[61].mxu0 }
 0x1b9   :  { %20011 = vst [vmem:[#allocation241_spill] sm:$0xff] %v14654_v35  ;;  %20012 = vst [vmem:[#allocation242_spill] sm:$0xff] %v14658_v44  ;;  %v14668_v21 = vcombine.high %v14645_v30, %v14645_v30  ;;  %v3580_v38 = vrot.slane %v3566_v59, %v12754_v12  ;;  %v14677_v41 = vrot.slane %v14658_v44, %v12809_v43 }
 0x1ba   :  { %20013 = vst [vmem:[#allocation243_spill] sm:$0xff] %v14662_v24  ;;  %20014 = vst [vmem:[#allocation244_spill] sm:$0xff] %v14664_v20  ;;  %v3581_v6 = vcombine.high %v3573_v34, %v3573_v34  ;;  %v4041_v24 = vrot.slane %v3573_v34, %v12809_v43  ;;  %v4884_v40 = vrot.slane %v3573_v34, %v12767_v17 }
 0x1bb   :  { %20015 = vst [vmem:[#allocation245_spill] sm:$0xff] %v14668_v21  ;;  %20016 = vst [vmem:[#allocation246_spill] sm:$0xff] %v14677_v41  ;;  %v14682_v16 = vcombine.high %v3580_v38, %v3580_v38  ;;  %v14685_v21 = vrot.slane %v3580_v38, %v12809_v43  ;;  %v4892_v54 = vrot.slane %v3580_v38, %v12767_v17  ;;  %v754_v41 = vmax.f32 %v640_v3, 0.0 }
 0x1bc   :  { %v4045_v59 = vrot.slane %v3581_v6, %v12809_v43  ;;  %v4888_v9 = vrot.slane %v3581_v6, %v12767_v17  ;;  %v635_v0 = vadd.f32 %v13854_v4, %v13658_v31  ;;  %v2168_v34 = vrot.slane %v14434_v2, %v12767_v17 }
 0x1bd   :  { %20017 = vst [vmem:[#allocation247_spill] sm:$0xff] %v14682_v16  ;;  %20018 = vst [vmem:[#allocation248_spill] sm:$0xff] %v14685_v21  ;;  %v14695_v44 = vrot.slane %v14682_v16, %v12809_v43  ;;  %v20020_v38 = vrot.slane %v14461_v58, %v12767_v17  ;;  %v14719_v16 = vrot.slane %v754_v41, %v12754_v12 }
 0x1be   :  { %v14707_v3 = vsel %vm1697_vm5, %v4045_v59, %v4041_v24  ;;  %v5093_v31 = vsel %vm2297_vm4, %v4888_v9, %v4884_v40  ;;  %v5467_v20 = vsel %vm2297_vm4, %v4045_v59, %v4041_v24  ;;  %v753_v58 = vmax.f32 %v635_v0, 0.0  ;;  %v20025_v40 = vld [vmem:[#allocation121_spill] sm:$0xff]  ;;  %v20026_v59 = vld [vmem:[#allocation123_spill] sm:$0xff] }
 0x1bf   :  { %20019 = vst [vmem:[#allocation249_spill] sm:$0xff] %v14695_v44  ;;  %v2370_v6 = vsel %vm1699_vm6, %v20020_v38, %v14487_v52  ;;  %20021 = vst [vmem:[#allocation250_spill] sm:$0xff] %v14707_v3  ;;  %v1204_v44 = vcombine.high %v754_v41, %v754_v41  ;;  %v14712_v61 = vsel %vm1697_vm5, %v4892_v54, %v5093_v31 }
 0x1c0   :  { %20022 = vst [vmem:[#allocation251_spill] sm:$0xff] %v14712_v61  ;;  %v14716_v30 = vsel %vm1697_vm5, %v14685_v21, %v5467_v20  ;;  %v20024_v9 = vrot.slane %v14396_v1, %v12767_v17  ;;  %v650_v54 = vadd.f32 %v13854_v4, %v20025_v40  ;;  %v645_v38 = vadd.f32 %v13854_v4, %v20026_v59 }
 0x1c1   :  { %20023 = vst [vmem:[#allocation252_spill] sm:$0xff] %v14716_v30  ;;  %v14722_v52 = vrot.slane %v1204_v44, %v12754_v12  ;;  %v14734_v20 = vcombine.high %v14719_v16, %v14719_v16  ;;  %v14738_v41 = vrot.slane %v14719_v16, %v12809_v43  ;;  %v1187_v1 = vcombine.high %v753_v58, %v753_v58 }
 0x1c2   :  { %v2371_v24 = vsel %vm1701_vm7, %v20024_v9, %v2370_v6  ;;  %v1194_v31 = vrot.slane %v753_v58, %v12754_v12  ;;  %v20029_v9 = vrot.slane %v14412_v5, %v12767_v17  ;;  %v20031_v61 = vrot.slane %v14408_v50, %v12767_v17  ;;  %v1824_v5 = vld [vmem:[%s19357_s3] sm:$0xff]  ;;  %v1825_v58 = vld [vmem:[%s19357_s3 + $0x8] sm:$0xff] }
 0x1c3   :  { %20027 = vst [vmem:[#allocation121_spill] sm:$0xff] %v14738_v41  ;;  %v14744_v0 = vcombine.high %v14722_v52, %v14722_v52  ;;  %v14755_v59 = vrot.slane %v14734_v20, %v12809_v43  ;;  %v1201_v30 = vrot.slane %v1187_v1, %v12754_v12  ;;  %v756_v3 = vmax.f32 %v650_v54, 0.0 }
 0x1c4   :  { %v2372_v40 = vsel %vm1703_vm8, %v20029_v9, %v2371_v24  ;;  %v1202_v24 = vcombine.high %v1194_v31, %v1194_v31  ;;  %v1616_v9 = vrot.slane %v1194_v31, %v12809_v43  ;;  %v2204_v44 = vrot.slane %v1194_v31, %v12767_v17 }
 0x1c5   :  { %20028 = vst [vmem:[#allocation123_spill] sm:$0xff] %v14744_v0  ;;  %20030 = vst [vmem:[#allocation253_spill] sm:$0xff] %v14755_v59  ;;  %v2373_v6 = vsel %vm1705_vm9, %v20031_v61, %v2372_v40  ;;  %v14775_v21 = vcombine.high %v1201_v30, %v1201_v30  ;;  %v14778_v61 = vrot.slane %v1201_v30, %v12809_v43  ;;  %v755_v59 = vmax.f32 %v645_v38, 0.0 }
 0x1c6   :  { %v14773_v1 = vsel %vm1707_vm10, %v2168_v34, %v2373_v6  ;;  %v2212_v40 = vrot.slane %v1201_v30, %v12767_v17  ;;  %v1620_v35 = vrot.slane %v1202_v24, %v12809_v43  ;;  %v2208_v2 = vrot.slane %v1202_v24, %v12767_v17 }
 0x1c7   :  { %20032 = vst [vmem:[#allocation254_spill] sm:$0xff] %v14773_v1  ;;  %10967 = vmatmul.mubr.msk.f32.gmra.mrb[10].mxu1 %vm2403_vm11, %v14773_v1  ;;  %v11601_v31 = vpack.c.bf16 %v1825_v58, %v1824_v5  ;;  %v14787_v34 = vrot.slane %v14775_v21, %v12809_v43  ;;  %v3617_v41 = vcombine.high %v756_v3, %v756_v3 }
 0x1c8   :  { %v14792_v30 = vrot.slane %v756_v3, %v12754_v12  ;;  %v14795_v1 = vsel %vm1697_vm5, %v1620_v35, %v1616_v9  ;;  %v2382_v54 = vsel %vm2297_vm4, %v2208_v2, %v2204_v44  ;;  %v2914_v24 = vsel %vm2297_vm4, %v1620_v35, %v1616_v9 }
 0x1c9   :  { %20033 = vst [vmem:[#allocation255_spill] sm:$0xff] %v14787_v34  ;;  %v3600_v38 = vcombine.high %v755_v59, %v755_v59  ;;  %11602 = vmatprep.subr.bf16.mxu1 %v11601_v31  ;;  %v14800_v5 = vsel %vm1697_vm5, %v2212_v40, %v2382_v54  ;;  %v14804_v58 = vsel %vm1697_vm5, %v14778_v61, %v2914_v24 }
 0x1ca   :  { %20034 = vst [vmem:[#allocation256_spill] sm:$0xff] %v14792_v30  ;;  %20035 = vst [vmem:[#allocation257_spill] sm:$0xff] %v14804_v58  ;;  %v14807_v6 = vrot.slane %v3617_v41, %v12754_v12  ;;  %v14811_v3 = vcombine.high %v14792_v30, %v14792_v30  ;;  %11604 = vmatpush3.bf16.msra.mxu1 %v11601_v31  ;;  %v14815_v2 = vrot.slane %v14792_v30, %v12809_v43 }
 0x1cb   :  { %v3607_v44 = vrot.slane %v755_v59, %v12754_v12  ;;  %v3614_v9 = vrot.slane %v3600_v38, %v12754_v12  ;;  %v655_v31 = vadd.f32 %v13854_v4, %v13732_v7  ;;  %v20044_v7 = vrot.slane %v14616_v63, %v12767_v17 }
 0x1cc   :  { %20036 = vst [vmem:[#allocation258_spill] sm:$0xff] %v14807_v6  ;;  %20037 = vst [vmem:[#allocation259_spill] sm:$0xff] %v14811_v3  ;;  %v14823_v41 = vcombine.high %v14807_v6, %v14807_v6  ;;  %v14827_v40 = vrot.slane %v14811_v3, %v12809_v43 }
 0x1cd   :  { %20038 = vst [vmem:[#allocation260_spill] sm:$0xff] %v14815_v2  ;;  %v3615_v24 = vcombine.high %v3607_v44, %v3607_v44  ;;  %v14833_v35 = vcombine.high %v3614_v9, %v3614_v9  ;;  %v4069_v59 = vrot.slane %v3607_v44, %v12809_v43  ;;  %v14837_v38 = vrot.slane %v3614_v9, %v12809_v43 }
 0x1ce   :  { %20039 = vst [vmem:[#allocation261_spill] sm:$0xff] %v14823_v41  ;;  %20040 = vst [vmem:[#allocation262_spill] sm:$0xff] %v14827_v40  ;;  %v4916_v41 = vrot.slane %v3607_v44, %v12767_v17  ;;  %v4924_v30 = vrot.slane %v3614_v9, %v12767_v17  ;;  %v660_v40 = vadd.f32 %v13854_v4, %v13720_v32  ;;  %v757_v58 = vmax.f32 %v655_v31, 0.0 }
 0x1cf   :  { %20041 = vst [vmem:[#allocation263_spill] sm:$0xff] %v14833_v35  ;;  %20042 = vst [vmem:[#allocation264_spill] sm:$0xff] %v14837_v38  ;;  %v4073_v54 = vrot.slane %v3615_v24, %v12809_v43  ;;  %v14848_v3 = vrot.slane %v14833_v35, %v12809_v43  ;;  %v4920_v2 = vrot.slane %v3615_v24, %v12767_v17 }
 0x1d0   :  { %v758_v44 = vmax.f32 %v660_v40, 0.0  ;;  %v2200_v9 = vrot.slane %v14570_v33, %v12767_v17  ;;  %v2377_v32 = vsel %vm1699_vm6, %v20044_v7, %v14650_v62  ;;  %v20046_v40 = vrot.slane %v14533_v10, %v12767_v17 }
 0x1d1   :  { %20043 = vst [vmem:[#allocation265_spill] sm:$0xff] %v14848_v3  ;;  %v14861_v34 = vsel %vm1697_vm5, %v4073_v54, %v4069_v59  ;;  %v5100_v3 = vsel %vm2297_vm4, %v4920_v2, %v4916_v41  ;;  %v5474_v24 = vsel %vm2297_vm4, %v4073_v54, %v4069_v59  ;;  %v1221_v35 = vcombine.high %v757_v58, %v757_v58 }
 0x1d2   :  { %20045 = vst [vmem:[#allocation266_spill] sm:$0xff] %v14861_v34  ;;  %v2378_v31 = vsel %vm1701_vm7, %v20046_v40, %v2377_v32  ;;  %v14870_v6 = vsel %vm1697_vm5, %v4924_v30, %v5100_v3  ;;  %v14874_v63 = vsel %vm1697_vm5, %v14837_v38, %v5474_v24  ;;  %v1238_v62 = vcombine.high %v758_v44, %v758_v44 }
 0x1d3   :  { %20047 = vst [vmem:[#allocation267_spill] sm:$0xff] %v14870_v6  ;;  %20048 = vst [vmem:[#allocation268_spill] sm:$0xff] %v14874_v63  ;;  %v14877_v7 = vrot.slane %v758_v44, %v12754_v12  ;;  %v1228_v2 = vrot.slane %v757_v58, %v12754_v12  ;;  %v20049_v41 = vrot.slane %v14552_v51, %v12767_v17 }
 0x1d4   :  { %v670_v30 = vadd.f32 %v13854_v4, %v13841_v48  ;;  %v14887_v3 = vrot.slane %v1238_v62, %v12754_v12  ;;  %v1235_v51 = vrot.slane %v1221_v35, %v12754_v12  ;;  %v20053_v63 = vrot.slane %v14548_v29, %v12767_v17 }
 0x1d5   :  { %v2379_v10 = vsel %vm1703_vm8, %v20049_v41, %v2378_v31  ;;  %v14891_v54 = vcombine.high %v14877_v7, %v14877_v7  ;;  %v14895_v59 = vrot.slane %v14877_v7, %v12809_v43  ;;  %v1236_v44 = vcombine.high %v1228_v2, %v1228_v2  ;;  %v14929_v31 = vld [vmem:[%s19358_s2] ss:$0 sm:$0xff] }
 0x1d6   :  { %v1644_v32 = vrot.slane %v1228_v2, %v12809_v43  ;;  %v2236_v48 = vrot.slane %v1228_v2, %v12767_v17  ;;  %v14904_v4 = vcombine.high %v14887_v3, %v14887_v3  ;;  %v14914_v35 = vcombine.high %v1235_v51, %v1235_v51  ;;  %20054 = vst [vmem:[#allocation272_spill] sm:$0xff] %v14929_v31 }
 0x1d7   :  { %20050 = vst [vmem:[#allocation269_spill] sm:$0xff] %v14895_v59  ;;  %v14908_v24 = vrot.slane %v14891_v54, %v12809_v43  ;;  %v1648_v62 = vrot.slane %v1236_v44, %v12809_v43  ;;  %v14918_v2 = vrot.slane %v1235_v51, %v12809_v43  ;;  %v2240_v41 = vrot.slane %v1236_v44, %v12767_v17 }
 0x1d8   :  { %20051 = vst [vmem:[#allocation270_spill] sm:$0xff] %v14904_v4  ;;  %v2244_v58 = vrot.slane %v1235_v51, %v12767_v17  ;;  %v2380_v6 = vsel %vm1705_vm9, %v20053_v63, %v2379_v10  ;;  %v760_v40 = vmax.f32 %v670_v30, 0.0  ;;  %v665_v38 = vadd.f32 %v14929_v31, %v13864_v28 }
 0x1d9   :  { %20052 = vst [vmem:[#allocation271_spill] sm:$0xff] %v14908_v24  ;;  %v14935_v34 = vrot.slane %v14914_v35, %v12809_v43  ;;  %v14938_v51 = vsel %vm1697_vm5, %v1648_v62, %v1644_v32  ;;  %v2248_v44 = vrot.slane %v14914_v35, %v12767_v17  ;;  %v2389_v63 = vsel %vm2297_vm4, %v2240_v41, %v2236_v48 }
 0x1da   :  { %v2390_v10 = vsel %vm1697_vm5, %v2244_v58, %v2389_v63  ;;  %v2921_v30 = vsel %vm2297_vm4, %v1648_v62, %v1644_v32  ;;  %v14946_v33 = vsel %vm1707_vm10, %v2200_v9, %v2380_v6  ;;  %v3651_v28 = vcombine.high %v760_v40, %v760_v40 }
 0x1db   :  { %20055 = vst [vmem:[#allocation273_spill] sm:$0xff] %v14946_v33  ;;  %v14950_v24 = vsel %vm1697_vm5, %v14918_v2, %v2921_v30  ;;  %10969 = vmatprep.mubr.msk.f32.mxu1 %vm2403_vm11, %v14946_v33  ;;  %v14955_v59 = vrot.slane %v760_v40, %v12754_v12  ;;  %v759_v35 = vmax.f32 %v665_v38, 0.0  ;;  %v680_v58 = vadd.f32 %v14929_v31, %v13886_v46 }
 0x1dc   :  { %20056 = vst [vmem:[#allocation274_spill] sm:$0xff] %v14950_v24  ;;  %v14960_v32 = vrot.slane %v3651_v28, %v12754_v12  ;;  %v675_v6 = vadd.f32 %v14929_v31, %v13894_v19  ;;  %v20059_v48 = vrot.slane %v14775_v21, %v12767_v17 }
 0x1dd   :  { %20057 = vst [vmem:[#allocation275_spill] sm:$0xff] %v14955_v59  ;;  %v14973_v38 = vcombine.high %v14955_v59, %v14955_v59  ;;  %v14977_v46 = vrot.slane %v14955_v59, %v12809_v43  ;;  %v3634_v62 = vcombine.high %v759_v35, %v759_v35  ;;  %v762_v63 = vmax.f32 %v680_v58, 0.0 }
 0x1de   :  { %20058 = vst [vmem:[#allocation276_spill] sm:$0xff] %v14960_v32  ;;  %v2384_v40 = vsel %vm1699_vm6, %v20059_v48, %v14800_v5  ;;  %v14983_v41 = vcombine.high %v14960_v32, %v14960_v32  ;;  %v3641_v5 = vrot.slane %v759_v35, %v12754_v12  ;;  %v761_v19 = vmax.f32 %v675_v6, 0.0 }
 0x1df   :  { %20060 = vst [vmem:[#allocation277_spill] sm:$0xff] %v14973_v38  ;;  %20061 = vst [vmem:[#allocation278_spill] sm:$0xff] %v14977_v46  ;;  %v14990_v30 = vrot.slane %v14973_v38, %v12809_v43  ;;  %v3648_v48 = vrot.slane %v3634_v62, %v12754_v12  ;;  %v1272_v59 = vcombine.high %v762_v63, %v762_v63  ;;  %v1826_v46 = vld [vmem:[%s19357_s3 + $0x10] sm:$0xff] }
 0x1e0   :  { %20062 = vst [vmem:[#allocation279_spill] sm:$0xff] %v14983_v41  ;;  %v3649_v9 = vcombine.high %v3641_v5, %v3641_v5  ;;  %v4097_v33 = vrot.slane %v3641_v5, %v12809_v43  ;;  %v4948_v41 = vrot.slane %v3641_v5, %v12767_v17  ;;  %v1255_v38 = vcombine.high %v761_v19, %v761_v19 }
 0x1e1   :  { %20063 = vst [vmem:[#allocation280_spill] sm:$0xff] %v14990_v30  ;;  %v14997_v21 = vcombine.high %v3648_v48, %v3648_v48  ;;  %v15000_v35 = vrot.slane %v3648_v48, %v12809_v43  ;;  %v4956_v58 = vrot.slane %v3648_v48, %v12767_v17  ;;  %v15004_v30 = vrot.slane %v762_v63, %v12754_v12 }
 0x1e2   :  { %v4101_v28 = vrot.slane %v3649_v9, %v12809_v43  ;;  %v4952_v6 = vrot.slane %v3649_v9, %v12767_v17  ;;  %v15009_v62 = vrot.slane %v1272_v59, %v12754_v12  ;;  %v1262_v24 = vrot.slane %v761_v19, %v12754_v12 }
 0x1e3   :  { %20064 = vst [vmem:[#allocation281_spill] sm:$0xff] %v14997_v21  ;;  %20065 = vst [vmem:[#allocation282_spill] sm:$0xff] %v15000_v35  ;;  %v15013_v5 = vrot.slane %v14997_v21, %v12809_v43  ;;  %v1287_v48 = vcombine.high %v15004_v30, %v15004_v30  ;;  %v15021_v63 = vrot.slane %v15004_v30, %v12809_v43  ;;  %v1827_v21 = vld [vmem:[%s19357_s3 + $0x18] sm:$0xff] }
 0x1e4   :  { %v15024_v9 = vsel %vm1697_vm5, %v4101_v28, %v4097_v33  ;;  %v5107_v59 = vsel %vm2297_vm4, %v4952_v6, %v4948_v41  ;;  %v5481_v32 = vsel %vm2297_vm4, %v4101_v28, %v4097_v33  ;;  %v2284_v28 = vrot.slane %v15004_v30, %v12767_v17 }
 0x1e5   :  { %20066 = vst [vmem:[#allocation283_spill] sm:$0xff] %v15013_v5  ;;  %20067 = vst [vmem:[#allocation284_spill] sm:$0xff] %v15021_v63  ;;  %v15030_v5 = vcombine.high %v15009_v62, %v15009_v62  ;;  %v15039_v31 = vsel %vm1697_vm5, %v4956_v58, %v5107_v59  ;;  %v15043_v41 = vsel %vm1697_vm5, %v15000_v35, %v5481_v32 }
 0x1e6   :  { %20068 = vst [vmem:[#allocation285_spill] sm:$0xff] %v15024_v9  ;;  %20070 = vst [vmem:[#allocation287_spill] sm:$0xff] %v15039_v31  ;;  %v15046_v33 = vrot.slane %v1287_v48, %v12809_v43  ;;  %v2288_v6 = vrot.slane %v1287_v48, %v12767_v17  ;;  %v2292_v9 = vrot.slane %v15009_v62, %v12767_v17 }
 0x1e7   :  { %20069 = vst [vmem:[#allocation286_spill] sm:$0xff] %v15030_v5  ;;  %20071 = vst [vmem:[#allocation288_spill] sm:$0xff] %v15043_v41  ;;  %v1269_v58 = vrot.slane %v1255_v38, %v12754_v12  ;;  %v20073_v59 = vrot.slane %v14719_v16, %v12767_v17  ;;  %v11605_v41 = vpack.c.bf16 %v1827_v21, %v1826_v46 }
 0x1e8   :  { %20072 = vst [vmem:[#allocation289_spill] sm:$0xff] %v15046_v33  ;;  %v2264_v31 = vrot.slane %v14904_v4, %v12767_v17  ;;  %v2391_v30 = vsel %vm1699_vm6, %v2248_v44, %v2390_v10  ;;  %v1270_v35 = vcombine.high %v1262_v24, %v1262_v24  ;;  %v1672_v33 = vrot.slane %v1262_v24, %v12809_v43  ;;  %v20106_v4 = vld [vmem:[#allocation73_spill] sm:$0xff] }
 0x1e9   :  { %v2385_v32 = vsel %vm1701_vm7, %v20073_v59, %v2384_v40  ;;  %v1271_v48 = vcombine.high %v1269_v58, %v1269_v58  ;;  %v15064_v63 = vrot.slane %v1269_v58, %v12809_v43  ;;  %v2268_v38 = vrot.slane %v1262_v24, %v12767_v17  ;;  %11606 = vmatprep.subr.bf16.mxu1 %v11605_v41 }
 0x1ea   :  { %v2276_v19 = vrot.slane %v1269_v58, %v12767_v17  ;;  %v20074_v16 = vrot.slane %v14734_v20, %v12767_v17  ;;  %v20075_v44 = vrot.slane %v14877_v7, %v12767_v17  ;;  %v1676_v46 = vrot.slane %v1270_v35, %v12809_v43  ;;  %11608 = vmatpush3.bf16.msra.mxu1 %v11605_v41 }
 0x1eb   :  { %v15078_v21 = vrot.slane %v1271_v48, %v12809_v43  ;;  %v2272_v24 = vrot.slane %v1270_v35, %v12767_v17  ;;  %v2280_v58 = vrot.slane %v1271_v48, %v12767_v17  ;;  %v20076_v20 = vrot.slane %v14722_v52, %v12767_v17 }
 0x1ec   :  { %v2386_v40 = vsel %vm1703_vm8, %v20074_v16, %v2385_v32  ;;  %v2392_v10 = vsel %vm1701_vm7, %v20075_v44, %v2391_v30  ;;  %v20077_v7 = vrot.slane %v14891_v54, %v12767_v17  ;;  %v2296_v30 = vrot.slane %v15030_v5, %v12767_v17  ;;  %v20078_v16 = vld [vmem:[#allocation4_spill] sm:$0xff]  ;;  %v20105_v5 = vld [vmem:[#allocation69_spill] sm:$0xff] }
 0x1ed   :  { %v2387_v59 = vsel %vm1705_vm9, %v20076_v20, %v2386_v40  ;;  %v15094_v44 = vrot.slane %v20078_v16, %v12809_v43  ;;  %v15097_v35 = vsel %vm1697_vm5, %v1676_v46, %v1672_v33  ;;  %v2396_v41 = vsel %vm2297_vm4, %v2272_v24, %v2268_v38  ;;  %v9981_v20 = vld [vmem:[%s19357_s3 + $0x48] sm:$0xff]  ;;  %v20083_v24 = vld [vmem:[#allocation6_spill] sm:$0xff] }
 0x1ee   :  { %v2393_v32 = vsel %vm1703_vm8, %v20077_v7, %v2392_v10  ;;  %v2928_v48 = vsel %vm2297_vm4, %v1676_v46, %v1672_v33  ;;  %v20079_v40 = vrot.slane %v14744_v0, %v12767_v17  ;;  %v9980_v10 = vld [vmem:[%s19357_s3 + $0x40] sm:$0xff]  ;;  %v2397_v7 = vsel %vm1697_vm5, %v2276_v19, %v2396_v41 }
 0x1ef   :  { %v15116_v38 = vsel %vm1697_vm5, %v15064_v63, %v2928_v48  ;;  %v20082_v33 = vrot.slane %v14887_v3, %v12767_v17  ;;  %v2398_v19 = vsel %vm1699_vm6, %v2280_v58, %v2397_v7  ;;  %v20085_v41 = vld [vmem:[#allocation10_spill] sm:$0xff]  ;;  %v20089_v7 = vld [vmem:[#allocation12_spill] sm:$0xff]  ;;  %v20109_v0 = vld [vmem:[#allocation83_spill] sm:$0xff] }
 0x1f0   :  { %v15105_v54 = vsel %vm1707_vm10, %v20079_v40, %v2387_v59  ;;  %20081 = vst [vmem:[#allocation290_spill] sm:$0xff] %v15116_v38  ;;  %v15126_v59 = vrot.slane %v20083_v24, %v12809_v43  ;;  %v1698_v48 = vsel %vm1697_vm5, %v20085_v41, %v15094_v44  ;;  %v2399_v40 = vsel %vm1701_vm7, %v2284_v28, %v2398_v19  ;;  %v20087_v24 = vld [vmem:[#allocation27_spill] sm:$0xff]  ;;  %v20090_v17 = vld [vmem:[#allocation24_spill] sm:$0xff] }
 0x1f1   :  { %20080 = vst [vmem:[#allocation4_spill] sm:$0xff] %v15105_v54  ;;  %10970 = vmatmul.mubr.msk.f32.gmra.mrb[12].mxu1 %vm2403_vm11, %v15105_v54  ;;  %v2394_v46 = vsel %vm1705_vm9, %v20082_v33, %v2393_v32  ;;  %v11609_v33 = vpack.c.bf16 %v9981_v20, %v9980_v10  ;;  %v2400_v58 = vsel %vm1703_vm8, %v2288_v6, %v2399_v40  ;;  %v20091_v28 = vld [vmem:[#allocation35_spill] sm:$0xff]  ;;  %v20093_v20 = vld [vmem:[#allocation25_spill] sm:$0xff] }
 0x1f2   :  { %v15129_v16 = vsel %vm1707_vm10, %v2264_v31, %v2394_v46  ;;  %v15140_v32 = vsel %vm1699_vm6, %v15126_v59, %v1698_v48  ;;  %v20088_v31 = vld [vmem:[#allocation22_spill] sm:$0xff]  ;;  %v15153_v19 = vrot.slane %v20091_v28, %v12809_v43  ;;  %v2401_v48 = vsel %vm1705_vm9, %v2292_v9, %v2400_v58  ;;  %v20094_v40 = vld [vmem:[#allocation49_spill] sm:$0xff]  ;;  %v20098_v9 = vld [vmem:[#allocation48_spill] sm:$0xff] }
 0x1f3   :  { %20084 = vst [vmem:[#allocation6_spill] sm:$0xff] %v15129_v16  ;;  %10972 = vmatprep.mubr.msk.f32.mxu1 %vm2403_vm11, %v15129_v16  ;;  %20086 = vst [vmem:[#allocation10_spill] sm:$0xff] %v15140_v32  ;;  %v1712_v46 = vsel %vm1703_vm8, %v20088_v31, %v20087_v24  ;;  %v1702_v54 = vsel %vm1701_vm7, %v20089_v7, %v15140_v32  ;;  %11610 = vmatprep.subr.bf16.mxu1 %v11609_v33  ;;  %v20095_v24 = vld [vmem:[#allocation44_spill] sm:$0xff] }
 0x1f4   :  { %v1713_v16 = vsel %vm1705_vm9, %v20090_v17, %v1712_v46  ;;  %20092 = vst [vmem:[#allocation27_spill] sm:$0xff] %v15153_v19  ;;  %v1704_v10 = vsel %vm1703_vm8, %v15094_v44, %v1702_v54  ;;  %v1716_v32 = vsel %vm1699_vm6, %v20095_v24, %v20094_v40  ;;  %v15164_v12 = vsel %vm1707_vm10, %v2296_v30, %v2401_v48  ;;  %v20099_v58 = vld [vmem:[#allocation36_spill] sm:$0xff]  ;;  %v20103_v24 = vld [vmem:[#allocation61_spill] sm:$0xff] }
 0x1f5   :  { %v1714_v6 = vsel %vm1707_vm10, %v20093_v20, %v1713_v16  ;;  %20096 = vst [vmem:[#allocation22_spill] sm:$0xff] %v15164_v12  ;;  %v1706_v46 = vsel %vm1705_vm9, %v20085_v41, %v1704_v10  ;;  %v1717_v54 = vsel %vm1701_vm7, %v20098_v9, %v1716_v32  ;;  %10973 = vmatmul.mubr.msk.f32.gmra.mrb[14].mxu1 %vm2403_vm11, %v15164_v12  ;;  %v20100_v30 = vld [vmem:[#allocation52_spill] sm:$0xff]  ;;  %v20102_v10 = vld [vmem:[#allocation65_spill] sm:$0xff]  ;;  %v20104_v32 = vld [vmem:[#allocation38_spill] sm:$0xff] }
 0x1f6   :  { %v15169_v28 = vsel %vm1808_vm12, 0.0, %v1714_v6  ;;  %v1708_v16 = vsel %vm1707_vm10, %v15126_v59, %v1706_v46  ;;  %v1718_v40 = vsel %vm1703_vm8, %v20099_v58, %v1717_v54  ;;  %v15181_v48 = vrot.slane %v20100_v30, %v12809_v43  ;;  %v20112_v58 = vld [vmem:[#allocation88_spill] sm:$0xff] }
 0x1f7   :  { %20097 = vst [vmem:[#allocation12_spill] sm:$0xff] %v15169_v28  ;;  %v1722_v6 = vsel %vm1699_vm6, %v20103_v24, %v20102_v10  ;;  %v15187_v38 = vsel %vm1808_vm12, 0.0, %v1708_v16  ;;  %v1719_v12 = vsel %vm1705_vm9, %v20104_v32, %v1718_v40  ;;  %v15195_v54 = vrot.slane %v20106_v4, %v12809_v43  ;;  %v20107_v10 = vld [vmem:[#allocation56_spill] sm:$0xff]  ;;  %v20108_v24 = vld [vmem:[#allocation85_spill] sm:$0xff]  ;;  %v20111_v32 = vld [vmem:[#allocation58_spill] sm:$0xff] }
 0x1f8   :  { %20101 = vst [vmem:[#allocation24_spill] sm:$0xff] %v15181_v48  ;;  %v1723_v46 = vsel %vm1701_vm7, %v20105_v5, %v1722_v6  ;;  %10983 = vmatprep.mubr.msk.f32.mxu1 %vm2403_vm11, %v15187_v38  ;;  %v1720_v30 = vsel %vm1707_vm10, %v15153_v19, %v1719_v12  ;;  %v1728_v40 = vsel %vm1699_vm6, %v20109_v0, %v20108_v24  ;;  %v20113_v19 = vld [vmem:[#allocation107_spill] sm:$0xff]  ;;  %v20114_v9 = vld [vmem:[#allocation104_spill] sm:$0xff]  ;;  %v20115_v0 = vld [vmem:[#allocation77_spill] sm:$0xff] }
 0x1f9   :  { %v1724_v16 = vsel %vm1703_vm8, %v20107_v10, %v1723_v46  ;;  %v15208_v6 = vrot.slane %v13471_v15, %v12809_v43  ;;  %v15211_v4 = vsel %vm1808_vm12, 0.0, %v1720_v30  ;;  %v1729_v12 = vsel %vm1701_vm7, %v20112_v58, %v1728_v40  ;;  %10984 = vmatmul.mubr.msk.f32.vlgmr.msra.gmra.mrb[0].mxu1 %vm2403_vm11, %v15169_v28  ;;  %v20116_v24 = vld [vmem:[#allocation109_spill] sm:$0xff]  ;;  %v20119_v28 = vld [vmem:[#allocation128_spill] sm:$0xff] }
 0x1fa   :  { %20110 = vst [vmem:[#allocation35_spill] sm:$0xff] %v15211_v4  ;;  %v1725_v5 = vsel %vm1705_vm9, %v20111_v32, %v1724_v16  ;;  %v1734_v46 = vsel %vm1699_vm6, %v20114_v9, %v20113_v19  ;;  %v1730_v30 = vsel %vm1703_vm8, %v20115_v0, %v1729_v12  ;;  %v15230_v16 = vrot.slane %v13649_v60, %v12809_v43  ;;  %v20117_v19 = vld [vmem:[#allocation79_spill] sm:$0xff]  ;;  %v20118_v40 = vld [vmem:[#allocation101_spill] sm:$0xff] }
 0x1fb   :  { %v1726_v15 = vsel %vm1707_vm10, %v15181_v48, %v1725_v5  ;;  %v1735_v10 = vsel %vm1701_vm7, %v20116_v24, %v1734_v46  ;;  %11612 = vmatpush3.bf16.msra.mxu1 %v11609_v33  ;;  %10986 = vmatprep.mubr.msk.f32.mxu1 %vm2403_vm11, %v15211_v4  ;;  %v1731_v9 = vsel %vm1705_vm9, %v20117_v19, %v1730_v30  ;;  %v20120_v48 = vld [vmem:[#allocation125_spill] sm:$0xff]  ;;  %v20122_v4 = vld [vmem:[#allocation102_spill] sm:$0xff] }
 0x1fc   :  { %v1736_v5 = vsel %vm1703_vm8, %v20118_v40, %v1735_v10  ;;  %v1740_v12 = vsel %vm1699_vm6, %v20120_v48, %v20119_v28  ;;  %v9982_v46 = vld [vmem:[%s19357_s3 + $0x50] sm:$0xff]  ;;  %v9983_v60 = vld [vmem:[%s19357_s3 + $0x58] sm:$0xff]  ;;  %v15248_v33 = vsel %vm1808_vm12, 0.0, %v1726_v15  ;;  %v1732_v30 = vsel %vm1707_vm10, %v15195_v54, %v1731_v9 }
 0x1fd   :  { %20121 = vst [vmem:[#allocation25_spill] sm:$0xff] %v15248_v33  ;;  %v1737_v10 = vsel %vm1705_vm9, %v20122_v4, %v1736_v5  ;;  %v20123_v40 = vld [vmem:[#allocation130_spill] sm:$0xff]  ;;  %v15262_v0 = vrot.slane %v13795_v42, %v12809_v43  ;;  %v1746_v15 = vsel %vm1699_vm6, %v13875_v36, %v13891_v39  ;;  %10987 = vmatmul.mubr.msk.f32.gmra.mrb[2].mxu1 %vm2403_vm11, %v15248_v33  ;;  %v15270_v9 = vsel %vm1808_vm12, 0.0, %v1732_v30  ;;  %v20126_v5 = vld [vmem:[#allocation124_spill] sm:$0xff]  ;;  %v20129_v39 = vld [vmem:[#allocation141_spill] sm:$0xff] }
 0x1fe   :  { %v1741_v28 = vsel %vm1701_vm7, %v20123_v40, %v1740_v12  ;;  %v1738_v48 = vsel %vm1707_vm10, %v15208_v6, %v1737_v10  ;;  %v20124_v24 = vld [vmem:[#allocation118_spill] sm:$0xff]  ;;  %20125 = vst [vmem:[#allocation49_spill] sm:$0xff] %v15270_v9  ;;  %v20127_v10 = vld [vmem:[#allocation148_spill] sm:$0xff]  ;;  %10989 = vmatprep.mubr.msk.f32.mxu1 %vm2403_vm11, %v15270_v9 }
 0x1ff   :  { %v1742_v19 = vsel %vm1703_vm8, %v20124_v24, %v1741_v28  ;;  %v1747_v28 = vsel %vm1701_vm7, %v20127_v10, %v1746_v15  ;;  %v11613_v24 = vpack.c.bf16 %v9983_v60, %v9982_v46  ;;  %v15279_v42 = vsel %vm1808_vm12, 0.0, %v1738_v48  ;;  %v20131_v46 = vld [vmem:[#allocation144_spill] sm:$0xff] }
 0x200   :  { %v1743_v12 = vsel %vm1705_vm9, %v20126_v5, %v1742_v19  ;;  %20128 = vst [vmem:[#allocation44_spill] sm:$0xff] %v15279_v42  ;;  %v1748_v30 = vsel %vm1703_vm8, %v20129_v39, %v1747_v28  ;;  %v1752_v19 = vsel %vm1699_vm6, %v14199_v37, %v14224_v18  ;;  %v15295_v48 = vrot.slane %v14124_v14, %v12809_v43 }
 0x201   :  { %v1744_v36 = vsel %vm1707_vm10, %v15230_v16, %v1743_v12  ;;  %v1749_v60 = vsel %vm1705_vm9, %v20131_v46, %v1748_v30  ;;  %11614 = vmatprep.subr.bf16.mxu1 %v11613_v24  ;;  %v1753_v15 = vsel %vm1701_vm7, %v14217_v45, %v1752_v19  ;;  %v15305_v18 = vrot.slane %v14268_v49, %v12809_v43 }
 0x202   :  { %v15289_v33 = vsel %vm1808_vm12, 0.0, %v1744_v36  ;;  %v1750_v12 = vsel %vm1707_vm10, %v15262_v0, %v1749_v60  ;;  %v1754_v37 = vsel %vm1703_vm8, %v14144_v55, %v1753_v15  ;;  %11616 = vmatpush3.bf16.msra.mxu1 %v11613_v24  ;;  %v1758_v28 = vsel %vm1699_vm6, %v14334_v57, %v14360_v8  ;;  %v20133_v60 = vld [vmem:[#allocation213_spill] sm:$0xff] }
 0x203   :  { %20130 = vst [vmem:[#allocation52_spill] sm:$0xff] %v15289_v33  ;;  %10990 = vmatmul.mubr.msk.f32.gmra.mrb[4].mxu1 %vm2403_vm11, %v15279_v42  ;;  %v1755_v14 = vsel %vm1705_vm9, %v14154_v47, %v1754_v37  ;;  %v1759_v36 = vsel %vm1701_vm7, %v14347_v53, %v1758_v28  ;;  %v15318_v24 = vrot.slane %v14408_v50, %v12809_v43  ;;  %v15326_v57 = vsel %vm1808_vm12, 0.0, %v1750_v12  ;;  %v20135_v28 = vld [vmem:[#allocation218_spill] sm:$0xff] }
 0x204   :  { %v1764_v49 = vsel %vm1699_vm6, %v14465_v23, %v14481_v13  ;;  %10992 = vmatprep.mubr.msk.f32.mxu1 %vm2403_vm11, %v15289_v33  ;;  %20132 = vst [vmem:[#allocation65_spill] sm:$0xff] %v15326_v57  ;;  %v1756_v8 = vsel %vm1707_vm10, %v15295_v48, %v1755_v14  ;;  %v1760_v30 = vsel %vm1703_vm8, %v14288_v25, %v1759_v36  ;;  %v20147_v33 = vld [vmem:[#allocation289_spill] sm:$0xff] }
 0x205   :  { %v1765_v50 = vsel %vm1701_vm7, %v14478_v11, %v1764_v49  ;;  %v1761_v19 = vsel %vm1705_vm9, %v14298_v22, %v1760_v30  ;;  %v15340_v23 = vrot.slane %v14548_v29, %v12809_v43  ;;  %v1770_v15 = vsel %vm1699_vm6, %v14619_v27, %v14640_v26  ;;  %v20136_v49 = vld [vmem:[#allocation228_spill] sm:$0xff] }
 0x206   :  { %v1766_v13 = vsel %vm1703_vm8, %v20133_v60, %v1765_v50  ;;  %v15346_v12 = vsel %vm1808_vm12, 0.0, %v1756_v8  ;;  %v1762_v37 = vsel %vm1707_vm10, %v15305_v18, %v1761_v19  ;;  %v1771_v36 = vsel %vm1701_vm7, %v14634_v56, %v1770_v15  ;;  %v20139_v19 = vld [vmem:[#allocation232_spill] sm:$0xff]  ;;  %v20140_v15 = vld [vmem:[#allocation255_spill] sm:$0xff] }
 0x207   :  { %20134 = vst [vmem:[#allocation61_spill] sm:$0xff] %v15346_v12  ;;  %v1767_v14 = vsel %vm1705_vm9, %v20135_v28, %v1766_v13  ;;  %10993 = vmatmul.mubr.msk.f32.gmra.mrb[6].mxu1 %vm2403_vm11, %v15326_v57  ;;  %v1772_v27 = vsel %vm1703_vm8, %v20136_v49, %v1771_v36  ;;  %v15362_v26 = vrot.slane %v14722_v52, %v12809_v43  ;;  %v15370_v30 = vsel %vm1808_vm12, 0.0, %v1762_v37  ;;  %v20141_v36 = vld [vmem:[#allocation121_spill] sm:$0xff] }
 0x208   :  { %v1768_v29 = vsel %vm1707_vm10, %v15318_v24, %v1767_v14  ;;  %v1776_v8 = vsel %vm1699_vm6, %v14778_v61, %v14795_v1  ;;  %10995 = vmatprep.mubr.msk.f32.mxu1 %vm2403_vm11, %v15187_v38  ;;  %20137 = vst [vmem:[#allocation73_spill] sm:$0xff] %v15370_v30  ;;  %v1773_v13 = vsel %vm1705_vm9, %v20139_v19, %v1772_v27  ;;  %v20142_v37 = vld [vmem:[#allocation253_spill] sm:$0xff] }
 0x209   :  { %v15373_v50 = vsel %vm1808_vm12, 0.0, %v1768_v29  ;;  %v1777_v52 = vsel %vm1701_vm7, %v20140_v15, %v1776_v8  ;;  %v1774_v14 = vsel %vm1707_vm10, %v15340_v23, %v1773_v13  ;;  %v15385_v61 = vrot.slane %v14887_v3, %v12809_v43  ;;  %v10000_v3 = vld [vmem:[%s19357_s3 + $0x60] sm:$0xff] }
 0x20a   :  { %20138 = vst [vmem:[#allocation85_spill] sm:$0xff] %v15373_v50  ;;  %v1778_v1 = vsel %vm1703_vm8, %v20141_v36, %v1777_v52  ;;  %v1782_v38 = vsel %vm1699_vm6, %v14918_v2, %v14938_v51  ;;  %v15396_v8 = vrot.slane %v15009_v62, %v12809_v43  ;;  %v1788_v13 = vsel %vm1699_vm6, %v15064_v63, %v15097_v35  ;;  %v10001_v2 = vld [vmem:[%s19357_s3 + $0x68] sm:$0xff]  ;;  %v20143_v62 = vld [vmem:[#allocation269_spill] sm:$0xff] }
 0x20b   :  { %v1779_v29 = vsel %vm1705_vm9, %v20142_v37, %v1778_v1  ;;  %v1783_v27 = vsel %vm1701_vm7, %v14935_v34, %v1782_v38  ;;  %10996 = vmatmul.mubr.msk.f32.gmra.mrb[8].mxu1 %vm2403_vm11, %v15346_v12  ;;  %v1789_v63 = vsel %vm1701_vm7, %v15078_v21, %v1788_v13  ;;  %v2830_v35 = vsel %vm2297_vm4, %v20085_v41, %v15094_v44  ;;  %v20145_v38 = vld [vmem:[#allocation271_spill] sm:$0xff] }
 0x20c   :  { %v1780_v51 = vsel %vm1707_vm10, %v15362_v26, %v1779_v29  ;;  %v1784_v52 = vsel %vm1703_vm8, %v20143_v62, %v1783_v27  ;;  %10998 = vmatprep.mubr.msk.f32.mxu1 %vm2403_vm11, %v15370_v30  ;;  %v15421_v1 = vsel %vm1808_vm12, 0.0, %v1774_v14  ;;  %v20146_v29 = vld [vmem:[#allocation284_spill] sm:$0xff]  ;;  %v2831_v27 = vsel %vm1697_vm5, %v15126_v59, %v2830_v35 }
 0x20d   :  { %20144 = vst [vmem:[#allocation83_spill] sm:$0xff] %v15421_v1  ;;  %v1785_v12 = vsel %vm1705_vm9, %v20145_v38, %v1784_v52  ;;  %v1790_v57 = vsel %vm1703_vm8, %v20146_v29, %v1789_v63  ;;  %v15435_v30 = vsel %vm1699_vm6, %v20089_v7, %v2831_v27  ;;  %v15437_v14 = vpack.c.bf16 %v10001_v2, %v10000_v3  ;;  %v20153_v27 = vld [vmem:[#allocation37_spill] sm:$0xff] }
 0x20e   :  { %v1786_v13 = vsel %vm1707_vm10, %v15385_v61, %v1785_v12  ;;  %v1791_v42 = vsel %vm1705_vm9, %v20147_v33, %v1790_v57  ;;  %20148 = vst [vmem:[#allocation58_spill] sm:$0xff] %v15435_v30  ;;  %v15440_v52 = vsel %vm1808_vm12, 0.0, %v1780_v51  ;;  %v2833_v35 = vsel %vm1701_vm7, %v15094_v44, %v15435_v30  ;;  %v20150_v12 = vld [vmem:[#allocation28_spill] sm:$0xff] }
 0x20f   :  { %20149 = vst [vmem:[#allocation88_spill] sm:$0xff] %v15440_v52  ;;  %v1792_v63 = vsel %vm1707_vm10, %v15396_v8, %v1791_v42  ;;  %v2840_v57 = vsel %vm1701_vm7, %v20088_v31, %v20150_v12  ;;  %10999 = vmatmul.mubr.msk.f32.gmra.mrb[10].mxu1 %vm2403_vm11, %v15373_v50  ;;  %v15453_v3 = vsel %vm1808_vm12, 0.0, %v1786_v13  ;;  %v2834_v42 = vsel %vm1703_vm8, %v20085_v41, %v2833_v35  ;;  %v20155_v12 = vld [vmem:[#allocation48_spill] sm:$0xff] }
 0x210   :  { %20151 = vst [vmem:[#allocation107_spill] sm:$0xff] %v15453_v3  ;;  %v15456_v2 = vsel %vm1808_vm12, 0.0, %v1792_v63  ;;  %11618 = vmatprep.subr.bf16.mxu1 %v15437_v14  ;;  %v2841_v44 = vsel %vm1703_vm8, %v20090_v17, %v2840_v57  ;;  %11001 = vmatprep.mubr.msk.f32.mxu1 %vm2403_vm11, %v15421_v1  ;;  %v2835_v31 = vsel %vm1705_vm9, %v15126_v59, %v2834_v42  ;;  %v20154_v63 = vld [vmem:[#allocation50_spill] sm:$0xff]  ;;  %v20156_v17 = vld [vmem:[#allocation23_spill] sm:$0xff]  ;;  %v20159_v59 = vld [vmem:[#allocation36_spill] sm:$0xff] }
 0x211   :  { %20152 = vst [vmem:[#allocation104_spill] sm:$0xff] %v15456_v2  ;;  %v2842_v51 = vsel %vm1705_vm9, %v20093_v20, %v2841_v44  ;;  %v2781_v13 = vrot.slane %v20153_v27, %v12809_v43  ;;  %v2846_v41 = vsel %vm1699_vm6, %v20155_v12, %v20154_v63  ;;  %v15476_v35 = vsel %vm1707_vm10, %v20089_v7, %v2835_v31  ;;  %v20160_v42 = vld [vmem:[#allocation67_spill] sm:$0xff]  ;;  %v20161_v44 = vld [vmem:[#allocation69_spill] sm:$0xff]  ;;  %v20162_v1 = vld [vmem:[#allocation38_spill] sm:$0xff] }
 0x212   :  { %v20157_v57 = vrot.slane %v20156_v17, %v12809_v43  ;;  %v2847_v20 = vsel %vm1701_vm7, %v20159_v59, %v2846_v41  ;;  %v2853_v27 = vsel %vm1699_vm6, %v20161_v44, %v20160_v42  ;;  %v20163_v12 = vld [vmem:[#allocation55_spill] sm:$0xff]  ;;  %v20164_v31 = vld [vmem:[#allocation56_spill] sm:$0xff]  ;;  %v20165_v17 = vld [vmem:[#allocation86_spill] sm:$0xff] }
 0x213   :  { %v2848_v63 = vsel %vm1703_vm8, %v20162_v1, %v2847_v20  ;;  %v2785_v7 = vrot.slane %v20163_v12, %v12809_v43  ;;  %v2854_v50 = vsel %vm1701_vm7, %v20164_v31, %v2853_v27  ;;  %11002 = vmatmul.mubr.msk.f32.gmra.mrb[12].mxu1 %vm2403_vm11, %v15440_v52  ;;  %v20166_v41 = vld [vmem:[#allocation27_spill] sm:$0xff]  ;;  %v20167_v1 = vld [vmem:[#allocation76_spill] sm:$0xff]  ;;  %v20168_v42 = vld [vmem:[#allocation77_spill] sm:$0xff] }
 0x214   :  { %v15482_v30 = vsel %vm1707_vm10, %v20157_v57, %v2842_v51  ;;  %v2860_v51 = vsel %vm1699_vm6, %v20112_v58, %v20165_v17  ;;  %v2849_v57 = vsel %vm1705_vm9, %v20166_v41, %v2848_v63  ;;  %v2855_v59 = vsel %vm1703_vm8, %v20111_v32, %v2854_v50  ;;  %11004 = vmatprep.mubr.msk.f32.mxu1 %vm2403_vm11, %v15453_v3  ;;  %v20169_v27 = vld [vmem:[#allocation24_spill] sm:$0xff]  ;;  %v20170_v12 = vld [vmem:[#allocation79_spill] sm:$0xff]  ;;  %v20172_v41 = vld [vmem:[#allocation110_spill] sm:$0xff] }
 0x215   :  { %20158 = vst [vmem:[#allocation128_spill] sm:$0xff] %v15482_v30  ;;  %v2789_v20 = vrot.slane %v20167_v1, %v12809_v43  ;;  %v2861_v44 = vsel %vm1701_vm7, %v20168_v42, %v2860_v51  ;;  %v2856_v58 = vsel %vm1705_vm9, %v20169_v27, %v2855_v59  ;;  %v20171_v63 = vld [vmem:[#allocation100_spill] sm:$0xff]  ;;  %v20173_v32 = vld [vmem:[#allocation109_spill] sm:$0xff]  ;;  %v15520_v1 = vsel %vm1707_vm10, %v2781_v13, %v2849_v57  ;;  %v20178_v57 = vld [vmem:[#allocation122_spill] sm:$0xff] }
 0x216   :  { %v2862_v31 = vsel %vm1703_vm8, %v20170_v12, %v2861_v44  ;;  %v2793_v17 = vrot.slane %v20171_v63, %v12809_v43  ;;  %v2867_v50 = vsel %vm1699_vm6, %v20173_v32, %v20172_v41  ;;  %20174 = vst [vmem:[#allocation125_spill] sm:$0xff] %v15520_v1  ;;  %v15523_v51 = vsel %vm1707_vm10, %v2785_v7, %v2856_v58  ;;  %v20176_v59 = vld [vmem:[#allocation101_spill] sm:$0xff]  ;;  %v20179_v58 = vld [vmem:[#allocation131_spill] sm:$0xff]  ;;  %v20180_v41 = vld [vmem:[#allocation118_spill] sm:$0xff] }
 0x217   :  { %20175 = vst [vmem:[#allocation102_spill] sm:$0xff] %v15523_v51  ;;  %v2863_v42 = vsel %vm1705_vm9, %v15195_v54, %v2862_v31  ;;  %v2868_v27 = vsel %vm1701_vm7, %v20176_v59, %v2867_v50  ;;  %v10002_v44 = vld [vmem:[%s19357_s3 + $0x70] sm:$0xff]  ;;  %v10003_v12 = vld [vmem:[%s19357_s3 + $0x78] sm:$0xff]  ;;  %v2797_v54 = vrot.slane %v20178_v57, %v12809_v43  ;;  %v2874_v31 = vsel %vm1699_vm6, %v20123_v40, %v20179_v58  ;;  %v20181_v32 = vld [vmem:[#allocation143_spill] sm:$0xff] }
 0x218   :  { %v15536_v13 = vsel %vm1707_vm10, %v2789_v20, %v2863_v42  ;;  %v2869_v7 = vsel %vm1703_vm8, %v20122_v4, %v2868_v27  ;;  %11005 = vmatmul.mubr.msk.f32.gmra.mrb[14].mxu1 %vm2403_vm11, %v15456_v2  ;;  %v2875_v20 = vsel %vm1701_vm7, %v20180_v41, %v2874_v31  ;;  %v2801_v50 = vrot.slane %v20181_v32, %v12809_v43  ;;  %v20182_v4 = vld [vmem:[#allocation149_spill] sm:$0xff]  ;;  %v20185_v31 = vld [vmem:[#allocation192_spill] sm:$0xff]  ;;  %v20190_v41 = vld [vmem:[#allocation223_spill] sm:$0xff]  ;;  %v15605_v32 = vpop.f32.mrb[62].mxu0 }
 0x219   :  { %20177 = vst [vmem:[#allocation130_spill] sm:$0xff] %v15536_v13  ;;  %v2870_v63 = vsel %vm1705_vm9, %v15208_v6, %v2869_v7  ;;  %v2881_v42 = vsel %vm1699_vm6, %v20127_v10, %v20182_v4  ;;  %11015 = vmatprep.mubr.msk.f32.mxu1 %vm2403_vm11, %v15476_v35  ;;  %v2876_v59 = vsel %vm1703_vm8, %v20126_v5, %v2875_v20  ;;  %v20184_v10 = vld [vmem:[#allocation184_spill] sm:$0xff]  ;;  %20191 = vst [vmem:[#allocation144_spill] sm:$0xff] %v15605_v32  ;;  %v20265_v32 = vld [vmem:[#allocation137_spill] sm:$0xff] }
 0x21a   :  { %v15559_v40 = vsel %vm1707_vm10, %v2793_v17, %v2870_v63  ;;  %v2882_v6 = vsel %vm1701_vm7, %v20129_v39, %v2881_v42  ;;  %v11621_v27 = vpack.c.bf16 %v10003_v12, %v10002_v44  ;;  %v2877_v7 = vsel %vm1705_vm9, %v15230_v16, %v2876_v59  ;;  %v20186_v44 = vld [vmem:[#allocation199_spill] sm:$0xff]  ;;  %v20187_v16 = vld [vmem:[#allocation209_spill] sm:$0xff] }
 0x21b   :  { %20183 = vst [vmem:[#allocation124_spill] sm:$0xff] %v15559_v40  ;;  %v2883_v57 = vsel %vm1703_vm8, %v20131_v46, %v2882_v6  ;;  %v2805_v58 = vrot.slane %v20184_v10, %v12809_v43  ;;  %v2888_v17 = vsel %vm1699_vm6, %v14217_v45, %v20185_v31  ;;  %v2809_v12 = vrot.slane %v20186_v44, %v12809_v43  ;;  %v20196_v42 = vld [vmem:[#allocation231_spill] sm:$0xff]  ;;  %v20197_v6 = vld [vmem:[#allocation241_spill] sm:$0xff]  ;;  %v20200_v31 = vld [vmem:[#allocation270_spill] sm:$0xff] }
 0x21c   :  { %v2884_v5 = vsel %vm1705_vm9, %v15262_v0, %v2883_v57  ;;  %v2889_v39 = vsel %vm1701_vm7, %v14144_v55, %v2888_v17  ;;  %v2895_v46 = vsel %vm1699_vm6, %v14347_v53, %v20187_v16  ;;  %11016 = vmatmul.mubr.msk.f32.vlgmr.msra.gmra.mrb[0].mxu1 %vm2403_vm11, %v15482_v30  ;;  %v15586_v63 = vsel %vm1707_vm10, %v2797_v54, %v2877_v7  ;;  %v20198_v57 = vld [vmem:[#allocation123_spill] sm:$0xff]  ;;  %v20204_v16 = vld [vmem:[#allocation290_spill] sm:$0xff]  ;;  %v20254_v30 = vld [vmem:[#allocation136_spill] sm:$0xff] }
 0x21d   :  { %20188 = vst [vmem:[#allocation148_spill] sm:$0xff] %v15586_v63  ;;  %v15589_v45 = vsel %vm1707_vm10, %v2801_v50, %v2884_v5  ;;  %v2890_v0 = vsel %vm1703_vm8, %v14154_v47, %v2889_v39  ;;  %v2896_v55 = vsel %vm1701_vm7, %v14288_v25, %v2895_v46  ;;  %11620 = vmatpush3.bf16.msra.mxu1 %v15437_v14  ;;  %v20193_v14 = vld [vmem:[#allocation217_spill] sm:$0xff]  ;;  %v20202_v39 = vld [vmem:[#allocation274_spill] sm:$0xff] }
 0x21e   :  { %20189 = vst [vmem:[#allocation141_spill] sm:$0xff] %v15589_v45  ;;  %11018 = vmatprep.mubr.msk.f32.mxu1 %vm2403_vm11, %v15520_v1  ;;  %v2891_v53 = vsel %vm1705_vm9, %v15295_v48, %v2890_v0  ;;  %v2897_v54 = vsel %vm1703_vm8, %v14298_v22, %v2896_v55  ;;  %v2902_v20 = vsel %vm1699_vm6, %v14478_v11, %v20190_v41  ;;  %v15616_v22 = vpop.f32.mrb[63].mxu0 }
 0x21f   :  { %11622 = vmatprep.subr.bf16.mxu1 %v11621_v27  ;;  %v15608_v47 = vsel %vm1707_vm10, %v2805_v58, %v2891_v53  ;;  %v2898_v25 = vsel %vm1705_vm9, %v15305_v18, %v2897_v54  ;;  %v2813_v50 = vrot.slane %v20193_v14, %v12809_v43  ;;  %v2903_v48 = vsel %vm1701_vm7, %v20133_v60, %v2902_v20  ;;  %v20207_v53 = vld [vmem:[#allocation20_spill] sm:$0xff]  ;;  %v20208_v54 = vld [vmem:[#allocation15_spill] sm:$0xff] }
 0x220   :  { %20192 = vst [vmem:[#allocation213_spill] sm:$0xff] %v15608_v47  ;;  %20194 = vst [vmem:[#allocation218_spill] sm:$0xff] %v15616_v22  ;;  %v15619_v4 = vsel %vm1707_vm10, %v2809_v12, %v2898_v25  ;;  %v2904_v11 = vsel %vm1703_vm8, %v20135_v28, %v2903_v48  ;;  %v2817_v59 = vrot.slane %v20196_v42, %v12809_v43  ;;  %11019 = vmatmul.mubr.msk.f32.gmra.mrb[2].mxu1 %vm2403_vm11, %v15523_v51  ;;  %v20199_v28 = vld [vmem:[#allocation257_spill] sm:$0xff]  ;;  %v20210_v25 = vld [vmem:[#allocation18_spill] sm:$0xff] }
 0x221   :  { %20195 = vst [vmem:[#allocation228_spill] sm:$0xff] %v15619_v4  ;;  %v2909_v18 = vsel %vm1699_vm6, %v14634_v56, %v20197_v6  ;;  %v2905_v60 = vsel %vm1705_vm9, %v15318_v24, %v2904_v11  ;;  %v2821_v10 = vrot.slane %v20198_v57, %v12809_v43  ;;  %v2916_v58 = vsel %vm1699_vm6, %v20140_v15, %v20199_v28  ;;  %v20214_v11 = vld [vmem:[#allocation9_spill] sm:$0xff]  ;;  %v20218_v57 = vld [vmem:[#allocation34_spill] sm:$0xff]  ;;  %v20219_v28 = vld [vmem:[#allocation59_spill] sm:$0xff] }
 0x222   :  { %v2910_v7 = vsel %vm1701_vm7, %v20136_v49, %v2909_v18  ;;  %11021 = vmatprep.mubr.msk.f32.mxu1 %vm2403_vm11, %v15536_v13  ;;  %11624 = vmatpush3.bf16.msra.mxu1 %v11621_v27  ;;  %v2917_v24 = vsel %vm1701_vm7, %v20141_v36, %v2916_v58  ;;  %v2825_v49 = vrot.slane %v20200_v31, %v12809_v43  ;;  %v10021_v36 = vld [vmem:[%s19357_s3 + $0x88] sm:$0xff]  ;;  %v20220_v58 = vld [vmem:[#allocation54_spill] sm:$0xff] }
 0x223   :  { %v2911_v56 = vsel %vm1703_vm8, %v20139_v19, %v2910_v7  ;;  %v15648_v17 = vsel %vm1707_vm10, %v2813_v50, %v2905_v60  ;;  %v2918_v15 = vsel %vm1703_vm8, %v20142_v37, %v2917_v24  ;;  %v2923_v27 = vsel %vm1699_vm6, %v14935_v34, %v20202_v39  ;;  %v10020_v19 = vld [vmem:[%s19357_s3 + $0x80] sm:$0xff]  ;;  %v20211_v50 = vld [vmem:[#allocation41_spill] sm:$0xff]  ;;  %v20221_v24 = vld [vmem:[#allocation240_spill] sm:$0xff] }
 0x224   :  { %20201 = vst [vmem:[#allocation232_spill] sm:$0xff] %v15648_v17  ;;  %v2912_v5 = vsel %vm1705_vm9, %v15340_v23, %v2911_v56  ;;  %v2919_v44 = vsel %vm1705_vm9, %v15362_v26, %v2918_v15  ;;  %v2924_v23 = vsel %vm1701_vm7, %v20143_v62, %v2923_v27  ;;  %v20203_v37 = vld [vmem:[#allocation286_spill] sm:$0xff]  ;;  %v2930_v34 = vsel %vm1699_vm6, %v15078_v21, %v20204_v16  ;;  %v20217_v60 = vld [vmem:[#allocation17_spill] sm:$0xff]  ;;  %v20222_v31 = vld [vmem:[#allocation272_spill] sm:$0xff] }
 0x225   :  { %v2829_v12 = vrot.slane %v20203_v37, %v12809_v43  ;;  %11022 = vmatmul.mubr.msk.f32.gmra.mrb[4].mxu1 %vm2403_vm11, %v15559_v40  ;;  %v15675_v46 = vsel %vm1707_vm10, %v2817_v59, %v2912_v5  ;;  %v15678_v0 = vsel %vm1707_vm10, %v2821_v10, %v2919_v44  ;;  %v2925_v26 = vsel %vm1703_vm8, %v20145_v38, %v2924_v23  ;;  %v20215_v59 = vld [vmem:[#allocation13_spill] sm:$0xff]  ;;  %v20223_v15 = vld [vmem:[#allocation43_spill] sm:$0xff] }
 0x226   :  { %20205 = vst [vmem:[#allocation255_spill] sm:$0xff] %v15675_v46  ;;  %20206 = vst [vmem:[#allocation121_spill] sm:$0xff] %v15678_v0  ;;  %v2931_v62 = vsel %vm1701_vm7, %v20146_v29, %v2930_v34  ;;  %11024 = vmatprep.mubr.msk.f32.mxu1 %vm2403_vm11, %v15586_v63  ;;  %v2926_v21 = vsel %vm1705_vm9, %v15385_v61, %v2925_v26  ;;  %v4151_v41 = vsel %vm1699_vm6, %v20208_v54, %v20207_v53  ;;  %v20212_v61 = vld [vmem:[#allocation32_spill] sm:$0xff]  ;;  %v20224_v27 = vld [vmem:[#allocation57_spill] sm:$0xff] }
 0x227   :  { %v2932_v55 = vsel %vm1703_vm8, %v20147_v33, %v2931_v62  ;;  %v15693_v20 = vpack.c.bf16 %v10021_v36, %v10020_v19  ;;  %v15696_v38 = vsel %vm1707_vm10, %v2825_v49, %v2926_v21  ;;  %v4152_v14 = vsel %vm1701_vm7, %v20210_v25, %v4151_v41  ;;  %v20225_v36 = vld [vmem:[#allocation244_spill] sm:$0xff]  ;;  %v20227_v34 = vld [vmem:[#allocation51_spill] sm:$0xff]  ;;  %v20228_v21 = vld [vmem:[#allocation66_spill] sm:$0xff] }
 0x228   :  { %20209 = vst [vmem:[#allocation253_spill] sm:$0xff] %v15696_v38  ;;  %v2933_v29 = vsel %vm1705_vm9, %v15396_v8, %v2932_v55  ;;  %v4159_v48 = vsel %vm1703_vm8, %v20212_v61, %v20211_v50  ;;  %v15710_v42 = vrot.slane %v20214_v11, %v12809_v43  ;;  %v4153_v6 = vsel %vm1703_vm8, %v20215_v59, %v4152_v14  ;;  %v20216_v8 = vld [vmem:[#allocation33_spill] sm:$0xff]  ;;  %v20231_v54 = vld [vmem:[#allocation75_spill] sm:$0xff] }
 0x229   :  { %v15706_v33 = vsel %vm1707_vm10, %v2829_v12, %v2933_v29  ;;  %11626 = vmatprep.subr.bf16.mxu1 %v15693_v20  ;;  %v4160_v18 = vsel %vm1705_vm9, %v20216_v8, %v4159_v48  ;;  %11025 = vmatmul.mubr.msk.f32.gmra.mrb[6].mxu1 %vm2403_vm11, %v15589_v45  ;;  %v4154_v7 = vsel %vm1705_vm9, %v20217_v60, %v4153_v6  ;;  %v20230_v53 = vld [vmem:[#allocation81_spill] sm:$0xff]  ;;  %v20232_v50 = vld [vmem:[#allocation3_spill] sm:$0xff]  ;;  %v20233_v6 = vld [vmem:[#allocation78_spill] sm:$0xff] }
 0x22a   :  { %20213 = vst [vmem:[#allocation269_spill] sm:$0xff] %v15706_v33  ;;  %v4161_v10 = vsel %vm1707_vm10, %v20218_v57, %v4160_v18  ;;  %v4163_v56 = vsel %vm1699_vm6, %v20220_v58, %v20219_v28  ;;  %v690_v49 = vadd.f32 %v20222_v31, %v20221_v24  ;;  %11027 = vmatprep.mubr.msk.f32.mxu1 %vm2403_vm11, %v15476_v35  ;;  %v20226_v35 = vld [vmem:[#allocation47_spill] sm:$0xff] }
 0x22b   :  { %v4155_v5 = vsel %vm1707_vm10, %v15710_v42, %v4154_v7  ;;  %v15734_v39 = vrot.slane %v20223_v15, %v12809_v43  ;;  %v4164_v19 = vsel %vm1701_vm7, %v20224_v27, %v4163_v56  ;;  %v685_v44 = vadd.f32 %v20222_v31, %v20225_v36  ;;  %v20234_v28 = vld [vmem:[#allocation71_spill] sm:$0xff]  ;;  %v20235_v56 = vld [vmem:[#allocation89_spill] sm:$0xff] }
 0x22c   :  { %v15741_v23 = vsel %vm1808_vm12, 0.0, %v4155_v5  ;;  %v15744_v37 = vsel %vm1808_vm12, 0.0, %v4161_v10  ;;  %v4165_v12 = vsel %vm1703_vm8, %v20226_v35, %v4164_v19  ;;  %v764_v16 = vmax.f32 %v690_v49, 0.0 }
 0x22d   :  { %v4166_v26 = vsel %vm1705_vm9, %v20227_v34, %v4165_v12  ;;  %v763_v62 = vmax.f32 %v685_v44, 0.0  ;;  %v15752_v55 = vrot.slane %v20228_v21, %v12809_v43  ;;  %v4169_v41 = vsel %vm1699_vm6, %v20231_v54, %v20230_v53  ;;  %11028 = vmatmul.mubr.msk.f32.gmra.mrb[8].mxu1 %vm2403_vm11, %v15608_v47  ;;  %v20242_v47 = vld [vmem:[#allocation93_spill] sm:$0xff] }
 0x22e   :  { %v4167_v29 = vsel %vm1707_vm10, %v15734_v39, %v4166_v26  ;;  %v3685_v14 = vcombine.high %v764_v16, %v764_v16  ;;  %v15762_v48 = vrot.slane %v764_v16, %v20232_v50  ;;  %v4170_v18 = vsel %vm1701_vm7, %v20233_v6, %v4169_v41  ;;  %11030 = vmatprep.mubr.msk.f32.mxu1 %vm2403_vm11, %v15619_v4  ;;  %v20238_v16 = vld [vmem:[#allocation5_spill] sm:$0xff] }
 0x22f   :  { %20229 = vst [vmem:[#allocation271_spill] sm:$0xff] %v15752_v55  ;;  %v3668_v7 = vcombine.high %v763_v62, %v763_v62  ;;  %v3675_v10 = vrot.slane %v763_v62, %v20232_v50  ;;  %v4171_v58 = vsel %vm1703_vm8, %v20234_v28, %v4170_v18  ;;  %v15773_v24 = vrot.slane %v20235_v56, %v12809_v43  ;;  %v20241_v4 = vld [vmem:[#allocation97_spill] sm:$0xff]  ;;  %v20361_v28 = vld [vmem:[#allocation114_spill] sm:$0xff] }
 0x230   :  { %v15776_v31 = vsel %vm1808_vm12, 0.0, %v4167_v29  ;;  %v15779_v49 = vrot.slane %v3685_v14, %v20232_v50  ;;  %v15783_v5 = vcombine.high %v15762_v48, %v15762_v48  ;;  %v15787_v19 = vrot.slane %v15762_v48, %v12809_v43 }
 0x231   :  { %20236 = vst [vmem:[#allocation284_spill] sm:$0xff] %v15773_v24  ;;  %v3682_v36 = vrot.slane %v3668_v7, %v20232_v50  ;;  %v3683_v44 = vcombine.high %v3675_v10, %v3675_v10  ;;  %v4125_v12 = vrot.slane %v3675_v10, %v12809_v43  ;;  %v4980_v26 = vrot.slane %v3675_v10, %v20238_v16  ;;  %v20244_v10 = vld [vmem:[#allocation106_spill] sm:$0xff] }
 0x232   :  { %20237 = vst [vmem:[#allocation289_spill] sm:$0xff] %v15787_v19  ;;  %11031 = vmatmul.mubr.msk.f32.gmra.mrb[10].mxu1 %vm2403_vm11, %v15648_v17  ;;  %v15796_v62 = vcombine.high %v15779_v49, %v15779_v49  ;;  %v15800_v53 = vrot.slane %v15783_v5, %v12809_v43  ;;  %v20240_v17 = vld [vmem:[#allocation72_spill] sm:$0xff]  ;;  %v15833_v40 = vrot.slane %v20244_v10, %v12809_v43  ;;  %v20264_v50 = vld [vmem:[#allocation158_spill] sm:$0xff] }
 0x233   :  { %11033 = vmatprep.mubr.msk.f32.mxu1 %vm2403_vm11, %v15675_v46  ;;  %v15808_v29 = vcombine.high %v3682_v36, %v3682_v36  ;;  %v4129_v14 = vrot.slane %v3683_v44, %v12809_v43  ;;  %v15812_v18 = vrot.slane %v3682_v36, %v12809_v43  ;;  %v4984_v7 = vrot.slane %v3683_v44, %v20238_v16 }
 0x234   :  { %20239 = vst [vmem:[#allocation28_spill] sm:$0xff] %v15800_v53  ;;  %v4988_v54 = vrot.slane %v3682_v36, %v20238_v16  ;;  %v4172_v41 = vsel %vm1705_vm9, %v20240_v17, %v4171_v58  ;;  %v4175_v46 = vsel %vm1699_vm6, %v20242_v47, %v20241_v4  ;;  %20245 = vst [vmem:[#allocation50_spill] sm:$0xff] %v15833_v40  ;;  %v20246_v36 = vld [vmem:[#allocation96_spill] sm:$0xff]  ;;  %v20321_v17 = vld [vmem:[#allocation14_spill] sm:$0xff] }
 0x235   :  { %v15825_v45 = vrot.slane %v15808_v29, %v12809_v43  ;;  %v15828_v63 = vsel %vm1697_vm5, %v4129_v14, %v4125_v12  ;;  %v5114_v44 = vsel %vm2297_vm4, %v4984_v7, %v4980_v26  ;;  %v5488_v47 = vsel %vm2297_vm4, %v4129_v14, %v4125_v12  ;;  %v20249_v12 = vld [vmem:[#allocation119_spill] sm:$0xff] }
 0x236   :  { %11034 = vmatmul.mubr.msk.f32.gmra.mrb[12].mxu1 %vm2403_vm11, %v15678_v0  ;;  %v4173_v4 = vsel %vm1707_vm10, %v15752_v55, %v4172_v41  ;;  %v4176_v13 = vsel %vm1701_vm7, %v20246_v36, %v4175_v46  ;;  %v15847_v26 = vsel %vm1697_vm5, %v4988_v54, %v5114_v44  ;;  %v15851_v7 = vsel %vm1697_vm5, %v15812_v18, %v5488_v47  ;;  %v20248_v0 = vld [vmem:[#allocation91_spill] sm:$0xff] }
 0x237   :  { %20243 = vst [vmem:[#allocation37_spill] sm:$0xff] %v15825_v45  ;;  %11036 = vmatprep.mubr.msk.f32.mxu1 %vm2403_vm11, %v15696_v38  ;;  %20247 = vst [vmem:[#allocation48_spill] sm:$0xff] %v15851_v7  ;;  %v4177_v58 = vsel %vm1703_vm8, %v20248_v0, %v4176_v13  ;;  %v20250_v14 = vld [vmem:[#allocation115_spill] sm:$0xff]  ;;  %v4265_v51 = vsel %vm1808_vm12, 0.0, %v4173_v4  ;;  %v20252_v38 = vld [vmem:[#allocation116_spill] sm:$0xff] }
 0x238   :  { %v4181_v41 = vsel %vm1699_vm6, %v20250_v14, %v20249_v12  ;;  %v20251_v46 = vld [vmem:[#allocation95_spill] sm:$0xff]  ;;  %v20255_v13 = vld [vmem:[#allocation112_spill] sm:$0xff]  ;;  %v20258_v4 = vld [vmem:[#allocation138_spill] sm:$0xff] }
 0x239   :  { %v4178_v1 = vsel %vm1705_vm9, %v20251_v46, %v4177_v58  ;;  %v4182_v54 = vsel %vm1701_vm7, %v20252_v38, %v4181_v41  ;;  %v20253_v44 = vld [vmem:[#allocation139_spill] sm:$0xff]  ;;  %v20259_v41 = vld [vmem:[#allocation113_spill] sm:$0xff] }
 0x23a   :  { %v4187_v47 = vsel %vm1699_vm6, %v20254_v30, %v20253_v44  ;;  %v4179_v2 = vsel %vm1707_vm10, %v15773_v24, %v4178_v1  ;;  %v4183_v3 = vsel %vm1703_vm8, %v20255_v13, %v4182_v54  ;;  %v20256_v12 = vld [vmem:[#allocation127_spill] sm:$0xff]  ;;  %11037 = vmatmul.mubr.msk.f32.gmra.mrb[14].mxu1 %vm2403_vm11, %v15706_v33  ;;  %v20260_v30 = vld [vmem:[#allocation134_spill] sm:$0xff]  ;;  %v20320_v0 = vld [vmem:[#allocation21_spill] sm:$0xff] }
 0x23b   :  { %v15872_v14 = vrot.slane %v20256_v12, %v12809_v43  ;;  %v4188_v58 = vsel %vm1701_vm7, %v20258_v4, %v4187_v47  ;;  %v4184_v52 = vsel %vm1705_vm9, %v20259_v41, %v4183_v3  ;;  %v20261_v1 = vld [vmem:[#allocation147_spill] sm:$0xff]  ;;  %v10022_v47 = vld [vmem:[%s19357_s3 + $0x90] sm:$0xff]  ;;  %v10023_v33 = vld [vmem:[%s19357_s3 + $0x98] sm:$0xff]  ;;  %11047 = vmatprep.mubr.msk.f32.mxu1 %vm2403_vm11, %v15741_v23  ;;  %v4266_v3 = vsel %vm1808_vm12, 0.0, %v4179_v2 }
 0x23c   :  { %v4189_v44 = vsel %vm1703_vm8, %v20260_v30, %v4188_v58  ;;  %v15884_v9 = vrot.slane %v20261_v1, %v12809_v43  ;;  %v20263_v54 = vld [vmem:[#allocation163_spill] sm:$0xff]  ;;  %v4185_v58 = vsel %vm1707_vm10, %v15833_v40, %v4184_v52  ;;  %v20270_v2 = vld [vmem:[#allocation186_spill] sm:$0xff] }
 0x23d   :  { %20257 = vst [vmem:[#allocation23_spill] sm:$0xff] %v15872_v14  ;;  %v4193_v22 = vsel %vm1699_vm6, %v20264_v50, %v20263_v54  ;;  %v4190_v7 = vsel %vm1705_vm9, %v20265_v32, %v4189_v44  ;;  %v20266_v50 = vld [vmem:[#allocation162_spill] sm:$0xff]  ;;  %v20267_v4 = vld [vmem:[#allocation151_spill] sm:$0xff]  ;;  %v4267_v40 = vsel %vm1808_vm12, 0.0, %v4185_v58 }
 0x23e   :  { %20262 = vst [vmem:[#allocation36_spill] sm:$0xff] %v15884_v9  ;;  %v4194_v54 = vsel %vm1701_vm7, %v20266_v50, %v4193_v22  ;;  %v4191_v30 = vsel %vm1707_vm10, %v15872_v14, %v4190_v7  ;;  %v20268_v24 = vld [vmem:[#allocation171_spill] sm:$0xff]  ;;  %v20272_v44 = vld [vmem:[#allocation154_spill] sm:$0xff]  ;;  %v20273_v22 = vld [vmem:[#allocation185_spill] sm:$0xff]  ;;  %v11629_v7 = vpack.c.bf16 %v10023_v33, %v10022_v47  ;;  %11048 = vmatmul.mubr.msk.f32.vlgmr.msra.gmra.mrb[0].mxu1 %vm2403_vm11, %v15744_v37 }
 0x23f   :  { %v4195_v41 = vsel %vm1703_vm8, %v20267_v4, %v4194_v54  ;;  %v15910_v23 = vrot.slane %v20268_v24, %v12809_v43  ;;  %v20271_v13 = vld [vmem:[#allocation183_spill] sm:$0xff]  ;;  %v4268_v54 = vsel %vm1808_vm12, 0.0, %v4191_v30  ;;  %v20274_v14 = vld [vmem:[#allocation177_spill] sm:$0xff]  ;;  %v20276_v58 = vld [vmem:[#allocation198_spill] sm:$0xff]  ;;  %11628 = vmatpush3.bf16.msra.mxu1 %v15693_v20  ;;  %11050 = vmatprep.mubr.msk.f32.mxu1 %vm2403_vm11, %v15776_v31 }
 0x240   :  { %v4199_v52 = vsel %vm1699_vm6, %v20271_v13, %v20270_v2  ;;  %v4196_v32 = vsel %vm1705_vm9, %v20272_v44, %v4195_v41  ;;  %v20275_v2 = vld [vmem:[#allocation201_spill] sm:$0xff]  ;;  %v20277_v37 = vld [vmem:[#allocation179_spill] sm:$0xff]  ;;  %v20280_v47 = vld [vmem:[#allocation200_spill] sm:$0xff]  ;;  %11630 = vmatprep.subr.bf16.mxu1 %v11629_v7 }
 0x241   :  { %20269 = vst [vmem:[#allocation67_spill] sm:$0xff] %v15910_v23  ;;  %v4200_v50 = vsel %vm1701_vm7, %v20273_v22, %v4199_v52  ;;  %v4197_v4 = vsel %vm1707_vm10, %v15884_v9, %v4196_v32  ;;  %v4205_v46 = vsel %vm1699_vm6, %v20276_v58, %v20275_v2  ;;  %v20278_v30 = vld [vmem:[#allocation191_spill] sm:$0xff]  ;;  %v20281_v20 = vld [vmem:[#allocation194_spill] sm:$0xff]  ;;  %v20282_v31 = vld [vmem:[#allocation205_spill] sm:$0xff] }
 0x242   :  { %v4201_v13 = vsel %vm1703_vm8, %v20274_v14, %v4200_v50  ;;  %v4269_v33 = vsel %vm1808_vm12, 0.0, %v4197_v4  ;;  %v15938_v32 = vrot.slane %v20278_v30, %v12809_v43  ;;  %v4206_v50 = vsel %vm1701_vm7, %v20280_v47, %v4205_v46  ;;  %v20284_v58 = vld [vmem:[#allocation215_spill] sm:$0xff]  ;;  %v20286_v9 = vld [vmem:[#allocation196_spill] sm:$0xff]  ;;  %v20287_v44 = vld [vmem:[#allocation214_spill] sm:$0xff]  ;;  %11051 = vmatmul.mubr.msk.f32.gmra.mrb[2].mxu1 %vm2403_vm11, %v4265_v51 }
 0x243   :  { %v4202_v41 = vsel %vm1705_vm9, %v20277_v37, %v4201_v13  ;;  %v4207_v2 = vsel %vm1703_vm8, %v20281_v20, %v4206_v50  ;;  %v15948_v4 = vrot.slane %v20282_v31, %v12809_v43  ;;  %v20285_v13 = vld [vmem:[#allocation212_spill] sm:$0xff]  ;;  %v20290_v47 = vld [vmem:[#allocation234_spill] sm:$0xff]  ;;  %11053 = vmatprep.mubr.msk.f32.mxu1 %vm2403_vm11, %v4266_v3  ;;  %11632 = vmatpush3.bf16.msra.mxu1 %v11629_v7  ;;  %v20300_v38 = vld [vmem:[#allocation227_spill] sm:$0xff] }
 0x244   :  { %20279 = vst [vmem:[#allocation69_spill] sm:$0xff] %v15938_v32  ;;  %v4203_v52 = vsel %vm1707_vm10, %v15910_v23, %v4202_v41  ;;  %v4211_v37 = vsel %vm1699_vm6, %v20285_v13, %v20284_v58  ;;  %v4208_v14 = vsel %vm1705_vm9, %v20286_v9, %v4207_v2  ;;  %v20288_v41 = vld [vmem:[#allocation222_spill] sm:$0xff]  ;;  %v20292_v58 = vld [vmem:[#allocation207_spill] sm:$0xff]  ;;  %v20293_v2 = vld [vmem:[#allocation233_spill] sm:$0xff] }
 0x245   :  { %20283 = vst [vmem:[#allocation38_spill] sm:$0xff] %v15948_v4  ;;  %v4212_v46 = vsel %vm1701_vm7, %v20287_v44, %v4211_v37  ;;  %v15959_v23 = vrot.slane %v20288_v41, %v12809_v43  ;;  %v20291_v50 = vld [vmem:[#allocation230_spill] sm:$0xff]  ;;  %v4209_v22 = vsel %vm1707_vm10, %v15938_v32, %v4208_v14  ;;  %v20294_v37 = vld [vmem:[#allocation239_spill] sm:$0xff]  ;;  %v4270_v55 = vsel %vm1808_vm12, 0.0, %v4203_v52  ;;  %v20301_v52 = vld [vmem:[#allocation249_spill] sm:$0xff] }
 0x246   :  { %v4217_v20 = vsel %vm1699_vm6, %v20291_v50, %v20290_v47  ;;  %v4213_v13 = vsel %vm1703_vm8, %v20292_v58, %v4212_v46  ;;  %v15973_v44 = vrot.slane %v20294_v37, %v12809_v43  ;;  %v20296_v47 = vld [vmem:[#allocation210_spill] sm:$0xff]  ;;  %v20297_v50 = vld [vmem:[#allocation225_spill] sm:$0xff]  ;;  %v20299_v46 = vld [vmem:[#allocation248_spill] sm:$0xff]  ;;  %11054 = vmatmul.mubr.msk.f32.gmra.mrb[4].mxu1 %vm2403_vm11, %v4267_v40 }
 0x247   :  { %20289 = vst [vmem:[#allocation55_spill] sm:$0xff] %v15959_v23  ;;  %v4218_v9 = vsel %vm1701_vm7, %v20293_v2, %v4217_v20  ;;  %v4214_v51 = vsel %vm1705_vm9, %v20296_v47, %v4213_v13  ;;  %v20298_v32 = vld [vmem:[#allocation250_spill] sm:$0xff]  ;;  %v4271_v20 = vsel %vm1808_vm12, 0.0, %v4209_v22  ;;  %v20302_v47 = vld [vmem:[#allocation243_spill] sm:$0xff]  ;;  %11056 = vmatprep.mubr.msk.f32.mxu1 %vm2403_vm11, %v4268_v54  ;;  %v20310_v40 = vld [vmem:[#allocation276_spill] sm:$0xff] }
 0x248   :  { %20295 = vst [vmem:[#allocation56_spill] sm:$0xff] %v15973_v44  ;;  %v4219_v14 = vsel %vm1703_vm8, %v20297_v50, %v4218_v9  ;;  %v4223_v58 = vsel %vm1699_vm6, %v20299_v46, %v20298_v32  ;;  %v4215_v2 = vsel %vm1707_vm10, %v15948_v4, %v4214_v51  ;;  %v20303_v50 = vld [vmem:[#allocation258_spill] sm:$0xff]  ;;  %v20306_v46 = vld [vmem:[#allocation264_spill] sm:$0xff] }
 0x249   :  { %v4220_v3 = vsel %vm1705_vm9, %v20300_v38, %v4219_v14  ;;  %v4224_v7 = vsel %vm1701_vm7, %v20301_v52, %v4223_v58  ;;  %v15997_v32 = vrot.slane %v20303_v50, %v12809_v43  ;;  %v20305_v22 = vld [vmem:[#allocation266_spill] sm:$0xff]  ;;  %v4272_v14 = vsel %vm1808_vm12, 0.0, %v4215_v2  ;;  %v20309_v52 = vld [vmem:[#allocation260_spill] sm:$0xff]  ;;  %v20312_v2 = vld [vmem:[#allocation285_spill] sm:$0xff] }
 0x24a   :  { %v4221_v13 = vsel %vm1707_vm10, %v15959_v23, %v4220_v3  ;;  %v4225_v9 = vsel %vm1703_vm8, %v20302_v47, %v4224_v7  ;;  %v4229_v51 = vsel %vm1699_vm6, %v20306_v46, %v20305_v22  ;;  %v20307_v38 = vld [vmem:[#allocation246_spill] sm:$0xff]  ;;  %v20308_v23 = vld [vmem:[#allocation265_spill] sm:$0xff]  ;;  %v16016_v46 = vrot.slane %v20310_v40, %v12809_v43  ;;  %11057 = vmatmul.mubr.msk.f32.gmra.mrb[6].mxu1 %vm2403_vm11, %v4269_v33 }
 0x24b   :  { %20304 = vst [vmem:[#allocation86_spill] sm:$0xff] %v15997_v32  ;;  %v4273_v58 = vsel %vm1808_vm12, 0.0, %v4221_v13  ;;  %v4226_v3 = vsel %vm1705_vm9, %v20307_v38, %v4225_v9  ;;  %v4230_v7 = vsel %vm1701_vm7, %v20308_v23, %v4229_v51  ;;  %v20313_v13 = vld [vmem:[#allocation282_spill] sm:$0xff]  ;;  %v20315_v51 = vld [vmem:[#allocation283_spill] sm:$0xff]  ;;  %v20319_v23 = vld [vmem:[#allocation16_spill] sm:$0xff]  ;;  %11059 = vmatprep.mubr.msk.f32.mxu1 %vm2403_vm11, %v4270_v55 }
 0x24c   :  { %v4227_v47 = vsel %vm1707_vm10, %v15973_v44, %v4226_v3  ;;  %v4231_v22 = vsel %vm1703_vm8, %v20309_v52, %v4230_v7  ;;  %20311 = vst [vmem:[#allocation27_spill] sm:$0xff] %v16016_v46  ;;  %v4235_v4 = vsel %vm1699_vm6, %v20313_v13, %v20312_v2  ;;  %v20314_v9 = vld [vmem:[#allocation262_spill] sm:$0xff]  ;;  %v16027_v3 = vrot.slane %v15779_v49, %v12809_v43  ;;  %v10041_v2 = vld [vmem:[%s19357_s3 + $0xa8] sm:$0xff] }
 0x24d   :  { %v4232_v38 = vsel %vm1705_vm9, %v20314_v9, %v4231_v22  ;;  %v4236_v54 = vsel %vm1701_vm7, %v20315_v51, %v4235_v4  ;;  %v4241_v7 = vsel %vm1699_vm6, %v15812_v18, %v15828_v63  ;;  %v10040_v52 = vld [vmem:[%s19357_s3 + $0xa0] sm:$0xff]  ;;  %v4274_v22 = vsel %vm1808_vm12, 0.0, %v4227_v47  ;;  %v20318_v63 = vld [vmem:[#allocation280_spill] sm:$0xff] }
 0x24e   :  { %20316 = vst [vmem:[#allocation76_spill] sm:$0xff] %v16027_v3  ;;  %v4233_v4 = vsel %vm1707_vm10, %v15997_v32, %v4232_v38  ;;  %v20317_v13 = vld [vmem:[#allocation278_spill] sm:$0xff]  ;;  %v4242_v51 = vsel %vm1701_vm7, %v15825_v45, %v4241_v7  ;;  %v4528_v47 = vrot.slane %v20319_v23, %v20238_v16  ;;  %v20322_v38 = vrot.slane %v20321_v17, %v20238_v16  ;;  %v20323_v7 = vld [vmem:[#allocation8_spill] sm:$0xff]  ;;  %v20352_v32 = vld [vmem:[#allocation99_spill] sm:$0xff] }
 0x24f   :  { %v4237_v9 = vsel %vm1703_vm8, %v20317_v13, %v4236_v54  ;;  %v4243_v44 = vsel %vm1703_vm8, %v15787_v19, %v4242_v51  ;;  %v20324_v51 = vrot.slane %v20323_v7, %v20238_v16  ;;  %v16066_v45 = vpack.c.bf16 %v10041_v2, %v10040_v52  ;;  %11060 = vmatmul.mubr.msk.f32.gmra.mrb[8].mxu1 %vm2403_vm11, %v4271_v20  ;;  %v20353_v13 = vld [vmem:[#allocation92_spill] sm:$0xff] }
 0x250   :  { %v4238_v18 = vsel %vm1705_vm9, %v20318_v63, %v4237_v9  ;;  %v5011_v54 = vsel %vm1699_vm6, %v20322_v38, %v20320_v0  ;;  %v4244_v9 = vsel %vm1705_vm9, %v15800_v53, %v4243_v44  ;;  %v4275_v63 = vsel %vm1808_vm12, 0.0, %v4233_v4  ;;  %v20325_v0 = vld [vmem:[#allocation11_spill] sm:$0xff]  ;;  %v20327_v38 = vld [vmem:[#allocation42_spill] sm:$0xff]  ;;  %11062 = vmatprep.mubr.msk.f32.mxu1 %vm2403_vm11, %v4272_v14 }
 0x251   :  { %v4239_v33 = vsel %vm1707_vm10, %v16016_v46, %v4238_v18  ;;  %v5012_v19 = vsel %vm1701_vm7, %v20324_v51, %v5011_v54  ;;  %v4245_v17 = vsel %vm1707_vm10, %v16027_v3, %v4244_v9  ;;  %v20326_v55 = vrot.slane %v20325_v0, %v20238_v16  ;;  %v20328_v46 = vld [vmem:[#allocation26_spill] sm:$0xff]  ;;  %11634 = vmatprep.subr.bf16.mxu1 %v16066_v45  ;;  %v20333_v0 = vld [vmem:[#allocation29_spill] sm:$0xff] }
 0x252   :  { %v20329_v44 = vrot.slane %v20328_v46, %v20238_v16  ;;  %v4276_v54 = vsel %vm1808_vm12, 0.0, %v4239_v33  ;;  %v4277_v52 = vsel %vm1808_vm12, 0.0, %v4245_v17  ;;  %v20330_v2 = vrot.slane %v20214_v11, %v20238_v16  ;;  %v20331_v9 = vld [vmem:[#allocation30_spill] sm:$0xff] }
 0x253   :  { %v5013_v18 = vsel %vm1703_vm8, %v20326_v55, %v5012_v19  ;;  %v20332_v19 = vrot.slane %v20331_v9, %v20238_v16  ;;  %v20334_v33 = vrot.slane %v20333_v0, %v20238_v16  ;;  %v20335_v11 = vld [vmem:[#allocation46_spill] sm:$0xff]  ;;  %v20354_v36 = vrot.slane %v20353_v13, %v20238_v16  ;;  %11063 = vmatmul.mubr.msk.f32.gmra.mrb[10].mxu1 %vm2403_vm11, %v4273_v58 }
 0x254   :  { %v5019_v7 = vsel %vm1701_vm7, %v20329_v44, %v20327_v38  ;;  %v5014_v4 = vsel %vm1705_vm9, %v20330_v2, %v5013_v18  ;;  %v4592_v55 = vrot.slane %v20335_v11, %v20238_v16  ;;  %v20336_v18 = vld [vmem:[#allocation64_spill] sm:$0xff]  ;;  %v20337_v38 = vld [vmem:[#allocation53_spill] sm:$0xff]  ;;  %v20362_v13 = vrot.slane %v20361_v28, %v20238_v16  ;;  %11065 = vmatprep.mubr.msk.f32.mxu1 %vm2403_vm11, %v4274_v22 }
 0x255   :  { %v5020_v51 = vsel %vm1703_vm8, %v20332_v19, %v5019_v7  ;;  %v5015_v46 = vsel %vm1707_vm10, %v4528_v47, %v5014_v4  ;;  %v20338_v44 = vrot.slane %v20337_v38, %v20238_v16  ;;  %v20339_v7 = vld [vmem:[#allocation31_spill] sm:$0xff]  ;;  %v20341_v4 = vld [vmem:[#allocation40_spill] sm:$0xff]  ;;  %v20345_v38 = vld [vmem:[#allocation74_spill] sm:$0xff]  ;;  %v20372_v22 = vrot.slane %v20244_v10, %v20238_v16 }
 0x256   :  { %v5021_v17 = vsel %vm1705_vm9, %v20334_v33, %v5020_v51  ;;  %v20340_v20 = vrot.slane %v20339_v7, %v20238_v16  ;;  %v20342_v9 = vrot.slane %v20341_v4, %v20238_v16  ;;  %v20343_v51 = vld [vmem:[#allocation70_spill] sm:$0xff] }
 0x257   :  { %v5025_v2 = vsel %vm1699_vm6, %v20338_v44, %v20336_v18  ;;  %v4624_v0 = vrot.slane %v20343_v51, %v20238_v16  ;;  %v20344_v33 = vld [vmem:[#allocation82_spill] sm:$0xff]  ;;  %v20346_v18 = vrot.slane %v20345_v38, %v20238_v16  ;;  %v20347_v44 = vld [vmem:[#allocation45_spill] sm:$0xff]  ;;  %v5039_v38 = vsel %vm1699_vm6, %v20354_v36, %v20352_v32  ;;  %11066 = vmatmul.mubr.msk.f32.gmra.mrb[12].mxu1 %vm2403_vm11, %v4275_v63 }
 0x258   :  { %v16109_v47 = vsel %vm1707_vm10, %v20340_v20, %v5021_v17  ;;  %v5026_v19 = vsel %vm1701_vm7, %v20342_v9, %v5025_v2  ;;  %v20348_v3 = vrot.slane %v20347_v44, %v20238_v16  ;;  %v20349_v20 = vld [vmem:[#allocation63_spill] sm:$0xff]  ;;  %v20351_v2 = vld [vmem:[#allocation94_spill] sm:$0xff]  ;;  %v20363_v32 = vrot.slane %v20228_v21, %v20238_v16  ;;  %11068 = vmatprep.mubr.msk.f32.mxu1 %vm2403_vm11, %v4276_v54 }
 0x259   :  { %v5032_v14 = vsel %vm1699_vm6, %v20346_v18, %v20344_v33  ;;  %v20350_v53 = vrot.slane %v20349_v20, %v20238_v16  ;;  %v4656_v9 = vrot.slane %v20351_v2, %v20238_v16  ;;  %v20355_v33 = vrot.slane %v20223_v15, %v20238_v16  ;;  %v20360_v2 = vld [vmem:[#allocation120_spill] sm:$0xff] }
 0x25a   :  { %v5027_v17 = vsel %vm1703_vm8, %v20348_v3, %v5026_v19  ;;  %v20356_v3 = vld [vmem:[#allocation68_spill] sm:$0xff]  ;;  %v5046_v36 = vsel %vm1699_vm6, %v20362_v13, %v20360_v2  ;;  %v20368_v21 = vrot.slane %v20235_v56, %v20238_v16  ;;  %v20369_v2 = vld [vmem:[#allocation111_spill] sm:$0xff]  ;;  %v20373_v56 = vld [vmem:[#allocation133_spill] sm:$0xff]  ;;  %v20391_v63 = vrot.slane %v20256_v12, %v20238_v16 }
 0x25b   :  { %v5033_v4 = vsel %vm1701_vm7, %v20350_v53, %v5032_v14  ;;  %v5028_v18 = vsel %vm1705_vm9, %v20355_v33, %v5027_v17  ;;  %v20357_v19 = vrot.slane %v20356_v3, %v20238_v16  ;;  %v20358_v53 = vld [vmem:[#allocation87_spill] sm:$0xff]  ;;  %v4720_v13 = vrot.slane %v20373_v56, %v20238_v16  ;;  %11069 = vmatmul.mubr.msk.f32.gmra.mrb[14].mxu1 %vm2403_vm11, %v4277_v52 }
 0x25c   :  { %v20359_v14 = vrot.slane %v20358_v53, %v20238_v16  ;;  %v5029_v15 = vsel %vm1707_vm10, %v4592_v55, %v5028_v18  ;;  %v20366_v3 = vld [vmem:[#allocation103_spill] sm:$0xff]  ;;  %v4688_v18 = vrot.slane %v20369_v2, %v20238_v16  ;;  %v20396_v54 = vrot.slane %v20261_v1, %v20238_v16  ;;  %11079 = vmatprep.mubr.msk.f32.mxu1 %vm2403_vm11, %v5015_v46 }
 0x25d   :  { %v5034_v44 = vsel %vm1703_vm8, %v20357_v19, %v5033_v4  ;;  %v20364_v4 = vld [vmem:[#allocation90_spill] sm:$0xff]  ;;  %v20367_v19 = vrot.slane %v20366_v3, %v20238_v16  ;;  %v20412_v52 = vrot.slane %v20278_v30, %v20238_v16 }
 0x25e   :  { %v5040_v20 = vsel %vm1701_vm7, %v20359_v14, %v5039_v38  ;;  %v5035_v17 = vsel %vm1705_vm9, %v20363_v32, %v5034_v44  ;;  %v20365_v33 = vrot.slane %v20364_v4, %v20238_v16  ;;  %v20370_v44 = vld [vmem:[#allocation108_spill] sm:$0xff]  ;;  %v20375_v32 = vld [vmem:[#allocation135_spill] sm:$0xff]  ;;  %v20419_v30 = vld [vmem:[#allocation206_spill] sm:$0xff] }
 0x25f   :  { %v5047_v28 = vsel %vm1701_vm7, %v20367_v19, %v5046_v36  ;;  %v16170_v58 = vsel %vm1707_vm10, %v4624_v0, %v5035_v17  ;;  %v20371_v53 = vrot.slane %v20370_v44, %v20238_v16  ;;  %v20374_v36 = vld [vmem:[#allocation142_spill] sm:$0xff]  ;;  %v20376_v17 = vrot.slane %v20375_v32, %v20238_v16  ;;  %v20381_v44 = vld [vmem:[#allocation157_spill] sm:$0xff]  ;;  %11080 = vmatmul.mubr.msk.f32.vlgmr.msra.gmra.mrb[0].mxu1 %vm2403_vm11, %v16109_v47 }
 0x260   :  { %v5041_v38 = vsel %vm1703_vm8, %v20365_v33, %v5040_v20  ;;  %v10042_v33 = vld [vmem:[%s19357_s3 + $0xb0] sm:$0xff]  ;;  %11636 = vmatpush3.bf16.msra.mxu1 %v16066_v45  ;;  %11082 = vmatprep.mubr.msk.f32.mxu1 %vm2403_vm11, %v5029_v15 }
 0x261   :  { %v5042_v55 = vsel %vm1705_vm9, %v20368_v21, %v5041_v38  ;;  %v5048_v14 = vsel %vm1703_vm8, %v20371_v53, %v5047_v28  ;;  %v5053_v4 = vsel %vm1699_vm6, %v20376_v17, %v20374_v36  ;;  %v20377_v38 = vld [vmem:[#allocation126_spill] sm:$0xff]  ;;  %v20379_v28 = vld [vmem:[#allocation153_spill] sm:$0xff]  ;;  %v20382_v53 = vrot.slane %v20381_v44, %v20238_v16 }
 0x262   :  { %v16183_v20 = vsel %vm1707_vm10, %v4656_v9, %v5042_v55  ;;  %v5049_v0 = vsel %vm1705_vm9, %v20372_v22, %v5048_v14  ;;  %v10043_v9 = vld [vmem:[%s19357_s3 + $0xb8] sm:$0xff]  ;;  %v20378_v3 = vrot.slane %v20377_v38, %v20238_v16  ;;  %v4752_v21 = vrot.slane %v20379_v28, %v20238_v16  ;;  %v20383_v22 = vld [vmem:[#allocation132_spill] sm:$0xff] }
 0x263   :  { %v16203_v10 = vsel %vm1707_vm10, %v4688_v18, %v5049_v0  ;;  %v20380_v55 = vld [vmem:[#allocation165_spill] sm:$0xff]  ;;  %v20384_v18 = vrot.slane %v20383_v22, %v20238_v16  ;;  %v20389_v28 = vld [vmem:[#allocation182_spill] sm:$0xff]  ;;  %11083 = vmatmul.mubr.msk.f32.gmra.mrb[2].mxu1 %vm2403_vm11, %v16170_v58  ;;  %v20455_v58 = vrot.slane %v20310_v40, %v20238_v16 }
 0x264   :  { %v5054_v19 = vsel %vm1701_vm7, %v20378_v3, %v5053_v4  ;;  %v5060_v14 = vsel %vm1699_vm6, %v20382_v53, %v20380_v55  ;;  %v20385_v36 = vld [vmem:[#allocation145_spill] sm:$0xff]  ;;  %v20387_v4 = vld [vmem:[#allocation178_spill] sm:$0xff]  ;;  %v20388_v3 = vld [vmem:[#allocation187_spill] sm:$0xff]  ;;  %v20390_v44 = vrot.slane %v20389_v28, %v20238_v16  ;;  %v11637_v28 = vpack.c.bf16 %v10043_v9, %v10042_v33  ;;  %11085 = vmatprep.mubr.msk.f32.mxu1 %vm2403_vm11, %v16183_v20 }
 0x265   :  { %v5055_v0 = vsel %vm1703_vm8, %v20384_v18, %v5054_v19  ;;  %v20386_v32 = vrot.slane %v20385_v36, %v20238_v16  ;;  %v4784_v38 = vrot.slane %v20387_v4, %v20238_v16  ;;  %v20392_v53 = vld [vmem:[#allocation150_spill] sm:$0xff]  ;;  %v20394_v18 = vld [vmem:[#allocation168_spill] sm:$0xff]  ;;  %v20403_v9 = vld [vmem:[#allocation195_spill] sm:$0xff]  ;;  %v20458_v20 = vrot.slane %v15779_v49, %v20238_v16 }
 0x266   :  { %v5067_v55 = vsel %vm1699_vm6, %v20390_v44, %v20388_v3  ;;  %v5056_v19 = vsel %vm1705_vm9, %v20391_v63, %v5055_v0  ;;  %v20393_v22 = vrot.slane %v20392_v53, %v20238_v16  ;;  %v20395_v36 = vrot.slane %v20394_v18, %v20238_v16  ;;  %v20397_v0 = vld [vmem:[#allocation172_spill] sm:$0xff]  ;;  %v20400_v53 = vld [vmem:[#allocation197_spill] sm:$0xff]  ;;  %11638 = vmatprep.subr.bf16.mxu1 %v11637_v28 }
 0x267   :  { %v5061_v17 = vsel %vm1701_vm7, %v20386_v32, %v5060_v14  ;;  %v16246_v3 = vsel %vm1707_vm10, %v4720_v13, %v5056_v19  ;;  %v20398_v44 = vrot.slane %v20397_v0, %v20238_v16  ;;  %v20402_v13 = vrot.slane %v20268_v24, %v20238_v16  ;;  %v20441_v45 = vld [vmem:[#allocation261_spill] sm:$0xff]  ;;  %11640 = vmatpush3.bf16.msra.mxu1 %v11637_v28 }
 0x268   :  { %v5062_v14 = vsel %vm1703_vm8, %v20393_v22, %v5061_v17  ;;  %v5068_v32 = vsel %vm1701_vm7, %v20395_v36, %v5067_v55  ;;  %v20399_v17 = vld [vmem:[#allocation202_spill] sm:$0xff]  ;;  %v20401_v22 = vrot.slane %v20400_v53, %v20238_v16  ;;  %v4816_v19 = vrot.slane %v20403_v9, %v20238_v16  ;;  %11086 = vmatmul.mubr.msk.f32.gmra.mrb[4].mxu1 %vm2403_vm11, %v16203_v10 }
 0x269   :  { %v5063_v12 = vsel %vm1705_vm9, %v20396_v54, %v5062_v14  ;;  %v5069_v63 = vsel %vm1703_vm8, %v20398_v44, %v5068_v32  ;;  %v20404_v14 = vld [vmem:[#allocation190_spill] sm:$0xff]  ;;  %v20409_v44 = vld [vmem:[#allocation216_spill] sm:$0xff]  ;;  %v4944_v15 = vrot.slane %v20441_v45, %v20238_v16  ;;  %11088 = vmatprep.mubr.msk.f32.mxu1 %vm2403_vm11, %v16246_v3 }
 0x26a   :  { %v5074_v55 = vsel %vm1699_vm6, %v20401_v22, %v20399_v17  ;;  %v16262_v33 = vsel %vm1707_vm10, %v4752_v21, %v5063_v12  ;;  %v5070_v1 = vsel %vm1705_vm9, %v20402_v13, %v5069_v63  ;;  %v20405_v18 = vrot.slane %v20404_v14, %v20238_v16  ;;  %v20406_v21 = vld [vmem:[#allocation193_spill] sm:$0xff]  ;;  %v20408_v12 = vld [vmem:[#allocation208_spill] sm:$0xff]  ;;  %v20410_v63 = vld [vmem:[#allocation211_spill] sm:$0xff] }
 0x26b   :  { %v16276_v32 = vsel %vm1707_vm10, %v4784_v38, %v5070_v1  ;;  %v20407_v54 = vrot.slane %v20406_v21, %v20238_v16  ;;  %v4848_v0 = vrot.slane %v20408_v12, %v20238_v16  ;;  %v20411_v17 = vrot.slane %v20410_v63, %v20238_v16  ;;  %v20413_v22 = vld [vmem:[#allocation204_spill] sm:$0xff]  ;;  %v20415_v1 = vld [vmem:[#allocation226_spill] sm:$0xff] }
 0x26c   :  { %v5075_v36 = vsel %vm1701_vm7, %v20405_v18, %v5074_v55  ;;  %v20414_v55 = vrot.slane %v20413_v22, %v20238_v16  ;;  %v4880_v14 = vrot.slane %v20415_v1, %v20238_v16  ;;  %v20416_v18 = vld [vmem:[#allocation235_spill] sm:$0xff]  ;;  %v20421_v63 = vld [vmem:[#allocation220_spill] sm:$0xff]  ;;  %11089 = vmatmul.mubr.msk.f32.gmra.mrb[6].mxu1 %vm2403_vm11, %v16262_v33 }
 0x26d   :  { %v5076_v24 = vsel %vm1703_vm8, %v20407_v54, %v5075_v36  ;;  %v5081_v53 = vsel %vm1699_vm6, %v20411_v17, %v20409_v44  ;;  %v20417_v36 = vld [vmem:[#allocation229_spill] sm:$0xff]  ;;  %v20422_v17 = vrot.slane %v20421_v63, %v20238_v16  ;;  %v20424_v22 = vld [vmem:[#allocation247_spill] sm:$0xff]  ;;  %11091 = vmatprep.mubr.msk.f32.mxu1 %vm2403_vm11, %v16276_v32 }
 0x26e   :  { %v5077_v38 = vsel %vm1705_vm9, %v20412_v52, %v5076_v24  ;;  %v5082_v13 = vsel %vm1701_vm7, %v20414_v55, %v5081_v53  ;;  %v20418_v21 = vrot.slane %v20417_v36, %v20238_v16  ;;  %v20420_v24 = vrot.slane %v20419_v30, %v20238_v16  ;;  %v20423_v52 = vld [vmem:[#allocation251_spill] sm:$0xff]  ;;  %v20429_v30 = vld [vmem:[#allocation245_spill] sm:$0xff] }
 0x26f   :  { %v16306_v46 = vsel %vm1707_vm10, %v4816_v19, %v5077_v38  ;;  %v20425_v55 = vrot.slane %v20424_v22, %v20238_v16  ;;  %v20426_v19 = vrot.slane %v20282_v31, %v20238_v16  ;;  %v20472_v33 = vld [vmem:[#allocation95_spill] sm:$0xff] }
 0x270   :  { %v5088_v54 = vsel %vm1699_vm6, %v20418_v21, %v20416_v18  ;;  %v5083_v44 = vsel %vm1703_vm8, %v20420_v24, %v5082_v13  ;;  %v20427_v18 = vld [vmem:[#allocation224_spill] sm:$0xff]  ;;  %v4912_v24 = vrot.slane %v20429_v30, %v20238_v16  ;;  %11092 = vmatmul.mubr.msk.f32.gmra.mrb[8].mxu1 %vm2403_vm11, %v16306_v46  ;;  %v20486_v46 = vld [vmem:[#allocation153_spill] sm:$0xff] }
 0x271   :  { %v5089_v53 = vsel %vm1701_vm7, %v20422_v17, %v5088_v54  ;;  %v5095_v36 = vsel %vm1699_vm6, %v20425_v55, %v20423_v52  ;;  %v5084_v38 = vsel %vm1705_vm9, %v20426_v19, %v5083_v44  ;;  %v20428_v21 = vrot.slane %v20427_v18, %v20238_v16  ;;  %v20430_v54 = vld [vmem:[#allocation238_spill] sm:$0xff]  ;;  %v20435_v19 = vld [vmem:[#allocation267_spill] sm:$0xff] }
 0x272   :  { %v20431_v63 = vrot.slane %v20430_v54, %v20238_v16  ;;  %v16338_v31 = vsel %vm1707_vm10, %v4848_v0, %v5084_v38  ;;  %v20432_v44 = vrot.slane %v20288_v41, %v20238_v16  ;;  %v20436_v18 = vld [vmem:[#allocation263_spill] sm:$0xff]  ;;  %v20438_v41 = vrot.slane %v20294_v37, %v20238_v16  ;;  %v20439_v38 = vld [vmem:[#allocation256_spill] sm:$0xff] }
 0x273   :  { %v5090_v13 = vsel %vm1703_vm8, %v20428_v21, %v5089_v53  ;;  %v20433_v53 = vld [vmem:[#allocation242_spill] sm:$0xff]  ;;  %v20444_v37 = vld [vmem:[#allocation287_spill] sm:$0xff]  ;;  %11094 = vmatprep.mubr.msk.f32.mxu1 %vm2403_vm11, %v16338_v31  ;;  %v5354_v31 = vrot.slane %v20387_v4, %v12809_v43 }
 0x274   :  { %v5096_v17 = vsel %vm1701_vm7, %v20431_v63, %v5095_v36  ;;  %v5091_v52 = vsel %vm1705_vm9, %v20432_v44, %v5090_v13  ;;  %v20434_v22 = vrot.slane %v20433_v53, %v20238_v16  ;;  %v20437_v36 = vrot.slane %v20436_v18, %v20238_v16 }
 0x275   :  { %v16356_v47 = vsel %vm1707_vm10, %v4880_v14, %v5091_v52  ;;  %v20440_v13 = vrot.slane %v20439_v38, %v20238_v16  ;;  %v20445_v52 = vld [vmem:[#allocation281_spill] sm:$0xff]  ;;  %v10061_v38 = vld [vmem:[%s19357_s3 + $0xc8] sm:$0xff] }
 0x276   :  { %v5097_v55 = vsel %vm1703_vm8, %v20434_v22, %v5096_v17  ;;  %v5102_v21 = vsel %vm1699_vm6, %v20437_v36, %v20435_v19  ;;  %v20442_v17 = vld [vmem:[#allocation259_spill] sm:$0xff]  ;;  %v20446_v53 = vrot.slane %v20445_v52, %v20238_v16  ;;  %v20456_v52 = vrot.slane %v15783_v5, %v20238_v16  ;;  %11095 = vmatmul.mubr.msk.f32.gmra.mrb[10].mxu1 %vm2403_vm11, %v16356_v47  ;;  %v20500_v47 = vld [vmem:[#allocation196_spill] sm:$0xff] }
 0x277   :  { %v5098_v0 = vsel %vm1705_vm9, %v20438_v41, %v5097_v55  ;;  %v5103_v54 = vsel %vm1701_vm7, %v20440_v13, %v5102_v21  ;;  %v20443_v14 = vrot.slane %v20442_v17, %v20238_v16  ;;  %v20447_v55 = vrot.slane %v20303_v50, %v20238_v16  ;;  %v20448_v19 = vld [vmem:[#allocation275_spill] sm:$0xff] }
 0x278   :  { %v16367_v63 = vsel %vm1707_vm10, %v4912_v24, %v5098_v0  ;;  %v5109_v22 = vsel %vm1699_vm6, %v20446_v53, %v20444_v37  ;;  %v20449_v18 = vrot.slane %v20448_v19, %v20238_v16  ;;  %v5008_v21 = vrot.slane %v15796_v62, %v20238_v16  ;;  %v10060_v50 = vld [vmem:[%s19357_s3 + $0xc0] sm:$0xff] }
 0x279   :  { %v5104_v44 = vsel %vm1703_vm8, %v20443_v14, %v5103_v54  ;;  %v20450_v41 = vrot.slane %v15808_v29, %v20238_v16  ;;  %v20451_v54 = vld [vmem:[#allocation279_spill] sm:$0xff]  ;;  %v20452_v29 = vld [vmem:[#allocation277_spill] sm:$0xff]  ;;  %v5322_v19 = vrot.slane %v20319_v23, %v12809_v43  ;;  %11097 = vmatprep.mubr.msk.f32.mxu1 %vm2403_vm11, %v16367_v63  ;;  %v5366_v63 = vrot.slane %v20415_v1, %v12809_v43 }
 0x27a   :  { %v5105_v24 = vsel %vm1705_vm9, %v20447_v55, %v5104_v44  ;;  %v5110_v36 = vsel %vm1701_vm7, %v20449_v18, %v5109_v22  ;;  %v4976_v17 = vrot.slane %v20451_v54, %v20238_v16  ;;  %v20454_v44 = vrot.slane %v15762_v48, %v20238_v16  ;;  %v20457_v22 = vld [vmem:[#allocation19_spill] sm:$0xff] }
 0x27b   :  { %v5116_v0 = vsel %vm1699_vm6, %v20450_v41, %v15847_v26  ;;  %v16404_v13 = vsel %vm1707_vm10, %v4944_v15, %v5105_v24  ;;  %v20453_v26 = vrot.slane %v20452_v29, %v20238_v16  ;;  %v5385_v48 = vsel %vm1699_vm6, %v20210_v25, %v20457_v22  ;;  %v20459_v18 = vld [vmem:[#allocation39_spill] sm:$0xff]  ;;  %v20466_v29 = vld [vmem:[#allocation96_spill] sm:$0xff] }
 0x27c   :  { %v5117_v37 = vsel %vm1701_vm7, %v20454_v44, %v5116_v0  ;;  %v5386_v40 = vsel %vm1701_vm7, %v20215_v59, %v5385_v48  ;;  %v16438_v24 = vpack.c.bf16 %v10061_v38, %v10060_v50  ;;  %v5393_v49 = vsel %vm1701_vm7, %v20212_v61, %v20459_v18  ;;  %v20462_v0 = vld [vmem:[#allocation80_spill] sm:$0xff]  ;;  %v20469_v44 = vld [vmem:[#allocation117_spill] sm:$0xff]  ;;  %11098 = vmatmul.mubr.msk.f32.gmra.mrb[12].mxu1 %vm2403_vm11, %v16404_v13 }
 0x27d   :  { %v5111_v14 = vsel %vm1703_vm8, %v20453_v26, %v5110_v36  ;;  %v5118_v53 = vsel %vm1703_vm8, %v20456_v52, %v5117_v37  ;;  %v5387_v25 = vsel %vm1703_vm8, %v20217_v60, %v5386_v40  ;;  %v5394_v36 = vsel %vm1703_vm8, %v20216_v8, %v5393_v49  ;;  %v20470_v37 = vld [vmem:[#allocation116_spill] sm:$0xff]  ;;  %v20477_v49 = vld [vmem:[#allocation138_spill] sm:$0xff] }
 0x27e   :  { %v5112_v15 = vsel %vm1705_vm9, %v20455_v58, %v5111_v14  ;;  %v5119_v28 = vsel %vm1705_vm9, %v20458_v20, %v5118_v53  ;;  %v5388_v59 = vsel %vm1705_vm9, %v15710_v42, %v5387_v25  ;;  %11642 = vmatprep.subr.bf16.mxu1 %v16438_v24  ;;  %v5395_v60 = vsel %vm1705_vm9, %v20218_v57, %v5394_v36  ;;  %v20473_v48 = vld [vmem:[#allocation112_spill] sm:$0xff]  ;;  %v20475_v25 = vld [vmem:[#allocation113_spill] sm:$0xff]  ;;  %v20478_v36 = vld [vmem:[#allocation174_spill] sm:$0xff] }
 0x27f   :  { %v16430_v55 = vsel %vm1707_vm10, %v4976_v17, %v5112_v15  ;;  %v16441_v5 = vsel %vm1707_vm10, %v5008_v21, %v5119_v28  ;;  %v20460_v21 = vld [vmem:[#allocation60_spill] sm:$0xff]  ;;  %v16463_v61 = vsel %vm1707_vm10, %v5322_v19, %v5388_v59  ;;  %v5330_v42 = vrot.slane %v20335_v11, %v12809_v43  ;;  %v20465_v17 = vld [vmem:[#allocation98_spill] sm:$0xff]  ;;  %v20471_v15 = vld [vmem:[#allocation271_spill] sm:$0xff] }
 0x280   :  { %v5399_v23 = vsel %vm1699_vm6, %v20224_v27, %v20460_v21  ;;  %v20461_v8 = vrot.slane %v20339_v7, %v12809_v43  ;;  %v5334_v41 = vrot.slane %v20343_v51, %v12809_v43  ;;  %v5406_v57 = vsel %vm1699_vm6, %v20233_v6, %v20462_v0  ;;  %v20464_v7 = vld [vmem:[#allocation94_spill] sm:$0xff]  ;;  %v20467_v6 = vld [vmem:[#allocation72_spill] sm:$0xff]  ;;  %v20479_v21 = vld [vmem:[#allocation175_spill] sm:$0xff]  ;;  %11100 = vmatprep.mubr.msk.f32.mxu1 %vm2403_vm11, %v16430_v55 }
 0x281   :  { %v5400_v10 = vsel %vm1701_vm7, %v20226_v35, %v5399_v23  ;;  %v20463_v35 = vld [vmem:[#allocation71_spill] sm:$0xff]  ;;  %v5338_v38 = vrot.slane %v20464_v7, %v12809_v43  ;;  %v5420_v58 = vsel %vm1699_vm6, %v20470_v37, %v20469_v44  ;;  %v5342_v22 = vrot.slane %v20369_v2, %v12809_v43  ;;  %v20474_v40 = vld [vmem:[#allocation284_spill] sm:$0xff]  ;;  %v20482_v0 = vld [vmem:[#allocation137_spill] sm:$0xff]  ;;  %11101 = vmatmul.mubr.msk.f32.gmra.mrb[14].mxu1 %vm2403_vm11, %v16441_v5 }
 0x282   :  { %v16475_v27 = vsel %vm1707_vm10, %v20461_v8, %v5395_v60  ;;  %v5401_v3 = vsel %vm1703_vm8, %v20227_v34, %v5400_v10  ;;  %v5407_v50 = vsel %vm1701_vm7, %v20463_v35, %v5406_v57  ;;  %v5413_v34 = vsel %vm1699_vm6, %v20466_v29, %v20465_v17  ;;  %v20476_v18 = vld [vmem:[#allocation140_spill] sm:$0xff]  ;;  %v20480_v60 = vld [vmem:[#allocation50_spill] sm:$0xff]  ;;  %v20485_v7 = vld [vmem:[#allocation23_spill] sm:$0xff]  ;;  %11111 = vmatprep.mubr.msk.f32.mxu1 %vm2403_vm11, %v16463_v61 }
 0x283   :  { %v5402_v11 = vsel %vm1705_vm9, %v15734_v39, %v5401_v3  ;;  %v5408_v26 = vsel %vm1703_vm8, %v20467_v6, %v5407_v50  ;;  %v20468_v39 = vld [vmem:[#allocation91_spill] sm:$0xff]  ;;  %v5421_v20 = vsel %vm1701_vm7, %v20473_v48, %v5420_v58  ;;  %v5427_v59 = vsel %vm1699_vm6, %v20477_v49, %v20476_v18  ;;  %v20481_v10 = vld [vmem:[#allocation134_spill] sm:$0xff]  ;;  %v20489_v6 = vld [vmem:[#allocation185_spill] sm:$0xff] }
 0x284   :  { %v16496_v51 = vsel %vm1707_vm10, %v5330_v42, %v5402_v11  ;;  %v5414_v14 = vsel %vm1701_vm7, %v20468_v39, %v5413_v34  ;;  %v5409_v52 = vsel %vm1705_vm9, %v20471_v15, %v5408_v26  ;;  %v5422_v32 = vsel %vm1703_vm8, %v20475_v25, %v5421_v20  ;;  %v20483_v11 = vld [vmem:[#allocation164_spill] sm:$0xff]  ;;  %v20484_v35 = vld [vmem:[#allocation162_spill] sm:$0xff]  ;;  %v20487_v29 = vld [vmem:[#allocation151_spill] sm:$0xff] }
 0x285   :  { %v5415_v53 = vsel %vm1703_vm8, %v20472_v33, %v5414_v14  ;;  %v16516_v28 = vsel %vm1707_vm10, %v5334_v41, %v5409_v52  ;;  %v16528_v2 = vsel %vm1697_vm5, %v20479_v21, %v20478_v36  ;;  %v5423_v42 = vsel %vm1705_vm9, %v20480_v60, %v5422_v32  ;;  %v20490_v14 = vld [vmem:[#allocation154_spill] sm:$0xff]  ;;  %v20491_v37 = vld [vmem:[#allocation177_spill] sm:$0xff]  ;;  %v20492_v15 = vld [vmem:[#allocation36_spill] sm:$0xff]  ;;  %11112 = vmatmul.mubr.msk.f32.vlgmr.msra.gmra.mrb[0].mxu1 %vm2403_vm11, %v16475_v27 }
 0x286   :  { %v5416_v19 = vsel %vm1705_vm9, %v20474_v40, %v5415_v53  ;;  %v5428_v8 = vsel %vm1701_vm7, %v20481_v10, %v5427_v59  ;;  %v16540_v3 = vsel %vm1707_vm10, %v5342_v22, %v5423_v42  ;;  %v5346_v41 = vrot.slane %v20373_v56, %v12809_v43  ;;  %v20488_v56 = vld [vmem:[#allocation188_spill] sm:$0xff]  ;;  %v20493_v33 = vld [vmem:[#allocation179_spill] sm:$0xff]  ;;  %v20497_v32 = vld [vmem:[#allocation194_spill] sm:$0xff]  ;;  %11644 = vmatpush3.bf16.msra.mxu1 %v16438_v24 }
 0x287   :  { %v16531_v23 = vsel %vm1707_vm10, %v5338_v38, %v5416_v19  ;;  %v5429_v57 = vsel %vm1703_vm8, %v20482_v0, %v5428_v8  ;;  %v5434_v50 = vsel %vm1699_vm6, %v20484_v35, %v20483_v11  ;;  %v5350_v17 = vrot.slane %v20486_v46, %v12809_v43  ;;  %v20494_v48 = vld [vmem:[#allocation203_spill] sm:$0xff]  ;;  %v20495_v20 = vld [vmem:[#allocation200_spill] sm:$0xff]  ;;  %v20499_v59 = vld [vmem:[#allocation214_spill] sm:$0xff]  ;;  %11114 = vmatprep.mubr.msk.f32.mxu1 %vm2403_vm11, %v16496_v51 }
 0x288   :  { %v5430_v38 = vsel %vm1705_vm9, %v20485_v7, %v5429_v57  ;;  %v5435_v34 = vsel %vm1701_vm7, %v20487_v29, %v5434_v50  ;;  %v5441_v26 = vsel %vm1699_vm6, %v20489_v6, %v20488_v56  ;;  %v5358_v22 = vrot.slane %v20403_v9, %v12809_v43  ;;  %v20496_v19 = vld [vmem:[#allocation67_spill] sm:$0xff]  ;;  %v20502_v8 = vld [vmem:[#allocation69_spill] sm:$0xff]  ;;  %v20503_v0 = vld [vmem:[#allocation210_spill] sm:$0xff] }
 0x289   :  { %v16561_v39 = vsel %vm1707_vm10, %v5346_v41, %v5430_v38  ;;  %v5436_v44 = vsel %vm1703_vm8, %v20490_v14, %v5435_v34  ;;  %v5442_v58 = vsel %vm1701_vm7, %v20491_v37, %v5441_v26  ;;  %v5448_v40 = vsel %vm1699_vm6, %v20495_v20, %v20494_v48  ;;  %v20498_v49 = vld [vmem:[#allocation219_spill] sm:$0xff]  ;;  %v20504_v11 = vld [vmem:[#allocation236_spill] sm:$0xff]  ;;  %v20505_v35 = vld [vmem:[#allocation233_spill] sm:$0xff]  ;;  %11115 = vmatmul.mubr.msk.f32.gmra.mrb[2].mxu1 %vm2403_vm11, %v16516_v28 }
 0x28a   :  { %v5437_v52 = vsel %vm1705_vm9, %v20492_v15, %v5436_v44  ;;  %v5443_v53 = vsel %vm1703_vm8, %v20493_v33, %v5442_v58  ;;  %v5449_v18 = vsel %vm1701_vm7, %v20497_v32, %v5448_v40  ;;  %v5455_v9 = vsel %vm1699_vm6, %v20499_v59, %v20498_v49  ;;  %v20501_v42 = vld [vmem:[#allocation207_spill] sm:$0xff]  ;;  %v20507_v46 = vld [vmem:[#allocation225_spill] sm:$0xff]  ;;  %v20508_v29 = vld [vmem:[#allocation252_spill] sm:$0xff]  ;;  %11117 = vmatprep.mubr.msk.f32.mxu1 %vm2403_vm11, %v16531_v23 }
 0x28b   :  { %v16581_v4 = vsel %vm1707_vm10, %v5350_v17, %v5437_v52  ;;  %v5444_v25 = vsel %vm1705_vm9, %v20496_v19, %v5443_v53  ;;  %v5450_v21 = vsel %vm1703_vm8, %v20500_v47, %v5449_v18  ;;  %v5362_v60 = vrot.slane %v20408_v12, %v12809_v43  ;;  %v20506_v12 = vld [vmem:[#allocation38_spill] sm:$0xff]  ;;  %v20509_v34 = vld [vmem:[#allocation249_spill] sm:$0xff]  ;;  %v20510_v6 = vld [vmem:[#allocation227_spill] sm:$0xff] }
 0x28c   :  { %v16593_v36 = vsel %vm1707_vm10, %v5354_v31, %v5444_v25  ;;  %v5456_v10 = vsel %vm1701_vm7, %v20501_v42, %v5455_v9  ;;  %v5451_v41 = vsel %vm1705_vm9, %v20502_v8, %v5450_v21  ;;  %v5462_v50 = vsel %vm1699_vm6, %v20505_v35, %v20504_v11  ;;  %v20511_v44 = vld [vmem:[#allocation243_spill] sm:$0xff]  ;;  %v20513_v15 = vld [vmem:[#allocation246_spill] sm:$0xff]  ;;  %v20514_v33 = vld [vmem:[#allocation268_spill] sm:$0xff] }
 0x28d   :  { %v5457_v57 = vsel %vm1703_vm8, %v20503_v0, %v5456_v10  ;;  %v16611_v7 = vsel %vm1707_vm10, %v5358_v22, %v5451_v41  ;;  %v5463_v17 = vsel %vm1701_vm7, %v20507_v46, %v5462_v50  ;;  %v5469_v56 = vsel %vm1699_vm6, %v20509_v34, %v20508_v29  ;;  %v20512_v37 = vld [vmem:[#allocation55_spill] sm:$0xff]  ;;  %v20515_v53 = vld [vmem:[#allocation265_spill] sm:$0xff]  ;;  %v20516_v48 = vld [vmem:[#allocation56_spill] sm:$0xff]  ;;  %11118 = vmatmul.mubr.msk.f32.gmra.mrb[4].mxu1 %vm2403_vm11, %v16540_v3 }
 0x28e   :  { %v5458_v38 = vsel %vm1705_vm9, %v20506_v12, %v5457_v57  ;;  %v5464_v26 = vsel %vm1703_vm8, %v20510_v6, %v5463_v17  ;;  %v5370_v14 = vrot.slane %v20429_v30, %v12809_v43  ;;  %v5470_v31 = vsel %vm1701_vm7, %v20511_v44, %v5469_v56  ;;  %v20517_v55 = vld [vmem:[#allocation260_spill] sm:$0xff]  ;;  %v20519_v25 = vld [vmem:[#allocation283_spill] sm:$0xff]  ;;  %v10063_v18 = vld [vmem:[%s19357_s3 + $0xd8] sm:$0xff]  ;;  %11120 = vmatprep.mubr.msk.f32.mxu1 %vm2403_vm11, %v16561_v39 }
 0x28f   :  { %v16623_v1 = vsel %vm1707_vm10, %v5362_v60, %v5458_v38  ;;  %v5465_v58 = vsel %vm1705_vm9, %v20512_v37, %v5464_v26  ;;  %v5471_v13 = vsel %vm1703_vm8, %v20513_v15, %v5470_v31  ;;  %v5374_v52 = vrot.slane %v20441_v45, %v12809_v43  ;;  %v20518_v19 = vld [vmem:[#allocation288_spill] sm:$0xff]  ;;  %v20520_v59 = vld [vmem:[#allocation262_spill] sm:$0xff]  ;;  %v20526_v5 = vld [vmem:[#allocation27_spill] sm:$0xff] }
 0x290   :  { %v5476_v22 = vsel %vm1699_vm6, %v20515_v53, %v20514_v33  ;;  %v16643_v30 = vsel %vm1707_vm10, %v5366_v63, %v5465_v58  ;;  %v5472_v20 = vsel %vm1705_vm9, %v20516_v48, %v5471_v13  ;;  %v5483_v32 = vsel %vm1699_vm6, %v20519_v25, %v20518_v19  ;;  %v10062_v45 = vld [vmem:[%s19357_s3 + $0xd0] sm:$0xff]  ;;  %v20521_v21 = vld [vmem:[#allocation278_spill] sm:$0xff]  ;;  %v10081_v58 = vld [vmem:[%s19357_s3 + $0xe8] sm:$0xff] }
 0x291   :  { %v5477_v40 = vsel %vm1701_vm7, %v20517_v55, %v5476_v22  ;;  %v16659_v49 = vsel %vm1707_vm10, %v5370_v14, %v5472_v20  ;;  %v5378_v47 = vrot.slane %v20451_v54, %v12809_v43  ;;  %v5484_v60 = vsel %vm1701_vm7, %v20521_v21, %v5483_v32  ;;  %v20522_v42 = vld [vmem:[#allocation86_spill] sm:$0xff]  ;;  %v20523_v8 = vld [vmem:[#allocation280_spill] sm:$0xff]  ;;  %v20525_v63 = vld [vmem:[#allocation37_spill] sm:$0xff]  ;;  %11121 = vmatmul.mubr.msk.f32.gmra.mrb[6].mxu1 %vm2403_vm11, %v16581_v4 }
 0x292   :  { %v5478_v9 = vsel %vm1703_vm8, %v20520_v59, %v5477_v40  ;;  %v5485_v41 = vsel %vm1703_vm8, %v20523_v8, %v5484_v60  ;;  %v5382_v0 = vrot.slane %v15796_v62, %v12809_v43  ;;  %v20524_v57 = vld [vmem:[#allocation48_spill] sm:$0xff]  ;;  %v20527_v50 = vld [vmem:[#allocation289_spill] sm:$0xff]  ;;  %v12232_v62 = vld [vmem:[%s19358_s2] ss:$0 sm:$0xff]  ;;  %v11645_v17 = vpack.c.bf16 %v10063_v18, %v10062_v45  ;;  %11123 = vmatprep.mubr.msk.f32.mxu1 %vm2403_vm11, %v16593_v36 }
 0x293   :  { %v5479_v10 = vsel %vm1705_vm9, %v20522_v42, %v5478_v9  ;;  %v5490_v11 = vsel %vm1699_vm6, %v20525_v63, %v20524_v57  ;;  %v5486_v35 = vsel %vm1705_vm9, %v20526_v5, %v5485_v41  ;;  %v20528_v38 = vld [vmem:[#allocation144_spill] sm:$0xff]  ;;  %v20530_v56 = vld [vmem:[#allocation218_spill] sm:$0xff]  ;;  %v20531_v26 = vld [vmem:[#allocation173_spill] sm:$0xff] }
 0x294   :  { %v16681_v54 = vsel %vm1707_vm10, %v5374_v52, %v5479_v10  ;;  %v5491_v12 = vsel %vm1701_vm7, %v20527_v50, %v5490_v11  ;;  %v700_v46 = vadd.f32 %v12232_v62, %v20528_v38  ;;  %v16692_v29 = vsel %vm1707_vm10, %v5378_v47, %v5486_v35  ;;  %v20529_v61 = vld [vmem:[#allocation28_spill] sm:$0xff]  ;;  %v10080_v37 = vld [vmem:[%s19357_s3 + $0xe0] sm:$0xff]  ;;  %11646 = vmatprep.subr.bf16.mxu1 %v11645_v17  ;;  %v20541_v21 = vld [vmem:[#allocation161_spill] sm:$0xff] }
 0x295   :  { %v5492_v34 = vsel %vm1703_vm8, %v20529_v61, %v5491_v12  ;;  %v695_v6 = vadd.f32 %v12232_v62, %v20530_v56  ;;  %v6024_v14 = vrot.slane %v20531_v26, %v20238_v16  ;;  %v20532_v44 = vld [vmem:[#allocation76_spill] sm:$0xff]  ;;  %v20534_v33 = vld [vmem:[#allocation166_spill] sm:$0xff]  ;;  %v20539_v32 = vld [vmem:[#allocation3_spill] sm:$0xff]  ;;  %v16730_v27 = vpack.c.bf16 %v10081_v58, %v10080_v37  ;;  %11648 = vmatpush3.bf16.msra.mxu1 %v11645_v17 }
 0x296   :  { %v5493_v31 = vsel %vm1705_vm9, %v20532_v44, %v5492_v34  ;;  %v766_v15 = vmax.f32 %v700_v46, 0.0  ;;  %v20533_v13 = vld [vmem:[#allocation176_spill] sm:$0xff]  ;;  %v20535_v53 = vrot.slane %v20534_v33, %v20238_v16  ;;  %v20536_v22 = vld [vmem:[#allocation170_spill] sm:$0xff]  ;;  %v20540_v18 = vld [vmem:[#allocation159_spill] sm:$0xff]  ;;  %11124 = vmatmul.mubr.msk.f32.gmra.mrb[8].mxu1 %vm2403_vm11, %v16611_v7 }
 0x297   :  { %v5817_v52 = vsel %vm1699_vm6, %v20533_v13, %v16528_v2  ;;  %v20537_v48 = vrot.slane %v20536_v22, %v20238_v16  ;;  %v16720_v55 = vsel %vm1707_vm10, %v5382_v0, %v5493_v31  ;;  %v765_v40 = vmax.f32 %v695_v6, 0.0  ;;  %v20538_v19 = vld [vmem:[#allocation180_spill] sm:$0xff]  ;;  %v20542_v42 = vld [vmem:[#allocation169_spill] sm:$0xff]  ;;  %v20544_v41 = vld [vmem:[#allocation155_spill] sm:$0xff]  ;;  %11650 = vmatprep.subr.bf16.mxu1 %v16730_v27  ;;  %11126 = vmatprep.mubr.msk.f32.mxu1 %vm2403_vm11, %v16623_v1 }
 0x298   :  { %v5818_v25 = vsel %vm1701_vm7, %v20538_v19, %v5817_v52  ;;  %v5743_v2 = vcombine.high %v766_v15, %v766_v15  ;;  %v5750_v45 = vrot.slane %v766_v15, %v20539_v32  ;;  %v20543_v24 = vrot.slane %v20542_v42, %v20238_v16  ;;  %v20545_v22 = vld [vmem:[#allocation152_spill] sm:$0xff] }
 0x299   :  { %v6073_v20 = vsel %vm2297_vm4, %v20537_v48, %v20535_v53  ;;  %v5819_v59 = vsel %vm1703_vm8, %v20540_v18, %v5818_v25  ;;  %v5726_v9 = vcombine.high %v765_v40, %v765_v40  ;;  %v5733_v47 = vrot.slane %v765_v40, %v20539_v32  ;;  %v10123_v36 = vld [vmem:[%s19359_s5 + $0x50] sm:$0xff]  ;;  %v10126_v7 = vld [vmem:[%s19359_s5 + $0x68] sm:$0xff] }
 0x29a   :  { %v5820_v60 = vsel %vm1705_vm9, %v20541_v21, %v5819_v59  ;;  %v6074_v51 = vsel %vm1697_vm5, %v20543_v24, %v6073_v20  ;;  %v5757_v10 = vrot.slane %v5743_v2, %v20539_v32  ;;  %v5758_v8 = vcombine.high %v5750_v45, %v5750_v45  ;;  %v20547_v2 = vld [vmem:[#allocation160_spill] sm:$0xff]  ;;  %11127 = vmatmul.mubr.msk.f32.gmra.mrb[10].mxu1 %vm2403_vm11, %v16643_v30 }
 0x29b   :  { %v16742_v0 = vrot.slane %v20544_v41, %v12809_v43  ;;  %v5807_v57 = vrot.slane %v5750_v45, %v12809_v43  ;;  %v5740_v63 = vrot.slane %v5726_v9, %v20539_v32  ;;  %v5741_v11 = vcombine.high %v5733_v47, %v5733_v47  ;;  %11129 = vmatprep.mubr.msk.f32.mxu1 %vm2403_vm11, %v16659_v49  ;;  %v10082_v30 = vld [vmem:[%s19357_s3 + $0xf0] sm:$0xff]  ;;  %v10083_v49 = vld [vmem:[%s19357_s3 + $0xf8] sm:$0xff] }
 0x29c   :  { %v5791_v5 = vrot.slane %v5733_v47, %v12809_v43  ;;  %v16751_v35 = vcombine.high %v5757_v10, %v5757_v10  ;;  %v6060_v50 = vrot.slane %v5750_v45, %v20238_v16  ;;  %v6044_v12 = vrot.slane %v5733_v47, %v20238_v16  ;;  %v20548_v45 = vld [vmem:[#allocation156_spill] sm:$0xff] }
 0x29d   :  { %v5811_v28 = vrot.slane %v5758_v8, %v12809_v43  ;;  %v5742_v62 = vcombine.high %v5740_v63, %v5740_v63  ;;  %v5795_v38 = vrot.slane %v5741_v11, %v12809_v43  ;;  %v5799_v46 = vrot.slane %v5740_v63, %v12809_v43 }
 0x29e   :  { %v6064_v61 = vrot.slane %v5758_v8, %v20238_v16  ;;  %v6048_v23 = vrot.slane %v5741_v11, %v20238_v16  ;;  %v6052_v17 = vrot.slane %v5740_v63, %v20238_v16  ;;  %v16764_v34 = vsel %vm1707_vm10, %v16742_v0, %v5820_v60  ;;  %v10121_v60 = vld [vmem:[%s19359_s5 + $0x40] sm:$0xff]  ;;  %v10122_v63 = vld [vmem:[%s19359_s5 + $0x48] sm:$0xff]  ;;  %11130 = vmatmul.mubr.msk.f32.gmra.mrb[12].mxu1 %vm2403_vm11, %v16681_v54 }
 0x29f   :  { %v5803_v56 = vrot.slane %v5742_v62, %v12809_v43  ;;  %v5822_v6 = vsel %vm1697_vm5, %v5795_v38, %v5791_v5  ;;  %v6056_v26 = vrot.slane %v5742_v62, %v20238_v16  ;;  %v6272_v44 = vsel %vm2297_vm4, %v5795_v38, %v5791_v5  ;;  %11132 = vmatprep.mubr.msk.f32.mxu1 %vm2403_vm11, %v16692_v29  ;;  %v10100_v29 = vld [vmem:[%s19357_s3 + $0x100] sm:$0xff] }
 0x2a0   :  { %v6080_v31 = vsel %vm2297_vm4, %v6048_v23, %v6044_v12  ;;  %v6273_v37 = vsel %vm1697_vm5, %v5799_v46, %v6272_v44  ;;  %v5815_v58 = vrot.slane %v5757_v10, %v12809_v43  ;;  %v5823_v15 = vsel %vm1699_vm6, %v5799_v46, %v5822_v6  ;;  %v10128_v6 = vld [vmem:[%s19359_s5 + $0x78] sm:$0xff]  ;;  %v20552_v44 = vld [vmem:[#allocation12_spill] sm:$0xff] }
 0x2a1   :  { %v6068_v3 = vrot.slane %v5757_v10, %v20238_v16  ;;  %v6081_v13 = vsel %vm1697_vm5, %v6052_v17, %v6080_v31  ;;  %v5824_v52 = vsel %vm1701_vm7, %v5803_v56, %v5823_v15  ;;  %v6075_v33 = vsel %vm1699_vm6, %v6024_v14, %v6074_v51  ;;  %v20551_v10 = vld [vmem:[#allocation181_spill] sm:$0xff]  ;;  %v10101_v31 = vld [vmem:[%s19357_s3 + $0x108] sm:$0xff] }
 0x2a2   :  { %v5825_v53 = vsel %vm1703_vm8, %v5807_v57, %v5824_v52  ;;  %v20546_v39 = vrot.slane %v20545_v22, %v20238_v16  ;;  %v6072_v20 = vrot.slane %v16751_v35, %v20238_v16  ;;  %v6082_v40 = vsel %vm1699_vm6, %v6056_v26, %v6081_v13  ;;  %11133 = vmatmul.mubr.msk.f32.gmra.mrb[14].mxu1 %vm2403_vm11, %v16720_v55  ;;  %v20554_v55 = vld [vmem:[#allocation25_spill] sm:$0xff]  ;;  %v20557_v13 = vld [vmem:[#allocation52_spill] sm:$0xff] }
 0x2a3   :  { %v5826_v25 = vsel %vm1705_vm9, %v5811_v28, %v5825_v53  ;;  %v6040_v14 = vrot.slane %v20547_v2, %v20238_v16  ;;  %v20549_v59 = vrot.slane %v20548_v45, %v20238_v16  ;;  %v6083_v47 = vsel %vm1701_vm7, %v6060_v50, %v6082_v40  ;;  %11143 = vmatprep.mubr.msk.f32.mxu1 %vm2403_vm11, %v20552_v44  ;;  %v20555_v15 = vld [vmem:[#allocation49_spill] sm:$0xff] }
 0x2a4   :  { %v6076_v48 = vsel %vm1701_vm7, %v20546_v39, %v6075_v33  ;;  %v16806_v4 = vsel %vm1707_vm10, %v5815_v58, %v5826_v25  ;;  %v20550_v42 = vrot.slane %v20544_v41, %v20238_v16  ;;  %v6084_v51 = vsel %vm1703_vm8, %v6064_v61, %v6083_v47  ;;  %v10124_v41 = vld [vmem:[%s19359_s5 + $0x58] sm:$0xff]  ;;  %v20562_v39 = vld [vmem:[#allocation83_spill] sm:$0xff]  ;;  %v10102_v25 = vld [vmem:[%s19357_s3 + $0x110] sm:$0xff] }
 0x2a5   :  { %v6077_v9 = vsel %vm1703_vm8, %v20549_v59, %v6076_v48  ;;  %v6267_v8 = vsel %vm1699_vm6, %v20538_v19, %v20551_v10  ;;  %v6085_v5 = vsel %vm1705_vm9, %v6068_v3, %v6084_v51  ;;  %v6260_v19 = vrot.slane %v20547_v2, %v12809_v43  ;;  %v20556_v3 = vld [vmem:[#allocation44_spill] sm:$0xff]  ;;  %v20558_v52 = vld [vmem:[#allocation65_spill] sm:$0xff]  ;;  %v20575_v10 = vld [vmem:[#allocation254_spill] sm:$0xff] }
 0x2a6   :  { %v6078_v24 = vsel %vm1705_vm9, %v20550_v42, %v6077_v9  ;;  %v6268_v50 = vsel %vm1701_vm7, %v20540_v18, %v6267_v8  ;;  %v16834_v12 = vsel %vm1707_vm10, %v6072_v20, %v6085_v5  ;;  %v6264_v38 = vrot.slane %v16751_v35, %v12809_v43  ;;  %v20559_v33 = vld [vmem:[#allocation61_spill] sm:$0xff]  ;;  %v20563_v48 = vld [vmem:[#allocation88_spill] sm:$0xff]  ;;  %v20564_v20 = vld [vmem:[#allocation107_spill] sm:$0xff] }
 0x2a7   :  { %v16826_v11 = vsel %vm1707_vm10, %v6040_v14, %v6078_v24  ;;  %v6269_v62 = vsel %vm1703_vm8, %v20541_v21, %v6268_v50  ;;  %v6274_v46 = vsel %vm1699_vm6, %v5803_v56, %v6273_v37  ;;  %v11665_v18 = vpack.c.bf16 %v10122_v63, %v10121_v60  ;;  %v10125_v56 = vld [vmem:[%s19359_s5 + $0x60] sm:$0xff]  ;;  %v20560_v53 = vld [vmem:[#allocation73_spill] sm:$0xff]  ;;  %v20567_v59 = vld [vmem:[#allocation84_spill] sm:$0xff] }
 0x2a8   :  { %v6270_v61 = vsel %vm1705_vm9, %v16742_v0, %v6269_v62  ;;  %v6275_v23 = vsel %vm1701_vm7, %v5807_v57, %v6274_v46  ;;  %v11669_v17 = vpack.c.bf16 %v10124_v41, %v10123_v36  ;;  %v11673_v1 = vpack.c.bf16 %v10126_v7, %v10125_v56  ;;  %v20553_v37 = vld [vmem:[#allocation35_spill] sm:$0xff]  ;;  %v20561_v22 = vld [vmem:[#allocation85_spill] sm:$0xff]  ;;  %v20566_v14 = vld [vmem:[#allocation62_spill] sm:$0xff] }
 0x2a9   :  { %v16849_v21 = vsel %vm1707_vm10, %v6260_v19, %v6270_v61  ;;  %v6276_v35 = vsel %vm1703_vm8, %v5811_v28, %v6275_v23  ;;  %11666 = vmatprep.subr.bf16.mxu0 %v11665_v18  ;;  %v10127_v28 = vld [vmem:[%s19359_s5 + $0x70] sm:$0xff]  ;;  %v11653_v54 = vpack.c.bf16 %v10083_v49, %v10082_v30  ;;  %11144 = vmatmul.mubr.msk.f32.vlgmr.msra.gmra.mrb[0].mxu1 %vm2403_vm11, %v20553_v37  ;;  %v5831_v40 = vsel %vm1808_vm12, 0.0, %v16806_v4  ;;  %v10103_v2 = vld [vmem:[%s19357_s3 + $0x118] sm:$0xff]  ;;  %v20571_v4 = vld [vmem:[#allocation167_spill] sm:$0xff] }
 0x2aa   :  { %v6277_v0 = vsel %vm1705_vm9, %v5815_v58, %v6276_v35  ;;  %11668 = vmatpush3.bf16.msra.mxu0 %v11665_v18  ;;  %v11677_v26 = vpack.c.bf16 %v10128_v6, %v10127_v28  ;;  %11652 = vmatpush3.bf16.msra.mxu1 %v16730_v27  ;;  %v11657_v58 = vpack.c.bf16 %v10101_v31, %v10100_v29  ;;  %v5830_v27 = vsel %vm1808_vm12, 0.0, %v16764_v34  ;;  %v20565_v34 = vld [vmem:[#allocation104_spill] sm:$0xff]  ;;  %v20568_v9 = vld [vmem:[#allocation105_spill] sm:$0xff]  ;;  %v20570_v60 = vld [vmem:[#allocation146_spill] sm:$0xff] }
 0x2ab   :  { %v16860_v57 = vsel %vm1707_vm10, %v6264_v38, %v6277_v0  ;;  %11670 = vmatprep.subr.bf16.mxu0 %v11669_v17  ;;  %11146 = vmatprep.mubr.msk.f32.mxu1 %vm2403_vm11, %v20554_v55  ;;  %v11661_v45 = vpack.c.bf16 %v10103_v2, %v10102_v25  ;;  %v20569_v47 = vld [vmem:[#allocation129_spill] sm:$0xff]  ;;  %v20577_v63 = vld [vmem:[#allocation4_spill] sm:$0xff]  ;;  %v20578_v36 = vld [vmem:[#allocation6_spill] sm:$0xff] }
 0x2ac   :  { %11654 = vmatprep.subr.bf16.mxu1 %v11653_v54  ;;  %v20572_v42 = vld [vmem:[#allocation189_spill] sm:$0xff]  ;;  %v20579_v41 = vld [vmem:[#allocation22_spill] sm:$0xff]  ;;  %v20584_v62 = vld [vmem:[#allocation124_spill] sm:$0xff] }
 0x2ad   :  { %11147 = vmatmul.mubr.msk.f32.gmra.mrb[2].mxu1 %vm2403_vm11, %v20555_v15  ;;  %v20573_v24 = vld [vmem:[#allocation221_spill] sm:$0xff]  ;;  %v20582_v19 = vld [vmem:[#allocation102_spill] sm:$0xff]  ;;  %v20585_v38 = vld [vmem:[#allocation148_spill] sm:$0xff] }
 0x2ae   :  { %11672 = vmatpush3.bf16.msra.mxu0 %v11669_v17  ;;  %11149 = vmatprep.mubr.msk.f32.mxu1 %vm2403_vm11, %v20556_v3  ;;  %v20574_v51 = vld [vmem:[#allocation237_spill] sm:$0xff]  ;;  %v20583_v50 = vld [vmem:[#allocation130_spill] sm:$0xff]  ;;  %v20588_v61 = vld [vmem:[#allocation228_spill] sm:$0xff] }
 0x2af   :  { %11674 = vmatprep.subr.bf16.mxu0 %v11673_v1  ;;  %11656 = vmatpush3.bf16.msra.mxu1 %v11653_v54  ;;  %v20576_v8 = vld [vmem:[#allocation273_spill] sm:$0xff]  ;;  %v20589_v23 = vld [vmem:[#allocation232_spill] sm:$0xff]  ;;  %v20590_v18 = vld [vmem:[#allocation255_spill] sm:$0xff] }
 0x2b0   :  { %11658 = vmatprep.subr.bf16.mxu1 %v11657_v58  ;;  %v20581_v5 = vld [vmem:[#allocation125_spill] sm:$0xff]  ;;  %v6690_v7 = vld [vmem:[%s19359_s5 + $0x8] sm:$0xff]  ;;  %v10141_v2 = vld [vmem:[%s19359_s5 + $0xa0] sm:$0xff] }
 0x2b1   :  { %11150 = vmatmul.mubr.msk.f32.gmra.mrb[4].mxu1 %vm2403_vm11, %v20557_v13  ;;  %v20586_v46 = vld [vmem:[#allocation141_spill] sm:$0xff]  ;;  %v6694_v15 = vld [vmem:[%s19359_s5 + $0x28] sm:$0xff] }
 0x2b2   :  { %11676 = vmatpush3.bf16.msra.mxu0 %v11673_v1  ;;  %11152 = vmatprep.mubr.msk.f32.mxu1 %vm2403_vm11, %v20558_v52  ;;  %v20591_v17 = vld [vmem:[#allocation121_spill] sm:$0xff]  ;;  %v17007_v1 = vld [vmem:[%s19360_s4] ss:$0 sm:$0xff] }
 0x2b3   :  { %11678 = vmatprep.subr.bf16.mxu0 %v11677_v26  ;;  %v20592_v35 = vld [vmem:[#allocation253_spill] sm:$0xff] }
 0x2b4   :  { %v20593_v56 = vld [vmem:[#allocation269_spill] sm:$0xff] }
 0x2b5   :  { %11153 = vmatmul.mubr.msk.f32.gmra.mrb[6].mxu1 %vm2403_vm11, %v5830_v27  ;;  %v6691_v54 = vld [vmem:[%s19359_s5 + $0x10] sm:$0xff]  ;;  %v6692_v55 = vld [vmem:[%s19359_s5 + $0x18] sm:$0xff]  ;;  %v10137_v27 = vld [vmem:[%s19359_s5 + $0x80] sm:$0xff] }
 0x2b6   :  { %11680 = vmatpush3.bf16.msra.mxu0 %v11677_v26  ;;  %11155 = vmatprep.mubr.msk.f32.mxu1 %vm2403_vm11, %v20559_v33  ;;  %v6695_v13 = vld [vmem:[%s19359_s5 + $0x30] sm:$0xff]  ;;  %v6696_v52 = vld [vmem:[%s19359_s5 + $0x38] sm:$0xff]  ;;  %v17051_v25 = vpack.c.bf16 %v6692_v55, %v6691_v54 }
 0x2b9   :  { %11156 = vmatmul.mubr.msk.f32.gmra.mrb[8].mxu1 %vm2403_vm11, %v20560_v53 }
 0x2ba   :  { %11158 = vmatprep.mubr.msk.f32.mxu1 %vm2403_vm11, %v20561_v22 }
 0x2bd   :  { %11159 = vmatmul.mubr.msk.f32.gmra.mrb[10].mxu1 %vm2403_vm11, %v20562_v39  ;;  %v10138_v39 = vld [vmem:[%s19359_s5 + $0x88] sm:$0xff] }
 0x2be   :  { %11161 = vmatprep.mubr.msk.f32.mxu1 %vm2403_vm11, %v20563_v48  ;;  %v10139_v48 = vld [vmem:[%s19359_s5 + $0x90] sm:$0xff] }
 0x2c1   :  { %11162 = vmatmul.mubr.msk.f32.gmra.mrb[12].mxu1 %vm2403_vm11, %v20564_v20  ;;  %v10140_v20 = vld [vmem:[%s19359_s5 + $0x98] sm:$0xff] }
 0x2c2   :  { %11164 = vmatprep.mubr.msk.f32.mxu1 %vm2403_vm11, %v20565_v34 }
 0x2c5   :  { %11165 = vmatmul.mubr.msk.f32.gmra.mrb[14].mxu1 %vm2403_vm11, %v5831_v40 }
 0x2c6   :  { %11175 = vmatprep.mubr.msk.f32.mxu1 %vm2403_vm11, %v20566_v14  ;;  %v10142_v14 = vld [vmem:[%s19359_s5 + $0xa8] sm:$0xff] }
 0x2c9   :  { %11176 = vmatmul.mubr.msk.f32.vlgmr.msra.gmra.mrb[0].mxu1 %vm2403_vm11, %v20567_v59 }
 0x2ca   :  { %11660 = vmatpush3.bf16.msra.mxu1 %v11657_v58  ;;  %11178 = vmatprep.mubr.msk.f32.mxu1 %vm2403_vm11, %v20568_v9  ;;  %v6693_v58 = vld [vmem:[%s19359_s5 + $0x20] sm:$0xff] }
 0x2cb   :  { %11662 = vmatprep.subr.bf16.mxu1 %v11661_v45 }
 0x2cd   :  { %11179 = vmatmul.mubr.msk.f32.gmra.mrb[2].mxu1 %vm2403_vm11, %v20569_v47 }
 0x2ce   :  { %11181 = vmatprep.mubr.msk.f32.mxu1 %vm2403_vm11, %v20570_v60  ;;  %11664 = vmatpush3.bf16.msra.mxu1 %v11661_v45  ;;  %v10143_v45 = vld [vmem:[%s19359_s5 + $0xb0] sm:$0xff] }
 0x2d1   :  { %11182 = vmatmul.mubr.msk.f32.gmra.mrb[4].mxu1 %vm2403_vm11, %v20571_v4 }
 0x2d2   :  { %11184 = vmatprep.mubr.msk.f32.mxu1 %vm2403_vm11, %v20572_v42  ;;  %v10144_v42 = vld [vmem:[%s19359_s5 + $0xb8] sm:$0xff] }
 0x2d5   :  { %11185 = vmatmul.mubr.msk.f32.gmra.mrb[6].mxu1 %vm2403_vm11, %v16826_v11  ;;  %v20580_v11 = vld [vmem:[#allocation128_spill] sm:$0xff] }
 0x2d6   :  { %11187 = vmatprep.mubr.msk.f32.mxu1 %vm2403_vm11, %v20573_v24  ;;  %v10149_v24 = vld [vmem:[%s19359_s5 + $0xc0] sm:$0xff] }
 0x2d9   :  { %11188 = vmatmul.mubr.msk.f32.gmra.mrb[8].mxu1 %vm2403_vm11, %v20574_v51  ;;  %v10150_v51 = vld [vmem:[%s19359_s5 + $0xc8] sm:$0xff] }
 0x2da   :  { %11190 = vmatprep.mubr.msk.f32.mxu1 %vm2403_vm11, %v20575_v10 }
 0x2dd   :  { %11191 = vmatmul.mubr.msk.f32.gmra.mrb[10].mxu1 %vm2403_vm11, %v20576_v8  ;;  %v17083_v8 = vpack.c.bf16 %v6694_v15, %v6693_v58 }
 0x2de   :  { %11193 = vmatprep.mubr.msk.f32.mxu1 %vm2403_vm11, %v20577_v63  ;;  %v17085_v63 = vpack.c.bf16 %v6696_v52, %v6695_v13 }
 0x2e1   :  { %11194 = vmatmul.mubr.msk.f32.gmra.mrb[12].mxu1 %vm2403_vm11, %v20578_v36  ;;  %v20594_v36 = vld [vmem:[#allocation10_spill] sm:$0xff] }
 0x2e2   :  { %11196 = vmatprep.mubr.msk.f32.mxu1 %vm2403_vm11, %v20579_v41  ;;  %v17089_v41 = vsel %vm1808_vm12, 0.0, %v20594_v36 }
 0x2e5   :  { %11197 = vmatmul.mubr.msk.f32.gmra.mrb[14].mxu1 %vm2403_vm11, %v16834_v12  ;;  %v20587_v12 = vld [vmem:[#allocation213_spill] sm:$0xff] }
 0x2e6   :  { %11207 = vmatprep.mubr.msk.f32.mxu1 %vm2403_vm11, %v20580_v11  ;;  %v10151_v11 = vld [vmem:[%s19359_s5 + $0xd0] sm:$0xff] }
 0x2e9   :  { %11208 = vmatmul.mubr.msk.f32.vlgmr.msra.gmra.mrb[0].mxu1 %vm2403_vm11, %v20581_v5 }
 0x2ea   :  { %11210 = vmatprep.mubr.msk.f32.mxu1 %vm2403_vm11, %v20582_v19 }
 0x2ed   :  { %11211 = vmatmul.mubr.msk.f32.gmra.mrb[2].mxu1 %vm2403_vm11, %v20583_v50  ;;  %v17098_v50 = vpack.c.bf16 %v10138_v39, %v10137_v27 }
 0x2ee   :  { %11213 = vmatprep.mubr.msk.f32.mxu1 %vm2403_vm11, %v20584_v62  ;;  %v17100_v62 = vpack.c.bf16 %v10140_v20, %v10139_v48 }
 0x2f0   :  { %20595 = vst [vmem:[#allocation77_spill] sm:$0xff] %v17100_v62 }
 0x2f1   :  { %11214 = vmatmul.mubr.msk.f32.gmra.mrb[4].mxu1 %vm2403_vm11, %v20585_v38  ;;  %v10152_v38 = vld [vmem:[%s19359_s5 + $0xd8] sm:$0xff] }
 0x2f2   :  { %11216 = vmatprep.mubr.msk.f32.mxu1 %vm2403_vm11, %v20586_v46  ;;  %v10153_v46 = vld [vmem:[%s19359_s5 + $0xe0] sm:$0xff] }
 0x2f5   :  { %11217 = vmatmul.mubr.msk.f32.gmra.mrb[6].mxu1 %vm2403_vm11, %v16849_v21  ;;  %v6689_v21 = vld [vmem:[%s19359_s5] sm:$0xff] }
 0x2f6   :  { %11219 = vmatprep.mubr.msk.f32.mxu1 %vm2403_vm11, %v20587_v12  ;;  %v17001_v0 = vpack.c.bf16 %v6690_v7, %v6689_v21  ;;  %v10154_v12 = vld [vmem:[%s19359_s5 + $0xe8] sm:$0xff] }
 0x2f8   :  { %11682 = vmatprep.subr.bf16.mxu0 %v17001_v0 }
 0x2f9   :  { %11220 = vmatmul.mubr.msk.f32.gmra.mrb[8].mxu1 %vm2403_vm11, %v20588_v61 }
 0x2fa   :  { %11222 = vmatprep.mubr.msk.f32.mxu1 %vm2403_vm11, %v20589_v23 }
 0x2fd   :  { %11223 = vmatmul.mubr.msk.f32.gmra.mrb[10].mxu1 %vm2403_vm11, %v20590_v18  ;;  %v17115_v18 = vpack.c.bf16 %v10142_v14, %v10141_v2 }
 0x2fe   :  { %11225 = vmatprep.mubr.msk.f32.mxu1 %vm2403_vm11, %v20591_v17  ;;  %v17117_v17 = vpack.c.bf16 %v10144_v42, %v10143_v45 }
 0x2ff   :  { %20597 = vst [vmem:[#allocation79_spill] sm:$0xff] %v17115_v18 }
 0x300   :  { %20598 = vst [vmem:[#allocation100_spill] sm:$0xff] %v17117_v17 }
 0x301   :  { %11226 = vmatmul.mubr.msk.f32.gmra.mrb[12].mxu1 %vm2403_vm11, %v20592_v35  ;;  %v17119_v35 = vpack.c.bf16 %v10150_v51, %v10149_v24 }
 0x302   :  { %11228 = vmatprep.mubr.msk.f32.mxu1 %vm2403_vm11, %v20593_v56 }
 0x303   :  { %20599 = vst [vmem:[#allocation110_spill] sm:$0xff] %v17119_v35 }
 0x305   :  { %11229 = vmatmul.mubr.msk.f32.gmra.mrb[14].mxu1 %vm2403_vm11, %v16860_v57 }
 0x3bc   :  { %v11209_v28 = vpop.f32.mrb[0].mxu1 }
 0x3bd   :  { %v6452_v57 = vadd.f32 %v11209_v28, %v17007_v1  ;;  %v6349_v6 = vpop.f32.mrb[1].mxu1 }
 0x3be   :  { %v6451_v26 = vadd.f32 %v17007_v1, %v6349_v6 }
 0x3bf   :  { %v6468_v30 = vmax.f32 %v6452_v57, 0.0 }
 0x3c0   :  { %v6467_v49 = vmax.f32 %v6451_v26, 0.0  ;;  %v11212_v44 = vpop.f32.mrb[2].mxu1 }
 0x3c1   :  { %v6489_v29 = vcombine.high %v6468_v30, %v6468_v30  ;;  %v17015_v31 = vrot.slane %v6468_v30, %v20539_v32  ;;  %v6359_v37 = vpop.f32.mrb[3].mxu1  ;;  %v6454_v34 = vadd.f32 %v11212_v44, %v17007_v1  ;;  %v17129_v30 = vpack.c.bf16 %v10152_v38, %v10151_v11 }
 0x3c2   :  { %v7189_v3 = vrot.slane %v6467_v49, %v20539_v32  ;;  %v7182_v22 = vcombine.high %v6467_v49, %v6467_v49  ;;  %v6453_v60 = vadd.f32 %v17007_v1, %v6359_v37  ;;  %v17131_v49 = vpack.c.bf16 %v10154_v12, %v10153_v46 }
 0x3c3   :  { %v17037_v33 = vrot.slane %v6489_v29, %v20539_v32  ;;  %v6504_v53 = vcombine.high %v17015_v31, %v17015_v31  ;;  %v17064_v59 = vrot.slane %v17015_v31, %v20238_v16  ;;  %v6470_v7 = vmax.f32 %v6454_v34, 0.0  ;;  %20600 = vst [vmem:[#allocation109_spill] sm:$0xff] %v17129_v30 }
 0x3c4   :  { %v11215_v40 = vpop.f32.mrb[4].mxu1  ;;  %v7197_v47 = vcombine.high %v7189_v3, %v7189_v3  ;;  %v7196_v19 = vrot.slane %v7182_v22, %v20539_v32  ;;  %v6469_v28 = vmax.f32 %v6453_v60, 0.0  ;;  %v17126_v6 = vrot.slane %v7189_v3, %v12809_v43  ;;  %20601 = vst [vmem:[#allocation101_spill] sm:$0xff] %v17131_v49 }
 0x3c5   :  { %v17067_v9 = vrot.slane %v6504_v53, %v20238_v16  ;;  %v6369_v4 = vpop.f32.mrb[5].mxu1  ;;  %v17081_v10 = vrot.slane %v17037_v33, %v20238_v16  ;;  %v7576_v26 = vrot.slane %v7189_v3, %v20238_v16  ;;  %v6506_v54 = vcombine.high %v6470_v7, %v6470_v7 }
 0x3c6   :  { %v17122_v56 = vrot.slane %v7197_v47, %v12809_v43  ;;  %v7580_v21 = vrot.slane %v7197_v47, %v20238_v16  ;;  %v17133_v44 = vcombine.high %v7196_v19, %v7196_v19  ;;  %v6513_v29 = vrot.slane %v6470_v7, %v20539_v32 }
 0x3c7   :  { %v8213_v5 = vsel %vm2297_vm4, %v17067_v9, %v17064_v59  ;;  %v6456_v37 = vadd.f32 %v11215_v40, %v17007_v1  ;;  %v17138_v55 = vrot.slane %v7196_v19, %v12809_v43  ;;  %v7584_v58 = vrot.slane %v7196_v19, %v20238_v16 }
 0x3c8   :  { %v17113_v61 = vsel %vm1697_vm5, %v17081_v10, %v8213_v5  ;;  %v11218_v23 = vpop.f32.mrb[6].mxu1  ;;  %20602 = vst [vmem:[#allocation122_spill] sm:$0xff] %v17133_v44  ;;  %v7199_v15 = vcombine.high %v6469_v28, %v6469_v28  ;;  %v17142_v13 = vrot.slane %v6469_v28, %v20539_v32  ;;  %v7701_v52 = vsel %vm2297_vm4, %v7580_v21, %v7576_v26 }
 0x3c9   :  { %20596 = vst [vmem:[#allocation24_spill] sm:$0xff] %v17113_v61  ;;  %v6379_v57 = vpop.f32.mrb[7].mxu1  ;;  %20603 = vst [vmem:[#allocation131_spill] sm:$0xff] %v17138_v55  ;;  %v7867_v27 = vsel %vm2297_vm4, %v17122_v56, %v17126_v6  ;;  %v6521_v22 = vcombine.high %v6513_v29, %v6513_v29  ;;  %v6455_v39 = vadd.f32 %v17007_v1, %v6369_v4  ;;  %v6472_v60 = vmax.f32 %v6456_v37, 0.0 }
 0x3ca   :  { %20604 = vst [vmem:[#allocation118_spill] sm:$0xff] %v17142_v13  ;;  %v17155_v20 = vcombine.high %v17037_v33, %v17037_v33  ;;  %v17159_v34 = vrot.slane %v17015_v31, %v12809_v43  ;;  %v17162_v40 = vrot.slane %v6504_v53, %v12809_v43  ;;  %v6520_v2 = vrot.slane %v6506_v54, %v20539_v32 }
 0x3cb   :  { %v17167_v14 = vrot.slane %v17037_v33, %v12809_v43  ;;  %v17174_v4 = vsel %vm1697_vm5, %v7584_v58, %v7701_v52  ;;  %v17178_v31 = vsel %vm1697_vm5, %v17138_v55, %v7867_v27  ;;  %v17181_v53 = vrot.slane %v7199_v15, %v20539_v32 }
 0x3cc   :  { %v17144_v3 = vpop.f32.mrb[8].mxu1  ;;  %20605 = vst [vmem:[#allocation143_spill] sm:$0xff] %v17159_v34  ;;  %20606 = vst [vmem:[#allocation149_spill] sm:$0xff] %v17162_v40  ;;  %v17185_v33 = vcombine.high %v17142_v13, %v17142_v13  ;;  %v17190_v24 = vrot.slane %v6521_v22, %v12809_v43  ;;  %v6471_v51 = vmax.f32 %v6455_v39, 0.0  ;;  %v6458_v36 = vadd.f32 %v11218_v23, %v17007_v1 }
 0x3cd   :  { %v17151_v48 = vpop.f32.mrb[9].mxu1  ;;  %20607 = vst [vmem:[#allocation184_spill] sm:$0xff] %v17167_v14  ;;  %20608 = vst [vmem:[#allocation192_spill] sm:$0xff] %v17174_v4  ;;  %v6457_v11 = vadd.f32 %v17007_v1, %v6379_v57  ;;  %v6522_v19 = vcombine.high %v6520_v2, %v6520_v2  ;;  %v17197_v38 = vrot.slane %v6513_v29, %v12809_v43 }
 0x3ce   :  { %20609 = vst [vmem:[#allocation199_spill] sm:$0xff] %v17178_v31  ;;  %20610 = vst [vmem:[#allocation209_spill] sm:$0xff] %v17181_v53  ;;  %v17200_v46 = vrot.slane %v6513_v29, %v20238_v16  ;;  %v17203_v12 = vrot.slane %v6521_v22, %v20238_v16  ;;  %v17206_v21 = vrot.slane %v6520_v2, %v12809_v43 }
 0x3cf   :  { %20611 = vst [vmem:[#allocation223_spill] sm:$0xff] %v17185_v33  ;;  %20612 = vst [vmem:[#allocation217_spill] sm:$0xff] %v17190_v24  ;;  %v17210_v23 = vrot.slane %v17142_v13, %v12809_v43  ;;  %v6523_v28 = vcombine.high %v6472_v60, %v6472_v60  ;;  %v17215_v57 = vrot.slane %v6520_v2, %v20238_v16 }
 0x3d0   :  { %v17187_v42 = vpop.f32.mrb[10].mxu1  ;;  %20613 = vst [vmem:[#allocation231_spill] sm:$0xff] %v17197_v38  ;;  %20614 = vst [vmem:[#allocation241_spill] sm:$0xff] %v17200_v46  ;;  %v17219_v26 = vcombine.high %v17181_v53, %v17181_v53  ;;  %v17223_v54 = vrot.slane %v17185_v33, %v12809_v43  ;;  %v6530_v29 = vrot.slane %v6472_v60, %v20539_v32 }
 0x3d1   :  { %v17194_v5 = vpop.f32.mrb[11].mxu1  ;;  %20615 = vst [vmem:[#allocation123_spill] sm:$0xff] %v17203_v12  ;;  %20616 = vst [vmem:[#allocation257_spill] sm:$0xff] %v17206_v21  ;;  %v6665_v58 = vsel %vm1697_vm5, %v17190_v24, %v17197_v38  ;;  %v17233_v15 = vrot.slane %v17181_v53, %v12809_v43  ;;  %v6537_v52 = vrot.slane %v6523_v28, %v20539_v32 }
 0x3d2   :  { %20617 = vst [vmem:[#allocation270_spill] sm:$0xff] %v17210_v23  ;;  %20618 = vst [vmem:[#allocation274_spill] sm:$0xff] %v17215_v57  ;;  %v7223_v27 = vrot.slane %v6471_v51, %v20539_v32  ;;  %v17240_v39 = vrot.slane %v6522_v19, %v20238_v16  ;;  %v6806_v2 = vsel %vm2297_vm4, %v17203_v12, %v17200_v46 }
 0x3d3   :  { %20619 = vst [vmem:[#allocation286_spill] sm:$0xff] %v17219_v26  ;;  %20620 = vst [vmem:[#allocation290_spill] sm:$0xff] %v17223_v54  ;;  %v6538_v60 = vcombine.high %v6530_v29, %v6530_v29  ;;  %v7216_v47 = vcombine.high %v6471_v51, %v6471_v51  ;;  %v17246_v7 = vrot.slane %v6530_v29, %v12809_v43 }
 0x3d4   :  { %v17226_v37 = vpop.f32.mrb[12].mxu1  ;;  %20621 = vst [vmem:[#allocation20_spill] sm:$0xff] %v17233_v15  ;;  %20622 = vst [vmem:[#allocation15_spill] sm:$0xff] %v17240_v39  ;;  %v17249_v45 = vrot.slane %v6537_v52, %v12809_v43  ;;  %v17252_v28 = vrot.slane %v6537_v52, %v20238_v16  ;;  %v7231_v49 = vcombine.high %v7223_v27, %v7223_v27 }
 0x3d5   :  { %v17237_v22 = vpop.f32.mrb[13].mxu1  ;;  %v6539_v61 = vcombine.high %v6537_v52, %v6537_v52  ;;  %v17255_v30 = vrot.slane %v6538_v60, %v12809_v43  ;;  %v6741_v35 = vrot.slane %v6530_v29, %v20238_v16  ;;  %v17259_v12 = vrot.slane %v6538_v60, %v20238_v16 }
 0x3d6   :  { %20623 = vst [vmem:[#allocation18_spill] sm:$0xff] %v17249_v45  ;;  %v17265_v46 = vsel %vm1699_vm6, %v17206_v21, %v6665_v58  ;;  %v6807_v31 = vsel %vm1697_vm5, %v17215_v57, %v6806_v2  ;;  %v17270_v17 = vrot.slane %v6522_v19, %v12809_v43  ;;  %v7059_v52 = vsel %vm2297_vm4, %v17190_v24, %v17197_v38 }
 0x3d7   :  { %v8220_v60 = vsel %vm2297_vm4, %v17259_v12, %v6741_v35  ;;  %v8362_v58 = vsel %vm2297_vm4, %v17255_v30, %v17246_v7  ;;  %v7230_v13 = vrot.slane %v7216_v47, %v20539_v32  ;;  %v7349_v2 = vrot.slane %v7231_v49, %v12809_v43 }
 0x3d8   :  { %v17261_v51 = vpop.f32.mrb[14].mxu1  ;;  %20624 = vst [vmem:[#allocation41_spill] sm:$0xff] %v17270_v17  ;;  %v8221_v19 = vsel %vm1697_vm5, %v17252_v28, %v8220_v60  ;;  %v8363_v57 = vsel %vm1697_vm5, %v17249_v45, %v8362_v58  ;;  %v6474_v24 = vmax.f32 %v6458_v36, 0.0  ;;  %v6473_v38 = vmax.f32 %v6457_v11, 0.0 }
 0x3d9   :  { %v17275_v29 = vpop.f32.mrb[15].mxu1  ;;  %v17289_v44 = vrot.slane %v6539_v61, %v20238_v16  ;;  %v17292_v4 = vrot.slane %v6539_v61, %v12809_v43  ;;  %v7345_v18 = vrot.slane %v7223_v27, %v12809_v43  ;;  %v7612_v47 = vrot.slane %v7231_v49, %v20238_v16 }
 0x3da   :  { %v7060_v26 = vsel %vm1697_vm5, %v17206_v21, %v7059_v52  ;;  %v6808_v36 = vsel %vm1699_vm6, %v17240_v39, %v6807_v31  ;;  %v7608_v11 = vrot.slane %v7223_v27, %v20238_v16  ;;  %v6667_v61 = vsel %vm1697_vm5, %v17255_v30, %v17246_v7 }
 0x3db   :  { %20625 = vst [vmem:[#allocation32_spill] sm:$0xff] %v17292_v4  ;;  %v7232_v58 = vcombine.high %v7230_v13, %v7230_v13  ;;  %v7353_v15 = vrot.slane %v7230_v13, %v12809_v43  ;;  %v7418_v49 = vsel %vm1697_vm5, %v7349_v2, %v7345_v18  ;;  %v7616_v62 = vrot.slane %v7230_v13, %v20238_v16 }
 0x3dc   :  { %v7708_v52 = vsel %vm2297_vm4, %v7612_v47, %v7608_v11  ;;  %v7994_v21 = vcombine.high %v6474_v24, %v6474_v24  ;;  %v8001_v60 = vrot.slane %v6474_v24, %v20539_v32  ;;  %v8222_v31 = vsel %vm1699_vm6, %v17289_v44, %v8221_v19 }
 0x3dd   :  { %v8364_v27 = vsel %vm1699_vm6, %v17292_v4, %v8363_v57  ;;  %v7233_v39 = vcombine.high %v6473_v38, %v6473_v38  ;;  %v7240_v33 = vrot.slane %v6473_v38, %v20539_v32  ;;  %v6668_v24 = vsel %vm1699_vm6, %v17249_v45, %v6667_v61 }
 0x3de   :  { %v17317_v55 = vrot.slane %v7994_v21, %v20539_v32  ;;  %v17319_v54 = vcombine.high %v8001_v60, %v8001_v60  ;;  %v8031_v13 = vrot.slane %v8001_v60, %v12809_v43  ;;  %v8184_v47 = vrot.slane %v8001_v60, %v20238_v16 }
 0x3df   :  { %v7419_v19 = vsel %vm1699_vm6, %v7353_v15, %v7418_v49  ;;  %v17327_v11 = vrot.slane %v7233_v39, %v20539_v32  ;;  %v17329_v57 = vcombine.high %v7240_v33, %v7240_v33  ;;  %v7620_v38 = vrot.slane %v7232_v58, %v20238_v16 }
 0x3e0   :  { %20626 = vst [vmem:[#allocation9_spill] sm:$0xff] %v17317_v55  ;;  %20627 = vst [vmem:[#allocation13_spill] sm:$0xff] %v17319_v54  ;;  %v7874_v21 = vsel %vm2297_vm4, %v7349_v2, %v7345_v18  ;;  %v17335_v4 = vrot.slane %v17319_v54, %v12809_v43  ;;  %v17339_v60 = vrot.slane %v17317_v55, %v12809_v43 }
 0x3e1   :  { %20628 = vst [vmem:[#allocation33_spill] sm:$0xff] %v17327_v11  ;;  %v7709_v61 = vsel %vm1697_vm5, %v7616_v62, %v7708_v52  ;;  %v17343_v39 = vsel %vm1701_vm7, %v8184_v47, %v8222_v31  ;;  %v17346_v49 = vsel %vm1701_vm7, %v8031_v13, %v8364_v27  ;;  %v7624_v45 = vrot.slane %v7240_v33, %v20238_v16 }
 0x3e2   :  { %20629 = vst [vmem:[#allocation17_spill] sm:$0xff] %v17335_v4  ;;  %20630 = vst [vmem:[#allocation34_spill] sm:$0xff] %v17339_v60  ;;  %v7846_v18 = vrot.slane %v7232_v58, %v12809_v43  ;;  %v8052_v2 = vsel %vm1697_vm5, %v17335_v4, %v8031_v13  ;;  %v7357_v54 = vrot.slane %v7240_v33, %v12809_v43  ;;  %v17366_v58 = vsel %vm1808_vm12, 0.0, %v6668_v24 }
 0x3e3   :  { %20631 = vst [vmem:[#allocation59_spill] sm:$0xff] %v17343_v39  ;;  %20632 = vst [vmem:[#allocation54_spill] sm:$0xff] %v17346_v49  ;;  %v17355_v23 = vrot.slane %v17329_v57, %v12809_v43  ;;  %v6809_v62 = vsel %vm1701_vm7, %v6741_v35, %v6808_v36  ;;  %v7875_v52 = vsel %vm1697_vm5, %v7353_v15, %v7874_v21  ;;  %v17375_v15 = vsel %vm1808_vm12, 0.0, %v7419_v19  ;;  %v20639_v19 = vld [vmem:[#allocation7_spill] sm:$0xff] }
 0x3e4   :  { %v8053_v31 = vsel %vm1699_vm6, %v17339_v60, %v8052_v2  ;;  %v17363_v27 = vrot.slane %v17327_v11, %v12809_v43  ;;  %v7710_v35 = vsel %vm1699_vm6, %v7620_v38, %v7709_v61  ;;  %20636 = vst [vmem:[#allocation57_spill] sm:$0xff] %v17375_v15  ;;  %v7876_v2 = vsel %vm1699_vm6, %v7846_v18, %v7875_v52 }
 0x3e5   :  { %20633 = vst [vmem:[#allocation240_spill] sm:$0xff] %v17355_v23  ;;  %v17369_v33 = vsel %vm1808_vm12, 0.0, %v8053_v31  ;;  %v7420_v13 = vsel %vm1697_vm5, %v17355_v23, %v7357_v54  ;;  %v17382_v24 = vsel %vm1701_vm7, %v7624_v45, %v7710_v35  ;;  %v17390_v38 = vrot.slane %v17155_v20, %v20238_v16 }
 0x3e6   :  { %20634 = vst [vmem:[#allocation272_spill] sm:$0xff] %v17363_v27  ;;  %20635 = vst [vmem:[#allocation43_spill] sm:$0xff] %v17369_v33  ;;  %v7421_v47 = vsel %vm1699_vm6, %v17363_v27, %v7420_v13  ;;  %v6802_v61 = vsel %vm1701_vm7, %v17064_v59, %v20639_v19  ;;  %v17398_v13 = vsel %vm1701_vm7, %v7357_v54, %v7876_v2  ;;  %v17414_v54 = vsel %vm1808_vm12, 0.0, %v17265_v46 }
 0x3e7   :  { %v17385_v21 = vsel %vm1808_vm12, 0.0, %v7421_v47  ;;  %20638 = vst [vmem:[#allocation47_spill] sm:$0xff] %v17390_v38  ;;  %20640 = vst [vmem:[#allocation51_spill] sm:$0xff] %v17398_v13  ;;  %v6803_v45 = vsel %vm1703_vm8, %v17067_v9, %v6802_v61  ;;  %v6460_v18 = vadd.f32 %v17144_v3, %v17007_v1  ;;  %v7061_v52 = vsel %vm1699_vm6, %v17270_v17, %v7060_v26 }
 0x3e8   :  { %20637 = vst [vmem:[#allocation244_spill] sm:$0xff] %v17385_v21  ;;  %v6804_v35 = vsel %vm1705_vm9, %v17081_v10, %v6803_v45  ;;  %v6459_v59 = vadd.f32 %v17007_v1, %v17151_v48  ;;  %v6462_v47 = vadd.f32 %v17187_v42, %v17007_v1  ;;  %v6810_v26 = vsel %vm1703_vm8, %v17259_v12, %v6809_v62 }
 0x3e9   :  { %v6805_v9 = vsel %vm1707_vm10, %v17390_v38, %v6804_v35  ;;  %v6476_v3 = vmax.f32 %v6460_v18, 0.0  ;;  %v6811_v42 = vsel %vm1705_vm9, %v17252_v28, %v6810_v26  ;;  %v17427_v46 = vsel %vm1701_vm7, %v17246_v7, %v7061_v52 }
 0x3ea   :  { %11247 = vmatprep.mubr.msk.f32.mxu0 %vm6824_vm13, %v6805_v9  ;;  %v6475_v48 = vmax.f32 %v6459_v59, 0.0  ;;  %v6478_v2 = vmax.f32 %v6462_v47, 0.0  ;;  %v6812_v12 = vsel %vm1707_vm10, %v17289_v44, %v6811_v42  ;;  %v17436_v18 = vcombine.high %v17317_v55, %v17317_v55 }
 0x3eb   :  { %v6540_v61 = vcombine.high %v6476_v3, %v6476_v3  ;;  %v6547_v45 = vrot.slane %v6476_v3, %v20539_v32  ;;  %11248 = vmatmul.mubr.msk.f32.vlgmr.msra.gmra.mrb[64].mxu0 %vm6824_vm13, %v6812_v12  ;;  %v6464_v47 = vadd.f32 %v17226_v37, %v17007_v1  ;;  %v6461_v12 = vadd.f32 %v17007_v1, %v17194_v5 }
 0x3ec   :  { %20641 = vst [vmem:[#allocation66_spill] sm:$0xff] %v17436_v18  ;;  %v7250_v35 = vcombine.high %v6475_v48, %v6475_v48  ;;  %v7257_v28 = vrot.slane %v6475_v48, %v20539_v32  ;;  %v6557_v59 = vcombine.high %v6478_v2, %v6478_v2  ;;  %11684 = vmatpush3.bf16.msra.mxu0 %v17001_v0 }
 0x3ed   :  { %v6554_v7 = vrot.slane %v6540_v61, %v20539_v32  ;;  %v6555_v52 = vcombine.high %v6547_v45, %v6547_v45  ;;  %v17445_v44 = vrot.slane %v6547_v45, %v12809_v43  ;;  %v17448_v9 = vrot.slane %v6547_v45, %v20238_v16  ;;  %11686 = vmatprep.subr.bf16.mxu0 %v17051_v25 }
 0x3ee   :  { %v7265_v3 = vcombine.high %v7257_v28, %v7257_v28  ;;  %v6564_v26 = vrot.slane %v6478_v2, %v20539_v32  ;;  %v7264_v0 = vrot.slane %v7250_v35, %v20539_v32  ;;  %v17464_v61 = vcombine.high %v17327_v11, %v17327_v11 }
 0x3ef   :  { %v17453_v48 = vrot.slane %v6555_v52, %v12809_v43  ;;  %v17456_v42 = vrot.slane %v6554_v7, %v12809_v43  ;;  %v17459_v37 = vrot.slane %v6555_v52, %v20238_v16  ;;  %v17469_v45 = vrot.slane %v6554_v7, %v20238_v16 }
 0x3f0   :  { %20642 = vst [vmem:[#allocation81_spill] sm:$0xff] %v17464_v61  ;;  %v17480_v36 = vrot.slane %v7265_v3, %v12809_v43  ;;  %v7644_v31 = vrot.slane %v7265_v3, %v20238_v16  ;;  %11688 = vmatpush3.bf16.msra.mxu0 %v17051_v25  ;;  %v17493_v2 = vrot.slane %v7257_v28, %v12809_v43  ;;  %v6480_v62 = vmax.f32 %v6464_v47, 0.0 }
 0x3f1   :  { %v8227_v52 = vsel %vm2297_vm4, %v17459_v37, %v17448_v9  ;;  %v8369_v35 = vsel %vm2297_vm4, %v17453_v48, %v17445_v44  ;;  %11690 = vmatprep.subr.bf16.mxu0 %v17083_v8  ;;  %v17496_v17 = vcombine.high %v7264_v0, %v7264_v0  ;;  %v7640_v3 = vrot.slane %v7257_v28, %v20238_v16 }
 0x3f2   :  { %v17486_v10 = vsel %vm1697_vm5, %v17469_v45, %v8227_v52  ;;  %v17490_v5 = vsel %vm1697_vm5, %v17456_v42, %v8369_v35  ;;  %v6571_v25 = vrot.slane %v6557_v59, %v20539_v32  ;;  %v6572_v33 = vcombine.high %v6564_v26, %v6564_v26 }
 0x3f3   :  { %20643 = vst [vmem:[#allocation75_spill] sm:$0xff] %v17486_v10  ;;  %20644 = vst [vmem:[#allocation78_spill] sm:$0xff] %v17490_v5  ;;  %v17505_v21 = vrot.slane %v7264_v0, %v12809_v43  ;;  %v7648_v47 = vrot.slane %v7264_v0, %v20238_v16  ;;  %v7715_v60 = vsel %vm2297_vm4, %v7644_v31, %v7640_v3  ;;  %v6477_v5 = vmax.f32 %v6461_v12, 0.0 }
 0x3f4   :  { %20645 = vst [vmem:[#allocation89_spill] sm:$0xff] %v17496_v17  ;;  %v7881_v28 = vsel %vm2297_vm4, %v17480_v36, %v17493_v2  ;;  %v17515_v59 = vrot.slane %v6572_v33, %v20238_v16  ;;  %11692 = vmatpush3.bf16.msra.mxu0 %v17083_v8  ;;  %v6573_v35 = vcombine.high %v6571_v25, %v6571_v25 }
 0x3f5   :  { %v17519_v52 = vrot.slane %v6564_v26, %v20238_v16  ;;  %v6574_v0 = vcombine.high %v6480_v62, %v6480_v62  ;;  %11694 = vmatprep.subr.bf16.mxu0 %v17085_v63  ;;  %v17522_v15 = vcombine.high %v6554_v7, %v6554_v7  ;;  %v17527_v3 = vrot.slane %v6572_v33, %v12809_v43 }
 0x3f6   :  { %20646 = vst [vmem:[#allocation5_spill] sm:$0xff] %v17515_v59  ;;  %v17530_v4 = vrot.slane %v6571_v25, %v20238_v16  ;;  %v17533_v8 = vsel %vm1697_vm5, %v7648_v47, %v7715_v60  ;;  %v17539_v49 = vsel %vm1697_vm5, %v17505_v21, %v7881_v28  ;;  %v17545_v33 = vrot.slane %v6564_v26, %v12809_v43 }
 0x3f7   :  { %20647 = vst [vmem:[#allocation97_spill] sm:$0xff] %v17519_v52  ;;  %20649 = vst [vmem:[#allocation106_spill] sm:$0xff] %v17533_v8  ;;  %v6817_v7 = vsel %vm2297_vm4, %v17515_v59, %v17519_v52  ;;  %v17548_v31 = vrot.slane %v6571_v25, %v12809_v43  ;;  %v6581_v60 = vrot.slane %v6480_v62, %v20539_v32 }
 0x3f8   :  { %20648 = vst [vmem:[#allocation93_spill] sm:$0xff] %v17530_v4  ;;  %20650 = vst [vmem:[#allocation119_spill] sm:$0xff] %v17539_v49  ;;  %v6588_v47 = vrot.slane %v6574_v0, %v20539_v32  ;;  %11696 = vmatpush3.bf16.msra.mxu0 %v17085_v63  ;;  %v17554_v12 = vrot.slane %v6573_v35, %v20238_v16  ;;  %v17557_v28 = vrot.slane %v6573_v35, %v12809_v43 }
 0x3f9   :  { %v7267_v10 = vcombine.high %v6477_v5, %v6477_v5  ;;  %v17560_v59 = vrot.slane %v6477_v5, %v20539_v32  ;;  %11698 = vmatprep.subr.bf16.mxu0 %v17098_v50  ;;  %v6818_v26 = vsel %vm1697_vm5, %v17530_v4, %v6817_v7  ;;  %v7070_v62 = vsel %vm2297_vm4, %v17527_v3, %v17545_v33 }
 0x3fa   :  { %20651 = vst [vmem:[#allocation115_spill] sm:$0xff] %v17554_v12  ;;  %v6589_v63 = vcombine.high %v6581_v60, %v6581_v60  ;;  %v17569_v25 = vrot.slane %v6581_v60, %v12809_v43  ;;  %v17572_v35 = vrot.slane %v6588_v47, %v12809_v43  ;;  %v6789_v0 = vrot.slane %v6581_v60, %v20238_v16 }
 0x3fb   :  { %20652 = vst [vmem:[#allocation139_spill] sm:$0xff] %v17560_v59  ;;  %v17576_v5 = vrot.slane %v6588_v47, %v20238_v16  ;;  %v6463_v52 = vadd.f32 %v17007_v1, %v17237_v22  ;;  %v6466_v39 = vadd.f32 %v17261_v51, %v17007_v1  ;;  %v6465_v38 = vadd.f32 %v17007_v1, %v17275_v29 }
 0x3fc   :  { %v17581_v7 = vrot.slane %v6589_v63, %v12809_v43  ;;  %v6793_v4 = vrot.slane %v6589_v63, %v20238_v16  ;;  %v17590_v60 = vsel %vm1697_vm5, %v17548_v31, %v7070_v62  ;;  %v17593_v18 = vrot.slane %v7267_v10, %v20539_v32 }
 0x3fd   :  { %v17597_v22 = vcombine.high %v17560_v59, %v17560_v59  ;;  %v6479_v55 = vmax.f32 %v6463_v52, 0.0  ;;  %v6482_v49 = vmax.f32 %v6466_v39, 0.0  ;;  %v6481_v1 = vmax.f32 %v6465_v38, 0.0 }
 0x3fe   :  { %20653 = vst [vmem:[#allocation136_spill] sm:$0xff] %v17593_v18  ;;  %v8234_v63 = vsel %vm2297_vm4, %v6793_v4, %v6789_v0  ;;  %v8376_v51 = vsel %vm2297_vm4, %v17581_v7, %v17569_v25  ;;  %v17614_v52 = vrot.slane %v17560_v59, %v12809_v43  ;;  %v17634_v23 = vcombine.high %v6588_v47, %v6588_v47 }
 0x3ff   :  { %v17605_v29 = vsel %vm1697_vm5, %v17576_v5, %v8234_v63  ;;  %v17609_v10 = vsel %vm1697_vm5, %v17572_v35, %v8376_v51  ;;  %v7284_v62 = vcombine.high %v6479_v55, %v6479_v55  ;;  %v7291_v27 = vrot.slane %v6479_v55, %v20539_v32 }
 0x400   :  { %20654 = vst [vmem:[#allocation127_spill] sm:$0xff] %v17605_v29  ;;  %20655 = vst [vmem:[#allocation147_spill] sm:$0xff] %v17609_v10  ;;  %v8011_v39 = vcombine.high %v6482_v49, %v6482_v49  ;;  %v17619_v38 = vrot.slane %v6482_v49, %v20539_v32  ;;  %v17623_v63 = vcombine.high %v17593_v18, %v17593_v18 }
 0x401   :  { %v17627_v51 = vrot.slane %v17597_v22, %v12809_v43  ;;  %v7298_v55 = vrot.slane %v7284_v62, %v20539_v32  ;;  %v7299_v10 = vcombine.high %v7291_v27, %v7291_v27  ;;  %v17632_v29 = vrot.slane %v17593_v18, %v12809_v43 }
 0x402   :  { %20656 = vst [vmem:[#allocation163_spill] sm:$0xff] %v17619_v38  ;;  %20657 = vst [vmem:[#allocation158_spill] sm:$0xff] %v17623_v63  ;;  %v17637_v49 = vrot.slane %v8011_v39, %v20539_v32  ;;  %v7301_v13 = vcombine.high %v6481_v1, %v6481_v1  ;;  %v17647_v62 = vcombine.high %v17619_v38, %v17619_v38 }
 0x403   :  { %v17639_v59 = vcombine.high %v7298_v55, %v7298_v55  ;;  %v17642_v17 = vrot.slane %v7299_v10, %v12809_v43  ;;  %v7676_v8 = vrot.slane %v7299_v10, %v20238_v16  ;;  %v17654_v39 = vrot.slane %v7291_v27, %v12809_v43 }
 0x404   :  { %20658 = vst [vmem:[#allocation171_spill] sm:$0xff] %v17637_v49  ;;  %20659 = vst [vmem:[#allocation186_spill] sm:$0xff] %v17647_v62  ;;  %v7672_v61 = vrot.slane %v7291_v27, %v20238_v16  ;;  %v17658_v53 = vrot.slane %v7298_v55, %v12809_v43  ;;  %v7680_v10 = vrot.slane %v7298_v55, %v20238_v16 }
 0x405   :  { %v17662_v11 = vrot.slane %v6481_v1, %v20539_v32  ;;  %v6813_v63 = vsel %vm1701_vm7, %v17448_v9, %v20639_v19  ;;  %v7888_v47 = vsel %vm2297_vm4, %v17642_v17, %v17654_v39  ;;  %v17673_v27 = vrot.slane %v17522_v15, %v20238_v16 }
 0x406   :  { %v7722_v38 = vsel %vm2297_vm4, %v7676_v8, %v7672_v61  ;;  %v17677_v55 = vrot.slane %v17634_v23, %v20238_v16  ;;  %v17683_v19 = vrot.slane %v17647_v62, %v12809_v43  ;;  %v17687_v9 = vrot.slane %v17637_v49, %v12809_v43 }
 0x407   :  { %v17690_v61 = vrot.slane %v7301_v13, %v20539_v32  ;;  %v6814_v8 = vsel %vm1703_vm8, %v17459_v37, %v6813_v63  ;;  %v6819_v18 = vsel %vm1699_vm6, %v17554_v12, %v6818_v26  ;;  %v6663_v1 = vsel %vm1697_vm5, %v17162_v40, %v17159_v34 }
 0x408   :  { %20660 = vst [vmem:[#allocation183_spill] sm:$0xff] %v17683_v19  ;;  %20661 = vst [vmem:[#allocation201_spill] sm:$0xff] %v17687_v9  ;;  %v6669_v62 = vsel %vm1697_vm5, %v17453_v48, %v17445_v44  ;;  %v17703_v19 = vsel %vm1697_vm5, %v7680_v10, %v7722_v38  ;;  %v17709_v13 = vsel %vm1697_vm5, %v17658_v53, %v7888_v47 }
 0x409   :  { %v17713_v37 = vcombine.high %v17662_v11, %v17662_v11  ;;  %v17717_v26 = vrot.slane %v17662_v11, %v12809_v43  ;;  %v6815_v63 = vsel %vm1705_vm9, %v17469_v45, %v6814_v8  ;;  %v6820_v38 = vsel %vm1701_vm7, %v6789_v0, %v6819_v18 }
 0x40a   :  { %v6664_v10 = vsel %vm1699_vm6, %v17167_v14, %v6663_v1  ;;  %v6816_v47 = vsel %vm1707_vm10, %v17673_v27, %v6815_v63  ;;  %v6821_v32 = vsel %vm1703_vm8, %v6793_v4, %v6820_v38  ;;  %v6670_v9 = vsel %vm1699_vm6, %v17456_v42, %v6669_v62  ;;  %v20662_v38 = vld [vmem:[#allocation58_spill] sm:$0xff] }
 0x40b   :  { %v17728_v12 = vsel %vm1808_vm12, 0.0, %v6664_v10  ;;  %v17734_v49 = vcombine.high %v17690_v61, %v17690_v61  ;;  %11250 = vmatprep.mubr.msk.f32.mxu0 %vm6824_vm13, %v6816_v47  ;;  %v6822_v45 = vsel %vm1705_vm9, %v17576_v5, %v6821_v32  ;;  %v6671_v4 = vsel %vm1697_vm5, %v17527_v3, %v17545_v33 }
 0x40c   :  { %v6823_v0 = vsel %vm1707_vm10, %v17677_v55, %v6822_v45  ;;  %v6925_v62 = vcombine.low %v17089_v41, %v17728_v12  ;;  %v6672_v1 = vsel %vm1699_vm6, %v17548_v31, %v6671_v4  ;;  %v6673_v8 = vsel %vm1697_vm5, %v17581_v7, %v17569_v25 }
 0x40d   :  { %v17755_v5 = vrot.slane %v17713_v37, %v12809_v43  ;;  %11251 = vmatmul.mubr.msk.f32.gmra.mrb[66].mxu0 %vm6824_vm13, %v6823_v0  ;;  %v17759_v32 = vsel %vm1808_vm12, 0.0, %v6670_v9  ;;  %v6674_v63 = vsel %vm1699_vm6, %v17572_v35, %v6673_v8  ;;  %v7055_v10 = vsel %vm1701_vm7, %v17159_v34, %v20662_v38  ;;  %v20697_v34 = vld [vmem:[#allocation136_spill] sm:$0xff] }
 0x40e   :  { %11269 = vmatprep.mubr.msk.f32.mxu0 %vm6824_vm13, %v6925_v62  ;;  %v17768_v47 = vsel %vm1808_vm12, 0.0, %v6672_v1  ;;  %v17771_v45 = vsel %vm1808_vm12, 0.0, %v6674_v63  ;;  %v17775_v4 = vrot.slane %v17155_v20, %v12809_v43  ;;  %v7056_v9 = vsel %vm1703_vm8, %v17162_v40, %v7055_v10  ;;  %v20666_v20 = vld [vmem:[#allocation290_spill] sm:$0xff] }
 0x40f   :  { %v17781_v0 = vrot.slane %v17690_v61, %v12809_v43  ;;  %v6928_v1 = vcombine.low %v17768_v47, %v17771_v45  ;;  %v7057_v8 = vsel %vm1705_vm9, %v17167_v14, %v7056_v9  ;;  %v6927_v63 = vcombine.low %v17089_v41, %v17759_v32  ;;  %v20668_v14 = vld [vmem:[#allocation77_spill] sm:$0xff] }
 0x410   :  { %20663 = vst [vmem:[#allocation198_spill] sm:$0xff] %v17775_v4  ;;  %v7063_v10 = vsel %vm1703_vm8, %v17255_v30, %v17427_v46  ;;  %v7066_v62 = vsel %vm1701_vm7, %v17445_v44, %v20662_v38  ;;  %v20664_v18 = vcombine.low %v17414_v54, %v17366_v58  ;;  %v17805_v9 = vrot.slane %v17634_v23, %v12809_v43  ;;  %v20665_v46 = vld [vmem:[#allocation270_spill] sm:$0xff]  ;;  %v20667_v38 = vld [vmem:[#allocation131_spill] sm:$0xff] }
 0x411   :  { %v7072_v41 = vsel %vm1699_vm6, %v17557_v28, %v17590_v60  ;;  %v7414_v30 = vsel %vm1697_vm5, %v17122_v56, %v17126_v6  ;;  %v7416_v44 = vsel %vm1697_vm5, %v20666_v20, %v20665_v46  ;;  %v7058_v23 = vsel %vm1707_vm10, %v17775_v4, %v7057_v8  ;;  %v20669_v6 = vld [vmem:[#allocation20_spill] sm:$0xff] }
 0x412   :  { %11270 = vmatmul.mubr.msk.f32.vlgmr.msra.gmra.mrb[64].mxu0 %vm6824_vm13, %v20664_v18  ;;  %v7073_v18 = vsel %vm1701_vm7, %v17569_v25, %v7072_v41  ;;  %v7415_v60 = vsel %vm1699_vm6, %v20667_v38, %v7414_v30  ;;  %v7417_v40 = vsel %vm1699_vm6, %v20669_v6, %v7416_v44  ;;  %v7422_v8 = vsel %vm1697_vm5, %v17480_v36, %v17493_v2  ;;  %v20670_v44 = vld [vmem:[#allocation286_spill] sm:$0xff]  ;;  %v20671_v38 = vld [vmem:[#allocation79_spill] sm:$0xff] }
 0x413   :  { %11700 = vmatpush3.bf16.msra.mxu0 %v17098_v50  ;;  %11272 = vmatprep.mubr.msk.f32.mxu0 %vm6824_vm13, %v6927_v63  ;;  %v7074_v56 = vsel %vm1703_vm8, %v17581_v7, %v7073_v18  ;;  %v17830_v50 = vsel %vm1808_vm12, 0.0, %v7415_v60  ;;  %v17838_v63 = vsel %vm1808_vm12, 0.0, %v7417_v40  ;;  %v7423_v41 = vsel %vm1699_vm6, %v17505_v21, %v7422_v8 }
 0x414   :  { %11702 = vmatprep.subr.bf16.mxu0 %v20668_v14  ;;  %v7075_v25 = vsel %vm1705_vm9, %v17572_v35, %v7074_v56  ;;  %v7424_v7 = vsel %vm1697_vm5, %v17627_v51, %v17614_v52  ;;  %v17855_v2 = vsel %vm1808_vm12, 0.0, %v7423_v41  ;;  %v7426_v35 = vsel %vm1697_vm5, %v17642_v17, %v17654_v39  ;;  %v20672_v56 = vld [vmem:[#allocation192_spill] sm:$0xff]  ;;  %v20673_v17 = vld [vmem:[#allocation122_spill] sm:$0xff] }
 0x415   :  { %v17848_v30 = vsel %vm1707_vm10, %v17805_v9, %v7075_v25  ;;  %v7425_v40 = vsel %vm1699_vm6, %v17632_v29, %v7424_v7  ;;  %v7604_v18 = vrot.slane %v20670_v44, %v20238_v16  ;;  %v20674_v39 = vrot.slane %v20673_v17, %v20238_v16  ;;  %v20675_v7 = vld [vmem:[#allocation118_spill] sm:$0xff] }
 0x416   :  { %11273 = vmatmul.mubr.msk.f32.gmra.mrb[66].mxu0 %vm6824_vm13, %v6928_v1  ;;  %v17860_v21 = vsel %vm1808_vm12, 0.0, %v7425_v40  ;;  %v7428_v1 = vsel %vm1697_vm5, %v17755_v5, %v17717_v26  ;;  %v20676_v40 = vrot.slane %v20675_v7, %v20238_v16  ;;  %v20680_v7 = vld [vmem:[#allocation33_spill] sm:$0xff]  ;;  %v20693_v36 = vrot.slane %v17639_v59, %v20238_v16 }
 0x417   :  { %11704 = vmatpush3.bf16.msra.mxu0 %v20668_v14  ;;  %11291 = vmatprep.mubr.msk.f32.mxu0 %vm6824_vm13, %v7058_v23  ;;  %v7427_v23 = vsel %vm1699_vm6, %v17658_v53, %v7426_v35  ;;  %v7429_v60 = vsel %vm1699_vm6, %v17781_v0, %v7428_v1  ;;  %v7703_v8 = vsel %vm1699_vm6, %v20674_v39, %v20672_v56  ;;  %v20678_v39 = vld [vmem:[#allocation223_spill] sm:$0xff] }
 0x418   :  { %11706 = vmatprep.subr.bf16.mxu0 %v20671_v38  ;;  %v17883_v25 = vsel %vm1808_vm12, 0.0, %v7427_v23  ;;  %v17886_v41 = vsel %vm1808_vm12, 0.0, %v7429_v60  ;;  %v7704_v53 = vsel %vm1701_vm7, %v20676_v40, %v7703_v8  ;;  %v20677_v35 = vrot.slane %v17329_v57, %v20238_v16  ;;  %v20682_v57 = vld [vmem:[#allocation209_spill] sm:$0xff] }
 0x419   :  { %v7067_v56 = vsel %vm1703_vm8, %v17453_v48, %v7066_v62  ;;  %v20679_v60 = vrot.slane %v20678_v39, %v20238_v16  ;;  %v20681_v8 = vrot.slane %v20680_v7, %v20238_v16  ;;  %v20684_v62 = vld [vmem:[#allocation81_spill] sm:$0xff]  ;;  %v7724_v4 = vsel %vm1699_vm6, %v20693_v36, %v17703_v19 }
 0x41a   :  { %v7712_v1 = vsel %vm1703_vm8, %v20677_v35, %v17382_v24  ;;  %v20683_v24 = vrot.slane %v20682_v57, %v20238_v16  ;;  %v20685_v35 = vrot.slane %v20684_v62, %v20238_v16  ;;  %v20688_v7 = vld [vmem:[#allocation89_spill] sm:$0xff]  ;;  %v20698_v19 = vrot.slane %v20697_v34, %v20238_v16 }
 0x41b   :  { %v7705_v14 = vsel %vm1703_vm8, %v20679_v60, %v7704_v53  ;;  %v7713_v40 = vsel %vm1705_vm9, %v20681_v8, %v7712_v1  ;;  %11708 = vmatpush3.bf16.msra.mxu0 %v20671_v38  ;;  %v20686_v53 = vld [vmem:[#allocation158_spill] sm:$0xff]  ;;  %v20689_v1 = vrot.slane %v20688_v7, %v20238_v16  ;;  %v20690_v8 = vld [vmem:[#allocation100_spill] sm:$0xff]  ;;  %v7068_v34 = vsel %vm1705_vm9, %v17456_v42, %v7067_v56  ;;  %v20705_v56 = vld [vmem:[#allocation51_spill] sm:$0xff] }
 0x41c   :  { %v7706_v48 = vsel %vm1705_vm9, %v20683_v24, %v7705_v14  ;;  %v17918_v23 = vsel %vm1707_vm10, %v20685_v35, %v7713_v40  ;;  %v7668_v39 = vrot.slane %v20686_v53, %v20238_v16  ;;  %v20687_v60 = vld [vmem:[#allocation106_spill] sm:$0xff]  ;;  %11710 = vmatprep.subr.bf16.mxu0 %v20690_v8  ;;  %v20691_v14 = vld [vmem:[#allocation139_spill] sm:$0xff]  ;;  %v7700_v35 = vrot.slane %v17734_v49, %v20238_v16 }
 0x41d   :  { %v7717_v38 = vsel %vm1699_vm6, %v20689_v1, %v20687_v60  ;;  %v17929_v57 = vsel %vm1707_vm10, %v7604_v18, %v7706_v48  ;;  %v20692_v24 = vrot.slane %v20691_v14, %v20238_v16  ;;  %v20694_v60 = vld [vmem:[#allocation18_spill] sm:$0xff]  ;;  %v17946_v18 = vrot.slane %v17522_v15, %v12809_v43 }
 0x41e   :  { %v7064_v1 = vsel %vm1705_vm9, %v20694_v60, %v7063_v10  ;;  %v20695_v48 = vrot.slane %v17597_v22, %v20238_v16  ;;  %v20696_v14 = vrot.slane %v17662_v11, %v20238_v16  ;;  %v20699_v10 = vrot.slane %v17713_v37, %v20238_v16  ;;  %v20700_v60 = vld [vmem:[#allocation199_spill] sm:$0xff] }
 0x41f   :  { %v7718_v40 = vsel %vm1701_vm7, %v20692_v24, %v7717_v38  ;;  %v7842_v22 = vrot.slane %v20670_v44, %v12809_v43  ;;  %11712 = vmatpush3.bf16.msra.mxu0 %v20690_v8  ;;  %v20702_v37 = vrot.slane %v17690_v61, %v20238_v16 }
 0x420   :  { %v7719_v38 = vsel %vm1703_vm8, %v20695_v48, %v7718_v40  ;;  %v7725_v24 = vsel %vm1701_vm7, %v20696_v14, %v7724_v4  ;;  %v20701_v40 = vrot.slane %v20673_v17, %v12809_v43  ;;  %v20704_v14 = vld [vmem:[#allocation110_spill] sm:$0xff] }
 0x421   :  { %v7720_v36 = vsel %vm1705_vm9, %v20698_v19, %v7719_v38  ;;  %v7726_v15 = vsel %vm1703_vm8, %v20699_v10, %v7725_v24  ;;  %v20703_v38 = vld [vmem:[#allocation32_spill] sm:$0xff]  ;;  %11714 = vmatprep.subr.bf16.mxu0 %v20704_v14 }
 0x422   :  { %v7869_v11 = vsel %vm1699_vm6, %v20701_v40, %v20700_v60  ;;  %v17975_v4 = vsel %vm1707_vm10, %v7668_v39, %v7720_v36  ;;  %v7727_v48 = vsel %vm1705_vm9, %v20702_v37, %v7726_v15  ;;  %v7065_v17 = vsel %vm1707_vm10, %v20703_v38, %v7064_v1  ;;  %v20706_v39 = vld [vmem:[#allocation240_spill] sm:$0xff]  ;;  %v20708_v36 = vld [vmem:[#allocation119_spill] sm:$0xff] }
 0x423   :  { %v7870_v44 = vsel %vm1701_vm7, %v20665_v46, %v7869_v11  ;;  %v17987_v8 = vsel %vm1707_vm10, %v7700_v35, %v7727_v48  ;;  %v7878_v61 = vsel %vm1703_vm8, %v20706_v39, %v20705_v56  ;;  %v20707_v19 = vld [vmem:[#allocation272_spill] sm:$0xff]  ;;  %v7858_v1 = vrot.slane %v20686_v53, %v12809_v43  ;;  %11292 = vmatmul.mubr.msk.f32.vlgmr.msra.gmra.mrb[64].mxu0 %vm6824_vm13, %v7065_v17  ;;  %v20712_v11 = vld [vmem:[#allocation13_spill] sm:$0xff] }
 0x424   :  { %v7871_v42 = vsel %vm1703_vm8, %v20666_v20, %v7870_v44  ;;  %v7879_v46 = vsel %vm1705_vm9, %v20707_v19, %v7878_v61  ;;  %v20709_v35 = vrot.slane %v20688_v7, %v12809_v43  ;;  %v7069_v20 = vsel %vm1707_vm10, %v17946_v18, %v7068_v34  ;;  %11716 = vmatpush3.bf16.msra.mxu0 %v20704_v14  ;;  %v20714_v48 = vld [vmem:[#allocation109_spill] sm:$0xff] }
 0x425   :  { %v7872_v24 = vsel %vm1705_vm9, %v20669_v6, %v7871_v42  ;;  %v20710_v6 = vrot.slane %v20684_v62, %v12809_v43  ;;  %11294 = vmatprep.mubr.msk.f32.mxu0 %vm6824_vm13, %v7069_v20  ;;  %v20711_v62 = vrot.slane %v17639_v59, %v12809_v43  ;;  %v8188_v34 = vrot.slane %v20712_v11, %v20238_v16  ;;  %v20715_v44 = vld [vmem:[#allocation9_spill] sm:$0xff] }
 0x426   :  { %v7883_v10 = vsel %vm1699_vm6, %v20709_v35, %v20708_v36  ;;  %v18009_v15 = vsel %vm1707_vm10, %v7842_v22, %v7872_v24  ;;  %v7866_v22 = vrot.slane %v17734_v49, %v12809_v43  ;;  %11718 = vmatprep.subr.bf16.mxu0 %v20714_v48  ;;  %v8192_v59 = vrot.slane %v20715_v44, %v20238_v16  ;;  %v10155_v17 = vld [vmem:[%s19359_s5 + $0xf0] sm:$0xff]  ;;  %v10156_v14 = vld [vmem:[%s19359_s5 + $0xf8] sm:$0xff]  ;;  %v20718_v24 = vld [vmem:[#allocation183_spill] sm:$0xff] }
 0x427   :  { %v18015_v60 = vsel %vm1707_vm10, %v20710_v6, %v7879_v46  ;;  %v7884_v53 = vsel %vm1701_vm7, %v17614_v52, %v7883_v10  ;;  %v7890_v40 = vsel %vm1699_vm6, %v20711_v62, %v17709_v13  ;;  %v20713_v52 = vld [vmem:[#allocation163_spill] sm:$0xff]  ;;  %v20716_v13 = vld [vmem:[#allocation66_spill] sm:$0xff]  ;;  %11295 = vmatmul.mubr.msk.f32.gmra.mrb[66].mxu0 %vm6824_vm13, %v17848_v30  ;;  %v8073_v61 = vcombine.low %v17759_v32, %v17768_v47  ;;  %v20720_v30 = vld [vmem:[#allocation201_spill] sm:$0xff] }
 0x428   :  { %v7885_v7 = vsel %vm1703_vm8, %v17627_v51, %v7884_v53  ;;  %v18034_v37 = vrot.slane %v20713_v52, %v12809_v43  ;;  %v7891_v49 = vsel %vm1701_vm7, %v17717_v26, %v7890_v40  ;;  %v8196_v38 = vrot.slane %v20716_v13, %v20238_v16  ;;  %v20717_v26 = vld [vmem:[#allocation171_spill] sm:$0xff]  ;;  %11720 = vmatpush3.bf16.msra.mxu0 %v20714_v48  ;;  %v20723_v20 = vld [vmem:[#allocation101_spill] sm:$0xff] }
 0x429   :  { %v7886_v51 = vsel %vm1705_vm9, %v17632_v29, %v7885_v7  ;;  %v7892_v29 = vsel %vm1703_vm8, %v17755_v5, %v7891_v49  ;;  %v18058_v56 = vcombine.high %v20717_v26, %v20717_v26  ;;  %v20719_v5 = vcombine.low %v17830_v50, %v17838_v63  ;;  %v20722_v36 = vld [vmem:[#allocation47_spill] sm:$0xff]  ;;  %11722 = vmatprep.subr.bf16.mxu0 %v20723_v20  ;;  %v20724_v63 = vld [vmem:[#allocation186_spill] sm:$0xff] }
 0x42a   :  { %v18052_v42 = vsel %vm1707_vm10, %v7858_v1, %v7886_v51  ;;  %v7893_v39 = vsel %vm1705_vm9, %v17781_v0, %v7892_v29  ;;  %v8054_v19 = vsel %vm1697_vm5, %v20718_v24, %v18034_v37  ;;  %v20721_v1 = vld [vmem:[#allocation24_spill] sm:$0xff]  ;;  %v8200_v10 = vrot.slane %v20713_v52, %v20238_v16  ;;  %v10161_v7 = vld [vmem:[%s19359_s5 + $0x100] sm:$0xff]  ;;  %v10204_v32 = vld [vmem:[%s19359_s5 + $0x1f8] sm:$0xff] }
 0x42b   :  { %11313 = vmatprep.mubr.msk.f32.mxu0 %vm6824_vm13, %v20719_v5  ;;  %v18075_v46 = vsel %vm1707_vm10, %v7866_v22, %v7893_v39  ;;  %v8055_v0 = vsel %vm1699_vm6, %v20720_v30, %v8054_v19  ;;  %v18082_v35 = vsel %vm1699_vm6, %v20722_v36, %v20721_v1  ;;  %v11725_v6 = vpack.c.bf16 %v10156_v14, %v10155_v17  ;;  %v10162_v22 = vld [vmem:[%s19359_s5 + $0x108] sm:$0xff]  ;;  %v20727_v17 = vld [vmem:[#allocation97_spill] sm:$0xff] }
 0x42c   :  { %v18088_v50 = vsel %vm1808_vm12, 0.0, %v8055_v0  ;;  %v8204_v53 = vrot.slane %v20724_v63, %v20238_v16  ;;  %v20725_v40 = vld [vmem:[#allocation59_spill] sm:$0xff]  ;;  %v8208_v52 = vrot.slane %v20717_v26, %v20238_v16  ;;  %11724 = vmatpush3.bf16.msra.mxu0 %v20723_v20  ;;  %v20729_v39 = vld [vmem:[#allocation5_spill] sm:$0xff]  ;;  %v20732_v63 = vld [vmem:[#allocation54_spill] sm:$0xff] }
 0x42d   :  { %v8074_v62 = vcombine.low %v17771_v45, %v18088_v50  ;;  %v8224_v11 = vsel %vm1703_vm8, %v8188_v34, %v20725_v40  ;;  %v20726_v51 = vld [vmem:[#allocation75_spill] sm:$0xff]  ;;  %v8212_v34 = vrot.slane %v18058_v56, %v20238_v16  ;;  %11726 = vmatprep.subr.bf16.mxu0 %v11725_v6  ;;  %v10163_v5 = vld [vmem:[%s19359_s5 + $0x110] sm:$0xff]  ;;  %v10164_v16 = vld [vmem:[%s19359_s5 + $0x118] sm:$0xff] }
 0x42e   :  { %v8225_v48 = vsel %vm1705_vm9, %v8192_v59, %v8224_v11  ;;  %v8229_v49 = vsel %vm1699_vm6, %v17673_v27, %v20726_v51  ;;  %v20728_v29 = vld [vmem:[#allocation127_spill] sm:$0xff]  ;;  %v11729_v59 = vpack.c.bf16 %v10162_v22, %v10161_v7  ;;  %v20730_v0 = vld [vmem:[#allocation93_spill] sm:$0xff]  ;;  %v20734_v40 = vld [vmem:[#allocation78_spill] sm:$0xff] }
 0x42f   :  { %v18110_v44 = vsel %vm1707_vm10, %v8196_v38, %v8225_v48  ;;  %v8230_v14 = vsel %vm1701_vm7, %v20727_v17, %v8229_v49  ;;  %v8236_v26 = vsel %vm1699_vm6, %v17677_v55, %v20728_v29  ;;  %v8350_v38 = vrot.slane %v20716_v13, %v12809_v43  ;;  %v20731_v36 = vld [vmem:[#allocation115_spill] sm:$0xff]  ;;  %v20733_v7 = vld [vmem:[#allocation17_spill] sm:$0xff]  ;;  %v20735_v48 = vld [vmem:[#allocation34_spill] sm:$0xff] }
 0x430   :  { %v8231_v27 = vsel %vm1703_vm8, %v20729_v39, %v8230_v14  ;;  %v8237_v19 = vsel %vm1701_vm7, %v8200_v10, %v8236_v26  ;;  %11728 = vmatpush3.bf16.msra.mxu0 %v11725_v6  ;;  %v8366_v22 = vsel %vm1703_vm8, %v20733_v7, %v20732_v63  ;;  %v8371_v11 = vsel %vm1699_vm6, %v17946_v18, %v20734_v40  ;;  %v10165_v6 = vld [vmem:[%s19359_s5 + $0x120] sm:$0xff]  ;;  %v10166_v49 = vld [vmem:[%s19359_s5 + $0x128] sm:$0xff]  ;;  %v20737_v29 = vld [vmem:[#allocation57_spill] sm:$0xff] }
 0x431   :  { %v8232_v55 = vsel %vm1705_vm9, %v20730_v0, %v8231_v27  ;;  %v8238_v1 = vsel %vm1703_vm8, %v8204_v53, %v8237_v19  ;;  %11730 = vmatprep.subr.bf16.mxu0 %v11729_v59  ;;  %v11733_v53 = vpack.c.bf16 %v10164_v16, %v10163_v5  ;;  %v8367_v51 = vsel %vm1705_vm9, %v20735_v48, %v8366_v22  ;;  %v20738_v26 = vld [vmem:[#allocation244_spill] sm:$0xff]  ;;  %v10177_v5 = vld [vmem:[%s19359_s5 + $0x160] sm:$0xff]  ;;  %v10192_v48 = vld [vmem:[%s19359_s5 + $0x1b8] sm:$0xff] }
 0x432   :  { %v18135_v20 = vsel %vm1707_vm10, %v20731_v36, %v8232_v55  ;;  %v8239_v10 = vsel %vm1705_vm9, %v8208_v52, %v8238_v1  ;;  %v8372_v52 = vsel %vm1701_vm7, %v17545_v33, %v8371_v11  ;;  %v18158_v17 = vsel %vm1707_vm10, %v8350_v38, %v8367_v51  ;;  %v10178_v16 = vld [vmem:[%s19359_s5 + $0x168] sm:$0xff]  ;;  %v10179_v55 = vld [vmem:[%s19359_s5 + $0x170] sm:$0xff]  ;;  %v10180_v1 = vld [vmem:[%s19359_s5 + $0x178] sm:$0xff] }
 0x433   :  { %v18139_v13 = vsel %vm1707_vm10, %v8212_v34, %v8239_v10  ;;  %v8373_v18 = vsel %vm1703_vm8, %v17527_v3, %v8372_v52  ;;  %v8354_v14 = vrot.slane %v18058_v56, %v12809_v43  ;;  %v20736_v34 = vld [vmem:[#allocation147_spill] sm:$0xff]  ;;  %v20739_v39 = vcombine.low %v20737_v29, %v20738_v26  ;;  %v10200_v51 = vld [vmem:[%s19359_s5 + $0x1d8] sm:$0xff] }
 0x434   :  { %v8378_v33 = vsel %vm1699_vm6, %v17805_v9, %v20736_v34  ;;  %v8374_v27 = vsel %vm1705_vm9, %v17548_v31, %v8373_v18  ;;  %v20740_v3 = vcombine.low %v17855_v2, %v17860_v21  ;;  %v11737_v56 = vpack.c.bf16 %v10166_v49, %v10165_v6  ;;  %v10168_v2 = vld [vmem:[%s19359_s5 + $0x138] sm:$0xff]  ;;  %v10186_v36 = vld [vmem:[%s19359_s5 + $0x188] sm:$0xff]  ;;  %v10189_v7 = vld [vmem:[%s19359_s5 + $0x1a0] sm:$0xff] }
 0x435   :  { %11314 = vmatmul.mubr.msk.f32.vlgmr.msra.gmra.mrb[64].mxu0 %vm6824_vm13, %v20739_v39  ;;  %v8379_v19 = vsel %vm1701_vm7, %v18034_v37, %v8378_v33  ;;  %v18181_v43 = vsel %vm1707_vm10, %v17557_v28, %v8374_v27  ;;  %v10167_v37 = vld [vmem:[%s19359_s5 + $0x130] sm:$0xff]  ;;  %v20741_v28 = vcombine.low %v17883_v25, %v17886_v41  ;;  %v10176_v41 = vld [vmem:[%s19359_s5 + $0x158] sm:$0xff]  ;;  %v11753_v0 = vpack.c.bf16 %v10178_v16, %v10177_v5  ;;  %v10190_v22 = vld [vmem:[%s19359_s5 + $0x1a8] sm:$0xff] }
 0x436   :  { %11316 = vmatprep.mubr.msk.f32.mxu0 %vm6824_vm13, %v20740_v3  ;;  %11732 = vmatpush3.bf16.msra.mxu0 %v11729_v59  ;;  %v8380_v9 = vsel %vm1703_vm8, %v20718_v24, %v8379_v19  ;;  %v11741_v24 = vpack.c.bf16 %v10168_v2, %v10167_v37  ;;  %v10174_v59 = vld [vmem:[%s19359_s5 + $0x148] sm:$0xff]  ;;  %v10175_v25 = vld [vmem:[%s19359_s5 + $0x150] sm:$0xff]  ;;  %v11769_v40 = vpack.c.bf16 %v10190_v22, %v10189_v7  ;;  %v10201_v34 = vld [vmem:[%s19359_s5 + $0x1e0] sm:$0xff] }
 0x437   :  { %11734 = vmatprep.subr.bf16.mxu0 %v11733_v53  ;;  %v8381_v31 = vsel %vm1705_vm9, %v20720_v30, %v8380_v9  ;;  %v10173_v30 = vld [vmem:[%s19359_s5 + $0x140] sm:$0xff]  ;;  %v8071_v11 = vcombine.low %v17728_v12, %v17414_v54  ;;  %v10198_v12 = vld [vmem:[%s19359_s5 + $0x1c8] sm:$0xff]  ;;  %v20742_v52 = vld [vmem:[#allocation241_spill] sm:$0xff] }
 0x438   :  { %v18194_v21 = vsel %vm1707_vm10, %v8354_v14, %v8381_v31  ;;  %v11745_v38 = vpack.c.bf16 %v10174_v59, %v10173_v30  ;;  %v10197_v54 = vld [vmem:[%s19359_s5 + $0x1c0] sm:$0xff]  ;;  %v8216_v6 = vsel %vm1701_vm7, %v20742_v52, %v18082_v35  ;;  %v10202_v33 = vld [vmem:[%s19359_s5 + $0x1e8] sm:$0xff]  ;;  %v20748_v19 = vld [vmem:[#allocation149_spill] sm:$0xff] }
 0x439   :  { %11317 = vmatmul.mubr.msk.f32.gmra.mrb[66].mxu0 %vm6824_vm13, %v20741_v28  ;;  %v20743_v18 = vld [vmem:[#allocation123_spill] sm:$0xff]  ;;  %v20746_v35 = vld [vmem:[#allocation274_spill] sm:$0xff]  ;;  %v11785_v9 = vpack.c.bf16 %v10202_v33, %v10201_v34 }
 0x43a   :  { %11736 = vmatpush3.bf16.msra.mxu0 %v11733_v53  ;;  %11335 = vmatprep.mubr.msk.f32.mxu0 %vm6824_vm13, %v17929_v57  ;;  %v11749_v57 = vpack.c.bf16 %v10176_v41, %v10175_v25  ;;  %v10191_v53 = vld [vmem:[%s19359_s5 + $0x1b0] sm:$0xff]  ;;  %v8217_v14 = vsel %vm1703_vm8, %v20743_v18, %v8216_v6  ;;  %v20744_v29 = vld [vmem:[#allocation43_spill] sm:$0xff]  ;;  %v20751_v50 = vld [vmem:[#allocation198_spill] sm:$0xff] }
 0x43b   :  { %11738 = vmatprep.subr.bf16.mxu0 %v11737_v56  ;;  %v20745_v26 = vcombine.low %v17366_v58, %v20744_v29  ;;  %v8218_v39 = vsel %vm1705_vm9, %v20746_v35, %v8217_v14  ;;  %v20747_v27 = vld [vmem:[#allocation143_spill] sm:$0xff]  ;;  %v10203_v58 = vld [vmem:[%s19359_s5 + $0x1f0] sm:$0xff]  ;;  %v10212_v30 = vld [vmem:[%s19359_s5 + $0x218] sm:$0xff] }
 0x43c   :  { %v8355_v3 = vsel %vm2297_vm4, %v20748_v19, %v20747_v27  ;;  %v20749_v47 = vld [vmem:[#allocation15_spill] sm:$0xff]  ;;  %v11789_v37 = vpack.c.bf16 %v10204_v32, %v10203_v58  ;;  %v20753_v41 = vld [vmem:[#allocation217_spill] sm:$0xff]  ;;  %v10221_v33 = vld [vmem:[%s19362_s6] ss:$0 sm:$0xff] }
 0x43d   :  { %v10209_v2 = vld [vmem:[%s19359_s5 + $0x200] sm:$0xff]  ;;  %v10210_v45 = vld [vmem:[%s19359_s5 + $0x208] sm:$0xff]  ;;  %v8515_v7 = vld [vmem:[%s19361_s7 + $0x18] sm:$0xff] }
 0x43e   :  { %11740 = vmatpush3.bf16.msra.mxu0 %v11737_v56  ;;  %v20750_v56 = vld [vmem:[#allocation184_spill] sm:$0xff]  ;;  %v11793_v28 = vpack.c.bf16 %v10210_v45, %v10209_v2  ;;  %v20752_v59 = vld [vmem:[#allocation231_spill] sm:$0xff]  ;;  %v8527_v14 = vld [vmem:[%s19361_s7 + $0x78] sm:$0xff] }
 0x43f   :  { %11742 = vmatprep.subr.bf16.mxu0 %v11741_v24  ;;  %v8356_v31 = vsel %vm1697_vm5, %v20750_v56, %v8355_v3  ;;  %v10213_v5 = vld [vmem:[%s19359_s5 + $0x220] sm:$0xff]  ;;  %v10214_v16 = vld [vmem:[%s19359_s5 + $0x228] sm:$0xff]  ;;  %v8526_v18 = vld [vmem:[%s19361_s7 + $0x70] sm:$0xff] }
 0x440   :  { %v8524_v52 = vld [vmem:[%s19361_s7 + $0x60] sm:$0xff]  ;;  %v8525_v6 = vld [vmem:[%s19361_s7 + $0x68] sm:$0xff]  ;;  %v11831_v34 = vpack.c.bf16 %v8527_v14, %v8526_v18  ;;  %v18580_v18 = vld [vmem:[%s19363_s9 + $0xf0] sm:$0xff] }
 0x441   :  { %20787 = vst [vmem:[#allocation70_spill] sm:$0xff] %v18580_v18  ;;  %v18585_v14 = vld [vmem:[%s19363_s9 + $0xf8] sm:$0xff] }
 0x442   :  { %11744 = vmatpush3.bf16.msra.mxu0 %v11741_v24  ;;  %v10211_v24 = vld [vmem:[%s19359_s5 + $0x210] sm:$0xff]  ;;  %20788 = vst [vmem:[#allocation82_spill] sm:$0xff] %v18585_v14 }
 0x443   :  { %11746 = vmatprep.subr.bf16.mxu0 %v11745_v38  ;;  %v11797_v25 = vpack.c.bf16 %v10212_v30, %v10211_v24 }
 0x445   :  { %11336 = vmatmul.mubr.msk.f32.vlgmr.msra.gmra.mrb[64].mxu0 %vm6824_vm13, %v17918_v23  ;;  %v11757_v23 = vpack.c.bf16 %v10180_v1, %v10179_v55  ;;  %v11801_v1 = vpack.c.bf16 %v10214_v16, %v10213_v5 }
 0x446   :  { %11338 = vmatprep.mubr.msk.f32.mxu0 %vm6824_vm13, %v17975_v4  ;;  %11748 = vmatpush3.bf16.msra.mxu0 %v11745_v38  ;;  %v10185_v4 = vld [vmem:[%s19359_s5 + $0x180] sm:$0xff] }
 0x447   :  { %11750 = vmatprep.subr.bf16.mxu0 %v11749_v57  ;;  %v11761_v10 = vpack.c.bf16 %v10186_v36, %v10185_v4  ;;  %v10216_v4 = vld [vmem:[%s19359_s5 + $0x238] sm:$0xff] }
 0x449   :  { %11339 = vmatmul.mubr.msk.f32.gmra.mrb[66].mxu0 %vm6824_vm13, %v17987_v8  ;;  %v10187_v8 = vld [vmem:[%s19359_s5 + $0x190] sm:$0xff] }
 0x44a   :  { %11752 = vmatpush3.bf16.msra.mxu0 %v11749_v57  ;;  %11357 = vmatprep.mubr.msk.f32.mxu0 %vm6824_vm13, %v18009_v15  ;;  %v10188_v15 = vld [vmem:[%s19359_s5 + $0x198] sm:$0xff] }
 0x44b   :  { %11754 = vmatprep.subr.bf16.mxu0 %v11753_v0  ;;  %v11765_v63 = vpack.c.bf16 %v10188_v15, %v10187_v8  ;;  %v8513_v8 = vld [vmem:[%s19361_s7 + $0x8] sm:$0xff]  ;;  %v19720_v15 = vmov 0.0|0.0  }
 0x44e   :  { %11756 = vmatpush3.bf16.msra.mxu0 %v11753_v0  ;;  %v20754_v0 = vld [vmem:[#allocation257_spill] sm:$0xff] }
 0x44f   :  { %11758 = vmatprep.subr.bf16.mxu0 %v11757_v23 }
 0x452   :  { %11760 = vmatpush3.bf16.msra.mxu0 %v11757_v23  ;;  %v10215_v23 = vld [vmem:[%s19359_s5 + $0x230] sm:$0xff] }
 0x453   :  { %11762 = vmatprep.subr.bf16.mxu0 %v11761_v10  ;;  %v11805_v36 = vpack.c.bf16 %v10216_v4, %v10215_v23  ;;  %v18445_v23 = vld [vmem:[%s19363_s9 + $0x18] sm:$0xff]  ;;  %v18450_v4 = vld [vmem:[%s19363_s9 + $0x20] sm:$0xff] }
 0x454   :  { %20760 = vst [vmem:[#allocation212_spill] sm:$0xff] %v18445_v23  ;;  %20761 = vst [vmem:[#allocation222_spill] sm:$0xff] %v18450_v4 }
 0x455   :  { %11358 = vmatmul.mubr.msk.f32.vlgmr.msra.gmra.mrb[64].mxu0 %vm6824_vm13, %v18015_v60  ;;  %v11773_v60 = vpack.c.bf16 %v10192_v48, %v10191_v53  ;;  %v8520_v53 = vld [vmem:[%s19361_s7 + $0x40] sm:$0xff] }
 0x456   :  { %11360 = vmatprep.mubr.msk.f32.mxu0 %vm6824_vm13, %v18052_v42  ;;  %11764 = vmatpush3.bf16.msra.mxu0 %v11761_v10  ;;  %v11777_v42 = vpack.c.bf16 %v10198_v12, %v10197_v54  ;;  %v8512_v10 = vld [vmem:[%s19361_s7] sm:$0xff]  ;;  %v20756_v54 = vmov 0.0  }
 0x457   :  { %11766 = vmatprep.subr.bf16.mxu0 %v11765_v63 }
 0x459   :  { %11361 = vmatmul.mubr.msk.f32.gmra.mrb[66].mxu0 %vm6824_vm13, %v18075_v46  ;;  %v10199_v46 = vld [vmem:[%s19359_s5 + $0x1d0] sm:$0xff] }
 0x45a   :  { %11768 = vmatpush3.bf16.msra.mxu0 %v11765_v63  ;;  %11379 = vmatprep.mubr.msk.f32.mxu0 %vm6824_vm13, %v8071_v11  ;;  %v11781_v49 = vpack.c.bf16 %v10200_v51, %v10199_v46  ;;  %v8514_v63 = vld [vmem:[%s19361_s7 + $0x10] sm:$0xff]  ;;  %v8519_v11 = vld [vmem:[%s19361_s7 + $0x38] sm:$0xff] }
 0x45b   :  { %11770 = vmatprep.subr.bf16.mxu0 %v11769_v40  ;;  %v11813_v22 = vpack.c.bf16 %v8515_v7, %v8514_v63  ;;  %v8523_v46 = vld [vmem:[%s19361_s7 + $0x58] sm:$0xff]  ;;  %v18490_v7 = vld [vmem:[%s19363_s9 + $0x60] sm:$0xff] }
 0x45c   :  { %v18485_v63 = vld [vmem:[%s19363_s9 + $0x58] sm:$0xff]  ;;  %20769 = vst [vmem:[#allocation264_spill] sm:$0xff] %v18490_v7 }
 0x45d   :  { %20768 = vst [vmem:[#allocation266_spill] sm:$0xff] %v18485_v63 }
 0x45e   :  { %11772 = vmatpush3.bf16.msra.mxu0 %v11769_v40  ;;  %v8518_v40 = vld [vmem:[%s19361_s7 + $0x30] sm:$0xff] }
 0x45f   :  { %11774 = vmatprep.subr.bf16.mxu0 %v11773_v60  ;;  %v11819_v48 = vpack.c.bf16 %v8519_v11, %v8518_v40  ;;  %v18515_v40 = vld [vmem:[%s19363_s9 + $0x88] sm:$0xff]  ;;  %v18520_v11 = vld [vmem:[%s19363_s9 + $0x90] sm:$0xff] }
 0x460   :  { %20774 = vst [vmem:[#allocation21_spill] sm:$0xff] %v18515_v40  ;;  %20775 = vst [vmem:[#allocation14_spill] sm:$0xff] %v18520_v11 }
 0x462   :  { %11776 = vmatpush3.bf16.msra.mxu0 %v11773_v60  ;;  %v8521_v60 = vld [vmem:[%s19361_s7 + $0x48] sm:$0xff] }
 0x463   :  { %11778 = vmatprep.subr.bf16.mxu0 %v11777_v42  ;;  %v11822_v12 = vpack.c.bf16 %v8521_v60, %v8520_v53  ;;  %v18525_v53 = vld [vmem:[%s19363_s9 + $0x98] sm:$0xff]  ;;  %v18535_v60 = vld [vmem:[%s19363_s9 + $0xa8] sm:$0xff] }
 0x464   :  { %20776 = vst [vmem:[#allocation8_spill] sm:$0xff] %v18525_v53  ;;  %20778 = vst [vmem:[#allocation42_spill] sm:$0xff] %v18535_v60 }
 0x465   :  { %11380 = vmatmul.mubr.msk.f32.vlgmr.msra.gmra.mrb[64].mxu0 %vm6824_vm13, %v20745_v26 }
 0x466   :  { %11382 = vmatprep.mubr.msk.f32.mxu0 %vm6824_vm13, %v8073_v61  ;;  %11780 = vmatpush3.bf16.msra.mxu0 %v11777_v42  ;;  %v8219_v61 = vsel %vm1707_vm10, %v20749_v47, %v8218_v39  ;;  %v8522_v42 = vld [vmem:[%s19361_s7 + $0x50] sm:$0xff] }
 0x467   :  { %11782 = vmatprep.subr.bf16.mxu0 %v11781_v49  ;;  %v11825_v51 = vpack.c.bf16 %v8523_v46, %v8522_v42  ;;  %v18550_v42 = vld [vmem:[%s19363_s9 + $0xc0] sm:$0xff]  ;;  %v18555_v46 = vld [vmem:[%s19363_s9 + $0xc8] sm:$0xff] }
 0x468   :  { %20781 = vst [vmem:[#allocation29_spill] sm:$0xff] %v18550_v42  ;;  %20782 = vst [vmem:[#allocation46_spill] sm:$0xff] %v18555_v46 }
 0x469   :  { %11383 = vmatmul.mubr.msk.f32.gmra.mrb[66].mxu0 %vm6824_vm13, %v8074_v62  ;;  %v8357_v62 = vsel %vm1699_vm6, %v20751_v50, %v8356_v31 }
 0x46a   :  { %11784 = vmatpush3.bf16.msra.mxu0 %v11781_v49  ;;  %11401 = vmatprep.mubr.msk.f32.mxu0 %vm6824_vm13, %v8219_v61  ;;  %v8358_v38 = vsel %vm1701_vm7, %v20752_v59, %v8357_v62  ;;  %v11828_v49 = vpack.c.bf16 %v8525_v6, %v8524_v52  ;;  %v18565_v52 = vld [vmem:[%s19363_s9 + $0xd8] sm:$0xff]  ;;  %v18570_v6 = vld [vmem:[%s19363_s9 + $0xe0] sm:$0xff] }
 0x46b   :  { %11786 = vmatprep.subr.bf16.mxu0 %v11785_v9  ;;  %v8359_v57 = vsel %vm1703_vm8, %v20753_v41, %v8358_v38  ;;  %20784 = vst [vmem:[#allocation53_spill] sm:$0xff] %v18565_v52  ;;  %20785 = vst [vmem:[#allocation31_spill] sm:$0xff] %v18570_v6 }
 0x46c   :  { %v8360_v55 = vsel %vm1705_vm9, %v20754_v0, %v8359_v57  ;;  %v18430_v0 = vld [vmem:[%s19363_s9] sm:$0xff] }
 0x46d   :  { %20757 = vst [vmem:[#allocation191_spill] sm:$0xff] %v18430_v0 }
 0x46e   :  { %11788 = vmatpush3.bf16.msra.mxu0 %v11785_v9 }
 0x46f   :  { %11790 = vmatprep.subr.bf16.mxu0 %v11789_v37 }
 0x472   :  { %11792 = vmatpush3.bf16.msra.mxu0 %v11789_v37 }
 0x473   :  { %11794 = vmatprep.subr.bf16.mxu0 %v11793_v28 }
 0x475   :  { %11402 = vmatmul.mubr.msk.f32.vlgmr.msra.gmra.mrb[64].mxu0 %vm6824_vm13, %v18110_v44  ;;  %v20755_v44 = vld [vmem:[#allocation41_spill] sm:$0xff] }
 0x476   :  { %11404 = vmatprep.mubr.msk.f32.mxu0 %vm6824_vm13, %v18135_v20  ;;  %11796 = vmatpush3.bf16.msra.mxu0 %v11793_v28  ;;  %v8361_v20 = vsel %vm1707_vm10, %v20755_v44, %v8360_v55  ;;  %v18435_v55 = vld [vmem:[%s19363_s9 + $0x8] sm:$0xff] }
 0x477   :  { %11798 = vmatprep.subr.bf16.mxu0 %v11797_v25  ;;  %20758 = vst [vmem:[#allocation205_spill] sm:$0xff] %v18435_v55  ;;  %v18455_v44 = vld [vmem:[%s19363_s9 + $0x28] sm:$0xff] }
 0x478   :  { %20762 = vst [vmem:[#allocation234_spill] sm:$0xff] %v18455_v44 }
 0x479   :  { %11405 = vmatmul.mubr.msk.f32.gmra.mrb[66].mxu0 %vm6824_vm13, %v18139_v13  ;;  %v11810_v13 = vpack.c.bf16 %v8513_v8, %v8512_v10  ;;  %v18470_v10 = vld [vmem:[%s19363_s9 + $0x40] sm:$0xff]  ;;  %v18475_v8 = vld [vmem:[%s19363_s9 + $0x48] sm:$0xff] }
 0x47a   :  { %11800 = vmatpush3.bf16.msra.mxu0 %v11797_v25  ;;  %11423 = vmatprep.mubr.msk.f32.mxu0 %vm6824_vm13, %v8361_v20  ;;  %v18460_v20 = vld [vmem:[%s19363_s9 + $0x30] sm:$0xff]  ;;  %20765 = vst [vmem:[#allocation250_spill] sm:$0xff] %v18470_v10  ;;  %20766 = vst [vmem:[#allocation248_spill] sm:$0xff] %v18475_v8 }
 0x47b   :  { %11802 = vmatprep.subr.bf16.mxu0 %v11801_v1  ;;  %20763 = vst [vmem:[#allocation230_spill] sm:$0xff] %v18460_v20 }
 0x47e   :  { %11804 = vmatpush3.bf16.msra.mxu0 %v11801_v1  ;;  %v18440_v1 = vld [vmem:[%s19363_s9 + $0x10] sm:$0xff] }
 0x47f   :  { %11806 = vmatprep.subr.bf16.mxu0 %v11805_v36  ;;  %20759 = vst [vmem:[#allocation215_spill] sm:$0xff] %v18440_v1 }
 0x482   :  { %11808 = vmatpush3.bf16.msra.mxu0 %v11805_v36  ;;  %v18465_v36 = vld [vmem:[%s19363_s9 + $0x38] sm:$0xff] }
 0x483   :  { %11809 = vmatprep.subr.bf16.mxu0 %v19720_v15  ;;  %20764 = vst [vmem:[#allocation239_spill] sm:$0xff] %v18465_v36 }
 0x485   :  { %11424 = vmatmul.mubr.msk.f32.vlgmr.msra.gmra.mrb[64].mxu0 %vm6824_vm13, %v18158_v17  ;;  %v8516_v17 = vld [vmem:[%s19361_s7 + $0x20] sm:$0xff] }
 0x486   :  { %11426 = vmatprep.mubr.msk.f32.mxu0 %vm6824_vm13, %v18181_v43  ;;  %11811 = vmatpush3.bf16.msra.mxu0 %v11810_v13  ;;  %v8517_v43 = vld [vmem:[%s19361_s7 + $0x28] sm:$0xff]  ;;  %v18480_v13 = vld [vmem:[%s19363_s9 + $0x50] sm:$0xff] }
 0x487   :  { %11812 = vmatprep.subr.bf16.mxu0 %v19720_v15  ;;  %20767 = vst [vmem:[#allocation258_spill] sm:$0xff] %v18480_v13 }
 0x489   :  { %11427 = vmatmul.mubr.msk.f32.gmra.mrb[66].mxu0 %vm6824_vm13, %v18194_v21  ;;  %v11816_v21 = vpack.c.bf16 %v8517_v43, %v8516_v17  ;;  %v18500_v17 = vld [vmem:[%s19363_s9 + $0x70] sm:$0xff]  ;;  %v18505_v43 = vld [vmem:[%s19363_s9 + $0x78] sm:$0xff] }
 0x48a   :  { %11814 = vmatpush3.bf16.msra.mxu0 %v11813_v22  ;;  %11461 = vmatprep.mubr.msk.f32.mxu0 %vm12413_vm14, %v20756_v54  ;;  %v18495_v22 = vld [vmem:[%s19363_s9 + $0x68] sm:$0xff]  ;;  %20771 = vst [vmem:[#allocation285_spill] sm:$0xff] %v18500_v17  ;;  %20772 = vst [vmem:[#allocation282_spill] sm:$0xff] %v18505_v43  ;;  %v18540_v54 = vld [vmem:[%s19363_s9 + $0xb0] sm:$0xff] }
 0x48b   :  { %11815 = vmatprep.subr.bf16.mxu0 %v19720_v15  ;;  %20770 = vst [vmem:[#allocation276_spill] sm:$0xff] %v18495_v22  ;;  %20779 = vst [vmem:[#allocation26_spill] sm:$0xff] %v18540_v54 }
 0x48e   :  { %11817 = vmatpush3.bf16.msra.mxu0 %v11816_v21  ;;  %v18510_v21 = vld [vmem:[%s19363_s9 + $0x80] sm:$0xff] }
 0x48f   :  { %11818 = vmatprep.subr.bf16.mxu0 %v19720_v15  ;;  %20773 = vst [vmem:[#allocation16_spill] sm:$0xff] %v18510_v21 }
 0x492   :  { %11820 = vmatpush3.bf16.msra.mxu0 %v11819_v48  ;;  %v18530_v48 = vld [vmem:[%s19363_s9 + $0xa0] sm:$0xff] }
 0x493   :  { %11821 = vmatprep.subr.bf16.mxu0 %v19720_v15  ;;  %20777 = vst [vmem:[#allocation11_spill] sm:$0xff] %v18530_v48 }
 0x496   :  { %11823 = vmatpush3.bf16.msra.mxu0 %v11822_v12  ;;  %v18545_v12 = vld [vmem:[%s19363_s9 + $0xb8] sm:$0xff] }
 0x497   :  { %11824 = vmatprep.subr.bf16.mxu0 %v19720_v15  ;;  %20780 = vst [vmem:[#allocation30_spill] sm:$0xff] %v18545_v12 }
 0x49a   :  { %11826 = vmatpush3.bf16.msra.mxu0 %v11825_v51  ;;  %v18560_v51 = vld [vmem:[%s19363_s9 + $0xd0] sm:$0xff] }
 0x49b   :  { %11827 = vmatprep.subr.bf16.mxu0 %v19720_v15  ;;  %20783 = vst [vmem:[#allocation64_spill] sm:$0xff] %v18560_v51 }
 0x49e   :  { %11829 = vmatpush3.bf16.msra.mxu0 %v11828_v49  ;;  %v18575_v49 = vld [vmem:[%s19363_s9 + $0xe8] sm:$0xff] }
 0x49f   :  { %11830 = vmatprep.subr.bf16.mxu0 %v19720_v15  ;;  %20786 = vst [vmem:[#allocation40_spill] sm:$0xff] %v18575_v49  ;;  %v18745_v15 = vld [vmem:[%s19364_s10 + $0x98] sm:$0xff] }
 0x4a0   :  { %20820 = vst [vmem:[#allocation193_spill] sm:$0xff] %v18745_v15 }
 0x4a2   :  { %11832 = vmatpush3.bf16.msra.mxu0 %v11831_v34  ;;  %v18590_v34 = vld [vmem:[%s19363_s9 + $0x100] sm:$0xff] }
 0x4a3   :  { %20789 = vst [vmem:[#allocation74_spill] sm:$0xff] %v18590_v34 }
 0x558   :  { %v11425_v29 = vpop.f32.mrb[64].mxu0 }
 0x559   :  { %v8488_v26 = vadd.f32 %v11425_v29, %v10221_v33  ;;  %v8457_v35 = vpop.f32.mrb[65].mxu0  ;;  %v18600_v29 = vld [vmem:[%s19363_s9 + $0x110] sm:$0xff] }
 0x55a   :  { %v8487_v39 = vadd.f32 %v10221_v33, %v8457_v35  ;;  %20791 = vst [vmem:[#allocation63_spill] sm:$0xff] %v18600_v29  ;;  %v18610_v35 = vld [vmem:[%s19363_s9 + $0x120] sm:$0xff] }
 0x55b   :  { %v8492_v27 = vmax.f32 %v8488_v26, 0.0  ;;  %v18605_v26 = vld [vmem:[%s19363_s9 + $0x118] sm:$0xff]  ;;  %20793 = vst [vmem:[#allocation92_spill] sm:$0xff] %v18610_v35 }
 0x55c   :  { %v8491_v19 = vmax.f32 %v8487_v39, 0.0  ;;  %v11428_v3 = vpop.f32.mrb[66].mxu0  ;;  %20792 = vst [vmem:[#allocation99_spill] sm:$0xff] %v18605_v26  ;;  %v18615_v39 = vld [vmem:[%s19363_s9 + $0x128] sm:$0xff] }
 0x55d   :  { %v8490_v9 = vadd.f32 %v11428_v3, %v10221_v33  ;;  %v8467_v58 = vpop.f32.mrb[67].mxu0  ;;  %20794 = vst [vmem:[#allocation68_spill] sm:$0xff] %v18615_v39  ;;  %v18630_v3 = vld [vmem:[%s19363_s9 + $0x140] sm:$0xff] }
 0x55e   :  { %v8495_v32 = vadd.f32 %v8492_v27, %v8491_v19  ;;  %v8489_v47 = vadd.f32 %v10221_v33, %v8467_v58  ;;  %v18595_v33 = vld [vmem:[%s19363_s9 + $0x108] sm:$0xff]  ;;  %v18620_v27 = vld [vmem:[%s19363_s9 + $0x130] sm:$0xff]  ;;  %v18625_v19 = vld [vmem:[%s19363_s9 + $0x138] sm:$0xff]  ;;  %20797 = vst [vmem:[#allocation114_spill] sm:$0xff] %v18630_v3 }
 0x55f   :  { %v8494_v61 = vmax.f32 %v8490_v9, 0.0  ;;  %20790 = vst [vmem:[#allocation45_spill] sm:$0xff] %v18595_v33  ;;  %20795 = vst [vmem:[#allocation87_spill] sm:$0xff] %v18620_v27  ;;  %v18635_v9 = vld [vmem:[%s19363_s9 + $0x148] sm:$0xff]  ;;  %v18640_v58 = vld [vmem:[%s19363_s9 + $0x150] sm:$0xff] }
 0x560   :  { %v8496_v56 = vrot.slane %v8495_v32, 4  ;;  %v8493_v31 = vmax.f32 %v8489_v47, 0.0  ;;  %20796 = vst [vmem:[#allocation120_spill] sm:$0xff] %v18625_v19  ;;  %20798 = vst [vmem:[#allocation90_spill] sm:$0xff] %v18635_v9  ;;  %v18650_v47 = vld [vmem:[%s19364_s10] sm:$0xff] }
 0x561   :  { %20799 = vst [vmem:[#allocation103_spill] sm:$0xff] %v18640_v58  ;;  %20801 = vst [vmem:[#allocation108_spill] sm:$0xff] %v18650_v47 }
 0x562   :  { %v8497_v37 = vadd.f32 %v8496_v56, %v8495_v32  ;;  %v8502_v2 = vadd.f32 %v8494_v61, %v8493_v31  ;;  %v18645_v32 = vld [vmem:[%s19363_s9 + $0x158] sm:$0xff]  ;;  %v18655_v61 = vld [vmem:[%s19364_s10 + $0x8] sm:$0xff]  ;;  %v18660_v56 = vld [vmem:[%s19364_s10 + $0x10] sm:$0xff] }
 0x563   :  { %20800 = vst [vmem:[#allocation111_spill] sm:$0xff] %v18645_v32  ;;  %20802 = vst [vmem:[#allocation133_spill] sm:$0xff] %v18655_v61  ;;  %v18665_v31 = vld [vmem:[%s19364_s10 + $0x18] sm:$0xff] }
 0x564   :  { %v8498_v45 = vrot.slane %v8497_v37, 2  ;;  %v8503_v50 = vrot.slane %v8502_v2, 4  ;;  %20803 = vst [vmem:[#allocation142_spill] sm:$0xff] %v18660_v56  ;;  %20804 = vst [vmem:[#allocation135_spill] sm:$0xff] %v18665_v31 }
 0x566   :  { %v8499_v62 = vadd.f32 %v8498_v45, %v8497_v37  ;;  %v8504_v28 = vadd.f32 %v8503_v50, %v8502_v2  ;;  %v18670_v37 = vld [vmem:[%s19364_s10 + $0x20] sm:$0xff]  ;;  %v18675_v2 = vld [vmem:[%s19364_s10 + $0x28] sm:$0xff]  ;;  %v18680_v45 = vld [vmem:[%s19364_s10 + $0x30] sm:$0xff] }
 0x567   :  { %20805 = vst [vmem:[#allocation126_spill] sm:$0xff] %v18670_v37  ;;  %20806 = vst [vmem:[#allocation165_spill] sm:$0xff] %v18675_v2  ;;  %v18685_v50 = vld [vmem:[%s19364_s10 + $0x38] sm:$0xff]  ;;  %v18850_v2 = vld [vmem:[%s19364_s10 + $0x140] sm:$0xff] }
 0x568   :  { %v8500_v24 = vrot.slane %v8499_v62, 1  ;;  %v8505_v30 = vrot.slane %v8504_v28, 2  ;;  %20807 = vst [vmem:[#allocation157_spill] sm:$0xff] %v18680_v45  ;;  %20808 = vst [vmem:[#allocation132_spill] sm:$0xff] %v18685_v50  ;;  %v18790_v50 = vld [vmem:[%s19364_s10 + $0xe0] sm:$0xff]  ;;  %v18835_v45 = vld [vmem:[%s19364_s10 + $0x128] sm:$0xff] }
 0x569   :  { %20829 = vst [vmem:[#allocation220_spill] sm:$0xff] %v18790_v50  ;;  %v18815_v50 = vld [vmem:[%s19364_s10 + $0x108] sm:$0xff]  ;;  %20838 = vst [vmem:[#allocation256_spill] sm:$0xff] %v18835_v45  ;;  %v18860_v45 = vld [vmem:[%s19364_s10 + $0x150] sm:$0xff] }
 0x56a   :  { %v8506_v59 = vadd.f32 %v8505_v30, %v8504_v28  ;;  %v8501_v38 = vadd.f32 %v8500_v24, %v8499_v62  ;;  %v18690_v62 = vld [vmem:[%s19364_s10 + $0x40] sm:$0xff]  ;;  %v18695_v28 = vld [vmem:[%s19364_s10 + $0x48] sm:$0xff]  ;;  %v18700_v24 = vld [vmem:[%s19364_s10 + $0x50] sm:$0xff]  ;;  %20834 = vst [vmem:[#allocation238_spill] sm:$0xff] %v18815_v50 }
 0x56b   :  { %20809 = vst [vmem:[#allocation145_spill] sm:$0xff] %v18690_v62  ;;  %20810 = vst [vmem:[#allocation178_spill] sm:$0xff] %v18695_v28  ;;  %v18705_v30 = vld [vmem:[%s19364_s10 + $0x58] sm:$0xff]  ;;  %v18780_v28 = vld [vmem:[%s19364_s10 + $0xd0] sm:$0xff] }
 0x56c   :  { %v8507_v25 = vrot.slane %v8506_v59, 1  ;;  %v8510_v57 = vmul.f32 0.0625, %v8501_v38  ;;  %20811 = vst [vmem:[#allocation187_spill] sm:$0xff] %v18700_v24  ;;  %20812 = vst [vmem:[#allocation182_spill] sm:$0xff] %v18705_v30  ;;  %v18715_v38 = vld [vmem:[%s19364_s10 + $0x68] sm:$0xff]  ;;  %v18770_v30 = vld [vmem:[%s19364_s10 + $0xc0] sm:$0xff] }
 0x56d   :  { %20814 = vst [vmem:[#allocation168_spill] sm:$0xff] %v18715_v38  ;;  %v18760_v38 = vld [vmem:[%s19364_s10 + $0xb0] sm:$0xff]  ;;  %20825 = vst [vmem:[#allocation226_spill] sm:$0xff] %v18770_v30  ;;  %v18775_v24 = vld [vmem:[%s19364_s10 + $0xc8] sm:$0xff] }
 0x56e   :  { %v8508_v41 = vadd.f32 %v8507_v25, %v8506_v59  ;;  %v18710_v59 = vld [vmem:[%s19364_s10 + $0x60] sm:$0xff]  ;;  %v18720_v25 = vld [vmem:[%s19364_s10 + $0x70] sm:$0xff]  ;;  %20823 = vst [vmem:[#allocation211_spill] sm:$0xff] %v18760_v38  ;;  %20826 = vst [vmem:[#allocation235_spill] sm:$0xff] %v18775_v24 }
 0x56f   :  { %20813 = vst [vmem:[#allocation150_spill] sm:$0xff] %v18710_v59  ;;  %20815 = vst [vmem:[#allocation172_spill] sm:$0xff] %v18720_v25  ;;  %v18755_v25 = vld [vmem:[%s19364_s10 + $0xa8] sm:$0xff]  ;;  %v18765_v59 = vld [vmem:[%s19364_s10 + $0xb8] sm:$0xff] }
 0x570   :  { %v8511_v5 = vmul.f32 0.0625, %v8508_v41  ;;  %v18725_v41 = vld [vmem:[%s19364_s10 + $0x78] sm:$0xff]  ;;  %20822 = vst [vmem:[#allocation216_spill] sm:$0xff] %v18755_v25  ;;  %20824 = vst [vmem:[#allocation204_spill] sm:$0xff] %v18765_v59  ;;  %v18795_v30 = vld [vmem:[%s19364_s10 + $0xe8] sm:$0xff] }
 0x571   :  { %20816 = vst [vmem:[#allocation202_spill] sm:$0xff] %v18725_v41  ;;  %v18750_v41 = vld [vmem:[%s19364_s10 + $0xa0] sm:$0xff]  ;;  %20827 = vst [vmem:[#allocation229_spill] sm:$0xff] %v18780_v28  ;;  %v18785_v62 = vld [vmem:[%s19364_s10 + $0xd8] sm:$0xff] }
 0x572   :  { %v8537_v16 = vsel %vm2297_vm4, %v8511_v5, %v8510_v57  ;;  %v18730_v57 = vld [vmem:[%s19364_s10 + $0x80] sm:$0xff]  ;;  %v18735_v5 = vld [vmem:[%s19364_s10 + $0x88] sm:$0xff]  ;;  %20821 = vst [vmem:[#allocation208_spill] sm:$0xff] %v18750_v41  ;;  %20828 = vst [vmem:[#allocation206_spill] sm:$0xff] %v18785_v62 }
 0x573   :  { %11462 = vmatmul.mubr.f32.vlgmr.msra.gmra.mrb[68].mxu0 %v8537_v16  ;;  %20817 = vst [vmem:[#allocation197_spill] sm:$0xff] %v18730_v57  ;;  %20818 = vst [vmem:[#allocation195_spill] sm:$0xff] %v18735_v5  ;;  %v18740_v16 = vld [vmem:[%s19364_s10 + $0x90] sm:$0xff]  ;;  %v18805_v28 = vld [vmem:[%s19364_s10 + $0xf8] sm:$0xff] }
 0x574   :  { %20819 = vst [vmem:[#allocation190_spill] sm:$0xff] %v18740_v16  ;;  %20830 = vst [vmem:[#allocation251_spill] sm:$0xff] %v18795_v30  ;;  %v18800_v24 = vld [vmem:[%s19364_s10 + $0xf0] sm:$0xff]  ;;  %v18810_v62 = vld [vmem:[%s19364_s10 + $0x100] sm:$0xff] }
 0x575   :  { %20831 = vst [vmem:[#allocation247_spill] sm:$0xff] %v18800_v24  ;;  %20832 = vst [vmem:[#allocation224_spill] sm:$0xff] %v18805_v28  ;;  %v18820_v30 = vld [vmem:[%s19364_s10 + $0x110] sm:$0xff]  ;;  %v18825_v24 = vld [vmem:[%s19364_s10 + $0x118] sm:$0xff] }
 0x576   :  { %20833 = vst [vmem:[#allocation245_spill] sm:$0xff] %v18810_v62  ;;  %20835 = vst [vmem:[#allocation242_spill] sm:$0xff] %v18820_v30  ;;  %v18830_v28 = vld [vmem:[%s19364_s10 + $0x120] sm:$0xff]  ;;  %v18840_v59 = vld [vmem:[%s19364_s10 + $0x130] sm:$0xff] }
 0x577   :  { %20836 = vst [vmem:[#allocation267_spill] sm:$0xff] %v18825_v24  ;;  %20837 = vst [vmem:[#allocation263_spill] sm:$0xff] %v18830_v28  ;;  %v18845_v38 = vld [vmem:[%s19364_s10 + $0x138] sm:$0xff]  ;;  %v18855_v28 = vld [vmem:[%s19364_s10 + $0x148] sm:$0xff] }
 0x578   :  { %20839 = vst [vmem:[#allocation261_spill] sm:$0xff] %v18840_v59  ;;  %20840 = vst [vmem:[#allocation259_spill] sm:$0xff] %v18845_v38  ;;  %v18865_v59 = vld [vmem:[%s19364_s10 + $0x158] sm:$0xff]  ;;  %v10222_v38 = vld [vmem:[%s19365_s8] ss:$0 sm:$0xff] }
 0x579   :  { %20841 = vst [vmem:[#allocation287_spill] sm:$0xff] %v18850_v2  ;;  %20842 = vst [vmem:[#allocation281_spill] sm:$0xff] %v18855_v28  ;;  %v18874_v28 = vmov 0.0  }
 0x57a   :  { %20843 = vst [vmem:[#allocation275_spill] sm:$0xff] %v18860_v45  ;;  %20844 = vst [vmem:[#allocation279_spill] sm:$0xff] %v18865_v59 }
 0x646   :  { %v8605_v2 = vpop.f32.mrb[68].mxu0 }
 0x647   :  { %v18870_v37 = vadd.f32 %v10222_v38, %v8605_v2  ;;  %v11463_v25 = vpop.f32.mrb[69].mxu0 }
 0x649   :  { %20845 = vst [vmem:[#allocation277_spill] sm:$0xff] %v18870_v37 }
 0x64a LB: > { %20846 = vst [vmem:[#allocation291_spill] sm:$0xff] %v12407_v28  ;;  %v20847_v21 = vld [vmem:[#allocation16_spill] sm:$0xff]  ;;  %v20848_v40 = vld [vmem:[#allocation21_spill] sm:$0xff]  ;;  %v20850_v0 = vld [vmem:[#allocation191_spill] sm:$0xff]  ;;  %vm12415_vm15 = vmmov 0   ;;  %s12417_s8 = smov 32   ;;  %v12407_v28 = vphi %v18874_v28, %v20956_v28   ;;  %s12403_s20 = sphi %s18872_s20, %s20955_s20  }
 0x64b   : > { %v18884_v59 = vpack.c.bf16 %v20848_v40, %v20847_v21  ;;  %v20851_v55 = vld [vmem:[#allocation205_spill] sm:$0xff]  ;;  %v20853_v11 = vld [vmem:[#allocation14_spill] sm:$0xff]  ;;  %v20854_v53 = vld [vmem:[#allocation8_spill] sm:$0xff]  ;;  %v19722_v40 = vmov 0.0|0.0   ;;  %s12418_s10 = smov 64   ;;  %s12419_s21 = smov 96  }
 0x64c   : > { %v18888_v2 = vpack.c.bf16 %v20851_v55, %v20850_v0  ;;  %v18892_v38 = vpack.c.bf16 %v20854_v53, %v20853_v11  ;;  %v20857_v1 = vld [vmem:[#allocation215_spill] sm:$0xff]  ;;  %v20858_v23 = vld [vmem:[#allocation212_spill] sm:$0xff]  ;;  %v20860_v34 = vld [vmem:[#allocation74_spill] sm:$0xff]  ;;  %11865 = vmatprep.subr.bf16.mxu1 %v19722_v40  ;;  %vm8809_vm0 = vcmask 785408   ;;  %vm9213_vm1 = vcmask 254976   ;;  %s9239_s5 = sadd.s32 1, %s12403_s20 }
 0x64d   : > { %20849 = vst [vmem:[#allocation292_spill] sm:$0xff] %v18884_v59  ;;  %11834 = vmatprep.subr.bf16.mxu0 %v18884_v59  ;;  %v18901_v45 = vpack.c.bf16 %v20858_v23, %v20857_v1  ;;  %v20861_v33 = vld [vmem:[#allocation45_spill] sm:$0xff]  ;;  %v20863_v48 = vld [vmem:[#allocation11_spill] sm:$0xff]  ;;  %v20864_v60 = vld [vmem:[#allocation42_spill] sm:$0xff]  ;;  %vm9224_vm3 = vcmask 1024   ;;  %p9240_p0 = scmp.ge.s32.totalorder %s9239_s5, 25 }
 0x64e   : > { %20852 = vst [vmem:[#allocation293_spill] sm:$0xff] %v18888_v2  ;;  %20855 = vst [vmem:[#allocation294_spill] sm:$0xff] %v18892_v38  ;;  %v18905_v21 = vpack.c.bf16 %v20861_v33, %v20860_v34  ;;  %11836 = vmatpush3.bf16.msra.mxu0 %v18888_v2  ;;  %v18910_v0 = vpack.c.bf16 %v20864_v60, %v20863_v48  ;;  %v20866_v4 = vld [vmem:[#allocation222_spill] sm:$0xff]  ;;  %v20868_v29 = vld [vmem:[#allocation63_spill] sm:$0xff]  ;;  %s9775_s23 = sadd.s32 2, %s12403_s20 }
 0x64f   : > { %20859 = vst [vmem:[#allocation295_spill] sm:$0xff] %v18901_v45  ;;  %v20867_v44 = vld [vmem:[#allocation234_spill] sm:$0xff]  ;;  %v20869_v26 = vld [vmem:[#allocation99_spill] sm:$0xff]  ;;  %11838 = vmatprep.subr.bf16.mxu0 %v18892_v38  ;;  %v20876_v42 = vld [vmem:[#allocation29_spill] sm:$0xff] }
 0x650   : > { %v20856_v37 = vld [vmem:[#allocation277_spill] sm:$0xff]  ;;  %20862 = vst [vmem:[#allocation296_spill] sm:$0xff] %v18905_v21  ;;  %20865 = vst [vmem:[#allocation297_spill] sm:$0xff] %v18910_v0  ;;  %v18914_v11 = vpack.c.bf16 %v20867_v44, %v20866_v4  ;;  %v18919_v1 = vpack.c.bf16 %v20869_v26, %v20868_v29  ;;  %11867 = vmatpush3.bf16.msra.mxu1 %v18905_v21  ;;  %v20871_v54 = vld [vmem:[#allocation26_spill] sm:$0xff]  ;;  %v20873_v29 = vmov 0.0|0.0  }
 0x651   : > { %v18896_v25 = vadd.f32 %v12407_v28, %v20856_v37  ;;  %v20872_v12 = vld [vmem:[#allocation30_spill] sm:$0xff]  ;;  %11868 = vmatprep.subr.bf16.mxu1 %v20873_v29  ;;  %v20875_v36 = vld [vmem:[#allocation239_spill] sm:$0xff]  ;;  %v20878_v35 = vld [vmem:[#allocation92_spill] sm:$0xff] }
 0x652   : > { %20870 = vst [vmem:[#allocation298_spill] sm:$0xff] %v18919_v1  ;;  %v18932_v26 = vpack.c.bf16 %v20872_v12, %v20871_v54  ;;  %11840 = vmatpush3.bf16.msra.mxu0 %v18901_v45  ;;  %v20874_v20 = vld [vmem:[#allocation230_spill] sm:$0xff]  ;;  %v20879_v39 = vld [vmem:[#allocation68_spill] sm:$0xff]  ;;  %v20882_v27 = vld [vmem:[#allocation87_spill] sm:$0xff] }
 0x653   : > { %v10223_v23 = vadd.f32 1.0, %v18896_v25  ;;  %v10227_v33 = vadd.f32 0.11111111, %v18896_v25  ;;  %v10224_v34 = vadd.f32 0.7777778, %v18896_v25  ;;  %v10232_v48 = vadd.f32 -1.0, %v18896_v25  ;;  %11842 = vmatprep.subr.bf16.mxu0 %v18910_v0 }
 0x654   : > { %v10228_v4 = vadd.f32 -0.11111111, %v18896_v25  ;;  %v10225_v40 = vadd.f32 0.5555556, %v18896_v25  ;;  %v10229_v44 = vadd.f32 -0.33333334, %v18896_v25  ;;  %11870 = vmatpush3.bf16.msra.mxu1 %v18919_v1 }
 0x655   : > { %v8716_v53 = vmul.f32 4.5, %v10223_v23  ;;  %v8740_v55 = vmul.f32 4.5, %v10227_v33  ;;  %v8722_v60 = vmul.f32 4.5, %v10224_v34  ;;  %v10231_v28 = vadd.f32 -0.7777778, %v18896_v25  ;;  %11871 = vmatprep.subr.bf16.mxu1 %v20873_v29  ;;  %v20877_v46 = vld [vmem:[#allocation46_spill] sm:$0xff] }
 0x656   : > { %v8746_v37 = vmul.f32 4.5, %v10228_v4  ;;  %v8728_v38 = vmul.f32 4.5, %v10225_v40  ;;  %v8752_v2 = vmul.f32 4.5, %v10229_v44  ;;  %v8770_v21 = vmul.f32 4.5, %v10232_v48  ;;  %11844 = vmatpush3.bf16.msra.mxu0 %v18914_v11  ;;  %v20880_v10 = vld [vmem:[#allocation250_spill] sm:$0xff]  ;;  %v20881_v8 = vld [vmem:[#allocation248_spill] sm:$0xff] }
 0x657   : > { %v8717_v59 = vsub.f32 0.0, %v8716_v53  ;;  %v8741_v41 = vsub.f32 0.0, %v8740_v55  ;;  %v8723_v24 = vsub.f32 0.0, %v8722_v60  ;;  %v8764_v30 = vmul.f32 4.5, %v10231_v28  ;;  %11846 = vmatprep.subr.bf16.mxu0 %v18932_v26  ;;  %v20883_v19 = vld [vmem:[#allocation120_spill] sm:$0xff]  ;;  %v20885_v52 = vld [vmem:[#allocation53_spill] sm:$0xff] }
 0x658   : > { %v8747_v12 = vsub.f32 0.0, %v8746_v37  ;;  %v8729_v23 = vsub.f32 0.0, %v8728_v38  ;;  %v8753_v33 = vsub.f32 0.0, %v8752_v2  ;;  %v18941_v34 = vpack.c.bf16 %v20875_v36, %v20874_v20  ;;  %v20884_v51 = vld [vmem:[#allocation64_spill] sm:$0xff]  ;;  %v20886_v13 = vld [vmem:[#allocation258_spill] sm:$0xff]  ;;  %v20890_v6 = vld [vmem:[#allocation31_spill] sm:$0xff] }
 0x659   : > { %v8718_v4 = vmul.f32 %v8717_v59, %v8716_v53  ;;  %v8742_v44 = vmul.f32 %v8741_v41, %v8740_v55  ;;  %v8724_v40 = vmul.f32 %v8723_v24, %v8722_v60  ;;  %v8765_v48 = vsub.f32 0.0, %v8764_v30  ;;  %v20887_v63 = vld [vmem:[#allocation266_spill] sm:$0xff]  ;;  %v20891_v49 = vld [vmem:[#allocation40_spill] sm:$0xff]  ;;  %v20894_v58 = vld [vmem:[#allocation103_spill] sm:$0xff] }
 0x65a   : > { %v8748_v54 = vmul.f32 %v8747_v12, %v8746_v37  ;;  %v8730_v45 = vmul.f32 %v8729_v23, %v8728_v38  ;;  %v8754_v28 = vmul.f32 %v8753_v33, %v8752_v2  ;;  %v8771_v31 = vsub.f32 0.0, %v8770_v21  ;;  %11848 = vmatpush3.bf16.msra.mxu0 %v18941_v34  ;;  %v20888_v3 = vld [vmem:[#allocation114_spill] sm:$0xff]  ;;  %v20892_v7 = vld [vmem:[#allocation264_spill] sm:$0xff]  ;;  %v20895_v32 = vld [vmem:[#allocation111_spill] sm:$0xff] }
 0x65b   : > { %v8719_v0 = vmul.f32 1.442695, %v8718_v4  ;;  %v8743_v1 = vmul.f32 1.442695, %v8742_v44  ;;  %v8725_v56 = vmul.f32 1.442695, %v8724_v40  ;;  %v18948_v20 = vpack.c.bf16 %v20877_v46, %v20876_v42 }
 0x65c   : > { %v8749_v36 = vmul.f32 1.442695, %v8748_v54  ;;  %v18952_v55 = vpack.c.bf16 %v20879_v39, %v20878_v35  ;;  %v8731_v53 = vmul.f32 1.442695, %v8730_v45  ;;  %v8766_v60 = vmul.f32 %v8765_v48, %v8764_v30  ;;  %v20889_v9 = vld [vmem:[#allocation90_spill] sm:$0xff]  ;;  %v20893_v22 = vld [vmem:[#allocation276_spill] sm:$0xff] }
 0x65d   : > { %12293 = vpow2.f32 %v8719_v0  ;;  %v18956_v12 = vpack.c.bf16 %v20881_v8, %v20880_v10  ;;  %v8755_v37 = vmul.f32 1.442695, %v8754_v28  ;;  %v8772_v24 = vmul.f32 %v8771_v31, %v8770_v21  ;;  %11850 = vmatprep.subr.bf16.mxu0 %v18948_v20  ;;  %v20896_v18 = vld [vmem:[#allocation70_spill] sm:$0xff]  ;;  %v20898_v17 = vld [vmem:[#allocation285_spill] sm:$0xff]  ;;  %v20902_v5 = vld [vmem:[#allocation195_spill] sm:$0xff] }
 0x65e   : > { %12295 = vpow2.f32 %v8743_v1  ;;  %11873 = vmatpush3.bf16.msra.mxu1 %v18952_v55  ;;  %v18962_v54 = vpack.c.bf16 %v20883_v19, %v20882_v27  ;;  %v18967_v0 = vpack.c.bf16 %v20885_v52, %v20884_v51  ;;  %v8767_v1 = vmul.f32 1.442695, %v8766_v60  ;;  %v20897_v14 = vld [vmem:[#allocation82_spill] sm:$0xff]  ;;  %v20901_v57 = vld [vmem:[#allocation197_spill] sm:$0xff]  ;;  %v20903_v47 = vld [vmem:[#allocation108_spill] sm:$0xff] }
 0x65f   : > { %12297 = vpow2.f32 %v8725_v56  ;;  %11874 = vmatprep.subr.bf16.mxu1 %v20873_v29  ;;  %v8773_v21 = vmul.f32 1.442695, %v8772_v24  ;;  %11852 = vmatpush3.bf16.msra.mxu0 %v18956_v12  ;;  %v18973_v31 = vpack.c.bf16 %v20887_v63, %v20886_v13  ;;  %v18978_v56 = vpack.c.bf16 %v20889_v9, %v20888_v3  ;;  %v20899_v43 = vld [vmem:[#allocation282_spill] sm:$0xff]  ;;  %v20904_v61 = vld [vmem:[#allocation133_spill] sm:$0xff] }
 0x660   : > { %12299 = vpow2.f32 %v8749_v36  ;;  %11854 = vmatprep.subr.bf16.mxu0 %v18967_v0  ;;  %v18983_v36 = vpack.c.bf16 %v20891_v49, %v20890_v6  ;;  %v18989_v45 = vpack.c.bf16 %v20893_v22, %v20892_v7  ;;  %v18994_v30 = vpack.c.bf16 %v20895_v32, %v20894_v58  ;;  %v20905_v16 = vld [vmem:[#allocation190_spill] sm:$0xff]  ;;  %v20906_v15 = vld [vmem:[#allocation193_spill] sm:$0xff] }
 0x661   : > { %12301 = vpow2.f32 %v8731_v53  ;;  %v18999_v41 = vpack.c.bf16 %v20897_v14, %v20896_v18  ;;  %v19734_v38 = vmov 0.0   ;;  %v19007_v44 = vpack.c.bf16 %v20899_v43, %v20898_v17  ;;  %v20907_v62 = vld [vmem:[#allocation245_spill] sm:$0xff]  ;;  %v20908_v50 = vld [vmem:[#allocation238_spill] sm:$0xff] }
 0x662   : > { %12303 = vpow2.f32 %v8755_v37  ;;  %11876 = vmatpush3.bf16.msra.mxu1 %v18962_v54  ;;  %11488 = vmatprep.mubr.msk.f32.mxu1 %vm12415_vm15, %v19734_v38  ;;  %v8708_v24 = vsub.f32 0.0, %v18896_v25 }
 0x663   : > { %11877 = vmatprep.subr.bf16.mxu1 %v20873_v29  ;;  %12305 = vpow2.f32 %v8767_v1  ;;  %11856 = vmatpush3.bf16.msra.mxu0 %v18973_v31 }
 0x664   : > { %12307 = vpow2.f32 %v8773_v21  ;;  %11858 = vmatprep.subr.bf16.mxu0 %v18983_v36  ;;  %v8709_v1 = vmul.f32 1.442695, %v8708_v24  ;;  %v10226_v21 = vadd.f32 0.33333334, %v18896_v25 }
 0x666   : > { %11879 = vmatpush3.bf16.msra.mxu1 %v18978_v56  ;;  %12309 = vpow2.f32 %v8709_v1 }
 0x667   : > { %v12294_v59 = vpop.eup %12293  ;;  %11880 = vmatprep.subr.bf16.mxu1 %v20873_v29  ;;  %11860 = vmatpush3.bf16.msra.mxu0 %v18989_v45 }
 0x668   : > { %v12296_v2 = vpop.eup %12295  ;;  %11862 = vmatprep.subr.bf16.mxu0 %v18999_v41 }
 0x669   : > { %v12298_v23 = vpop.eup %12297  ;;  %v12233_v33 = vpack.i.bf16 %v12294_v59, %v12296_v2  ;;  %v10230_v59 = vadd.f32 -0.5555556, %v18896_v25  ;;  %v8734_v2 = vmul.f32 4.5, %v10226_v21 }
 0x66a   : > { %v12300_v4 = vpop.eup %12299  ;;  %11882 = vmatpush3.bf16.msra.mxu1 %v18994_v30 }
 0x66b   : > { %v12302_v40 = vpop.eup %12301  ;;  %12234 = vrot.lane.b32.xlu0 %v12233_v33, %s12417_s8  ;;  %v12238_v48 = vpack.i.bf16 %v12298_v23, %v12300_v4  ;;  %11864 = vmatpush3.bf16.msra.mxu0 %v19007_v44  ;;  %v8758_v23 = vmul.f32 4.5, %v10230_v59  ;;  %v8735_v33 = vsub.f32 0.0, %v8734_v2 }
 0x66c   : > { %v12304_v28 = vpop.eup %12303  ;;  %11915 = vmatprep.subr.bf16.mxu0 %v20873_v29 }
 0x66d   : > { %v12243_v53 = vpack.i.bf16 %v12302_v40, %v12304_v28  ;;  %v12306_v60 = vpop.eup %12305  ;;  %v8759_v40 = vsub.f32 0.0, %v8758_v23  ;;  %v8736_v28 = vmul.f32 %v8735_v33, %v8734_v2 }
 0x66e   : > { %v12308_v37 = vpop.eup %12307 }
 0x66f   : > { %12239 = vrot.lane.b32.xlu0 %v12238_v48, %s12418_s10  ;;  %12244 = vrot.lane.b32.xlu1 %v12243_v53, %s12419_s21  ;;  %v8760_v53 = vmul.f32 %v8759_v40, %v8758_v23 }
 0x670   : > { %v12310_v4 = vpop.eup %12309 }
 0x671   : > { %v8711_v48 = vadd.f32 1.0, %v12310_v4  ;;  %v8761_v38 = vmul.f32 1.442695, %v8760_v53 }
 0x673   : > { %8800 = vrot.lane.b32.xlu1 %v12306_v60, %s12417_s8  ;;  %8804 = vrot.lane.b32.xlu0 %v12308_v37, %s12418_s10  ;;  %12311 = vrcp.f32 %v8711_v48  ;;  %v8737_v60 = vmul.f32 1.442695, %v8736_v28 }
 0x675   : > { %12313 = vpow2.f32 %v8737_v60 }
 0x676   : > { %12315 = vpow2.f32 %v8761_v38 }
 0x67d   : > { %v12312_v37 = vpop.eup %12311 }
 0x67e   : > { %v8714_v6 = vmul.f32 %v12312_v37, %v18896_v25 }
 0x67f   : > { %v12314_v7 = vpop.eup %12313 }
 0x680   : > { %v12316_v23 = vpop.eup %12315 }
 0x6dd   : > { %v12235_v24 = vpop.permute.xlu0 %12234 }
 0x6de   : > { %v12237_v1 = vunpack.i.h.bf16 %v12235_v24  ;;  %v12236_v3 = vunpack.i.l.bf16 %v12235_v24 }
 0x6e0   : > { %v8807_v33 = vsel %vm2403_vm11, %v8714_v6, %v12237_v1  ;;  %v8811_v40 = vsel %vm2403_vm11, %v12314_v7, %v12236_v3  ;;  %v20900_v6 = vmov 0.0   ;;  %v19039_v7 = vpack.c.bf16 %v20904_v61, %v20903_v47  ;;  %v20909_v1 = vld [vmem:[#allocation142_spill] sm:$0xff] }
 0x6e1   : > { %v12240_v21 = vpop.permute.xlu0 %12239  ;;  %v12245_v59 = vpop.permute.xlu1 %12244  ;;  %v19043_v3 = vpack.c.bf16 %v20906_v15, %v20905_v16 }
 0x6e2   : > { %v12242_v8 = vunpack.i.h.bf16 %v12240_v21  ;;  %v12241_v9 = vunpack.i.l.bf16 %v12240_v21  ;;  %v12247_v4 = vunpack.i.h.bf16 %v12245_v59  ;;  %v12246_v2 = vunpack.i.l.bf16 %v12245_v59  ;;  %v20910_v21 = vld [vmem:[#allocation135_spill] sm:$0xff] }
 0x6e3   : > { %v19053_v59 = vpack.c.bf16 %v20910_v21, %v20909_v1  ;;  %v20920_v1 = vld [vmem:[#allocation204_spill] sm:$0xff] }
 0x6e4   : > { %v8808_v38 = vsel %vm6824_vm13, %v8807_v33, %v12242_v8  ;;  %v8812_v48 = vsel %vm6824_vm13, %v8811_v40, %v12241_v9  ;;  %v19035_v8 = vpack.c.bf16 %v20902_v5, %v20901_v57  ;;  %v19047_v9 = vpack.c.bf16 %v20908_v50, %v20907_v62  ;;  %v20913_v33 = vld [vmem:[#allocation208_spill] sm:$0xff]  ;;  %v20928_v5 = vld [vmem:[#allocation178_spill] sm:$0xff] }
 0x6e5   : > { %v8801_v28 = vpop.permute.xlu1 %8800  ;;  %v8813_v25 = vsel %vm8809_vm0, %v8812_v48, %v12246_v2  ;;  %v8805_v53 = vpop.permute.xlu0 %8804  ;;  %v8810_v60 = vsel %vm8809_vm0, %v8808_v38, %v12247_v4  ;;  %v20911_v4 = vld [vmem:[#allocation242_spill] sm:$0xff]  ;;  %v20912_v2 = vld [vmem:[#allocation267_spill] sm:$0xff]  ;;  %v20914_v40 = vld [vmem:[#allocation216_spill] sm:$0xff] }
 0x6e6   : > { %v8814_v37 = vsel %vm2403_vm11, %v12316_v23, %v8801_v28  ;;  %8883 = vmatprep.mubr.f32.mxu0 %v8813_v25  ;;  %11884 = vmatprep.subr.bf16.mxu1 %v19035_v8  ;;  %v19058_v23 = vpack.c.bf16 %v20912_v2, %v20911_v4  ;;  %v19063_v38 = vpack.c.bf16 %v20914_v40, %v20913_v33  ;;  %v20915_v48 = vld [vmem:[#allocation126_spill] sm:$0xff]  ;;  %v20916_v28 = vld [vmem:[#allocation165_spill] sm:$0xff]  ;;  %v20922_v2 = vld [vmem:[#allocation132_spill] sm:$0xff] }
 0x6e7   : > { %v8815_v24 = vsel %vm6824_vm13, %v8814_v37, %v8805_v53  ;;  %8884 = vmatmul.mubr.f32.vlgmr.msra.gmra.mrb[0].mxu0 %v8810_v60  ;;  %v19069_v25 = vpack.c.bf16 %v20916_v28, %v20915_v48  ;;  %v20917_v53 = vld [vmem:[#allocation263_spill] sm:$0xff]  ;;  %v20918_v60 = vld [vmem:[#allocation256_spill] sm:$0xff]  ;;  %v20921_v4 = vld [vmem:[#allocation157_spill] sm:$0xff] }
 0x6e8   : > { %11489 = vmatmul.mubr.msk.f32.vlgmr.msra.gmra.mrb[0].mxu1 %vm8809_vm0, %v8815_v24  ;;  %11515 = vmatprep.mubr.msk.f32.mxu0 %vm12415_vm15, %v20900_v6  ;;  %v19074_v37 = vpack.c.bf16 %v20918_v60, %v20917_v53  ;;  %v20919_v24 = vld [vmem:[#allocation211_spill] sm:$0xff]  ;;  %v19085_v33 = vpack.c.bf16 %v20922_v2, %v20921_v4  ;;  %v20923_v40 = vld [vmem:[#allocation261_spill] sm:$0xff]  ;;  %v20925_v53 = vld [vmem:[#allocation226_spill] sm:$0xff] }
 0x6e9   : > { %11886 = vmatpush3.bf16.msra.mxu1 %v19039_v7  ;;  %11917 = vmatpush3.bf16.msra.mxu0 %v19047_v9  ;;  %v19079_v21 = vpack.c.bf16 %v20920_v1, %v20919_v24  ;;  %v20924_v48 = vld [vmem:[#allocation259_spill] sm:$0xff]  ;;  %v20927_v1 = vld [vmem:[#allocation145_spill] sm:$0xff] }
 0x6ea   : > { %11888 = vmatprep.subr.bf16.mxu1 %v19043_v3  ;;  %11918 = vmatprep.subr.bf16.mxu0 %v20873_v29  ;;  %v19090_v28 = vpack.c.bf16 %v20924_v48, %v20923_v40  ;;  %v20926_v60 = vld [vmem:[#allocation235_spill] sm:$0xff]  ;;  %v19101_v4 = vpack.c.bf16 %v20928_v5, %v20927_v1  ;;  %v20929_v2 = vld [vmem:[#allocation229_spill] sm:$0xff]  ;;  %v20930_v40 = vld [vmem:[#allocation206_spill] sm:$0xff] }
 0x6eb   : > { %v19095_v24 = vpack.c.bf16 %v20926_v60, %v20925_v53  ;;  %v19107_v48 = vpack.c.bf16 %v20930_v40, %v20929_v2  ;;  %v20931_v53 = vld [vmem:[#allocation187_spill] sm:$0xff]  ;;  %v20932_v60 = vld [vmem:[#allocation182_spill] sm:$0xff] }
 0x6ec   : > { %v19113_v10 = vpack.c.bf16 %v20932_v60, %v20931_v53 }
 0x6ed   : > { %11890 = vmatpush3.bf16.msra.mxu1 %v19053_v59  ;;  %11920 = vmatpush3.bf16.msra.mxu0 %v19058_v23 }
 0x6ee   : > { %11892 = vmatprep.subr.bf16.mxu1 %v19063_v38  ;;  %11921 = vmatprep.subr.bf16.mxu0 %v20873_v29 }
 0x6f1   : > { %11894 = vmatpush3.bf16.msra.mxu1 %v19069_v25  ;;  %11923 = vmatpush3.bf16.msra.mxu0 %v19074_v37 }
 0x6f2   : > { %11896 = vmatprep.subr.bf16.mxu1 %v19079_v21  ;;  %11924 = vmatprep.subr.bf16.mxu0 %v20873_v29 }
 0x6f5   : > { %11898 = vmatpush3.bf16.msra.mxu1 %v19085_v33  ;;  %11926 = vmatpush3.bf16.msra.mxu0 %v19090_v28 }
 0x6f6   : > { %11900 = vmatprep.subr.bf16.mxu1 %v19095_v24  ;;  %11927 = vmatprep.subr.bf16.mxu0 %v20873_v29 }
 0x6f9   : > { %11902 = vmatpush3.bf16.msra.mxu1 %v19101_v4 }
 0x6fa   : > { %11904 = vmatprep.subr.bf16.mxu1 %v19107_v48 }
 0x6fd   : > { %11906 = vmatpush3.bf16.msra.mxu1 %v19113_v10 }
 0x7ba   : > { %v10674_v5 = vpop.f32.mrb[0].mxu0 }
 0x7bb   : > { %v10675_v1 = vpop.f32.mrb[1].mxu0  ;;  %v8955_v13 = vpop.f32.mrb[0].mxu1 }
 0x7bc   : > { %v10676_v14 = vadd.f32 %v10675_v1, %v10674_v5  ;;  %v11490_v15 = vpop.f32.mrb[1].mxu1 }
 0x7be   : > { %v19117_v16 = vadd.f32 %v10676_v14, %v8955_v13 }
 0x7c0   : > { %v10235_v2 = vadd.f32 0.7777778, %v19117_v16  ;;  %v10239_v40 = vadd.f32 -0.11111111, %v19117_v16  ;;  %v10234_v17 = vadd.f32 1.0, %v19117_v16  ;;  %v10243_v1 = vadd.f32 -1.0, %v19117_v16 }
 0x7c1   : > { %v10238_v53 = vadd.f32 0.11111111, %v19117_v16  ;;  %v10242_v60 = vadd.f32 -0.7777778, %v19117_v16  ;;  %v10236_v18 = vadd.f32 0.5555556, %v19117_v16 }
 0x7c2   : > { %v8973_v19 = vmul.f32 4.5, %v10235_v2  ;;  %v8997_v22 = vmul.f32 4.5, %v10239_v40  ;;  %v8967_v27 = vmul.f32 4.5, %v10234_v17  ;;  %v10240_v5 = vadd.f32 -0.33333334, %v19117_v16 }
 0x7c3   : > { %v8991_v15 = vmul.f32 4.5, %v10238_v53  ;;  %v9015_v13 = vmul.f32 4.5, %v10242_v60  ;;  %v8979_v14 = vmul.f32 4.5, %v10236_v18  ;;  %v9021_v52 = vmul.f32 4.5, %v10243_v1 }
 0x7c4   : > { %v8974_v32 = vsub.f32 0.0, %v8973_v19  ;;  %v8998_v35 = vsub.f32 0.0, %v8997_v22  ;;  %v8968_v39 = vsub.f32 0.0, %v8967_v27  ;;  %v9003_v42 = vmul.f32 4.5, %v10240_v5 }
 0x7c5   : > { %v8992_v43 = vsub.f32 0.0, %v8991_v15  ;;  %v9016_v46 = vsub.f32 0.0, %v9015_v13  ;;  %v8980_v47 = vsub.f32 0.0, %v8979_v14  ;;  %v9022_v5 = vsub.f32 0.0, %v9021_v52 }
 0x7c6   : > { %v8975_v49 = vmul.f32 %v8974_v32, %v8973_v19  ;;  %v8999_v50 = vmul.f32 %v8998_v35, %v8997_v22  ;;  %v8969_v51 = vmul.f32 %v8968_v39, %v8967_v27  ;;  %v9004_v2 = vsub.f32 0.0, %v9003_v42  ;;  %v20934_v35 = vld [vmem:[#allocation251_spill] sm:$0xff]  ;;  %v20938_v27 = vld [vmem:[#allocation281_spill] sm:$0xff] }
 0x7c7   : > { %v8993_v40 = vmul.f32 %v8992_v43, %v8991_v15  ;;  %v8981_v17 = vmul.f32 %v8980_v47, %v8979_v14  ;;  %v9017_v61 = vmul.f32 %v9016_v46, %v9015_v13  ;;  %v9023_v22 = vmul.f32 %v9022_v5, %v9021_v52  ;;  %v20933_v43 = vld [vmem:[#allocation220_spill] sm:$0xff]  ;;  %v20937_v46 = vld [vmem:[#allocation287_spill] sm:$0xff] }
 0x7c8   : > { %v8976_v57 = vmul.f32 1.442695, %v8975_v49  ;;  %v9000_v53 = vmul.f32 1.442695, %v8999_v50  ;;  %v8970_v60 = vmul.f32 1.442695, %v8969_v51  ;;  %v9005_v18 = vmul.f32 %v9004_v2, %v9003_v42 }
 0x7c9   : > { %v8994_v58 = vmul.f32 1.442695, %v8993_v40  ;;  %v8982_v62 = vmul.f32 1.442695, %v8981_v17  ;;  %v9018_v19 = vmul.f32 1.442695, %v9017_v61  ;;  %v19129_v39 = vpack.c.bf16 %v20934_v35, %v20933_v43 }
 0x7ca   : > { %12317 = vpow2.f32 %v8976_v57  ;;  %v9006_v63 = vmul.f32 1.442695, %v9005_v18  ;;  %v20935_v49 = vld [vmem:[#allocation150_spill] sm:$0xff]  ;;  %v20936_v51 = vld [vmem:[#allocation168_spill] sm:$0xff]  ;;  %v19137_v32 = vpack.c.bf16 %v20938_v27, %v20937_v46  ;;  %v20939_v47 = vld [vmem:[#allocation247_spill] sm:$0xff]  ;;  %v8959_v35 = vsub.f32 0.0, %v19117_v16 }
 0x7cb   : > { %12319 = vpow2.f32 %v9000_v53  ;;  %v19133_v42 = vpack.c.bf16 %v20936_v51, %v20935_v49  ;;  %v20940_v50 = vld [vmem:[#allocation224_spill] sm:$0xff]  ;;  %11908 = vmatprep.subr.bf16.mxu1 %v19129_v39  ;;  %v20942_v61 = vld [vmem:[#allocation202_spill] sm:$0xff]  ;;  %v20943_v57 = vld [vmem:[#allocation275_spill] sm:$0xff]  ;;  %v10237_v51 = vadd.f32 0.33333334, %v19117_v16 }
 0x7cc   : > { %12321 = vpow2.f32 %v8970_v60  ;;  %11929 = vmatpush3.bf16.msra.mxu0 %v19137_v32  ;;  %v20941_v52 = vld [vmem:[#allocation172_spill] sm:$0xff]  ;;  %v20944_v15 = vld [vmem:[#allocation279_spill] sm:$0xff]  ;;  %v8960_v49 = vmul.f32 1.442695, %v8959_v35  ;;  %v10241_v27 = vadd.f32 -0.5555556, %v19117_v16 }
 0x7cd   : > { %12323 = vpow2.f32 %v8994_v58  ;;  %v19141_v58 = vpack.c.bf16 %v20940_v50, %v20939_v47  ;;  %11910 = vmatpush3.bf16.msra.mxu1 %v19133_v42  ;;  %v19152_v13 = vpack.c.bf16 %v20944_v15, %v20943_v57  ;;  %11930 = vmatprep.subr.bf16.mxu0 %v20873_v29  ;;  %v20945_v60 = vld [vmem:[#allocation292_spill] sm:$0xff]  ;;  %v8985_v46 = vmul.f32 4.5, %v10237_v51 }
 0x7ce   : > { %12325 = vpow2.f32 %v8982_v62  ;;  %v19148_v62 = vpack.c.bf16 %v20942_v61, %v20941_v52 }
 0x7cf   : > { %12327 = vpow2.f32 %v9006_v63  ;;  %v9024_v63 = vmul.f32 1.442695, %v9023_v22  ;;  %11912 = vmatprep.subr.bf16.mxu1 %v19141_v58  ;;  %v8986_v47 = vsub.f32 0.0, %v8985_v46 }
 0x7d0   : > { %12329 = vpow2.f32 %v9018_v19  ;;  %11932 = vmatpush3.bf16.msra.mxu0 %v19152_v13 }
 0x7d1   : > { %12331 = vpow2.f32 %v9024_v63  ;;  %11914 = vmatpush3.bf16.msra.mxu1 %v19148_v62  ;;  %11934 = vmatprep.subr.bf16.mxu0 %v20945_v60  ;;  %v9009_v63 = vmul.f32 4.5, %v10241_v27  ;;  %v8987_v52 = vmul.f32 %v8986_v47, %v8985_v46 }
 0x7d2   : > { %11965 = vmatprep.subr.bf16.mxu1 %v20873_v29  ;;  %12333 = vpow2.f32 %v8960_v49 }
 0x7d3   : > { %v9010_v57 = vsub.f32 0.0, %v9009_v63  ;;  %v8988_v15 = vmul.f32 1.442695, %v8987_v52 }
 0x7d4   : > { %v12318_v14 = vpop.eup %12317 }
 0x7d5   : > { %v12320_v1 = vpop.eup %12319 }
 0x7d6   : > { %v12322_v2 = vpop.eup %12321  ;;  %v12253_v40 = vpack.i.bf16 %v12318_v14, %v12320_v1  ;;  %v9011_v14 = vmul.f32 %v9010_v57, %v9009_v63 }
 0x7d7   : > { %v12324_v17 = vpop.eup %12323 }
 0x7d8   : > { %12254 = vrot.lane.b32.xlu0 %v12253_v40, %s12418_s10  ;;  %v12248_v53 = vpack.i.bf16 %v12322_v2, %v12324_v17  ;;  %v12326_v18 = vpop.eup %12325  ;;  %v9012_v1 = vmul.f32 1.442695, %v9011_v14  ;;  %v20946_v14 = vld [vmem:[#allocation296_spill] sm:$0xff] }
 0x7d9   : > { %v12328_v5 = vpop.eup %12327 }
 0x7da   : > { %12249 = vrot.lane.b32.xlu1 %v12248_v53, %s12417_s8  ;;  %v12330_v19 = vpop.eup %12329  ;;  %v12258_v22 = vpack.i.bf16 %v12326_v18, %v12328_v5 }
 0x7db   : > { %v12332_v43 = vpop.eup %12331 }
 0x7dc   : > { %9051 = vrot.lane.b32.xlu0 %v12330_v19, %s12417_s8  ;;  %v12334_v50 = vpop.eup %12333 }
 0x7dd   : > { %v8962_v61 = vadd.f32 1.0, %v12334_v50 }
 0x7de   : > { %12259 = vrot.lane.b32.xlu1 %v12258_v22, %s12419_s21 }
 0x7df   : > { %12335 = vrcp.f32 %v8962_v61 }
 0x7e0   : > { %12337 = vpow2.f32 %v8988_v15 }
 0x7e1   : > { %12339 = vpow2.f32 %v9012_v1  ;;  %v20947_v1 = vld [vmem:[#allocation293_spill] sm:$0xff] }
 0x7e2   : > { %9055 = vrot.lane.b32.xlu1 %v12332_v43, %s12418_s10 }
 0x7e9   : > { %v12336_v2 = vpop.eup %12335 }
 0x7ea   : > { %v8965_v18 = vmul.f32 %v12336_v2, %v19117_v16  ;;  %v12338_v5 = vpop.eup %12337  ;;  %v20948_v2 = vld [vmem:[#allocation294_spill] sm:$0xff] }
 0x7eb   : > { %v12340_v63 = vpop.eup %12339 }
 0x84a   : > { %v12255_v40 = vpop.permute.xlu0 %12254 }
 0x84b   : > { %v12257_v19 = vunpack.i.h.bf16 %v12255_v40  ;;  %v12256_v22 = vunpack.i.l.bf16 %v12255_v40  ;;  %v20949_v40 = vld [vmem:[#allocation298_spill] sm:$0xff] }
 0x84c   : > { %v12250_v17 = vpop.permute.xlu1 %12249 }
 0x84d   : > { %v12252_v53 = vunpack.i.h.bf16 %v12250_v17  ;;  %v12251_v60 = vunpack.i.l.bf16 %v12250_v17  ;;  %v20950_v17 = vld [vmem:[#allocation295_spill] sm:$0xff] }
 0x84e   : > { %v9052_v51 = vpop.permute.xlu0 %9051 }
 0x84f   : > { %v9058_v43 = vsel %vm2403_vm11, %v8965_v18, %v12252_v53  ;;  %v9061_v35 = vsel %vm2403_vm11, %v12338_v5, %v12251_v60  ;;  %v9064_v61 = vsel %vm2403_vm11, %v12340_v63, %v9052_v51  ;;  %v20951_v53 = vld [vmem:[#allocation297_spill] sm:$0xff] }
 0x850   : > { %v12260_v49 = vpop.permute.xlu1 %12259  ;;  %v9059_v47 = vsel %vm6824_vm13, %v9058_v43, %v12257_v19  ;;  %v9062_v50 = vsel %vm6824_vm13, %v9061_v35, %v12256_v22 }
 0x851   : > { %v12262_v46 = vunpack.i.h.bf16 %v12260_v49  ;;  %v12261_v27 = vunpack.i.l.bf16 %v12260_v49 }
 0x853   : > { %v9063_v52 = vsel %vm8809_vm0, %v9062_v50, %v12261_v27  ;;  %v9060_v16 = vsel %vm8809_vm0, %v9059_v47, %v12262_v46 }
 0x854   : > { %v9056_v57 = vpop.permute.xlu1 %9055  ;;  %9133 = vmatprep.mubr.f32.mxu1 %v9063_v52 }
 0x855   : > { %v9065_v15 = vsel %vm6824_vm13, %v9064_v61, %v9056_v57  ;;  %9134 = vmatmul.mubr.f32.vlgmr.msra.gmra.mrb[2].mxu1 %v9060_v16 }
 0x856   : > { %11516 = vmatmul.mubr.msk.f32.vlgmr.msra.gmra.mrb[2].mxu0 %vm8809_vm0, %v9065_v15  ;;  %11967 = vmatpush3.bf16.msra.mxu1 %v20946_v14 }
 0x857   : > { %11936 = vmatpush3.bf16.msra.mxu0 %v20947_v1  ;;  %11968 = vmatprep.subr.bf16.mxu1 %v20873_v29 }
 0x858   : > { %11938 = vmatprep.subr.bf16.mxu0 %v20948_v2  ;;  %11542 = vmatprep.mubr.msk.f32.mxu1 %vm12415_vm15, %v20900_v6 }
 0x85a   : > { %11970 = vmatpush3.bf16.msra.mxu1 %v20949_v40 }
 0x85b   : > { %11940 = vmatpush3.bf16.msra.mxu0 %v20950_v17  ;;  %11971 = vmatprep.subr.bf16.mxu1 %v20873_v29 }
 0x85c   : > { %11942 = vmatprep.subr.bf16.mxu0 %v20951_v53 }
 0x85e   : > { %11973 = vmatpush3.bf16.msra.mxu1 %v18952_v55 }
 0x85f   : > { %11944 = vmatpush3.bf16.msra.mxu0 %v18914_v11  ;;  %11974 = vmatprep.subr.bf16.mxu1 %v20873_v29 }
 0x860   : > { %11946 = vmatprep.subr.bf16.mxu0 %v18932_v26 }
 0x862   : > { %11976 = vmatpush3.bf16.msra.mxu1 %v18962_v54  ;;  %v20952_v54 = vld [vmem:[#allocation277_spill] sm:$0xff] }
 0x863   : > { %11948 = vmatpush3.bf16.msra.mxu0 %v18941_v34  ;;  %11977 = vmatprep.subr.bf16.mxu1 %v20873_v29 }
 0x864   : > { %11950 = vmatprep.subr.bf16.mxu0 %v18948_v20 }
 0x866   : > { %11979 = vmatpush3.bf16.msra.mxu1 %v18978_v56 }
 0x867   : > { %11952 = vmatpush3.bf16.msra.mxu0 %v18956_v12  ;;  %11980 = vmatprep.subr.bf16.mxu1 %v20873_v29 }
 0x868   : > { %11954 = vmatprep.subr.bf16.mxu0 %v18967_v0 }
 0x86a   : > { %11982 = vmatpush3.bf16.msra.mxu1 %v18994_v30 }
 0x86b   : > { %11956 = vmatpush3.bf16.msra.mxu0 %v18973_v31  ;;  %11984 = vmatprep.subr.bf16.mxu1 %v19035_v8  ;;  %v20953_v31 = vld [vmem:[#allocation291_spill] sm:$0xff] }
 0x86c   : > { %11958 = vmatprep.subr.bf16.mxu0 %v18983_v36 }
 0x86f   : > { %11960 = vmatpush3.bf16.msra.mxu0 %v18989_v45 }
 0x870   : > { %11962 = vmatprep.subr.bf16.mxu0 %v18999_v41 }
 0x873   : > { %11964 = vmatpush3.bf16.msra.mxu0 %v19007_v44 }
 0x874   : > { %12015 = vmatprep.subr.bf16.mxu0 %v20873_v29 }
 0x928   : > { %v10722_v20 = vpop.f32.mrb[2].mxu1 }
 0x929   : > { %v10723_v11 = vpop.f32.mrb[3].mxu1  ;;  %v9205_v26 = vpop.f32.mrb[2].mxu0 }
 0x92a   : > { %v10724_v34 = vadd.f32 %v10723_v11, %v10722_v20  ;;  %v11517_v55 = vpop.f32.mrb[3].mxu0 }
 0x92c   : > { %v9206_v12 = vadd.f32 %v10724_v34, %v9205_v26 }
 0x92e   : > { %v9209_v0 = vadd.f32 %v9206_v12, %v20952_v54 }
 0x930   : > { %v19210_v56 = vadd.f32 %v20953_v31, %v9209_v0 }
 0x932   : > { %v19214_v36 = vadd.f32 %v19210_v56, %v20952_v54 }
 0x934   : > { %v10246_v45 = vadd.f32 0.7777778, %v19214_v36  ;;  %v10250_v30 = vadd.f32 -0.11111111, %v19214_v36  ;;  %v10245_v41 = vadd.f32 1.0, %v19214_v36  ;;  %v10254_v51 = vadd.f32 -1.0, %v19214_v36 }
 0x935   : > { %v10249_v44 = vadd.f32 0.11111111, %v19214_v36  ;;  %v10253_v8 = vadd.f32 -0.7777778, %v19214_v36  ;;  %v10247_v60 = vadd.f32 0.5555556, %v19214_v36 }
 0x936   : > { %v9257_v18 = vmul.f32 4.5, %v10246_v45  ;;  %v9281_v5 = vmul.f32 4.5, %v10250_v30  ;;  %v9251_v19 = vmul.f32 4.5, %v10245_v41  ;;  %v10251_v22 = vadd.f32 -0.33333334, %v19214_v36 }
 0x937   : > { %v9275_v43 = vmul.f32 4.5, %v10249_v44  ;;  %v9299_v35 = vmul.f32 4.5, %v10253_v8  ;;  %v9263_v49 = vmul.f32 4.5, %v10247_v60  ;;  %v9305_v40 = vmul.f32 4.5, %v10254_v51 }
 0x938   : > { %v9258_v46 = vsub.f32 0.0, %v9257_v18  ;;  %v9282_v27 = vsub.f32 0.0, %v9281_v5  ;;  %v9252_v47 = vsub.f32 0.0, %v9251_v19  ;;  %v9287_v50 = vmul.f32 4.5, %v10251_v22 }
 0x939   : > { %v9276_v63 = vsub.f32 0.0, %v9275_v43  ;;  %v9300_v52 = vsub.f32 0.0, %v9299_v35  ;;  %v9264_v16 = vsub.f32 0.0, %v9263_v49  ;;  %v9306_v12 = vsub.f32 0.0, %v9305_v40 }
 0x93a   : > { %v9259_v61 = vmul.f32 %v9258_v46, %v9257_v18  ;;  %v9283_v57 = vmul.f32 %v9282_v27, %v9281_v5  ;;  %v9253_v15 = vmul.f32 %v9252_v47, %v9251_v19  ;;  %v9288_v14 = vsub.f32 0.0, %v9287_v50 }
 0x93b   : > { %v9277_v1 = vmul.f32 %v9276_v63, %v9275_v43  ;;  %v9265_v2 = vmul.f32 %v9264_v16, %v9263_v49  ;;  %v9301_v34 = vmul.f32 %v9300_v52, %v9299_v35  ;;  %v9307_v30 = vmul.f32 %v9306_v12, %v9305_v40 }
 0x93c   : > { %v9260_v17 = vmul.f32 1.442695, %v9259_v61  ;;  %v9284_v53 = vmul.f32 1.442695, %v9283_v57  ;;  %v9254_v20 = vmul.f32 1.442695, %v9253_v15  ;;  %v9289_v11 = vmul.f32 %v9288_v14, %v9287_v50 }
 0x93d   : > { %v9278_v26 = vmul.f32 1.442695, %v9277_v1  ;;  %v9266_v55 = vmul.f32 1.442695, %v9265_v2  ;;  %v9302_v45 = vmul.f32 1.442695, %v9301_v34 }
 0x93e   : > { %12341 = vpow2.f32 %v9260_v17  ;;  %v9290_v0 = vmul.f32 1.442695, %v9289_v11  ;;  %v9308_v41 = vmul.f32 1.442695, %v9307_v30  ;;  %v9243_v46 = vsub.f32 0.0, %v19214_v36 }
 0x93f   : > { %12343 = vpow2.f32 %v9284_v53  ;;  %v10248_v47 = vadd.f32 0.33333334, %v19214_v36  ;;  %v10252_v63 = vadd.f32 -0.5555556, %v19214_v36 }
 0x940   : > { %12345 = vpow2.f32 %v9254_v20  ;;  %v9244_v27 = vmul.f32 1.442695, %v9243_v46 }
 0x941   : > { %12347 = vpow2.f32 %v9278_v26  ;;  %v9269_v50 = vmul.f32 4.5, %v10248_v47  ;;  %v9293_v61 = vmul.f32 4.5, %v10252_v63 }
 0x942   : > { %12349 = vpow2.f32 %v9266_v55 }
 0x943   : > { %12351 = vpow2.f32 %v9290_v0  ;;  %v9270_v52 = vsub.f32 0.0, %v9269_v50  ;;  %v9294_v14 = vsub.f32 0.0, %v9293_v61 }
 0x944   : > { %12353 = vpow2.f32 %v9302_v45 }
 0x945   : > { %12355 = vpow2.f32 %v9308_v41  ;;  %v9271_v57 = vmul.f32 %v9270_v52, %v9269_v50  ;;  %v9295_v2 = vmul.f32 %v9294_v14, %v9293_v61 }
 0x946   : > { %12357 = vpow2.f32 %v9244_v27 }
 0x947   : > { %v9272_v1 = vmul.f32 1.442695, %v9271_v57  ;;  %v9296_v40 = vmul.f32 1.442695, %v9295_v2 }
 0x948   : > { %v12342_v44 = vpop.eup %12341 }
 0x949   : > { %v12344_v8 = vpop.eup %12343 }
 0x94a   : > { %v12346_v60 = vpop.eup %12345  ;;  %v12268_v18 = vpack.i.bf16 %v12342_v44, %v12344_v8 }
 0x94b   : > { %v12348_v5 = vpop.eup %12347 }
 0x94c   : > { %12269 = vrot.lane.b32.xlu1 %v12268_v18, %s12418_s10  ;;  %v12263_v19 = vpack.i.bf16 %v12346_v60, %v12348_v5  ;;  %v12350_v22 = vpop.eup %12349 }
 0x94d   : > { %v12352_v43 = vpop.eup %12351 }
 0x94e   : > { %12264 = vrot.lane.b32.xlu0 %v12263_v19, %s12417_s8  ;;  %v12354_v35 = vpop.eup %12353  ;;  %v12273_v49 = vpack.i.bf16 %v12350_v22, %v12352_v43 }
 0x94f   : > { %v12356_v51 = vpop.eup %12355 }
 0x950   : > { %9335 = vrot.lane.b32.xlu1 %v12354_v35, %s12417_s8  ;;  %v12358_v16 = vpop.eup %12357 }
 0x951   : > { %v9246_v15 = vadd.f32 1.0, %v12358_v16 }
 0x952   : > { %12274 = vrot.lane.b32.xlu0 %v12273_v49, %s12419_s21 }
 0x953   : > { %12359 = vrcp.f32 %v9246_v15 }
 0x954   : > { %12361 = vpow2.f32 %v9272_v1 }
 0x955   : > { %12363 = vpow2.f32 %v9296_v40 }
 0x956   : > { %9339 = vrot.lane.b32.xlu0 %v12356_v51, %s12418_s10 }
 0x95d   : > { %v12360_v17 = vpop.eup %12359 }
 0x95e   : > { %v9249_v34 = vmul.f32 %v12360_v17, %v19214_v36  ;;  %v12362_v55 = vpop.eup %12361 }
 0x95f   : > { %v12364_v19 = vpop.eup %12363 }
 0x9be   : > { %v12270_v53 = vpop.permute.xlu1 %12269 }
 0x9bf   : > { %v12272_v12 = vunpack.i.h.bf16 %v12270_v53  ;;  %v12271_v0 = vunpack.i.l.bf16 %v12270_v53 }
 0x9c0   : > { %v12265_v20 = vpop.permute.xlu0 %12264 }
 0x9c1   : > { %v12267_v11 = vunpack.i.h.bf16 %v12265_v20  ;;  %v12266_v26 = vunpack.i.l.bf16 %v12265_v20 }
 0x9c2   : > { %v9336_v44 = vpop.permute.xlu1 %9335 }
 0x9c3   : > { %v9342_v45 = vsel %vm2403_vm11, %v9249_v34, %v12267_v11  ;;  %v9345_v30 = vsel %vm2403_vm11, %v12362_v55, %v12266_v26  ;;  %v9348_v43 = vsel %vm2403_vm11, %v12364_v19, %v9336_v44 }
 0x9c4   : > { %v12275_v41 = vpop.permute.xlu0 %12274  ;;  %v9343_v18 = vsel %vm6824_vm13, %v9342_v45, %v12272_v12  ;;  %v9346_v5 = vsel %vm6824_vm13, %v9345_v30, %v12271_v0 }
 0x9c5   : > { %v12277_v8 = vunpack.i.h.bf16 %v12275_v41  ;;  %v12276_v60 = vunpack.i.l.bf16 %v12275_v41 }
 0x9c7   : > { %v9347_v22 = vsel %vm8809_vm0, %v9346_v5, %v12276_v60  ;;  %v9344_v36 = vsel %vm8809_vm0, %v9343_v18, %v12277_v8 }
 0x9c8   : > { %v9340_v35 = vpop.permute.xlu0 %9339  ;;  %9417 = vmatprep.mubr.f32.mxu0 %v9347_v22 }
 0x9c9   : > { %v9349_v49 = vsel %vm6824_vm13, %v9348_v43, %v9340_v35  ;;  %9418 = vmatmul.mubr.f32.vlgmr.msra.gmra.mrb[4].mxu0 %v9344_v36  ;;  %v9211_v36 = vsub.f32 %v19210_v56, %v20953_v31 }
 0x9ca   : > { %11543 = vmatmul.mubr.msk.f32.vlgmr.msra.gmra.mrb[4].mxu1 %vm8809_vm0, %v9349_v49  ;;  %12017 = vmatpush3.bf16.msra.mxu0 %v19047_v9 }
 0x9cb   : > { %11986 = vmatpush3.bf16.msra.mxu1 %v19039_v7  ;;  %12018 = vmatprep.subr.bf16.mxu0 %v20873_v29  ;;  %v9212_v43 = vmul.f32 %v9211_v36, %v9211_v36 }
 0x9cc   : > { %11988 = vmatprep.subr.bf16.mxu1 %v19043_v3  ;;  %11569 = vmatprep.mubr.msk.f32.mxu0 %vm12415_vm15, %v20900_v6 }
 0x9cd   : > { %v9214_v35 = vsel %vm9213_vm1, %v9212_v43, 0.0 }
 0x9ce   : > { %12020 = vmatpush3.bf16.msra.mxu0 %v19058_v23 }
 0x9cf   : > { %11990 = vmatpush3.bf16.msra.mxu1 %v19053_v59  ;;  %12021 = vmatprep.subr.bf16.mxu0 %v20873_v29 }
 0x9d0   : > { %11992 = vmatprep.subr.bf16.mxu1 %v19063_v38 }
 0x9d2   : > { %12023 = vmatpush3.bf16.msra.mxu0 %v19074_v37 }
 0x9d3   : > { %11994 = vmatpush3.bf16.msra.mxu1 %v19069_v25  ;;  %12024 = vmatprep.subr.bf16.mxu0 %v20873_v29 }
 0x9d4   : > { %11996 = vmatprep.subr.bf16.mxu1 %v19079_v21 }
 0x9d6   : > { %12026 = vmatpush3.bf16.msra.mxu0 %v19090_v28 }
 0x9d7   : > { %11998 = vmatpush3.bf16.msra.mxu1 %v19085_v33  ;;  %12027 = vmatprep.subr.bf16.mxu0 %v20873_v29 }
 0x9d8   : > { %12000 = vmatprep.subr.bf16.mxu1 %v19095_v24 }
 0x9da   : > { %12029 = vmatpush3.bf16.msra.mxu0 %v19137_v32 }
 0x9db   : > { %12002 = vmatpush3.bf16.msra.mxu1 %v19101_v4  ;;  %12030 = vmatprep.subr.bf16.mxu0 %v20873_v29 }
 0x9dc   : > { %12004 = vmatprep.subr.bf16.mxu1 %v19107_v48 }
 0x9de   : > { %12032 = vmatpush3.bf16.msra.mxu0 %v19152_v13 }
 0x9df   : > { %12006 = vmatpush3.bf16.msra.mxu1 %v19113_v10 }
 0x9e0   : > { %12008 = vmatprep.subr.bf16.mxu1 %v19129_v39 }
 0x9e3   : > { %12010 = vmatpush3.bf16.msra.mxu1 %v19133_v42 }
 0x9e4   : > { %12012 = vmatprep.subr.bf16.mxu1 %v19141_v58 }
 0x9e7   : > { %12014 = vmatpush3.bf16.msra.mxu1 %v19148_v62 }
 0xa9c   : > { %v10770_v6 = vpop.f32.mrb[4].mxu0 }
 0xa9d   : > { %v10771_v7 = vpop.f32.mrb[5].mxu0  ;;  %v9489_v3 = vpop.f32.mrb[4].mxu1 }
 0xa9e   : > { %v10772_v9 = vadd.f32 %v10771_v7, %v10770_v6  ;;  %v11544_v59 = vpop.f32.mrb[5].mxu1 }
 0xaa0   : > { %v19270_v29 = vadd.f32 %v10772_v9, %v9489_v3 }
 0xaa2   : > { %v10257_v23 = vadd.f32 0.7777778, %v19270_v29  ;;  %v10261_v38 = vadd.f32 -0.11111111, %v19270_v29  ;;  %v10256_v10 = vadd.f32 1.0, %v19270_v29  ;;  %v10265_v32 = vadd.f32 -1.0, %v19270_v29 }
 0xaa3   : > { %v10260_v25 = vadd.f32 0.11111111, %v19270_v29  ;;  %v10264_v37 = vadd.f32 -0.7777778, %v19270_v29  ;;  %v10258_v21 = vadd.f32 0.5555556, %v19270_v29 }
 0xaa4   : > { %v9507_v33 = vmul.f32 4.5, %v10257_v23  ;;  %v9531_v28 = vmul.f32 4.5, %v10261_v38  ;;  %v9501_v24 = vmul.f32 4.5, %v10256_v10  ;;  %v10262_v4 = vadd.f32 -0.33333334, %v19270_v29 }
 0xaa5   : > { %v9525_v48 = vmul.f32 4.5, %v10260_v25  ;;  %v9549_v39 = vmul.f32 4.5, %v10264_v37  ;;  %v9513_v42 = vmul.f32 4.5, %v10258_v21  ;;  %v9555_v15 = vmul.f32 4.5, %v10265_v32 }
 0xaa6   : > { %v9508_v58 = vsub.f32 0.0, %v9507_v33  ;;  %v9532_v62 = vsub.f32 0.0, %v9531_v28  ;;  %v9502_v13 = vsub.f32 0.0, %v9501_v24  ;;  %v9537_v51 = vmul.f32 4.5, %v10262_v4 }
 0xaa7   : > { %v9526_v46 = vsub.f32 0.0, %v9525_v48  ;;  %v9550_v27 = vsub.f32 0.0, %v9549_v39  ;;  %v9514_v47 = vsub.f32 0.0, %v9513_v42  ;;  %v9556_v11 = vsub.f32 0.0, %v9555_v15 }
 0xaa8   : > { %v9509_v50 = vmul.f32 %v9508_v58, %v9507_v33  ;;  %v9533_v63 = vmul.f32 %v9532_v62, %v9531_v28  ;;  %v9503_v52 = vmul.f32 %v9502_v13, %v9501_v24  ;;  %v9538_v16 = vsub.f32 0.0, %v9537_v51 }
 0xaa9   : > { %v9527_v61 = vmul.f32 %v9526_v46, %v9525_v48  ;;  %v9515_v57 = vmul.f32 %v9514_v47, %v9513_v42  ;;  %v9551_v53 = vmul.f32 %v9550_v27, %v9549_v39  ;;  %v9557_v55 = vmul.f32 %v9556_v11, %v9555_v15 }
 0xaaa   : > { %v9510_v14 = vmul.f32 1.442695, %v9509_v50  ;;  %v9534_v1 = vmul.f32 1.442695, %v9533_v63  ;;  %v9504_v2 = vmul.f32 1.442695, %v9503_v52  ;;  %v9539_v40 = vmul.f32 %v9538_v16, %v9537_v51 }
 0xaab   : > { %v9528_v17 = vmul.f32 1.442695, %v9527_v61  ;;  %v9516_v20 = vmul.f32 1.442695, %v9515_v57  ;;  %v9552_v34 = vmul.f32 1.442695, %v9551_v53 }
 0xaac   : > { %12365 = vpow2.f32 %v9510_v14  ;;  %v9540_v26 = vmul.f32 1.442695, %v9539_v40  ;;  %v9558_v12 = vmul.f32 1.442695, %v9557_v55  ;;  %v9493_v49 = vsub.f32 0.0, %v19270_v29 }
 0xaad   : > { %12367 = vpow2.f32 %v9534_v1  ;;  %v10259_v7 = vadd.f32 0.33333334, %v19270_v29  ;;  %v10263_v9 = vadd.f32 -0.5555556, %v19270_v29 }
 0xaae   : > { %12369 = vpow2.f32 %v9504_v2  ;;  %v9494_v6 = vmul.f32 1.442695, %v9493_v49 }
 0xaaf   : > { %12371 = vpow2.f32 %v9528_v17  ;;  %v9519_v3 = vmul.f32 4.5, %v10259_v7  ;;  %v9543_v38 = vmul.f32 4.5, %v10263_v9 }
 0xab0   : > { %12373 = vpow2.f32 %v9516_v20 }
 0xab1   : > { %12375 = vpow2.f32 %v9540_v26  ;;  %v9520_v59 = vsub.f32 0.0, %v9519_v3  ;;  %v9544_v31 = vsub.f32 0.0, %v9543_v38 }
 0xab2   : > { %12377 = vpow2.f32 %v9552_v34 }
 0xab3   : > { %12379 = vpow2.f32 %v9558_v12  ;;  %v9521_v10 = vmul.f32 %v9520_v59, %v9519_v3  ;;  %v9545_v21 = vmul.f32 %v9544_v31, %v9543_v38 }
 0xab4   : > { %12381 = vpow2.f32 %v9494_v6 }
 0xab5   : > { %v9522_v37 = vmul.f32 1.442695, %v9521_v10  ;;  %v9546_v33 = vmul.f32 1.442695, %v9545_v21 }
 0xab6   : > { %v12366_v0 = vpop.eup %12365 }
 0xab7   : > { %v12368_v45 = vpop.eup %12367 }
 0xab8   : > { %v12370_v30 = vpop.eup %12369  ;;  %v12283_v41 = vpack.i.bf16 %v12366_v0, %v12368_v45 }
 0xab9   : > { %v12372_v44 = vpop.eup %12371 }
 0xaba   : > { %12284 = vrot.lane.b32.xlu0 %v12283_v41, %s12418_s10  ;;  %v12278_v8 = vpack.i.bf16 %v12370_v30, %v12372_v44  ;;  %v12374_v60 = vpop.eup %12373 }
 0xabb   : > { %v12376_v18 = vpop.eup %12375 }
 0xabc   : > { %12279 = vrot.lane.b32.xlu1 %v12278_v8, %s12417_s8  ;;  %v12378_v5 = vpop.eup %12377  ;;  %v12288_v19 = vpack.i.bf16 %v12374_v60, %v12376_v18 }
 0xabd   : > { %v12380_v22 = vpop.eup %12379 }
 0xabe   : > { %9585 = vrot.lane.b32.xlu0 %v12378_v5, %s12417_s8  ;;  %v12382_v23 = vpop.eup %12381 }
 0xabf   : > { %v9496_v25 = vadd.f32 1.0, %v12382_v23 }
 0xac0   : > { %12289 = vrot.lane.b32.xlu1 %v12288_v19, %s12419_s21 }
 0xac1   : > { %12383 = vrcp.f32 %v9496_v25 }
 0xac2   : > { %12385 = vpow2.f32 %v9522_v37 }
 0xac3   : > { %12387 = vpow2.f32 %v9546_v33 }
 0xac4   : > { %9589 = vrot.lane.b32.xlu1 %v12380_v22, %s12418_s10 }
 0xacb   : > { %v12384_v28 = vpop.eup %12383 }
 0xacc   : > { %v9499_v42 = vmul.f32 %v12384_v28, %v19270_v29  ;;  %v12386_v32 = vpop.eup %12385 }
 0xacd   : > { %v12388_v16 = vpop.eup %12387 }
 0xadd   : > { %9215 = vadd.xlane.f32.xlu0 %v9214_v35 }
 0xb2c   : > { %v12285_v24 = vpop.permute.xlu0 %12284 }
 0xb2d   : > { %v12287_v58 = vunpack.i.h.bf16 %v12285_v24  ;;  %v12286_v62 = vunpack.i.l.bf16 %v12285_v24 }
 0xb2e   : > { %v12280_v4 = vpop.permute.xlu1 %12279 }
 0xb2f   : > { %v12282_v48 = vunpack.i.h.bf16 %v12280_v4  ;;  %v12281_v39 = vunpack.i.l.bf16 %v12280_v4 }
 0xb30   : > { %v9586_v27 = vpop.permute.xlu0 %9585 }
 0xb31   : > { %v9592_v13 = vsel %vm2403_vm11, %v9499_v42, %v12282_v48  ;;  %v9595_v51 = vsel %vm2403_vm11, %v12386_v32, %v12281_v39  ;;  %v9598_v57 = vsel %vm2403_vm11, %v12388_v16, %v9586_v27 }
 0xb32   : > { %v12290_v46 = vpop.permute.xlu1 %12289  ;;  %v9593_v63 = vsel %vm6824_vm13, %v9592_v13, %v12287_v58  ;;  %v9596_v52 = vsel %vm6824_vm13, %v9595_v51, %v12286_v62 }
 0xb33   : > { %v12292_v47 = vunpack.i.h.bf16 %v12290_v46  ;;  %v12291_v50 = vunpack.i.l.bf16 %v12290_v46 }
 0xb35   : > { %v9597_v61 = vsel %vm8809_vm0, %v9596_v52, %v12291_v50  ;;  %v9594_v29 = vsel %vm8809_vm0, %v9593_v63, %v12292_v47 }
 0xb36   : > { %v9590_v15 = vpop.permute.xlu1 %9589  ;;  %9667 = vmatprep.mubr.f32.mxu1 %v9597_v61 }
 0xb37   : > { %v9599_v14 = vsel %vm6824_vm13, %v9598_v57, %v9590_v15  ;;  %9668 = vmatmul.mubr.f32.vlgmr.msra.gmra.mrb[6].mxu1 %v9594_v29 }
 0xb38   : > { %11570 = vmatmul.mubr.msk.f32.vlgmr.msra.gmra.mrb[6].mxu0 %vm8809_vm0, %v9599_v14 }
 0xb6a   : > { %v9216_v1 = vpop.xlane.xlu0 %9215 }
 0xb6b   : > { %12389 = vrsqrt.f32 %v9216_v1  ;;  %vm9219_vm2 = vcmp.eq.f32.partialorder %v9216_v1, inf  ;;  %v9222_v17 = vand.u32 2147483648, %v9216_v1  ;;  %vm9221_vm4 = vcmp.eq.f32.partialorder %v9216_v1, 0.0 }
 0xb75   : > { %v12390_v2 = vpop.eup %12389 }
 0xb76   : > { %v9218_v40 = vmul.f32 %v12390_v2, %v9216_v1 }
 0xb78   : > { %v9220_v53 = vsel %vm9219_vm2, %v9216_v1, %v9218_v40 }
 0xb79   : > { %v9223_v20 = vsel %vm9221_vm4, %v9222_v17, %v9220_v53 }
 0xb7a   : > { %v9225_v11 = vsel %vm9224_vm3, %v9223_v20, 0.0 }
 0xb7b   : > { %9226 = vadd.xlane.f32.xlu0 %v9225_v11 }
 0xc08   : > { %v9227_v26 = vpop.xlane.xlu0 %9226 }
 0xc09   : > { %v9228_v34 = vrot.slane %v9227_v26, 4 }
 0xc0a   : > { %v10818_v55 = vpop.f32.mrb[6].mxu1 }
 0xc0b   : > { %v9229_v12 = vadd.f32 %v9228_v34, %v9227_v26  ;;  %v10819_v0 = vpop.f32.mrb[7].mxu1  ;;  %v9739_v45 = vpop.f32.mrb[6].mxu0 }
 0xc0c   : > { %v10820_v30 = vadd.f32 %v10819_v0, %v10818_v55  ;;  %v11571_v41 = vpop.f32.mrb[7].mxu0 }
 0xc0d   : > { %v9230_v44 = vrot.slane %v9229_v12, 2 }
 0xc0e   : > { %v9740_v8 = vadd.f32 %v10820_v30, %v9739_v45 }
 0xc0f   : > { %v9231_v60 = vadd.f32 %v9230_v44, %v9229_v12 }
 0xc10   : > { %v9743_v18 = vadd.f32 %v9740_v8, %v20952_v54 }
 0xc11   : > { %v9232_v5 = vrot.slane %v9231_v60, 1 }
 0xc12   : > { %v9744_v19 = vadd.f32 %v9743_v18, %v19210_v56 }
 0xc13   : > { %v9233_v22 = vadd.f32 %v9232_v5, %v9231_v60 }
 0xc14   : > { %v9745_v36 = vsub.f32 %v9744_v19, %v19210_v56 }
 0xc15   : > { %12199 = vpush %v9233_v22 }
 0xc16   : > { %v9746_v43 = vmul.f32 %v9745_v36, %v9745_v36 }
 0xc18   : > { %v9747_v35 = vsel %vm9213_vm1, %v9746_v43, 0.0 }
 0xc19   : > { %9748 = vadd.xlane.f32.xlu1 %v9747_v35 }
 0xc46   : > { %s19307_s0 = spop %12199 }
 0xc47   : > { %s9237_s22 = smul.f32 0.5, %s19307_s0 }
 0xc49   : > { %p9238_p1 = scmp.lt.f32.partialorder %s9237_s22, 0.001 }
 0xc4b   : > { %p19312_p2 = por %p9240_p0, %p9238_p1 }
 0xc4d   : > { %s9770_s3 = scalar_select %p19312_p2, 1, 0 }
 0xc4e   : > { %s20960_s5 = smov (!%p19312_p2, %s9239_s5), %s9775_s23 }
 0xc4f   : > { %v9771_v54 = vstv %s9770_s3  ;;  %p8701_p3 = scmp.lt.s32.totalorder %s20960_s5, 25  ;;  %s20955_s20 = smov %s20960_s5 }
 0xc50   : > { %vm9772_vm5 = vcmp.eq.s32.totalorder %v9771_v54, 1 }
 0xc51   : > { %v9773_v49 = vsel %vm9772_vm5, %v19210_v56, %v9744_v19  }
 0xc52   : > { %v20956_v28 = vmov %v9773_v49 }
 0xca6   : > { %v9749_v6 = vpop.xlane.xlu1 %9748 }
 0xca7   : > { %12391 = vrsqrt.f32 %v9749_v6  ;;  %vm9752_vm6 = vcmp.eq.f32.partialorder %v9749_v6, inf  ;;  %v9755_v9 = vand.u32 2147483648, %v9749_v6  ;;  %vm9754_vm7 = vcmp.eq.f32.partialorder %v9749_v6, 0.0 }
 0xcb1   : > { %v12392_v7 = vpop.eup %12391 }
 0xcb2   : > { %v9751_v3 = vmul.f32 %v12392_v7, %v9749_v6 }
 0xcb4   : > { %v9753_v59 = vsel %vm9752_vm6, %v9749_v6, %v9751_v3 }
 0xcb5   : > { %v9756_v23 = vsel %vm9754_vm7, %v9755_v9, %v9753_v59 }
 0xcb6   : > { %v9757_v38 = vsel %vm9224_vm3, %v9756_v23, 0.0 }
 0xcb7   : > { %9758 = vadd.xlane.f32.xlu0 %v9757_v38 }
 0xd44   : > { %v9759_v10 = vpop.xlane.xlu0 %9758 }
 0xd45   : > { %v9760_v25 = vrot.slane %v9759_v10, 4 }
 0xd47   : > { %v9761_v31 = vadd.f32 %v9760_v25, %v9759_v10 }
 0xd49   : > { %v9762_v37 = vrot.slane %v9761_v31, 2 }
 0xd4b   : > { %v9763_v21 = vadd.f32 %v9762_v37, %v9761_v31 }
 0xd4d   : > { %v9764_v56 = vrot.slane %v9763_v21, 1 }
 0xd4f   : > { %v9765_v33 = vadd.f32 %v9764_v56, %v9763_v21 }
 0xd51   : > { %12201 = vpush %v9765_v33 }
 0xd82   : > { %s12202_s6 = spop %12201 }
 0xd83   : > { %s9769_s7 = smul.f32 0.5, %s12202_s6 }
 0xd85   : > { %s20962_s22 = smov (!%p19312_p2, %s9237_s22), %s9769_s7 }
 0xd86   : > { %p8702_p4 = scmp.ge.f32.partialorder %s20962_s22, 0.001 }
 0xd88   : > { %p8703_p5 = pnand %p8702_p4, %p8701_p3 }
 0xd89   :  { %v20957_v28 = vmov (%p8703_p5), 0.0|0.0   ;;  %v9777_v24 = vld [vmem:[%s19353_s11] sm:$0xff] (%p8703_p5)  ;;  %v9778_v4 = vld [vmem:[%s19353_s11 + $0x8] sm:$0xff] (%p8703_p5)  ;;  %v9779_v48 = vld [vmem:[%s19353_s11 + $0x10] sm:$0xff] (%p8703_p5)  ;;  %v20958_v39 = vmov (%p8703_p5), 0.0  }
 0xd8a   :  { %8706 = sbr.rel (!%p8703_p5) target bundleno = 1610 (0x64a), region = 95  ;;  %12033 = vmatprep.subr.bf16.mxu0 (%p8703_p5), %v20957_v28  ;;  %11580 = vmatprep.mubr.msk.f32.mxu0 (%p8703_p5), %vm12413_vm14, %v20958_v39  ;;  %v12034_v42 = vpack.c.bf16 (%p8703_p5), %v9778_v4, %v9777_v24  ;;  %v9780_v32 = vld [vmem:[%s19353_s11 + $0x18] sm:$0xff] (%p8703_p5)  ;;  %v10267_v62 = vld [vmem:[#allocation2] ss:$0 sm:$0xff] (%p8703_p5) }
 0xd8b   :  { %v12037_v58 = vpack.c.bf16 (%p8703_p5), %v9780_v32, %v9779_v48 }
 0xd8c   :  { %12035 = vmatpush3.bf16.msra.mxu0 (%p8703_p5), %v12034_v42 }
 0xd8d   :  { %12036 = vmatprep.subr.bf16.mxu0 (%p8703_p5), %v20957_v28 }
 0xd90   :  { %12038 = vmatpush3.bf16.msra.mxu0 (%p8703_p5), %v12037_v58 }
 0xd93   :  { %11581 = vmatmul.mubr.msk.f32.vlgmr.msra.gmra.mrb[0].mxu0 %vm2403_vm11, %v9773_v49 }
 0xe66   :  { %v9857_v13 = vpop.f32.mrb[0].mxu0 }
 0xe67   :  { %v9858_v51 = vadd.f32 %v10267_v62, %v9857_v13  ;;  %v11582_v46 = vpop.f32.mrb[1].mxu0 }
 0xe69   :  { %9862 = vst.msk [vmem:[%s19355_s13] sm:$0x3] %vm9224_vm3, %v9858_v51 }

</bundles_post_ra>
